<compile_context>
chip_gen: v7x
topology: tpu7x:2x2x1
jax: 0.10.0
libtpu: 0.0.40
codegen_flags: <defaults>
</compile_context>

<pallas_src>
import functools

import jax
import jax.numpy as jnp
from jax.experimental import pallas as pl
from jax.experimental.pallas import tpu as pltpu


def _relu(v):
    return jnp.maximum(v, 0.0)


@functools.lru_cache(maxsize=None)
def _vmem_limit_bytes():
    # Per-generation VMEM budget with ~25% headroom for compiler scratch/semaphores.
    cap = 64 * 1024 * 1024          # conservative fallback = v7x physical VMEM per TC
    try:
        info = pltpu.get_tpu_info()
        cap = int(getattr(info, "vmem_capacity_bytes", cap))
    except Exception:
        pass
    return (cap // 4) * 3


# ----------------------------- Pallas kernels -----------------------------

def _encoder_kernel(xp_ref, w1a_ref, w1b_ref, b1_ref, w2s_ref, b2_ref, o_ref,
                    h1_scr, *, L1, L2):
    # xp_ref : (1, L2+1, 32) bf16  lane-packed mod-4 phases of the zero-padded input
    # w1a/b  : (32, 128) bf16      conv1 weights, even|odd output phases fused along lanes
    # w2s    : (3, 128, 128) bf16  conv2 weights arranged per row-shift of [h1e | h1o]
    xp = xp_ref[0]
    x0 = xp[0:L2]             # phases at row j
    x1 = xp[1:L2 + 1]         # phases at row j+1

    # conv1 polyphase: single 128-lane result [h1_even | h1_odd], 2 accumulating pushes.
    h1 = jnp.dot(x0, w1a_ref[...], preferred_element_type=jnp.float32)
    h1 = h1 + jnp.dot(x1, w1b_ref[...], preferred_element_type=jnp.float32)
    h1 = _relu(h1 + b1_ref[...])                                    # (L2, 128)

    # odd h1 rows past the true h1 length (L1 rows) must be exact zeros for conv2.
    n_odd = L1 // 2
    if n_odd < L2:  # static
        ridx = jax.lax.broadcasted_iota(jnp.int32, (L2, 128), 0)
        cidx = jax.lax.broadcasted_iota(jnp.int32, (L2, 128), 1)
        h1 = jnp.where((cidx < 64) | (ridx < n_odd), h1, 0.0)

    # stage [h1e | h1o] in a zero-guarded scratch -> shifted taps via row slices.
    h1_scr[0:1, :] = jnp.zeros((1, 128), jnp.bfloat16)
    h1_scr[L2 + 1:L2 + 2, :] = jnp.zeros((1, 128), jnp.bfloat16)
    h1_scr[1:L2 + 1, :] = h1.astype(jnp.bfloat16)

    # conv2 polyphase: 3 accumulating K=128 / N=128 MXU pushes (no concatenates).
    h2 = jnp.dot(h1_scr[0:L2, :], w2s_ref[0], preferred_element_type=jnp.float32)
    h2 = h2 + jnp.dot(h1_scr[1:L2 + 1, :], w2s_ref[1], preferred_element_type=jnp.float32)
    h2 = h2 + jnp.dot(h1_scr[2:L2 + 2, :], w2s_ref[2], preferred_element_type=jnp.float32)
    o_ref[0] = _relu(h2 + b2_ref[...]).astype(o_ref.dtype)


def _fc_kernel(x_ref, w_ref, b_ref, o_ref, acc_ref):
    @pl.when(pl.program_id(1) == 0)
    def _():
        acc_ref[...] = jnp.zeros_like(acc_ref)

    acc_ref[...] += jnp.dot(x_ref[...], w_ref[...], preferred_element_type=jnp.float32)

    @pl.when(pl.program_id(1) == pl.num_programs(1) - 1)
    def _():
        o_ref[...] = _relu(acc_ref[...] + b_ref[...]).astype(o_ref.dtype)


def _decoder_kernel(h3_ref, vt_ref, bt1_ref, ut_ref, bt2_ref, o_ref,
                    h3_scr, eo_scr, *, L2):
    # Polyphase ConvTranspose1d(k=5, s=2, p=2), even/odd (and all 4 output phases) fused.
    h3_scr[0:1, :] = jnp.zeros((1, 128), jnp.bfloat16)
    h3_scr[L2 + 1:L2 + 2, :] = jnp.zeros((1, 128), jnp.bfloat16)
    h3_scr[1:L2 + 1, :] = h3_ref[0]

    # ct1: one 128-lane result [e1 | o1] = [y[2l] | y[2l+1]] via 3 accumulating pushes.
    y = jnp.dot(h3_scr[0:L2, :], vt_ref[0], preferred_element_type=jnp.float32)
    y = y + jnp.dot(h3_scr[1:L2 + 1, :], vt_ref[1], preferred_element_type=jnp.float32)
    y = y + jnp.dot(h3_scr[2:L2 + 2, :], vt_ref[2], preferred_element_type=jnp.float32)
    y = _relu(y + bt1_ref[...])                                     # (L2, 128)

    # y has 2*L2-1 real rows: the last odd row is out of range -> exact zero.
    ridx = jax.lax.broadcasted_iota(jnp.int32, (L2, 128), 0)
    cidx = jax.lax.broadcasted_iota(jnp.int32, (L2, 128), 1)
    y = jnp.where((cidx < 64) | (ridx < L2 - 1), y, 0.0)

    eo_scr[0:1, :] = jnp.zeros((1, 128), jnp.bfloat16)
    eo_scr[L2 + 1:L2 + 2, :] = jnp.zeros((1, 128), jnp.bfloat16)
    eo_scr[1:L2 + 1, :] = y.astype(jnp.bfloat16)

    # ct2: all 4 mod-4 output phases packed along lanes (N=32), 3 accumulating pushes.
    z = jnp.dot(eo_scr[0:L2, :], ut_ref[0], preferred_element_type=jnp.float32)
    z = z + jnp.dot(eo_scr[1:L2 + 1, :], ut_ref[1], preferred_element_type=jnp.float32)
    z = z + jnp.dot(eo_scr[2:L2 + 2, :], ut_ref[2], preferred_element_type=jnp.float32)
    o_ref[0] = jnp.tanh(z + bt2_ref[...])


# ------------------------------- wrappers ---------------------------------

def encoder(x_nlc, params, L1, L2):
    """Fused conv1+conv2 (both k=5, s=2, p=2, relu).  x_nlc: (B, L, 1) f32 -> (B, L2, 128) bf16."""
    B, L, C = x_nlc.shape
    total = 4 * (L2 + 1)
    x_p = jnp.pad(x_nlc, ((0, 0), (2, total - L - 2), (0, 0)))       # conv "same" front pad
    x_p = jnp.pad(x_p, ((0, 0), (0, 0), (0, 8 - C)))                 # lane-pad channel 1 -> 8
    phases = x_p.reshape(B, L2 + 1, 32).astype(jnp.bfloat16)         # phase*chan packed on lanes

    kernel = functools.partial(_encoder_kernel, L1=L1, L2=L2)
    # TODO(synk): at real audio lengths (L=88200, L2=22050) add a length-tile grid axis with
    # 1-row halos; whole-sequence-per-batch blocks are only safe at demo scale.
    return pl.pallas_call(
        kernel,
        out_shape=jax.ShapeDtypeStruct((B, L2, 128), jnp.bfloat16),
        grid=(B,),
        in_specs=[
            pl.BlockSpec((1, L2 + 1, 32), lambda b: (b, 0, 0)),
            pl.BlockSpec((32, 128), lambda b: (0, 0)),
            pl.BlockSpec((32, 128), lambda b: (0, 0)),
            pl.BlockSpec((1, 128), lambda b: (0, 0)),
            pl.BlockSpec((3, 128, 128), lambda b: (0, 0, 0)),
            pl.BlockSpec((1, 128), lambda b: (0, 0)),
        ],
        out_specs=pl.BlockSpec((1, L2, 128), lambda b: (b, 0, 0)),
        scratch_shapes=[pltpu.VMEM((L2 + 2, 128), jnp.bfloat16)],
        compiler_params=pltpu.CompilerParams(
            dimension_semantics=("parallel",), vmem_limit_bytes=_vmem_limit_bytes()),
    )(phases, params["w1a"], params["w1b"], params["b1eo"], params["w2s"], params["b2"])


def _pick_tile(n, max_tile):
    for t in (4096, 2048, 1024, 512, 256, 128):
        if t <= max_tile and n % t == 0:
            return t
    return n


def linear_relu(x, w, b):
    """y = relu(x @ W + b), reduction-tiled.  x: (B, D) bf16, w: (D, Dout) bf16 -> bf16."""
    B, D = x.shape
    Dout = w.shape[1]
    # keep >= 2 blocks on the parallel output axis (v7x megacore) and <= ~4 MB weight tiles.
    tile_n = _pick_tile(Dout, max(Dout // 2, 128))
    tile_k = _pick_tile(D, max(min(D, (4 * 1024 * 1024) // (2 * tile_n)), 128))
    # TODO(synk): for HBM-bound weight streaming at real D, quantize the FC weight
    # (int8 on v5e/v6e, fp8 on v7x) to halve the weight bytes.
    return pl.pallas_call(
        _fc_kernel,
        out_shape=jax.ShapeDtypeStruct((B, Dout), jnp.bfloat16),
        grid=(Dout // tile_n, D // tile_k),
        in_specs=[
            pl.BlockSpec((B, tile_k), lambda j, k: (0, k)),
            pl.BlockSpec((tile_k, tile_n), lambda j, k: (k, j)),
            pl.BlockSpec((1, tile_n), lambda j, k: (0, j)),
        ],
        out_specs=pl.BlockSpec((B, tile_n), lambda j, k: (0, j)),
        scratch_shapes=[pltpu.VMEM((B, tile_n), jnp.float32)],
        compiler_params=pltpu.CompilerParams(
            dimension_semantics=("parallel", "arbitrary"),
            vmem_limit_bytes=_vmem_limit_bytes()),
    )(x, w, b)


def decoder(h3_nlc, params, L2):
    """Fused ct1(relu)+ct2(tanh), polyphase.  (B, L2, 128) bf16 -> (B, L2, 32) output phases."""
    B = h3_nlc.shape[0]
    kernel = functools.partial(_decoder_kernel, L2=L2)
    return pl.pallas_call(
        kernel,
        out_shape=jax.ShapeDtypeStruct((B, L2, 32), jnp.float32),
        grid=(B,),
        in_specs=[
            pl.BlockSpec((1, L2, 128), lambda b: (b, 0, 0)),
            pl.BlockSpec((3, 128, 128), lambda b: (0, 0, 0)),
            pl.BlockSpec((1, 128), lambda b: (0, 0)),
            pl.BlockSpec((3, 128, 32), lambda b: (0, 0, 0)),
            pl.BlockSpec((1, 32), lambda b: (0, 0)),
        ],
        out_specs=pl.BlockSpec((1, L2, 32), lambda b: (b, 0, 0)),
        scratch_shapes=[pltpu.VMEM((L2 + 2, 128), jnp.bfloat16),
                        pltpu.VMEM((L2 + 2, 128), jnp.bfloat16)],
        compiler_params=pltpu.CompilerParams(
            dimension_semantics=("parallel",), vmem_limit_bytes=_vmem_limit_bytes()),
    )(h3_nlc, params["vt"], params["bt1eo"], params["ut"], params["bt2q"])


# --------------------------- parameters & model ----------------------------

def init_params(key, L):
    L1 = (L - 1) // 2 + 1
    L2 = (L1 - 1) // 2 + 1
    D = 128 * L2
    ks = jax.random.split(key, 10)

    def u(k, shape, fan_in):
        bound = 1.0 / jnp.sqrt(float(fan_in))
        return jax.random.uniform(k, shape, jnp.float32, -bound, bound)

    # Raw PyTorch-layout parameters.
    w1 = u(ks[0], (64, 1, 5), 1 * 5)          # Conv1d(1, 64, 5)            (Cout, Cin, K)
    b1 = u(ks[1], (64,), 1 * 5)
    w2 = u(ks[2], (128, 64, 5), 64 * 5)       # Conv1d(64, 128, 5)
    b2 = u(ks[3], (128,), 64 * 5)
    wfc = u(ks[4], (D, D), D)                 # Linear(D, D)                (out, in)
    bfc = u(ks[5], (D,), D)
    wt1 = u(ks[6], (128, 64, 5), 64 * 5)      # ConvTranspose1d(128, 64, 5) (Cin, Cout, K)
    bt1 = u(ks[7], (64,), 64 * 5)
    wt2 = u(ks[8], (64, 1, 5), 1 * 5)         # ConvTranspose1d(64, 1, 5)
    bt2 = u(ks[9], (1,), 1 * 5)
    raw = (w1, b1, w2, b2, wfc, bfc, wt1, bt1, wt2, bt2)

    # conv1 as 2 accumulating K=32 / N=128 matmuls (even|odd output phases fused on lanes).
    w1t = jnp.transpose(jnp.pad(w1, ((0, 0), (0, 7), (0, 0))), (2, 1, 0))    # (5, 8, 64)
    z8 = jnp.zeros((8, 64), jnp.float32)
    w1a = jnp.concatenate([
        jnp.concatenate([w1t[0], w1t[1], w1t[2], w1t[3]], axis=0),   # even cols, row-j block
        jnp.concatenate([z8, z8, w1t[0], w1t[1]], axis=0),           # odd  cols
    ], axis=1).astype(jnp.bfloat16)                                  # (32, 128)
    w1b = jnp.concatenate([
        jnp.concatenate([w1t[4], z8, z8, z8], axis=0),               # even cols, row-(j+1) block
        jnp.concatenate([w1t[2], w1t[3], w1t[4], z8], axis=0),       # odd  cols
    ], axis=1).astype(jnp.bfloat16)                                  # (32, 128)
    b1eo = jnp.concatenate([b1, b1]).reshape(1, 128)

    # conv2 as 3 accumulating shift matmuls over [h1_even | h1_odd].
    w2t = jnp.transpose(w2, (2, 1, 0))                               # (5, 64, 128) taps
    z64 = jnp.zeros((64, 128), jnp.float32)
    w2s = jnp.stack([
        jnp.concatenate([w2t[0], w2t[1]], axis=0),   # shift 0: [h1e[l-1] | h1o[l-1]]
        jnp.concatenate([w2t[2], w2t[3]], axis=0),   # shift 1: [h1e[l]   | h1o[l]  ]
        jnp.concatenate([w2t[4], z64], axis=0),      # shift 2: [h1e[l+1] | h1o[l+1]]
    ]).astype(jnp.bfloat16)                                          # (3, 128, 128)

    # fc: fold the NCL<->NLC flatten permutation into the weight (FC consumes/produces NLC).
    idx = jnp.arange(D)
    perm = (idx % 128) * L2 + (idx // 128)           # NLC flat index -> NCL flat index
    wfc_nlc = wfc.T[perm][:, perm].astype(jnp.bfloat16)              # (in_nlc, out_nlc)
    bfc_nlc = bfc[perm].reshape(1, D)

    # conv_transpose1 (even/odd output rows merged): 3 accumulating shift matmuls.
    W = [wt1[:, :, k] for k in range(5)]             # each (128, 64), contraction over Cin
    z128_64 = jnp.zeros((128, 64), jnp.float32)
    vt = jnp.stack([
        jnp.concatenate([W[4], z128_64], axis=1),    # shift 0: h3[l-1]
        jnp.concatenate([W[2], W[3]], axis=1),       # shift 1: h3[l]
        jnp.concatenate([W[0], W[1]], axis=1),       # shift 2: h3[l+1]
    ]).astype(jnp.bfloat16)                                          # (3, 128, 128)
    bt1eo = jnp.concatenate([bt1, bt1]).reshape(1, 128)

    # conv_transpose2: all 4 mod-4 output phases merged into one 32-lane result.
    U = [jnp.pad(wt2[:, :, k], ((0, 0), (0, 7))) for k in range(5)]  # each (64, 8)
    z64_8 = jnp.zeros((64, 8), jnp.float32)
    ut = jnp.stack([
        jnp.concatenate([jnp.concatenate([z64_8, z64_8, z64_8, z64_8], axis=1),  # e1[l-1]
                         jnp.concatenate([U[4], z64_8, z64_8, z64_8], axis=1)],  # o1[l-1]
                        axis=0),
        jnp.concatenate([jnp.concatenate([U[2], U[3], U[4], z64_8], axis=1),     # e1[l]
                         jnp.concatenate([U[0], U[1], U[2], U[3]], axis=1)],     # o1[l]
                        axis=0),
        jnp.concatenate([jnp.concatenate([z64_8, z64_8, U[0], U[1]], axis=1),    # e1[l+1]
                         jnp.concatenate([z64_8, z64_8, z64_8, z64_8], axis=1)], # o1[l+1]
                        axis=0),
    ]).astype(jnp.bfloat16)                                          # (3, 128, 32)
    bt2q = jnp.tile(jnp.pad(bt2, (0, 7)).reshape(1, 8), (1, 4))      # (1, 32)

    params = dict(
        w1a=w1a, w1b=w1b, b1eo=b1eo, w2s=w2s, b2=b2.reshape(1, 128),
        wfc=wfc_nlc, bfc=bfc_nlc,
        vt=vt, bt1eo=bt1eo, ut=ut, bt2q=bt2q,
    )
    return params, raw, (L1, L2, D)


def diffusion_forward(x_ncl, params, dims):
    L1, L2, D = dims
    B = x_ncl.shape[0]
    x = jnp.transpose(x_ncl, (0, 2, 1)).astype(jnp.float32)          # NCL -> NLC (B, L, 1)

    h2 = encoder(x, params, L1, L2)                                  # (B, L2, 128) bf16
    h3 = linear_relu(h2.reshape(B, D), params["wfc"], params["bfc"])  # (B, D) bf16
    h3 = h3.reshape(B, L2, 128)                                      # NLC view of .view(B,128,-1)

    # TODO(synk): the PyTorch reference calls conv_transpose1 a second time, which is a
    # channel-mismatch bug (64-ch input into a 128-in-ch layer); the declared
    # conv_transpose2 (64 -> 1) is used as the intended final tanh stage.
    zph = decoder(h3, params, L2)                                    # (B, L2, 32) phases

    Lout = 4 * L2 - 3
    z = zph.reshape(B, L2, 4, 8)[:, :, :, 0].reshape(B, 4 * L2)[:, :Lout]
    return z.reshape(B, 1, Lout)                                     # back to NCL


# ----------------------- pure-JAX reference (for checking) -----------------------

def _conv_transpose_ref(x, wt, b, stride=2, pad=2):
    K = wt.shape[-1]
    w_conv = jnp.flip(jnp.transpose(wt, (1, 0, 2)), axis=-1)         # (Cout, Cin, K)
    y = jax.lax.conv_general_dilated(
        x, w_conv, window_strides=(1,), padding=[(K - 1 - pad, K - 1 - pad)],
        lhs_dilation=(stride,), dimension_numbers=("NCH", "OIH", "NCH"))
    return y + b[None, :, None]


def reference_forward(x_ncl, raw):
    w1, b1, w2, b2, wfc, bfc, wt1, bt1, wt2, bt2 = raw
    h = jax.lax.conv_general_dilated(x_ncl, w1, (2,), [(2, 2)],
                                     dimension_numbers=("NCH", "OIH", "NCH"))
    h = jnp.maximum(h + b1[None, :, None], 0.0)
    h = jax.lax.conv_general_dilated(h, w2, (2,), [(2, 2)],
                                     dimension_numbers=("NCH", "OIH", "NCH"))
    h = jnp.maximum(h + b2[None, :, None], 0.0)
    B = h.shape[0]
    y = jnp.maximum(h.reshape(B, -1) @ wfc.T + bfc, 0.0).reshape(B, 128, -1)
    y = jnp.maximum(_conv_transpose_ref(y, wt1, bt1), 0.0)
    return jnp.tanh(_conv_transpose_ref(y, wt2, bt2))


if __name__ == "__main__":
    key = jax.random.PRNGKey(0)
    kx, kp = jax.random.split(key)
    B, L = 2, 64                         # small stand-in for the 88200-sample audio input
    x = jax.random.normal(kx, (B, 1, L), jnp.float32)
    params, raw, dims = init_params(kp, L)

    fwd = jax.jit(lambda xx: diffusion_forward(xx, params, dims))
    out = jax.block_until_ready(fwd(x))

    L1, L2, D = dims
    assert out.shape == (B, 1, 4 * L2 - 3), out.shape
    assert bool(jnp.all(jnp.isfinite(out)))

    ref = jax.jit(lambda xx: reference_forward(xx, raw))(x)
    err = float(jnp.max(jnp.abs(out - ref.astype(jnp.float32))))
    assert err < 8e-2, f"max abs error vs reference: {err}"
    print("KERNEL_OK")
</pallas_src>

<mosaic_0001>
module attributes {stable_mosaic.version = 11 : i64} {
  func.func @_encoder_kernel(%arg0: i32, %arg1: memref<1x17x32xbf16, #tpu.memory_space<vmem>>, %arg2: memref<32x128xbf16, #tpu.memory_space<vmem>>, %arg3: memref<32x128xbf16, #tpu.memory_space<vmem>>, %arg4: memref<1x128xf32, #tpu.memory_space<vmem>>, %arg5: memref<3x128x128xbf16, #tpu.memory_space<vmem>>, %arg6: memref<1x128xf32, #tpu.memory_space<vmem>>, %arg7: memref<1x16x128xbf16, #tpu.memory_space<vmem>>, %arg8: memref<18x128xbf16, #tpu.memory_space<vmem>>) attributes {dimension_semantics = [#tpu.dimension_semantics<parallel>], iteration_bounds = array<i64: 2>, scalar_prefetch = 0 : i64, scratch_operands = 1 : i64, tpu.core_type = #tpu.core_type<tc>, window_params = [{transform_indices = @transform_0, window_bounds = array<i64: 1, 17, 32>}, {pipeline_mode = #tpu.pipeline_mode<synchronous>, transform_indices = @transform_1, window_bounds = array<i64: 32, 128>}, {pipeline_mode = #tpu.pipeline_mode<synchronous>, transform_indices = @transform_2, window_bounds = array<i64: 32, 128>}, {pipeline_mode = #tpu.pipeline_mode<synchronous>, transform_indices = @transform_3, window_bounds = array<i64: 1, 128>}, {pipeline_mode = #tpu.pipeline_mode<synchronous>, transform_indices = @transform_4, window_bounds = array<i64: 3, 128, 128>}, {pipeline_mode = #tpu.pipeline_mode<synchronous>, transform_indices = @transform_5, window_bounds = array<i64: 1, 128>}, {transform_indices = @transform_6, window_bounds = array<i64: 1, 16, 128>}]} {
    %c0 = arith.constant 0 : index
    %c0_0 = arith.constant 0 : index
    %c0_1 = arith.constant 0 : index
    %0 = vector.load %arg1[%c0, %c0_0, %c0_1] : memref<1x17x32xbf16, #tpu.memory_space<vmem>>, vector<1x17x32xbf16>
    %1 = vector.shape_cast %0 : vector<1x17x32xbf16> to vector<17x32xbf16>
    %2 = vector.extract_strided_slice %1 {offsets = [0, 0], sizes = [16, 32], strides = [1, 1]} : vector<17x32xbf16> to vector<16x32xbf16>
    %3 = vector.extract_strided_slice %1 {offsets = [1, 0], sizes = [16, 32], strides = [1, 1]} : vector<17x32xbf16> to vector<16x32xbf16>
    %c0_2 = arith.constant 0 : index
    %c0_3 = arith.constant 0 : index
    %4 = vector.load %arg2[%c0_2, %c0_3] : memref<32x128xbf16, #tpu.memory_space<vmem>>, vector<32x128xbf16>
    %cst = arith.constant dense<0.000000e+00> : vector<16x128xf32>
    %5 = tpu.matmul %2, %4, %cst {dimension_numbers = #tpu.dot_dimension_numbers<[1], [0], [0], [1], [0, 0, 1, 1], [], []>} : vector<16x32xbf16>, vector<32x128xbf16>, vector<16x128xf32> -> vector<16x128xf32>
    %c0_4 = arith.constant 0 : index
    %c0_5 = arith.constant 0 : index
    %6 = vector.load %arg3[%c0_4, %c0_5] : memref<32x128xbf16, #tpu.memory_space<vmem>>, vector<32x128xbf16>
    %cst_6 = arith.constant dense<0.000000e+00> : vector<16x128xf32>
    %7 = tpu.matmul %3, %6, %cst_6 {dimension_numbers = #tpu.dot_dimension_numbers<[1], [0], [0], [1], [0, 0, 1, 1], [], []>} : vector<16x32xbf16>, vector<32x128xbf16>, vector<16x128xf32> -> vector<16x128xf32>
    %8 = arith.addf %5, %7 : vector<16x128xf32>
    %c0_7 = arith.constant 0 : index
    %c0_8 = arith.constant 0 : index
    %9 = vector.load %arg4[%c0_7, %c0_8] : memref<1x128xf32, #tpu.memory_space<vmem>>, vector<1x128xf32>
    %10 = vector.broadcast %9 : vector<1x128xf32> to vector<16x128xf32>
    %11 = arith.addf %8, %10 : vector<16x128xf32>
    %cst_9 = arith.constant 0.000000e+00 : f32
    %12 = vector.broadcast %cst_9 : f32 to vector<16x128xf32>
    %13 = arith.maximumf %11, %12 : vector<16x128xf32>
    %cst_10 = arith.constant 0.000000e+00 : bf16
    %14 = vector.broadcast %cst_10 : bf16 to vector<1x128xbf16>
    %c0_11 = arith.constant 0 : index
    %c0_12 = arith.constant 0 : index
    %15 = vector.load %arg8[%c0_11, %c0_12] : memref<18x128xbf16, #tpu.memory_space<vmem>>, vector<1x128xbf16>
    tpu.vector_store %arg8[%c0_11, %c0_12], %14 {strides = array<i32>} : memref<18x128xbf16, #tpu.memory_space<vmem>>, vector<1x128xbf16>,
    %cst_13 = arith.constant 0.000000e+00 : bf16
    %16 = vector.broadcast %cst_13 : bf16 to vector<1x128xbf16>
    %c17 = arith.constant 17 : index
    %c0_14 = arith.constant 0 : index
    %17 = vector.load %arg8[%c17, %c0_14] : memref<18x128xbf16, #tpu.memory_space<vmem>>, vector<1x128xbf16>
    tpu.vector_store %arg8[%c17, %c0_14], %16 {strides = array<i32>} : memref<18x128xbf16, #tpu.memory_space<vmem>>, vector<1x128xbf16>,
    %18 = arith.truncf %13 : vector<16x128xf32> to vector<16x128xbf16>
    %c1 = arith.constant 1 : index
    %c0_15 = arith.constant 0 : index
    %19 = vector.load %arg8[%c1, %c0_15] : memref<18x128xbf16, #tpu.memory_space<vmem>>, vector<16x128xbf16>
    tpu.vector_store %arg8[%c1, %c0_15], %18 {strides = array<i32>} : memref<18x128xbf16, #tpu.memory_space<vmem>>, vector<16x128xbf16>,
    %c0_16 = arith.constant 0 : index
    %c0_17 = arith.constant 0 : index
    %20 = vector.load %arg8[%c0_16, %c0_17] : memref<18x128xbf16, #tpu.memory_space<vmem>>, vector<16x128xbf16>
    %c0_18 = arith.constant 0 : index
    %c0_19 = arith.constant 0 : index
    %c0_20 = arith.constant 0 : index
    %21 = vector.load %arg5[%c0_18, %c0_19, %c0_20] : memref<3x128x128xbf16, #tpu.memory_space<vmem>>, vector<1x128x128xbf16>
    %22 = vector.shape_cast %21 : vector<1x128x128xbf16> to vector<128x128xbf16>
    %cst_21 = arith.constant dense<0.000000e+00> : vector<16x128xf32>
    %23 = tpu.matmul %20, %22, %cst_21 {dimension_numbers = #tpu.dot_dimension_numbers<[1], [0], [0], [1], [0, 0, 1, 1], [], []>} : vector<16x128xbf16>, vector<128x128xbf16>, vector<16x128xf32> -> vector<16x128xf32>
    %c1_22 = arith.constant 1 : index
    %c0_23 = arith.constant 0 : index
    %24 = vector.load %arg8[%c1_22, %c0_23] : memref<18x128xbf16, #tpu.memory_space<vmem>>, vector<16x128xbf16>
    %c1_24 = arith.constant 1 : index
    %c0_25 = arith.constant 0 : index
    %c0_26 = arith.constant 0 : index
    %25 = vector.load %arg5[%c1_24, %c0_25, %c0_26] : memref<3x128x128xbf16, #tpu.memory_space<vmem>>, vector<1x128x128xbf16>
    %26 = vector.shape_cast %25 : vector<1x128x128xbf16> to vector<128x128xbf16>
    %cst_27 = arith.constant dense<0.000000e+00> : vector<16x128xf32>
    %27 = tpu.matmul %24, %26, %cst_27 {dimension_numbers = #tpu.dot_dimension_numbers<[1], [0], [0], [1], [0, 0, 1, 1], [], []>} : vector<16x128xbf16>, vector<128x128xbf16>, vector<16x128xf32> -> vector<16x128xf32>
    %28 = arith.addf %23, %27 : vector<16x128xf32>
    %c2 = arith.constant 2 : index
    %c0_28 = arith.constant 0 : index
    %29 = vector.load %arg8[%c2, %c0_28] : memref<18x128xbf16, #tpu.memory_space<vmem>>, vector<16x128xbf16>
    %c2_29 = arith.constant 2 : index
    %c0_30 = arith.constant 0 : index
    %c0_31 = arith.constant 0 : index
    %30 = vector.load %arg5[%c2_29, %c0_30, %c0_31] : memref<3x128x128xbf16, #tpu.memory_space<vmem>>, vector<1x128x128xbf16>
    %31 = vector.shape_cast %30 : vector<1x128x128xbf16> to vector<128x128xbf16>
    %cst_32 = arith.constant dense<0.000000e+00> : vector<16x128xf32>
    %32 = tpu.matmul %29, %31, %cst_32 {dimension_numbers = #tpu.dot_dimension_numbers<[1], [0], [0], [1], [0, 0, 1, 1], [], []>} : vector<16x128xbf16>, vector<128x128xbf16>, vector<16x128xf32> -> vector<16x128xf32>
    %33 = arith.addf %28, %32 : vector<16x128xf32>
    %c0_33 = arith.constant 0 : index
    %c0_34 = arith.constant 0 : index
    %34 = vector.load %arg6[%c0_33, %c0_34] : memref<1x128xf32, #tpu.memory_space<vmem>>, vector<1x128xf32>
    %35 = vector.broadcast %34 : vector<1x128xf32> to vector<16x128xf32>
    %36 = arith.addf %33, %35 : vector<16x128xf32>
    %cst_35 = arith.constant 0.000000e+00 : f32
    %37 = vector.broadcast %cst_35 : f32 to vector<16x128xf32>
    %38 = arith.maximumf %36, %37 : vector<16x128xf32>
    %39 = arith.truncf %38 : vector<16x128xf32> to vector<16x128xbf16>
    %c0_36 = arith.constant 0 : index
    %c0_37 = arith.constant 0 : index
    %c0_38 = arith.constant 0 : index
    %40 = vector.load %arg7[%c0_36, %c0_37, %c0_38] : memref<1x16x128xbf16, #tpu.memory_space<vmem>>, vector<1x16x128xbf16>
    %41 = vector.shape_cast %40 : vector<1x16x128xbf16> to vector<16x128xbf16>
    %42 = vector.shape_cast %39 : vector<16x128xbf16> to vector<1x16x128xbf16>
    tpu.vector_store %arg7[%c0_36, %c0_37, %c0_38], %42 {strides = array<i32>} : memref<1x16x128xbf16, #tpu.memory_space<vmem>>, vector<1x16x128xbf16>,
    return
  }
  func.func @transform_0(%arg0: i32) -> (i32, i32, i32) {
    %c0_i32 = arith.constant 0 : i32
    %c0_i32_0 = arith.constant 0 : i32
    %c0_i32_1 = arith.constant 0 : i32
    return %arg0, %c0_i32, %c0_i32_0 : i32, i32, i32
  }
  func.func @transform_1(%arg0: i32) -> (i32, i32) {
    %c0_i32 = arith.constant 0 : i32
    %c0_i32_0 = arith.constant 0 : i32
    %c0_i32_1 = arith.constant 0 : i32
    return %c0_i32, %c0_i32_0 : i32, i32
  }
  func.func @transform_2(%arg0: i32) -> (i32, i32) {
    %c0_i32 = arith.constant 0 : i32
    %c0_i32_0 = arith.constant 0 : i32
    %c0_i32_1 = arith.constant 0 : i32
    return %c0_i32, %c0_i32_0 : i32, i32
  }
  func.func @transform_3(%arg0: i32) -> (i32, i32) {
    %c0_i32 = arith.constant 0 : i32
    %c0_i32_0 = arith.constant 0 : i32
    %c0_i32_1 = arith.constant 0 : i32
    return %c0_i32, %c0_i32_0 : i32, i32
  }
  func.func @transform_4(%arg0: i32) -> (i32, i32, i32) {
    %c0_i32 = arith.constant 0 : i32
    %c0_i32_0 = arith.constant 0 : i32
    %c0_i32_1 = arith.constant 0 : i32
    %c0_i32_2 = arith.constant 0 : i32
    return %c0_i32, %c0_i32_0, %c0_i32_1 : i32, i32, i32
  }
  func.func @transform_5(%arg0: i32) -> (i32, i32) {
    %c0_i32 = arith.constant 0 : i32
    %c0_i32_0 = arith.constant 0 : i32
    %c0_i32_1 = arith.constant 0 : i32
    return %c0_i32, %c0_i32_0 : i32, i32
  }
  func.func @transform_6(%arg0: i32) -> (i32, i32, i32) {
    %c0_i32 = arith.constant 0 : i32
    %c0_i32_0 = arith.constant 0 : i32
    %c0_i32_1 = arith.constant 0 : i32
    return %arg0, %c0_i32, %c0_i32_0 : i32, i32, i32
  }
}

module attributes {stable_mosaic.version = 11 : i64} {
  func.func @_fc_kernel(%arg0: i32, %arg1: i32, %arg2: memref<2x2048xbf16, #tpu.memory_space<vmem>>, %arg3: memref<2048x1024xbf16, #tpu.memory_space<vmem>>, %arg4: memref<1x1024xf32, #tpu.memory_space<vmem>>, %arg5: memref<2x1024xbf16, #tpu.memory_space<vmem>>, %arg6: memref<2x1024xf32, #tpu.memory_space<vmem>>) attributes {dimension_semantics = [#tpu.dimension_semantics<parallel>, #tpu.dimension_semantics<arbitrary>], iteration_bounds = array<i64: 2, 1>, scalar_prefetch = 0 : i64, scratch_operands = 1 : i64, tpu.core_type = #tpu.core_type<tc>, window_params = [{transform_indices = @transform_0, window_bounds = array<i64: 2, 2048>}, {transform_indices = @transform_1, window_bounds = array<i64: 2048, 1024>}, {transform_indices = @transform_2, window_bounds = array<i64: 1, 1024>}, {transform_indices = @transform_3, window_bounds = array<i64: 2, 1024>}]} {
    %c0_i32 = arith.constant 0 : i32
    %0 = arith.cmpi eq, %arg1, %c0_i32 : i32
    %1 = arith.extui %0 : i1 to i32
    %c0_i32_0 = arith.constant 0 : i32
    %2 = arith.cmpi ne, %1, %c0_i32_0 : i32
    scf.if %2 {
      %cst_10 = arith.constant 0.000000e+00 : f32
      %12 = vector.broadcast %cst_10 : f32 to vector<2x1024xf32>
      %c0_11 = arith.constant 0 : index
      %c0_12 = arith.constant 0 : index
      %13 = vector.load %arg6[%c0_11, %c0_12] : memref<2x1024xf32, #tpu.memory_space<vmem>>, vector<2x1024xf32>
      tpu.vector_store %arg6[%c0_11, %c0_12], %12 {strides = array<i32>} : memref<2x1024xf32, #tpu.memory_space<vmem>>, vector<2x1024xf32>,
    } else {
    }
    %c0 = arith.constant 0 : index
    %c0_1 = arith.constant 0 : index
    %3 = vector.load %arg6[%c0, %c0_1] : memref<2x1024xf32, #tpu.memory_space<vmem>>, vector<2x1024xf32>
    %c0_2 = arith.constant 0 : index
    %c0_3 = arith.constant 0 : index
    %4 = vector.load %arg2[%c0_2, %c0_3] : memref<2x2048xbf16, #tpu.memory_space<vmem>>, vector<2x2048xbf16>
    %c0_4 = arith.constant 0 : index
    %c0_5 = arith.constant 0 : index
    %5 = vector.load %arg3[%c0_4, %c0_5] : memref<2048x1024xbf16, #tpu.memory_space<vmem>>, vector<2048x1024xbf16>
    %cst = arith.constant dense<0.000000e+00> : vector<2x1024xf32>
    %6 = tpu.matmul %4, %5, %cst {dimension_numbers = #tpu.dot_dimension_numbers<[1], [0], [0], [1], [0, 0, 1, 1], [], []>} : vector<2x2048xbf16>, vector<2048x1024xbf16>, vector<2x1024xf32> -> vector<2x1024xf32>
    %7 = arith.addf %3, %6 : vector<2x1024xf32>
    %c0_6 = arith.constant 0 : index
    %c0_7 = arith.constant 0 : index
    %8 = vector.load %arg6[%c0_6, %c0_7] : memref<2x1024xf32, #tpu.memory_space<vmem>>, vector<2x1024xf32>
    tpu.vector_store %arg6[%c0_6, %c0_7], %7 {strides = array<i32>} : memref<2x1024xf32, #tpu.memory_space<vmem>>, vector<2x1024xf32>,
    %c0_i32_8 = arith.constant 0 : i32
    %9 = arith.cmpi eq, %arg1, %c0_i32_8 : i32
    %10 = arith.extui %9 : i1 to i32
    %c0_i32_9 = arith.constant 0 : i32
    %11 = arith.cmpi ne, %10, %c0_i32_9 : i32
    scf.if %11 {
      %c0_10 = arith.constant 0 : index
      %c0_11 = arith.constant 0 : index
      %12 = vector.load %arg6[%c0_10, %c0_11] : memref<2x1024xf32, #tpu.memory_space<vmem>>, vector<2x1024xf32>
      %c0_12 = arith.constant 0 : index
      %c0_13 = arith.constant 0 : index
      %13 = vector.load %arg4[%c0_12, %c0_13] : memref<1x1024xf32, #tpu.memory_space<vmem>>, vector<1x1024xf32>
      %14 = vector.broadcast %13 : vector<1x1024xf32> to vector<2x1024xf32>
      %15 = arith.addf %12, %14 : vector<2x1024xf32>
      %cst_14 = arith.constant 0.000000e+00 : f32
      %16 = vector.broadcast %cst_14 : f32 to vector<2x1024xf32>
      %17 = arith.maximumf %15, %16 : vector<2x1024xf32>
      %18 = arith.truncf %17 : vector<2x1024xf32> to vector<2x1024xbf16>
      %c0_15 = arith.constant 0 : index
      %c0_16 = arith.constant 0 : index
      %19 = vector.load %arg5[%c0_15, %c0_16] : memref<2x1024xbf16, #tpu.memory_space<vmem>>, vector<2x1024xbf16>
      tpu.vector_store %arg5[%c0_15, %c0_16], %18 {strides = array<i32>} : memref<2x1024xbf16, #tpu.memory_space<vmem>>, vector<2x1024xbf16>,
    } else {
    }
    return
  }
  func.func @transform_0(%arg0: i32, %arg1: i32) -> (i32, i32) {
    %c0_i32 = arith.constant 0 : i32
    %c0_i32_0 = arith.constant 0 : i32
    return %c0_i32, %arg1 : i32, i32
  }
  func.func @transform_1(%arg0: i32, %arg1: i32) -> (i32, i32) {
    %c0_i32 = arith.constant 0 : i32
    return %arg1, %arg0 : i32, i32
  }
  func.func @transform_2(%arg0: i32, %arg1: i32) -> (i32, i32) {
    %c0_i32 = arith.constant 0 : i32
    %c0_i32_0 = arith.constant 0 : i32
    return %c0_i32, %arg0 : i32, i32
  }
  func.func @transform_3(%arg0: i32, %arg1: i32) -> (i32, i32) {
    %c0_i32 = arith.constant 0 : i32
    %c0_i32_0 = arith.constant 0 : i32
    return %c0_i32, %arg0 : i32, i32
  }
}

module attributes {stable_mosaic.version = 11 : i64} {
  func.func @_decoder_kernel(%arg0: i32, %arg1: memref<1x16x128xbf16, #tpu.memory_space<vmem>>, %arg2: memref<3x128x128xbf16, #tpu.memory_space<vmem>>, %arg3: memref<1x128xf32, #tpu.memory_space<vmem>>, %arg4: memref<3x128x32xbf16, #tpu.memory_space<vmem>>, %arg5: memref<1x32xf32, #tpu.memory_space<vmem>>, %arg6: memref<1x16x32xf32, #tpu.memory_space<vmem>>, %arg7: memref<18x128xbf16, #tpu.memory_space<vmem>>, %arg8: memref<18x128xbf16, #tpu.memory_space<vmem>>) attributes {dimension_semantics = [#tpu.dimension_semantics<parallel>], iteration_bounds = array<i64: 2>, scalar_prefetch = 0 : i64, scratch_operands = 2 : i64, tpu.core_type = #tpu.core_type<tc>, window_params = [{transform_indices = @transform_0, window_bounds = array<i64: 1, 16, 128>}, {pipeline_mode = #tpu.pipeline_mode<synchronous>, transform_indices = @transform_1, window_bounds = array<i64: 3, 128, 128>}, {pipeline_mode = #tpu.pipeline_mode<synchronous>, transform_indices = @transform_2, window_bounds = array<i64: 1, 128>}, {pipeline_mode = #tpu.pipeline_mode<synchronous>, transform_indices = @transform_3, window_bounds = array<i64: 3, 128, 32>}, {pipeline_mode = #tpu.pipeline_mode<synchronous>, transform_indices = @transform_4, window_bounds = array<i64: 1, 32>}, {transform_indices = @transform_5, window_bounds = array<i64: 1, 16, 32>}]} {
    %cst = arith.constant 0.000000e+00 : bf16
    %0 = vector.broadcast %cst : bf16 to vector<1x128xbf16>
    %c0 = arith.constant 0 : index
    %c0_0 = arith.constant 0 : index
    %1 = vector.load %arg7[%c0, %c0_0] : memref<18x128xbf16, #tpu.memory_space<vmem>>, vector<1x128xbf16>
    tpu.vector_store %arg7[%c0, %c0_0], %0 {strides = array<i32>} : memref<18x128xbf16, #tpu.memory_space<vmem>>, vector<1x128xbf16>,
    %cst_1 = arith.constant 0.000000e+00 : bf16
    %2 = vector.broadcast %cst_1 : bf16 to vector<1x128xbf16>
    %c17 = arith.constant 17 : index
    %c0_2 = arith.constant 0 : index
    %3 = vector.load %arg7[%c17, %c0_2] : memref<18x128xbf16, #tpu.memory_space<vmem>>, vector<1x128xbf16>
    tpu.vector_store %arg7[%c17, %c0_2], %2 {strides = array<i32>} : memref<18x128xbf16, #tpu.memory_space<vmem>>, vector<1x128xbf16>,
    %c0_3 = arith.constant 0 : index
    %c0_4 = arith.constant 0 : index
    %c0_5 = arith.constant 0 : index
    %4 = vector.load %arg1[%c0_3, %c0_4, %c0_5] : memref<1x16x128xbf16, #tpu.memory_space<vmem>>, vector<1x16x128xbf16>
    %5 = vector.shape_cast %4 : vector<1x16x128xbf16> to vector<16x128xbf16>
    %c1 = arith.constant 1 : index
    %c0_6 = arith.constant 0 : index
    %6 = vector.load %arg7[%c1, %c0_6] : memref<18x128xbf16, #tpu.memory_space<vmem>>, vector<16x128xbf16>
    tpu.vector_store %arg7[%c1, %c0_6], %5 {strides = array<i32>} : memref<18x128xbf16, #tpu.memory_space<vmem>>, vector<16x128xbf16>,
    %c0_7 = arith.constant 0 : index
    %c0_8 = arith.constant 0 : index
    %7 = vector.load %arg7[%c0_7, %c0_8] : memref<18x128xbf16, #tpu.memory_space<vmem>>, vector<16x128xbf16>
    %c0_9 = arith.constant 0 : index
    %c0_10 = arith.constant 0 : index
    %c0_11 = arith.constant 0 : index
    %8 = vector.load %arg2[%c0_9, %c0_10, %c0_11] : memref<3x128x128xbf16, #tpu.memory_space<vmem>>, vector<1x128x128xbf16>
    %9 = vector.shape_cast %8 : vector<1x128x128xbf16> to vector<128x128xbf16>
    %cst_12 = arith.constant dense<0.000000e+00> : vector<16x128xf32>
    %10 = tpu.matmul %7, %9, %cst_12 {dimension_numbers = #tpu.dot_dimension_numbers<[1], [0], [0], [1], [0, 0, 1, 1], [], []>} : vector<16x128xbf16>, vector<128x128xbf16>, vector<16x128xf32> -> vector<16x128xf32>
    %c1_13 = arith.constant 1 : index
    %c0_14 = arith.constant 0 : index
    %11 = vector.load %arg7[%c1_13, %c0_14] : memref<18x128xbf16, #tpu.memory_space<vmem>>, vector<16x128xbf16>
    %c1_15 = arith.constant 1 : index
    %c0_16 = arith.constant 0 : index
    %c0_17 = arith.constant 0 : index
    %12 = vector.load %arg2[%c1_15, %c0_16, %c0_17] : memref<3x128x128xbf16, #tpu.memory_space<vmem>>, vector<1x128x128xbf16>
    %13 = vector.shape_cast %12 : vector<1x128x128xbf16> to vector<128x128xbf16>
    %cst_18 = arith.constant dense<0.000000e+00> : vector<16x128xf32>
    %14 = tpu.matmul %11, %13, %cst_18 {dimension_numbers = #tpu.dot_dimension_numbers<[1], [0], [0], [1], [0, 0, 1, 1], [], []>} : vector<16x128xbf16>, vector<128x128xbf16>, vector<16x128xf32> -> vector<16x128xf32>
    %15 = arith.addf %10, %14 : vector<16x128xf32>
    %c2 = arith.constant 2 : index
    %c0_19 = arith.constant 0 : index
    %16 = vector.load %arg7[%c2, %c0_19] : memref<18x128xbf16, #tpu.memory_space<vmem>>, vector<16x128xbf16>
    %c2_20 = arith.constant 2 : index
    %c0_21 = arith.constant 0 : index
    %c0_22 = arith.constant 0 : index
    %17 = vector.load %arg2[%c2_20, %c0_21, %c0_22] : memref<3x128x128xbf16, #tpu.memory_space<vmem>>, vector<1x128x128xbf16>
    %18 = vector.shape_cast %17 : vector<1x128x128xbf16> to vector<128x128xbf16>
    %cst_23 = arith.constant dense<0.000000e+00> : vector<16x128xf32>
    %19 = tpu.matmul %16, %18, %cst_23 {dimension_numbers = #tpu.dot_dimension_numbers<[1], [0], [0], [1], [0, 0, 1, 1], [], []>} : vector<16x128xbf16>, vector<128x128xbf16>, vector<16x128xf32> -> vector<16x128xf32>
    %20 = arith.addf %15, %19 : vector<16x128xf32>
    %c0_24 = arith.constant 0 : index
    %c0_25 = arith.constant 0 : index
    %21 = vector.load %arg3[%c0_24, %c0_25] : memref<1x128xf32, #tpu.memory_space<vmem>>, vector<1x128xf32>
    %22 = vector.broadcast %21 : vector<1x128xf32> to vector<16x128xf32>
    %23 = arith.addf %20, %22 : vector<16x128xf32>
    %cst_26 = arith.constant 0.000000e+00 : f32
    %24 = vector.broadcast %cst_26 : f32 to vector<16x128xf32>
    %25 = arith.maximumf %23, %24 : vector<16x128xf32>
    %26 = tpu.iota {dimensions = array<i32: 0>} : vector<16x128xi32>
    %27 = tpu.iota {dimensions = array<i32: 1>} : vector<16x128xi32>
    %c64_i32 = arith.constant 64 : i32
    %28 = vector.broadcast %c64_i32 : i32 to vector<16x128xi32>
    %29 = arith.cmpi slt, %27, %28 : vector<16x128xi32>
    %c15_i32 = arith.constant 15 : i32
    %30 = vector.broadcast %c15_i32 : i32 to vector<16x128xi32>
    %31 = arith.cmpi slt, %26, %30 : vector<16x128xi32>
    %32 = arith.ori %29, %31 : vector<16x128xi1>
    %cst_27 = arith.constant 0.000000e+00 : f32
    %33 = vector.broadcast %cst_27 : f32 to vector<16x128xf32>
    %34 = arith.select %32, %25, %33 : vector<16x128xi1>, vector<16x128xf32>
    %cst_28 = arith.constant 0.000000e+00 : bf16
    %35 = vector.broadcast %cst_28 : bf16 to vector<1x128xbf16>
    %c0_29 = arith.constant 0 : index
    %c0_30 = arith.constant 0 : index
    %36 = vector.load %arg8[%c0_29, %c0_30] : memref<18x128xbf16, #tpu.memory_space<vmem>>, vector<1x128xbf16>
    tpu.vector_store %arg8[%c0_29, %c0_30], %35 {strides = array<i32>} : memref<18x128xbf16, #tpu.memory_space<vmem>>, vector<1x128xbf16>,
    %cst_31 = arith.constant 0.000000e+00 : bf16
    %37 = vector.broadcast %cst_31 : bf16 to vector<1x128xbf16>
    %c17_32 = arith.constant 17 : index
    %c0_33 = arith.constant 0 : index
    %38 = vector.load %arg8[%c17_32, %c0_33] : memref<18x128xbf16, #tpu.memory_space<vmem>>, vector<1x128xbf16>
    tpu.vector_store %arg8[%c17_32, %c0_33], %37 {strides = array<i32>} : memref<18x128xbf16, #tpu.memory_space<vmem>>, vector<1x128xbf16>,
    %39 = arith.truncf %34 : vector<16x128xf32> to vector<16x128xbf16>
    %c1_34 = arith.constant 1 : index
    %c0_35 = arith.constant 0 : index
    %40 = vector.load %arg8[%c1_34, %c0_35] : memref<18x128xbf16, #tpu.memory_space<vmem>>, vector<16x128xbf16>
    tpu.vector_store %arg8[%c1_34, %c0_35], %39 {strides = array<i32>} : memref<18x128xbf16, #tpu.memory_space<vmem>>, vector<16x128xbf16>,
    %c0_36 = arith.constant 0 : index
    %c0_37 = arith.constant 0 : index
    %41 = vector.load %arg8[%c0_36, %c0_37] : memref<18x128xbf16, #tpu.memory_space<vmem>>, vector<16x128xbf16>
    %c0_38 = arith.constant 0 : index
    %c0_39 = arith.constant 0 : index
    %c0_40 = arith.constant 0 : index
    %42 = vector.load %arg4[%c0_38, %c0_39, %c0_40] : memref<3x128x32xbf16, #tpu.memory_space<vmem>>, vector<1x128x32xbf16>
    %43 = vector.shape_cast %42 : vector<1x128x32xbf16> to vector<128x32xbf16>
    %cst_41 = arith.constant dense<0.000000e+00> : vector<16x32xf32>
    %44 = tpu.matmul %41, %43, %cst_41 {dimension_numbers = #tpu.dot_dimension_numbers<[1], [0], [0], [1], [0, 0, 1, 1], [], []>} : vector<16x128xbf16>, vector<128x32xbf16>, vector<16x32xf32> -> vector<16x32xf32>
    %c1_42 = arith.constant 1 : index
    %c0_43 = arith.constant 0 : index
    %45 = vector.load %arg8[%c1_42, %c0_43] : memref<18x128xbf16, #tpu.memory_space<vmem>>, vector<16x128xbf16>
    %c1_44 = arith.constant 1 : index
    %c0_45 = arith.constant 0 : index
    %c0_46 = arith.constant 0 : index
    %46 = vector.load %arg4[%c1_44, %c0_45, %c0_46] : memref<3x128x32xbf16, #tpu.memory_space<vmem>>, vector<1x128x32xbf16>
    %47 = vector.shape_cast %46 : vector<1x128x32xbf16> to vector<128x32xbf16>
    %cst_47 = arith.constant dense<0.000000e+00> : vector<16x32xf32>
    %48 = tpu.matmul %45, %47, %cst_47 {dimension_numbers = #tpu.dot_dimension_numbers<[1], [0], [0], [1], [0, 0, 1, 1], [], []>} : vector<16x128xbf16>, vector<128x32xbf16>, vector<16x32xf32> -> vector<16x32xf32>
    %49 = arith.addf %44, %48 : vector<16x32xf32>
    %c2_48 = arith.constant 2 : index
    %c0_49 = arith.constant 0 : index
    %50 = vector.load %arg8[%c2_48, %c0_49] : memref<18x128xbf16, #tpu.memory_space<vmem>>, vector<16x128xbf16>
    %c2_50 = arith.constant 2 : index
    %c0_51 = arith.constant 0 : index
    %c0_52 = arith.constant 0 : index
    %51 = vector.load %arg4[%c2_50, %c0_51, %c0_52] : memref<3x128x32xbf16, #tpu.memory_space<vmem>>, vector<1x128x32xbf16>
    %52 = vector.shape_cast %51 : vector<1x128x32xbf16> to vector<128x32xbf16>
    %cst_53 = arith.constant dense<0.000000e+00> : vector<16x32xf32>
    %53 = tpu.matmul %50, %52, %cst_53 {dimension_numbers = #tpu.dot_dimension_numbers<[1], [0], [0], [1], [0, 0, 1, 1], [], []>} : vector<16x128xbf16>, vector<128x32xbf16>, vector<16x32xf32> -> vector<16x32xf32>
    %54 = arith.addf %49, %53 : vector<16x32xf32>
    %c0_54 = arith.constant 0 : index
    %c0_55 = arith.constant 0 : index
    %55 = vector.load %arg5[%c0_54, %c0_55] : memref<1x32xf32, #tpu.memory_space<vmem>>, vector<1x32xf32>
    %56 = vector.broadcast %55 : vector<1x32xf32> to vector<16x32xf32>
    %57 = arith.addf %54, %56 : vector<16x32xf32>
    %58 = math.tanh %57 : vector<16x32xf32>
    %c0_56 = arith.constant 0 : index
    %c0_57 = arith.constant 0 : index
    %c0_58 = arith.constant 0 : index
    %59 = vector.load %arg6[%c0_56, %c0_57, %c0_58] : memref<1x16x32xf32, #tpu.memory_space<vmem>>, vector<1x16x32xf32>
    %60 = vector.shape_cast %59 : vector<1x16x32xf32> to vector<16x32xf32>
    %61 = vector.shape_cast %58 : vector<16x32xf32> to vector<1x16x32xf32>
    tpu.vector_store %arg6[%c0_56, %c0_57, %c0_58], %61 {strides = array<i32>} : memref<1x16x32xf32, #tpu.memory_space<vmem>>, vector<1x16x32xf32>,
    return
  }
  func.func @transform_0(%arg0: i32) -> (i32, i32, i32) {
    %c0_i32 = arith.constant 0 : i32
    %c0_i32_0 = arith.constant 0 : i32
    %c0_i32_1 = arith.constant 0 : i32
    return %arg0, %c0_i32, %c0_i32_0 : i32, i32, i32
  }
  func.func @transform_1(%arg0: i32) -> (i32, i32, i32) {
    %c0_i32 = arith.constant 0 : i32
    %c0_i32_0 = arith.constant 0 : i32
    %c0_i32_1 = arith.constant 0 : i32
    %c0_i32_2 = arith.constant 0 : i32
    return %c0_i32, %c0_i32_0, %c0_i32_1 : i32, i32, i32
  }
  func.func @transform_2(%arg0: i32) -> (i32, i32) {
    %c0_i32 = arith.constant 0 : i32
    %c0_i32_0 = arith.constant 0 : i32
    %c0_i32_1 = arith.constant 0 : i32
    return %c0_i32, %c0_i32_0 : i32, i32
  }
  func.func @transform_3(%arg0: i32) -> (i32, i32, i32) {
    %c0_i32 = arith.constant 0 : i32
    %c0_i32_0 = arith.constant 0 : i32
    %c0_i32_1 = arith.constant 0 : i32
    %c0_i32_2 = arith.constant 0 : i32
    return %c0_i32, %c0_i32_0, %c0_i32_1 : i32, i32, i32
  }
  func.func @transform_4(%arg0: i32) -> (i32, i32) {
    %c0_i32 = arith.constant 0 : i32
    %c0_i32_0 = arith.constant 0 : i32
    %c0_i32_1 = arith.constant 0 : i32
    return %c0_i32, %c0_i32_0 : i32, i32
  }
  func.func @transform_5(%arg0: i32) -> (i32, i32, i32) {
    %c0_i32 = arith.constant 0 : i32
    %c0_i32_0 = arith.constant 0 : i32
    %c0_i32_1 = arith.constant 0 : i32
    return %arg0, %c0_i32, %c0_i32_0 : i32, i32, i32
  }
}

</mosaic_0001>

<bundles_post_ra>
// kernel: _lambda_.3
= control target key start
LH: loop header
LB: loop body
LE: loop exit
PB: predicated region body
PF: predicated region fallthrough
CT: control target
= control target key end

     0   :  { %11 = vsyncpa [#allocation4], 0  ;;  %s1718_s0 = inlined_call_operand.vmem [shape: bf16[2,17,32], index: 0, kind: input, shape index: {}]   ;;  %s1719_s1 = inlined_call_operand.hbm [shape: bf16[32,128], index: 1, kind: input, shape index: {}]   ;;  %s1720_s2 = inlined_call_operand.hbm [shape: bf16[32,128], index: 2, kind: input, shape index: {}]   ;;  %s1721_s3 = inlined_call_operand.hbm [shape: f32[1,128], index: 3, kind: input, shape index: {}]   ;;  %s1722_s4 = inlined_call_operand.hbm [shape: bf16[3,128,128], index: 4, kind: input, shape index: {}]   ;;  %s1723_s5 = inlined_call_operand.hbm [shape: f32[1,128], index: 5, kind: input, shape index: {}]   ;;  %s1724_s6 = inlined_call_operand.vmem [shape: bf16[2,16,128], index: 6, kind: output, shape index: {}]  }
   0x1   :  { %12 = vsyncpa [#allocation6], 0 }
   0x2   :  { %13 = vsyncpa [#allocation9], 0  ;;  %s1485_s21 = smov 0  }
   0x3 LB: > { %s1491_s22 = sadd.s32 4294967295, %s1439_s21   ;;  %p1006_p0 = scmp.ge.s32.totalorder %s1439_s21, 1  ;;  %s1439_s21 = sphi %s1485_s21, %s19_s21  }
   0x4   : > { %p181_p1 = scmp.lt.s32.totalorder %s1439_s21, 3  ;;  %p1725_p2 = scmp.eq.s32.totalorder %s1491_s22, 0 }
   0x5   : > { %s1441_s24 = smov [#allocation5]   ;;  %s1442_s26 = smov [#allocation8]  }
   0x6   : > { %p1496_p3 = pnand %p1006_p0, %p181_p1  ;;  %s206_s25 = sshll.u32 %s1441_s24, 4  ;;  %s1500_s25 = int_to_ptr.vmem [resolvable:$true] %s206_s25 }
   0x7   : > { %s230_s27 = sshll.u32 %s1442_s26, 4  ;;  %s1443_s29 = smov [#allocation3]   ;;  %s1504_s27 = int_to_ptr.vmem [resolvable:$true] %s230_s27 }
   0x8   : > { %s1727_s23 = scalar_select %p1496_p3, 1, 0 }
   0x9   : > { %p1205_p4 = pneg %p1496_p3  ;;  %s193_s30 = sshll.u32 %s1443_s29, 4  ;;  %s1512_s30 = int_to_ptr.vmem [resolvable:$true] %s193_s30 }
   0xa   : > { %s1444_s7 = smov [#allocation7]   ;;  %s1281_s11 = scalar_lea.hbm %s1720_s2, 256 }
   0xb   : > { %p1508_p5 = pnand %p1725_p2, %p1205_p4  ;;  %s1514_s8 = sshll.u32 %s1444_s7, 4  ;;  %s221_s8 = int_to_ptr.vmem [resolvable:$true] %s1514_s8 }
   0xc   : > { %p1282_p6 = scmp.ne.s32.totalorder %s1720_s2, %s1281_s11  ;;  %p1288_p10 = scmp.lt.u32.totalorder %s1281_s11, %s1720_s2 }
   0xd   : > { %p1524_p7 = pneg %p1508_p5 }
   0xf   : > { %p1284_p8 = pnand %p1524_p7, %p1282_p6 }
  0x11   : > { %p1285_p9 = pneg %p1284_p8 }
  0x13   : > { %p1290_p11 = pnand %p1288_p10, %p1285_p9 }
  0x15   : > { %1293 = shalt.err (!%p1290_p11)
}
  0x16   : > { %s1294_s17 = scalar_lea.vmem %s1500_s25, 256  ;;  %p1302_p1 = scmp.lt.s32.totalorder %s1500_s25, %s1500_s25 }
  0x17   : > { %p1295_p12 = scmp.ne.s32.totalorder %s1500_s25, %s1294_s17  ;;  %p1303_p4 = scmp.lt.s32.totalorder %s1294_s17, %s1294_s17 }
  0x19   : > { %p1297_p13 = pnand %p1295_p12, %p1524_p7  ;;  %p1304_p6 = por %p1303_p4, %p1302_p1 }
  0x1b   : > { %p1298_p0 = pneg %p1297_p13 }
  0x1d   : > { %p1305_p8 = pnand %p1304_p6, %p1298_p0 }
  0x1f   : > { %1308 = shalt.err (!%p1305_p8)
}
  0x20   : > { %s1445_s18 = smov 64   ;;  %s1446_s19 = smov 4  }
  0x21   : > { %1211 = dma.hbm_to_vmem [thread:$0]  (!%p1508_p5), %s1720_s2, 256, %s1500_s25, [#allocation6], %s1445_s18, %s1445_s18, %s1446_s19  }
  0x22   : > { %s1309_s7 = scalar_lea.hbm %s1722_s4, 3072 }
  0x23   : > { %p1310_p9 = scmp.ne.s32.totalorder %s1722_s4, %s1309_s7  ;;  %p1316_p12 = scmp.lt.u32.totalorder %s1309_s7, %s1722_s4 }
  0x25   : > { %p1312_p10 = pnand %p1310_p9, %p1524_p7 }
  0x27   : > { %p1313_p11 = pneg %p1312_p10 }
  0x29   : > { %p1318_p13 = pnand %p1316_p12, %p1313_p11 }
  0x2b   : > { %1321 = shalt.err (!%p1318_p13)
}
  0x2c   : > { %s1322_s25 = scalar_lea.vmem %s1504_s27, 3072  ;;  %p1330_p6 = scmp.lt.s32.totalorder %s1504_s27, %s1504_s27 }
  0x2d   : > { %p1323_p0 = scmp.ne.s32.totalorder %s1504_s27, %s1322_s25  ;;  %p1331_p8 = scmp.lt.s32.totalorder %s1322_s25, %s1322_s25 }
  0x2f   : > { %p1325_p1 = pnand %p1323_p0, %p1524_p7  ;;  %p1332_p9 = por %p1331_p8, %p1330_p6 }
  0x31   : > { %p1326_p4 = pneg %p1325_p1 }
  0x33   : > { %p1333_p10 = pnand %p1332_p9, %p1326_p4 }
  0x35   : > { %1336 = shalt.err (!%p1333_p10)
}
  0x36   : > { %1217 = dma.hbm_to_vmem [thread:$0]  (!%p1508_p5), %s1722_s4, 3072, %s1504_s27, [#allocation9], %s1445_s18, %s1445_s18, %s1446_s19  }
  0x37   : > { %s1337_s20 = scalar_lea.hbm %s1719_s1, 256 }
  0x38   : > { %p1338_p11 = scmp.ne.s32.totalorder %s1719_s1, %s1337_s20  ;;  %p1344_p0 = scmp.lt.u32.totalorder %s1337_s20, %s1719_s1 }
  0x3a   : > { %p1340_p12 = pnand %p1338_p11, %p1524_p7 }
  0x3c   : > { %p1341_p13 = pneg %p1340_p12 }
  0x3e   : > { %p1346_p1 = pnand %p1344_p0, %p1341_p13 }
  0x40   : > { %1349 = shalt.err (!%p1346_p1)
}
  0x41   : > { %s1350_s27 = scalar_lea.vmem %s1512_s30, 256  ;;  %p1358_p9 = scmp.lt.s32.totalorder %s1512_s30, %s1512_s30 }
  0x42   : > { %p1351_p4 = scmp.ne.s32.totalorder %s1512_s30, %s1350_s27  ;;  %p1359_p10 = scmp.lt.s32.totalorder %s1350_s27, %s1350_s27 }
  0x44   : > { %p1353_p6 = pnand %p1351_p4, %p1524_p7  ;;  %p1360_p11 = por %p1359_p10, %p1358_p9 }
  0x46   : > { %p1354_p8 = pneg %p1353_p6 }
  0x48   : > { %p1361_p12 = pnand %p1360_p11, %p1354_p8 }
  0x4a   : > { %1364 = shalt.err (!%p1361_p12)
}
  0x4b   : > { %1208 = dma.hbm_to_vmem [thread:$0]  (!%p1508_p5), %s1719_s1, 256, %s1512_s30, [#allocation4], %s1445_s18, %s1445_s18, %s1446_s19  }
  0x4c   : > { %s1365_s25 = scalar_lea.hbm %s1721_s3, 16 }
  0x4d   : > { %p1366_p13 = scmp.ne.s32.totalorder %s1721_s3, %s1365_s25  ;;  %p1372_p4 = scmp.lt.u32.totalorder %s1365_s25, %s1721_s3 }
  0x4f   : > { %p1368_p0 = pnand %p1366_p13, %p1524_p7 }
  0x51   : > { %p1369_p1 = pneg %p1368_p0 }
  0x53   : > { %p1374_p6 = pnand %p1372_p4, %p1369_p1 }
  0x55   : > { %1377 = shalt.err (!%p1374_p6)
}
  0x56   : > { %s1378_s20 = scalar_lea.vmem %s221_s8, 16  ;;  %s1385_s30 = scalar_lea.vmem %s221_s8, 32 }
  0x57   : > { %p1379_p8 = scmp.ne.s32.totalorder %s221_s8, %s1378_s20  ;;  %p1386_p11 = scmp.lt.s32.totalorder %s221_s8, %s221_s8 }
  0x58   : > { %p1387_p12 = scmp.lt.s32.totalorder %s1385_s30, %s1378_s20 }
  0x59   : > { %p1381_p9 = pnand %p1379_p8, %p1524_p7 }
  0x5a   : > { %p1388_p2 = por %p1387_p12, %p1386_p11 }
  0x5b   : > { %p1382_p10 = pneg %p1381_p9 }
  0x5d   : > { %p1389_p3 = pnand %p1388_p2, %p1382_p10 }
  0x5f   : > { %1392 = shalt.err (!%p1389_p3)
}
  0x60   : > { %1214 = dma.hbm_to_vmem [thread:$0]  (!%p1508_p5), %s1721_s3, 16, %s221_s8, [#allocation6]  }
  0x61   : > { %s1447_s24 = smov [#allocation10]   ;;  %s1393_s27 = scalar_lea.hbm %s1723_s5, 16 }
  0x62   : > { %s244_s26 = sshll.u32 %s1447_s24, 4  ;;  %p1394_p13 = scmp.ne.s32.totalorder %s1723_s5, %s1393_s27  ;;  %s245_s26 = int_to_ptr.vmem [resolvable:$true] %s244_s26 }
  0x63   : > { %p1400_p0 = scmp.lt.u32.totalorder %s1393_s27, %s1723_s5 }
  0x64   : > { %p1396_p2 = pnand %p1394_p13, %p1524_p7 }
  0x66   : > { %p1397_p3 = pneg %p1396_p2 }
  0x68   : > { %p1402_p1 = pnand %p1400_p0, %p1397_p3 }
  0x6a   : > { %1405 = shalt.err (!%p1402_p1)
}
  0x6b   : > { %s1406_s8 = scalar_lea.vmem %s245_s26, 16  ;;  %s1413_s25 = scalar_lea.vmem %s245_s26, 32 }
  0x6c   : > { %p1407_p4 = scmp.ne.s32.totalorder %s245_s26, %s1406_s8  ;;  %p1414_p9 = scmp.lt.s32.totalorder %s245_s26, %s245_s26 }
  0x6d   : > { %p1415_p10 = scmp.lt.s32.totalorder %s1413_s25, %s1406_s8 }
  0x6e   : > { %p1409_p6 = pnand %p1407_p4, %p1524_p7 }
  0x6f   : > { %p1416_p11 = por %p1415_p10, %p1414_p9 }
  0x70   : > { %p1410_p8 = pneg %p1409_p6 }
  0x72   : > { %p1417_p12 = pnand %p1416_p11, %p1410_p8 }
  0x74   : > { %1420 = shalt.err (!%p1417_p12)
}
  0x75   : > { %1220 = dma.hbm_to_vmem [thread:$0]  (!%p1508_p5), %s1723_s5, 16, %s245_s26, [#allocation9]  }
  0x76   : > { %p1730_p13 = scmp.ne.s32.totalorder %s1727_s23, 0 }
  0x77   : > { %p1731_p2 = scmp.eq.s32.totalorder (!%p1730_p13), %s1491_s22, 0 }
  0x78   : > { %265 = sbr.rel (%p1730_p13) target bundleno = 658 (0x292), region = 44 }
  0x7f   : > { %1426 = dma.done.wait (%p1731_p2), [#allocation4], 256   ;;  %p1732_p7 = pmov %p1731_p2 }
  0x80   : > { %p1733_p3 = pmov %p1731_p2 }
  0x81   : > { %1428 = vsyncadd (%p1732_p7), [#allocation4], 4294967040 }
  0x82   : > { %1430 = dma.done.wait (%p1733_p3), [#allocation6], 272   ;;  %p1734_p0 = pmov %p1731_p2 }
  0x84   : > { %1432 = vsyncadd (%p1734_p0), [#allocation6], 4294967024  ;;  %p1735_p1 = pmov %p1734_p0 }
  0x85   : > { %p1736_p5 = pmov %p1734_p0 }
  0x86   : > { %1434 = dma.done.wait (%p1735_p1), [#allocation9], 3088  }
  0x87   : > { %1436 = vsyncadd (%p1736_p5), [#allocation9], 4294964208  ;;  %p311_p4 = scmp.lt.s32.totalorder %s1491_s22, 1  ;;  %v1448_v0 = vmov 0.0   ;;  %vm1449_vm0 = vmmov 0   ;;  %v1248_v1 = vld [vmem:[#allocation5] sm:$0xff]  }
  0x88   : > { %1108 = vmatprep.subr.bf16.mxu1 %v1448_v0  ;;  %1112 = vmatprep.mubr.msk.bf16.mxu1 %vm1449_vm0, %v1448_v0  ;;  %v1249_v2 = vld [vmem:[#allocation5 + $0x8] sm:$0xff]   ;;  %vm341_vm1 = vsmask.f32 7424  ;;  %vm366_vm2 = vcmask 261120   ;;  %v1252_v10 = vld [vmem:[#allocation3] sm:$0xff]   ;;  %v1253_v13 = vld [vmem:[#allocation3 + $0x8] sm:$0xff]  }
  0x89   : > { %s1740_s22 = smov (!%p311_p4, %s1491_s22), 1  ;;  %1124 = vmatprep.subr.bf16.mxu0 %v1448_v0  ;;  %1140 = vmatprep.mubr.msk.bf16.mxu0 %vm1449_vm0, %v1448_v0  ;;  %v1254_v14 = vld [vmem:[#allocation8] sm:$0xff]   ;;  %v1255_v15 = vld [vmem:[#allocation8 + $0x8] sm:$0xff]   ;;  %v1257_v17 = vld [vmem:[#allocation8 + $0x10] sm:$0xff]   ;;  %vm477_vm3 = vcmask 1040384   ;;  %vm516_vm8 = vcmask 1043456  }
  0x8a   : > { %s1184_s23 = smul.u32 12, %s1740_s22  ;;  %1109 = vmatpush3.bf16.msra.mxu1 %v1248_v1  ;;  %v1256_v16 = vld [vmem:[#allocation8 + $0x40] sm:$0xff]   ;;  %vm478_vm4 = vsmask.f32 256  ;;  %v480_v19 = vld [vmem:[#allocation2] sm:$0x1] }
  0x8b   : > { %1110 = vmatprep.subr.bf16.mxu1 %v1448_v0  ;;  %1125 = vmatpush3.bf16.msra.mxu0 %v1256_v16  ;;  %vm1678_vm5 = vmand %vm477_vm3, %vm478_vm4  ;;  %vm483_vm6 = vsmask.f32 7938  ;;  %v485_v20 = vld [vmem:[#allocation2 + $0x8] sm:$0x1]  ;;  %v1258_v22 = vld [vmem:[#allocation8 + $0x48] sm:$0xff]   ;;  %vm782_vm12 = vcmask 1046528  }
  0x8c   : > { %s315_s16 = scalar_lea.vmem %s1718_s0, %s1184_s23  ;;  %1126 = vmatprep.subr.bf16.mxu0 %v1448_v0  ;;  %v481_v21 = vsel %vm1678_vm5, 0, %v480_v19  ;;  %vm484_vm7 = vmand %vm477_vm3, %vm483_vm6  ;;  %v1259_v24 = vld [vmem:[#allocation8 + $0x18] sm:$0xff]   ;;  %v1260_v25 = vld [vmem:[#allocation8 + $0x50] sm:$0xff]   ;;  %vm494_vm9 = vsmask.f32 4368  ;;  %s1065_s17 = sshll.u32 %s1740_s22, 3 }
  0x8d   : > { %v1250_v3 = vld [vmem:[%s315_s16] sm:$0xff]   ;;  %v1251_v4 = vld [vmem:[%s315_s16 + $0x8] ss:$0 sps:$4 sm:$0x11]   ;;  %482 = vst [vmem:[#allocation2] sm:$0x1] %v481_v21  ;;  %vm517_vm10 = vmand %vm516_vm8, %vm483_vm6  ;;  %s320_s18 = scalar_lea.vmem %s1724_s6, %s1065_s17 }
  0x8e   : > { %v343_v5 = vshrl.u32 %v1250_v3, 16  ;;  %v345_v6 = vshll.u32 %v1250_v3, 16  ;;  %v350_v7 = vshll.u32 %v1251_v4, 16  ;;  %1111 = vmatpush3.bf16.msra.mxu1 %v1249_v2  ;;  %v486_v23 = vsel %vm484_vm7, 0, %v485_v20  ;;  %v1261_v26 = vld [vmem:[#allocation8 + $0x20] sm:$0xff]   ;;  %v1262_v27 = vld [vmem:[#allocation8 + $0x58] sm:$0xff]   ;;  %vm495_vm11 = vmor %vm478_vm4, %vm494_vm9 }
  0x8f   : > { %1116 = vmatprep.subr.bf16.mxu1 %v1448_v0  ;;  %487 = vst [vmem:[#allocation2 + $0x8] sm:$0x1] %v486_v23  ;;  %1127 = vmatpush3.bf16.msra.mxu0 %v1258_v22  ;;  %v1263_v28 = vld [vmem:[#allocation8 + $0x28] sm:$0xff]   ;;  %v1264_v29 = vld [vmem:[#allocation8 + $0x60] sm:$0xff]   ;;  %v1265_v30 = vld [vmem:[#allocation8 + $0x30] sm:$0xff]  }
  0x90   : > { %v347_v8 = vrot.slane %v345_v6, 1  ;;  %v352_v9 = vrot.slane %v350_v7, 1  ;;  %1128 = vmatprep.subr.bf16.mxu0 %v1448_v0  ;;  %v1266_v31 = vld [vmem:[#allocation8 + $0x68] sm:$0xff]   ;;  %v1267_v32 = vld [vmem:[#allocation8 + $0x38] sm:$0xff]   ;;  %v1268_v33 = vld [vmem:[#allocation8 + $0x70] sm:$0xff]  }
  0x91   : > { %v1270_v34 = vld [vmem:[#allocation8 + $0x78] sm:$0xff]   ;;  %v1273_v16 = vld [vmem:[#allocation8 + $0x88] sm:$0xff]   ;;  %v1276_v19 = vld [vmem:[#allocation8 + $0xa0] sm:$0xff]  }
  0x92   : > { %v348_v11 = vor.u32 %v347_v8, %v343_v5  ;;  %v1030_v40 = vld [vmem:[#allocation7] ss:$0 sm:$0xff]  ;;  %v1277_v20 = vld [vmem:[#allocation8 + $0xa8] sm:$0xff]   ;;  %v1278_v21 = vld [vmem:[#allocation8 + $0xb0] sm:$0xff]  }
  0x93   : > { %1129 = vmatpush3.bf16.msra.mxu0 %v1260_v25  ;;  %v1275_v18 = vld [vmem:[#allocation8 + $0x98] sm:$0xff]  }
  0x94   : > { %v353_v12 = vsel %vm341_vm1, %v348_v11, %v352_v9  ;;  %1130 = vmatprep.subr.bf16.mxu0 %v1448_v0  ;;  %v518_v56 = vld [vmem:[#allocation2] sm:$0xf] }
  0x95   : > { %1113 = vmatmul.mubr.msk.bf16.vlgmr.msra.gmra.mrb[0].mxu1 %vm366_vm2, %v353_v12 }
  0x96   : > { %1117 = vmatpush3.bf16.msra.mxu1 %v1252_v10  ;;  %1120 = vmatprep.mubr.msk.bf16.mxu1 %vm1449_vm0, %v1448_v0  ;;  %v522_v60 = vld [vmem:[#allocation2 + $0x8] sm:$0x1] }
  0x97   : > { %1118 = vmatprep.subr.bf16.mxu1 %v1448_v0  ;;  %1131 = vmatpush3.bf16.msra.mxu0 %v1262_v27 }
  0x98   : > { %1132 = vmatprep.subr.bf16.mxu0 %v1448_v0 }
  0x9a   : > { %1119 = vmatpush3.bf16.msra.mxu1 %v1253_v13 }
  0x9b   : > { %1144 = vmatprep.subr.bf16.mxu1 %v1448_v0  ;;  %1133 = vmatpush3.bf16.msra.mxu0 %v1264_v29 }
  0x9c   : > { %1134 = vmatprep.subr.bf16.mxu0 %v1448_v0 }
  0x9d   : > { %1121 = vmatmul.mubr.msk.bf16.vlgmr.msra.gmra.mrb[4].mxu1 %vm366_vm2, %v1250_v3 }
  0x9e   : > { %1160 = vmatprep.mubr.msk.bf16.mxu1 %vm1449_vm0, %v1448_v0  ;;  %1145 = vmatpush3.bf16.msra.mxu1 %v1254_v14  ;;  %v1272_v14 = vld [vmem:[#allocation8 + $0x80] sm:$0xff]  }
  0x9f   : > { %1146 = vmatprep.subr.bf16.mxu1 %v1448_v0  ;;  %1135 = vmatpush3.bf16.msra.mxu0 %v1266_v31 }
  0xa0   : > { %1136 = vmatprep.subr.bf16.mxu0 %v1448_v0 }
  0xa2   : > { %1147 = vmatpush3.bf16.msra.mxu1 %v1255_v15 }
  0xa3   : > { %1148 = vmatprep.subr.bf16.mxu1 %v1448_v0  ;;  %1137 = vmatpush3.bf16.msra.mxu0 %v1268_v33 }
  0xa4   : > { %1138 = vmatprep.subr.bf16.mxu0 %v1448_v0 }
  0xa6   : > { %1149 = vmatpush3.bf16.msra.mxu1 %v1257_v17  ;;  %v1274_v17 = vld [vmem:[#allocation8 + $0x90] sm:$0xff]  }
  0xa7   : > { %1150 = vmatprep.subr.bf16.mxu1 %v1448_v0  ;;  %1139 = vmatpush3.bf16.msra.mxu0 %v1270_v34 }
  0xa8   : > { %1164 = vmatprep.subr.bf16.mxu0 %v1448_v0 }
  0xaa   : > { %1151 = vmatpush3.bf16.msra.mxu1 %v1259_v24  ;;  %v1279_v24 = vld [vmem:[#allocation8 + $0xb8] sm:$0xff]  }
  0xab   : > { %1152 = vmatprep.subr.bf16.mxu1 %v1448_v0 }
  0xae   : > { %1153 = vmatpush3.bf16.msra.mxu1 %v1261_v26 }
  0xaf   : > { %1154 = vmatprep.subr.bf16.mxu1 %v1448_v0 }
  0xb2   : > { %1155 = vmatpush3.bf16.msra.mxu1 %v1263_v28 }
  0xb3   : > { %1156 = vmatprep.subr.bf16.mxu1 %v1448_v0 }
  0xb6   : > { %1157 = vmatpush3.bf16.msra.mxu1 %v1265_v30 }
  0xb7   : > { %1158 = vmatprep.subr.bf16.mxu1 %v1448_v0 }
  0xba   : > { %1159 = vmatpush3.bf16.msra.mxu1 %v1267_v32 }
 0x168   : > { %v404_v35 = vpop.f32.mrb[0].mxu1 }
 0x169   : > { %v1114_v36 = vpop.f32.mrb[1].mxu1 }
 0x16a   : > { %v407_v37 = vpop.f32.mrb[2].mxu1 }
 0x16b   : > { %v1115_v38 = vpop.f32.mrb[3].mxu1 }
 0x170   : > { %v459_v39 = vpop.f32.mrb[4].mxu1 }
 0x171   : > { %v460_v41 = vadd.f32 %v459_v39, %v404_v35  ;;  %v1122_v42 = vpop.f32.mrb[5].mxu1  ;;  %v1060_v39 = vld [vmem:[#allocation10] ss:$0 sm:$0xff] }
 0x172   : > { %v462_v43 = vpop.f32.mrb[6].mxu1 }
 0x173   : > { %v473_v44 = vadd.f32 %v1030_v40, %v460_v41  ;;  %v463_v45 = vadd.f32 %v462_v43, %v407_v37  ;;  %v1123_v46 = vpop.f32.mrb[7].mxu1 }
 0x175   : > { %v475_v47 = vmax.f32 %v473_v44, 0.0  ;;  %v474_v48 = vadd.f32 %v1030_v40, %v463_v45 }
 0x177   : > { %v1066_v49 = vpack.c.bf16 %v475_v47, %v475_v47  ;;  %v476_v50 = vmax.f32 %v474_v48, 0.0 }
 0x179   : > { %v497_v51 = vshrl.u32 %v1066_v49, 16  ;;  %v1067_v52 = vpack.c.bf16 %v476_v50, %v476_v50  ;;  %v500_v54 = vshll.u32 %v1066_v49, 16 }
 0x17b   : > { %v499_v53 = vrot.slane %v497_v51, 7  ;;  %v505_v55 = vshrl.u32 %v1067_v52, 16  ;;  %v508_v59 = vshll.u32 %v1067_v52, 16 }
 0x17d   : > { %v502_v57 = vor.u32 %v500_v54, %v499_v53  ;;  %v507_v58 = vrot.slane %v505_v55, 7  ;;  %v503_v61 = vrot.slane %v499_v53, 4 }
 0x17f   : > { %v519_v62 = vsel %vm517_vm10, %v502_v57, %v518_v56  ;;  %v510_v63 = vor.u32 %v508_v59, %v507_v58  ;;  %v512_v1 = vrot.slane %v507_v58, 4 }
 0x180   : > { %520 = vst [vmem:[#allocation2] sm:$0xf] %v519_v62 }
 0x181   : > { %v511_v2 = vsel %vm495_vm11, %v503_v61, %v510_v63  ;;  %v523_v3 = vsel %vm1678_vm5, %v512_v1, %v522_v60 }
 0x182   : > { %521 = vst [vmem:[#allocation2 + $0x4] sm:$0xf] %v511_v2  ;;  %524 = vst [vmem:[#allocation2 + $0x8] sm:$0x1] %v523_v3 }
 0x187   : > { %v525_v4 = vld [vmem:[#allocation2] sm:$0xf] }
 0x188   : > { %v761_v22 = vld [vmem:[#allocation2] sm:$0xe] }
 0x189   : > { %v526_v5 = vld [vmem:[#allocation2 + $0x4] sm:$0xf]  ;;  %v1271_v7 = vld [vmem:[#allocation2 + $0x8] ss:$0 sps:$4 sm:$0x11]  }
 0x18a   : > { %v1033_v6 = vcombine.low %v525_v4, %v526_v5  ;;  %v577_v9 = vshll.u32 %v1271_v7, 16  ;;  %v1051_v23 = vcombine.low %v761_v22, %v526_v5  ;;  %v784_v26 = vrot.slane %v1271_v7, 1 }
 0x18c   : > { %1161 = vmatmul.mubr.bf16.vlgmr.msra.gmra.mrb[8].mxu1 %v1033_v6  ;;  %v572_v8 = vshll.u32 %v1033_v6, 16  ;;  %v570_v10 = vshrl.u32 %v1033_v6, 16  ;;  %v579_v13 = vrot.slane %v577_v9, 1  ;;  %v783_v25 = vrot.slane %v1051_v23, 1 }
 0x18e   : > { %v574_v11 = vrot.slane %v572_v8, 1  ;;  %v785_v27 = vsel %vm782_vm12, %v783_v25, %v784_v26 }
 0x190   : > { %v575_v12 = vor.u32 %v574_v11, %v570_v10 }
 0x192   : > { %v580_v15 = vsel %vm341_vm1, %v575_v12, %v579_v13 }
 0x193   : > { %1141 = vmatmul.mubr.bf16.vlgmr.msra.gmra.mrb[0].mxu0 %v580_v15 }
 0x194   : > { %1165 = vmatpush3.bf16.msra.mxu0 %v1272_v14  ;;  %1180 = vmatprep.mubr.msk.bf16.mxu0 %vm1449_vm0, %v1448_v0 }
 0x195   : > { %1166 = vmatprep.subr.bf16.mxu0 %v1448_v0 }
 0x198   : > { %1167 = vmatpush3.bf16.msra.mxu0 %v1273_v16 }
 0x199   : > { %1168 = vmatprep.subr.bf16.mxu0 %v1448_v0 }
 0x19c   : > { %1169 = vmatpush3.bf16.msra.mxu0 %v1274_v17 }
 0x19d   : > { %1170 = vmatprep.subr.bf16.mxu0 %v1448_v0 }
 0x1a0   : > { %1171 = vmatpush3.bf16.msra.mxu0 %v1275_v18 }
 0x1a1   : > { %1172 = vmatprep.subr.bf16.mxu0 %v1448_v0 }
 0x1a4   : > { %1173 = vmatpush3.bf16.msra.mxu0 %v1276_v19 }
 0x1a5   : > { %1174 = vmatprep.subr.bf16.mxu0 %v1448_v0 }
 0x1a8   : > { %1175 = vmatpush3.bf16.msra.mxu0 %v1277_v20 }
 0x1a9   : > { %1176 = vmatprep.subr.bf16.mxu0 %v1448_v0 }
 0x1ac   : > { %1177 = vmatpush3.bf16.msra.mxu0 %v1278_v21 }
 0x1ad   : > { %1178 = vmatprep.subr.bf16.mxu0 %v1448_v0 }
 0x1b0   : > { %1179 = vmatpush3.bf16.msra.mxu0 %v1279_v24 }
 0x1b3   : > { %1181 = vmatmul.mubr.bf16.vlgmr.msra.gmra.mrb[4].mxu0 %v785_v27 }
 0x25f   : > { %v754_v28 = vpop.f32.mrb[8].mxu1 }
 0x260   : > { %v1162_v29 = vpop.f32.mrb[9].mxu1 }
 0x261   : > { %v757_v30 = vpop.f32.mrb[10].mxu1 }
 0x262   : > { %v1163_v31 = vpop.f32.mrb[11].mxu1 }
 0x266   : > { %v664_v32 = vpop.f32.mrb[0].mxu0 }
 0x267   : > { %v755_v33 = vadd.f32 %v754_v28, %v664_v32  ;;  %v1142_v34 = vpop.f32.mrb[1].mxu0 }
 0x268   : > { %v667_v35 = vpop.f32.mrb[2].mxu0 }
 0x269   : > { %v758_v36 = vadd.f32 %v757_v30, %v667_v35  ;;  %v1143_v37 = vpop.f32.mrb[3].mxu0 }
 0x286   : > { %v869_v38 = vpop.f32.mrb[4].mxu0 }
 0x287   : > { %v876_v0 = vadd.f32 %v869_v38, %v755_v33  ;;  %v1182_v40 = vpop.f32.mrb[5].mxu0 }
 0x288   : > { %v872_v41 = vpop.f32.mrb[6].mxu0 }
 0x289   : > { %v885_v42 = vadd.f32 %v1060_v39, %v876_v0  ;;  %v877_v43 = vadd.f32 %v872_v41, %v758_v36  ;;  %v1183_v44 = vpop.f32.mrb[7].mxu0 }
 0x28b   : > { %v886_v45 = vadd.f32 %v1060_v39, %v877_v43  ;;  %v887_v46 = vmax.f32 %v885_v42, 0.0 }
 0x28d   : > { %v888_v47 = vmax.f32 %v886_v45, 0.0 }
 0x28f   : > { %v1073_v48 = vpack.c.bf16 %v888_v47, %v887_v46 }
 0x291   : > { %1074 = vst [vmem:[%s320_s18] sm:$0xff] %v1073_v48  }
 0x292 PF: > { %s19_s21 = sadd.s32 1, %s1439_s21  }
 0x293   : > { %p16_p6 = scmp.ge.s32.totalorder %s19_s21, 4  }
 0x295   :  { %18 = sbr.rel (!%p16_p6) target bundleno = 3 (0x3), region = 97 }
 0x29c   :  { %920 = vsyncpa [#allocation4], 1 }
 0x29d   :  { %922 = vsyncpa [#allocation4 + $0x1], 1 }
 0x29e   :  { %923 = vsyncpa [#allocation6], 1 }
 0x29f   :  { %924 = vsyncpa [#allocation9], 1 }

// kernel: _lambda_.5
= control target key start
LH: loop header
LB: loop body
LE: loop exit
PB: predicated region body
PF: predicated region fallthrough
CT: control target
= control target key end

     0   :  { %s1526_s18 = smov 0   ;;  %s1805_s0 = inlined_call_operand.vmem [shape: bf16[2,16,128], index: 0, kind: input, shape index: {}]   ;;  %s1806_s1 = inlined_call_operand.vmem [shape: bf16[3,128,128], index: 1, kind: input, shape index: {}]   ;;  %s1807_s2 = inlined_call_operand.vmem [shape: f32[1,128], index: 2, kind: input, shape index: {}]   ;;  %s1808_s3 = inlined_call_operand.vmem [shape: bf16[3,128,32], index: 3, kind: input, shape index: {}]   ;;  %s1809_s4 = inlined_call_operand.vmem [shape: f32[1,32], index: 4, kind: input, shape index: {}]   ;;  %s1810_s5 = inlined_call_operand.vmem [shape: f32[2,16,32], index: 5, kind: output, shape index: {}]  }
   0x1 LB: > { %s1107_s19 = sadd.s32 4294967295, %s1492_s18   ;;  %p1111_p0 = scmp.ge.s32.totalorder %s1492_s18, 1  ;;  %s1492_s18 = sphi %s1526_s18, %s15_s18  }
   0x2   : > { %p187_p1 = scmp.lt.s32.totalorder %s1492_s18, 3 }
   0x4   : > { %p188_p2 = pnand %p1111_p0, %p187_p1 }
   0x5   : > { %v1428_v0 = vld [vmem:[%s1806_s1 + $0x40] sm:$0xff] (!%p188_p2)   ;;  %v1494_v1 = vmov (!%p188_p2), 0.0   ;;  %v1430_v3 = vld [vmem:[%s1806_s1 + $0x48] sm:$0xff] (!%p188_p2)   ;;  %vm1495_vm0 = vmmov (!%p188_p2), 0   ;;  %p215_p3 = scmp.lt.s32.totalorder (!%p188_p2), %s1107_s19, 1  ;;  %v1432_v5 = vld [vmem:[%s1806_s1 + $0x50] sm:$0xff] (!%p188_p2)  }
   0x6   : > { %191 = sbr.rel (%p188_p2) target bundleno = 582 (0x246), region = 40  ;;  %1298 = vmatprep.subr.bf16.mxu0 (!%p188_p2), %v1494_v1  ;;  %1318 = vmatprep.subr.bf16.mxu1 (!%p188_p2), %v1494_v1  ;;  %v1429_v2 = vld [vmem:[%s1806_s1] sm:$0xff] (!%p188_p2)   ;;  %v1431_v4 = vld [vmem:[%s1806_s1 + $0x8] sm:$0xff] (!%p188_p2)   ;;  %v1433_v6 = vld [vmem:[%s1806_s1 + $0x10] sm:$0xff] (!%p188_p2)   ;;  %vm226_vm1 = vcmask (!%p188_p2), 1040384   ;;  %vm261_vm5 = vcmask (!%p188_p2), 1043456  }
   0x7   : > { %1299 = vmatpush3.bf16.msra.mxu0 (!%p188_p2), %v1428_v0  ;;  %1314 = vmatprep.mubr.msk.bf16.mxu0 (!%p188_p2), %vm1495_vm0, %v1494_v1  ;;  %v1434_v7 = vld [vmem:[%s1806_s1 + $0x58] sm:$0xff] (!%p188_p2)   ;;  %v1436_v9 = vld [vmem:[%s1806_s1 + $0x60] sm:$0xff] (!%p188_p2)   ;;  %v1438_v11 = vld [vmem:[%s1806_s1 + $0x68] sm:$0xff] (!%p188_p2)   ;;  %vm227_vm2 = vsmask.f32 (!%p188_p2), 256  ;;  %vm528_vm11 = vcmask (!%p188_p2), 1046528  }
   0x8   : > { %1319 = vmatpush3.bf16.msra.mxu1 (!%p188_p2), %v1429_v2  ;;  %1300 = vmatprep.subr.bf16.mxu0 (!%p188_p2), %v1494_v1  ;;  %v1435_v8 = vld [vmem:[%s1806_s1 + $0x18] sm:$0xff] (!%p188_p2)   ;;  %v1437_v10 = vld [vmem:[%s1806_s1 + $0x20] sm:$0xff] (!%p188_p2)   ;;  %vm232_vm3 = vsmask.f32 (!%p188_p2), 7938  ;;  %vm1589_vm4 = vmand (!%p188_p2), %vm226_vm1, %vm227_vm2  ;;  %vm239_vm7 = vsmask.f32 (!%p188_p2), 4368 }
   0x9   : > { %1320 = vmatprep.subr.bf16.mxu1 (!%p188_p2), %v1494_v1  ;;  %1334 = vmatprep.mubr.msk.bf16.mxu1 (!%p188_p2), %vm1495_vm0, %v1494_v1  ;;  %v229_v12 = vld [vmem:[#allocation2] sm:$0x1] (!%p188_p2)  ;;  %v234_v14 = vld [vmem:[#allocation2 + $0x8] sm:$0x1] (!%p188_p2)  ;;  %vm1597_vm6 = vmand (!%p188_p2), %vm226_vm1, %vm232_vm3  ;;  %vm314_vm10 = vsmask.f32 (!%p188_p2), 7424 }
   0xa   : > { %v230_v16 = vsel (!%p188_p2), %vm1589_vm4, 0, %v229_v12  ;;  %v1439_v20 = vld [vmem:[%s1806_s1 + $0x28] sm:$0xff] (!%p188_p2)   ;;  %v235_v21 = vsel (!%p188_p2), %vm1597_vm6, 0, %v234_v14  ;;  %v1440_v25 = vld [vmem:[%s1806_s1 + $0x70] sm:$0xff] (!%p188_p2)   ;;  %vm1616_vm8 = vmor (!%p188_p2), %vm227_vm2, %vm239_vm7  ;;  %vm1049_vm15 = vcmask (!%p188_p2), 261120  }
   0xb   : > { %1301 = vmatpush3.bf16.msra.mxu0 (!%p188_p2), %v1430_v3  ;;  %231 = vst [vmem:[#allocation2] sm:$0x1] (!%p188_p2), %v230_v16  ;;  %236 = vst [vmem:[#allocation2 + $0x8] sm:$0x1] (!%p188_p2), %v235_v21  ;;  %v1441_v27 = vld [vmem:[%s1806_s1 + $0x30] sm:$0xff] (!%p188_p2)   ;;  %v1442_v35 = vld [vmem:[%s1806_s1 + $0x78] sm:$0xff] (!%p188_p2)  }
   0xc   : > { %1321 = vmatpush3.bf16.msra.mxu1 (!%p188_p2), %v1431_v4  ;;  %1302 = vmatprep.subr.bf16.mxu0 (!%p188_p2), %v1494_v1  ;;  %vm1623_vm9 = vmand (!%p188_p2), %vm261_vm5, %vm232_vm3  ;;  %v1443_v37 = vld [vmem:[%s1806_s1 + $0x38] sm:$0xff] (!%p188_p2)   ;;  %v1446_v51 = vld [vmem:[%s1806_s1 + $0x80] sm:$0xff] (!%p188_p2)  }
   0xd   : > { %s1820_s19 = smov (!%p215_p3, %s1107_s19), 1  ;;  %1322 = vmatprep.subr.bf16.mxu1 %v1494_v1  ;;  %v1447_v54 = vld [vmem:[%s1806_s1 + $0x88] sm:$0xff]   ;;  %v1448_v55 = vld [vmem:[%s1806_s1 + $0x90] sm:$0xff]   ;;  %v1449_v56 = vld [vmem:[%s1806_s1 + $0x98] sm:$0xff]  }
   0xe   : > { %s1240_s11 = sshll.u32 %s1820_s19, 3  ;;  %v1450_v57 = vld [vmem:[%s1806_s1 + $0xa0] sm:$0xff]   ;;  %v1451_v58 = vld [vmem:[%s1806_s1 + $0xa8] sm:$0xff]   ;;  %v1452_v60 = vld [vmem:[%s1806_s1 + $0xb0] sm:$0xff]   ;;  %s1241_s7 = sshll.u32 %s1820_s19, 4 }
   0xf   : > { %1303 = vmatpush3.bf16.msra.mxu0 %v1432_v5  ;;  %s219_s16 = scalar_lea.vmem %s1805_s0, %s1240_s11  ;;  %v1453_v62 = vld [vmem:[%s1806_s1 + $0xb8] sm:$0xff]   ;;  %v1455_v3 = vld [vmem:[%s1808_s3] sm:$0xff]   ;;  %v1456_v4 = vld [vmem:[%s1808_s3 + $0x8] sm:$0xff]   ;;  %s224_s10 = scalar_lea.vmem %s1810_s5, %s1241_s7 }
  0x10   : > { %1323 = vmatpush3.bf16.msra.mxu1 %v1433_v6  ;;  %1304 = vmatprep.subr.bf16.mxu0 %v1494_v1  ;;  %v237_v15 = vld [vmem:[%s219_s16] sm:$0xf]  ;;  %v238_v18 = vld [vmem:[%s219_s16 + $0x4] sm:$0xf]  ;;  %v1458_v6 = vld [vmem:[%s1808_s3 + $0x10] sm:$0xff]  }
  0x11   : > { %1324 = vmatprep.subr.bf16.mxu1 %v1494_v1  ;;  %v242_v19 = vshrl.u32 %v237_v15, 16  ;;  %v245_v22 = vshll.u32 %v237_v15, 16  ;;  %v250_v23 = vshrl.u32 %v238_v18, 16  ;;  %v253_v24 = vshll.u32 %v238_v18, 16  ;;  %v1457_v5 = vld [vmem:[%s1808_s3 + $0x40] sm:$0xff]   ;;  %v1461_v14 = vld [vmem:[%s1808_s3 + $0x50] sm:$0xff]  }
  0x12   : > { %v263_v38 = vld [vmem:[#allocation2] sm:$0xf]  ;;  %v267_v40 = vld [vmem:[#allocation2 + $0x8] sm:$0x1]  ;;  %v1463_v16 = vld [vmem:[%s1808_s3 + $0x58] sm:$0xff]  }
  0x13   : > { %1305 = vmatpush3.bf16.msra.mxu0 %v1434_v7  ;;  %v244_v26 = vrot.slane %v242_v19, 7  ;;  %v252_v28 = vrot.slane %v250_v23, 7  ;;  %v647_v7 = vld [vmem:[#allocation3] sm:$0x1]  ;;  %v1462_v15 = vld [vmem:[%s1808_s3 + $0x20] sm:$0xff]   ;;  %v1466_v19 = vld [vmem:[%s1808_s3 + $0x30] sm:$0xff]  }
  0x14   : > { %1325 = vmatpush3.bf16.msra.mxu1 %v1435_v8  ;;  %1306 = vmatprep.subr.bf16.mxu0 %v1494_v1  ;;  %v648_v8 = vsel %vm1589_vm4, 0, %v647_v7  ;;  %v1464_v17 = vld [vmem:[%s1808_s3 + $0x28] sm:$0xff]   ;;  %v1465_v18 = vld [vmem:[%s1808_s3 + $0x60] sm:$0xff]   ;;  %v1468_v21 = vld [vmem:[%s1808_s3 + $0x38] sm:$0xff]  }
  0x15   : > { %1326 = vmatprep.subr.bf16.mxu1 %v1494_v1  ;;  %v248_v30 = vrot.slane %v244_v26, 4  ;;  %v247_v31 = vor.u32 %v245_v22, %v244_v26  ;;  %v255_v32 = vor.u32 %v253_v24, %v252_v28  ;;  %v257_v33 = vrot.slane %v252_v28, 4  ;;  %649 = vst [vmem:[#allocation3] sm:$0x1] %v648_v8  ;;  %v1469_v22 = vld [vmem:[%s1808_s3 + $0x70] sm:$0xff]   ;;  %v1471_v23 = vld [vmem:[%s1808_s3 + $0x78] sm:$0xff]  }
  0x16   : > { %v1473_v29 = vld [vmem:[%s1808_s3 + $0x80] sm:$0xff]  }
  0x17   : > { %1307 = vmatpush3.bf16.msra.mxu0 %v1436_v9  ;;  %v256_v36 = vsel %vm1616_vm8, %v248_v30, %v255_v32  ;;  %v264_v39 = vsel %vm1623_vm9, %v247_v31, %v263_v38  ;;  %v268_v41 = vsel %vm1589_vm4, %v257_v33, %v267_v40  ;;  %v1459_v9 = vld [vmem:[%s1808_s3 + $0x48] sm:$0xff]  }
  0x18   : > { %1327 = vmatpush3.bf16.msra.mxu1 %v1437_v10  ;;  %1308 = vmatprep.subr.bf16.mxu0 %v1494_v1  ;;  %266 = vst [vmem:[#allocation2 + $0x4] sm:$0xf] %v256_v36  ;;  %265 = vst [vmem:[#allocation2] sm:$0xf] %v264_v39  ;;  %v650_v10 = vld [vmem:[#allocation3 + $0x8] sm:$0x1]  ;;  %v635_v36 = vlaneseq }
  0x19   : > { %1328 = vmatprep.subr.bf16.mxu1 %v1494_v1  ;;  %269 = vst [vmem:[#allocation2 + $0x8] sm:$0x1] %v268_v41  ;;  %v651_v12 = vsel %vm1597_vm6, 0, %v650_v10  ;;  %v1175_v41 = vld [vmem:[%s1807_s2] ss:$0 sm:$0xff] }
  0x1a   : > { %652 = vst [vmem:[#allocation3 + $0x8] sm:$0x1] %v651_v12  ;;  %v639_v39 = vand.u32 127, %v635_v36 }
  0x1b   : > { %1309 = vmatpush3.bf16.msra.mxu0 %v1438_v11  ;;  %v1460_v11 = vld [vmem:[%s1808_s3 + $0x18] sm:$0xff]  }
  0x1c   : > { %1329 = vmatpush3.bf16.msra.mxu1 %v1439_v20  ;;  %1310 = vmatprep.subr.bf16.mxu0 %v1494_v1  ;;  %v1467_v20 = vld [vmem:[%s1808_s3 + $0x68] sm:$0xff]   ;;  %vm640_vm12 = vcmp.lt.s32.totalorder %v639_v39, 64 }
  0x1d   : > { %1330 = vmatprep.subr.bf16.mxu1 %v1494_v1 }
  0x1f   : > { %1311 = vmatpush3.bf16.msra.mxu0 %v1440_v25  ;;  %v271_v42 = vld [vmem:[#allocation2 + $0x4] sm:$0xf]  ;;  %v270_v43 = vld [vmem:[#allocation2] sm:$0xf] }
  0x20   : > { %1331 = vmatpush3.bf16.msra.mxu1 %v1441_v27  ;;  %1312 = vmatprep.subr.bf16.mxu0 %v1494_v1  ;;  %v1132_v44 = vcombine.low %v270_v43, %v271_v42  ;;  %v1445_v45 = vld [vmem:[#allocation2 + $0x8] ss:$0 sps:$4 sm:$0x11]   ;;  %v507_v59 = vld [vmem:[#allocation2] sm:$0xe] }
  0x21   : > { %1332 = vmatprep.subr.bf16.mxu1 %v1494_v1  ;;  %v323_v48 = vshll.u32 %v1445_v45, 16  ;;  %v1166_v61 = vcombine.low %v507_v59, %v271_v42  ;;  %v530_v0 = vrot.slane %v1445_v45, 1 }
  0x22   : > { %v316_v46 = vshrl.u32 %v1132_v44, 16  ;;  %v318_v47 = vshll.u32 %v1132_v44, 16 }
  0x23   : > { %1313 = vmatpush3.bf16.msra.mxu0 %v1442_v35  ;;  %v325_v50 = vrot.slane %v323_v48, 1  ;;  %v529_v63 = vrot.slane %v1166_v61, 1 }
  0x24   : > { %1333 = vmatpush3.bf16.msra.mxu1 %v1443_v37  ;;  %1338 = vmatprep.subr.bf16.mxu0 %v1494_v1  ;;  %v320_v49 = vrot.slane %v318_v47, 1  ;;  %v636_v37 = vshrl.u32 %v635_v36, 7 }
  0x25   : > { %1358 = vmatprep.subr.bf16.mxu1 %v1494_v1  ;;  %v531_v2 = vsel %vm528_vm11, %v529_v63, %v530_v0  ;;  %v683_v63 = vld [vmem:[#allocation3 + $0x8] sm:$0x1] }
  0x26   : > { %v321_v52 = vor.u32 %v320_v49, %v316_v46  ;;  %v637_v38 = vadd.s32 8, %v636_v37 }
  0x27   : > { %1335 = vmatmul.mubr.bf16.vlgmr.msra.gmra.mrb[0].mxu1 %v1132_v44 }
  0x28   : > { %1374 = vmatprep.mubr.msk.bf16.mxu1 %vm1495_vm0, %v1494_v1  ;;  %v326_v53 = vsel %vm314_vm10, %v321_v52, %v325_v50  ;;  %1359 = vmatpush3.bf16.msra.mxu1 %v1457_v5  ;;  %vm642_vm13 = vcmp.lt.s32.totalorder %v637_v38, 15 }
  0x29   : > { %1315 = vmatmul.mubr.bf16.vlgmr.msra.gmra.mrb[0].mxu0 %v326_v53  ;;  %1360 = vmatprep.subr.bf16.mxu1 %v1494_v1  ;;  %vm644_vm14 = vmor %vm640_vm12, %vm642_vm13 }
  0x2a   : > { %1339 = vmatpush3.bf16.msra.mxu0 %v1446_v51  ;;  %1354 = vmatprep.mubr.msk.bf16.mxu0 %vm1495_vm0, %v1494_v1 }
  0x2b   : > { %1340 = vmatprep.subr.bf16.mxu0 %v1494_v1 }
  0x2c   : > { %1361 = vmatpush3.bf16.msra.mxu1 %v1459_v9 }
  0x2d   : > { %1362 = vmatprep.subr.bf16.mxu1 %v1494_v1 }
  0x2e   : > { %1341 = vmatpush3.bf16.msra.mxu0 %v1447_v54 }
  0x2f   : > { %1342 = vmatprep.subr.bf16.mxu0 %v1494_v1 }
  0x30   : > { %1363 = vmatpush3.bf16.msra.mxu1 %v1461_v14 }
  0x31   : > { %1364 = vmatprep.subr.bf16.mxu1 %v1494_v1 }
  0x32   : > { %1343 = vmatpush3.bf16.msra.mxu0 %v1448_v55 }
  0x33   : > { %1344 = vmatprep.subr.bf16.mxu0 %v1494_v1 }
  0x34   : > { %1365 = vmatpush3.bf16.msra.mxu1 %v1463_v16  ;;  %v1474_v16 = vld [vmem:[%s1808_s3 + $0x88] sm:$0xff]  }
  0x35   : > { %1366 = vmatprep.subr.bf16.mxu1 %v1494_v1 }
  0x36   : > { %1345 = vmatpush3.bf16.msra.mxu0 %v1449_v56 }
  0x37   : > { %1346 = vmatprep.subr.bf16.mxu0 %v1494_v1 }
  0x38   : > { %1367 = vmatpush3.bf16.msra.mxu1 %v1465_v18  ;;  %v1476_v18 = vld [vmem:[%s1808_s3 + $0x98] sm:$0xff]  }
  0x39   : > { %1368 = vmatprep.subr.bf16.mxu1 %v1494_v1 }
  0x3a   : > { %1347 = vmatpush3.bf16.msra.mxu0 %v1450_v57  ;;  %v679_v57 = vld [vmem:[#allocation3] sm:$0xf] }
  0x3b   : > { %1348 = vmatprep.subr.bf16.mxu0 %v1494_v1 }
  0x3c   : > { %1369 = vmatpush3.bf16.msra.mxu1 %v1467_v20  ;;  %v1478_v20 = vld [vmem:[%s1808_s3 + $0xa8] sm:$0xff]  }
  0x3d   : > { %1370 = vmatprep.subr.bf16.mxu1 %v1494_v1 }
  0x3e   : > { %1349 = vmatpush3.bf16.msra.mxu0 %v1451_v58 }
  0x3f   : > { %1350 = vmatprep.subr.bf16.mxu0 %v1494_v1 }
  0x40   : > { %1371 = vmatpush3.bf16.msra.mxu1 %v1469_v22 }
  0x41   : > { %1372 = vmatprep.subr.bf16.mxu1 %v1494_v1 }
  0x42   : > { %1351 = vmatpush3.bf16.msra.mxu0 %v1452_v60 }
  0x43   : > { %1352 = vmatprep.subr.bf16.mxu0 %v1494_v1 }
  0x44   : > { %1373 = vmatpush3.bf16.msra.mxu1 %v1471_v23 }
  0x45   : > { %1398 = vmatprep.subr.bf16.mxu1 %v1494_v1 }
  0x46   : > { %1353 = vmatpush3.bf16.msra.mxu0 %v1453_v62 }
  0x47   : > { %1378 = vmatprep.subr.bf16.mxu0 %v1494_v1 }
  0x49   : > { %1355 = vmatmul.mubr.bf16.vlgmr.msra.gmra.mrb[4].mxu0 %v531_v2 }
  0x4a   : > { %1394 = vmatprep.mubr.msk.bf16.mxu0 %vm1495_vm0, %v1494_v1  ;;  %1379 = vmatpush3.bf16.msra.mxu0 %v1455_v3 }
  0x4b   : > { %1380 = vmatprep.subr.bf16.mxu0 %v1494_v1 }
  0x4e   : > { %1381 = vmatpush3.bf16.msra.mxu0 %v1456_v4 }
  0x4f   : > { %1382 = vmatprep.subr.bf16.mxu0 %v1494_v1 }
  0x52   : > { %1383 = vmatpush3.bf16.msra.mxu0 %v1458_v6 }
  0x53   : > { %1384 = vmatprep.subr.bf16.mxu0 %v1494_v1 }
  0x56   : > { %1385 = vmatpush3.bf16.msra.mxu0 %v1460_v11 }
  0x57   : > { %1386 = vmatprep.subr.bf16.mxu0 %v1494_v1 }
  0x5a   : > { %1387 = vmatpush3.bf16.msra.mxu0 %v1462_v15 }
  0x5b   : > { %1388 = vmatprep.subr.bf16.mxu0 %v1494_v1 }
  0x5e   : > { %1389 = vmatpush3.bf16.msra.mxu0 %v1464_v17  ;;  %v1475_v17 = vld [vmem:[%s1808_s3 + $0x90] sm:$0xff]  }
  0x5f   : > { %1390 = vmatprep.subr.bf16.mxu0 %v1494_v1 }
  0x62   : > { %1391 = vmatpush3.bf16.msra.mxu0 %v1466_v19  ;;  %v1477_v19 = vld [vmem:[%s1808_s3 + $0xa0] sm:$0xff]  }
  0x63   : > { %1392 = vmatprep.subr.bf16.mxu0 %v1494_v1 }
  0x66   : > { %1393 = vmatpush3.bf16.msra.mxu0 %v1468_v21  ;;  %v1479_v21 = vld [vmem:[%s1808_s3 + $0xb0] sm:$0xff]  }
  0xfa   : > { %v500_v24 = vpop.f32.mrb[0].mxu1 }
  0xfb   : > { %v1336_v25 = vpop.f32.mrb[1].mxu1 }
  0xfc   : > { %v503_v26 = vpop.f32.mrb[2].mxu1  ;;  %v410_v28 = vpop.f32.mrb[0].mxu0 }
  0xfd   : > { %v1337_v27 = vpop.f32.mrb[3].mxu1  ;;  %v501_v30 = vadd.f32 %v500_v24, %v410_v28  ;;  %v1316_v31 = vpop.f32.mrb[1].mxu0  ;;  %v1480_v24 = vld [vmem:[%s1808_s3 + $0xb8] sm:$0xff]  }
  0xfe   : > { %v413_v32 = vpop.f32.mrb[2].mxu0 }
  0xff   : > { %v504_v33 = vadd.f32 %v503_v26, %v413_v32  ;;  %v1317_v35 = vpop.f32.mrb[3].mxu0 }
 0x11c   : > { %v615_v40 = vpop.f32.mrb[4].mxu0 }
 0x11d   : > { %v622_v42 = vadd.f32 %v615_v40, %v501_v30  ;;  %v1356_v43 = vpop.f32.mrb[5].mxu0 }
 0x11e   : > { %v618_v44 = vpop.f32.mrb[6].mxu0 }
 0x11f   : > { %v631_v45 = vadd.f32 %v1175_v41, %v622_v42  ;;  %v623_v46 = vadd.f32 %v618_v44, %v504_v33  ;;  %v1357_v47 = vpop.f32.mrb[7].mxu0 }
 0x121   : > { %v633_v48 = vmax.f32 %v631_v45, 0.0  ;;  %v632_v49 = vadd.f32 %v1175_v41, %v623_v46 }
 0x123   : > { %v1242_v50 = vpack.c.bf16 %v633_v48, %v633_v48  ;;  %v634_v51 = vmax.f32 %v632_v49, 0.0 }
 0x125   : > { %v660_v52 = vshrl.u32 %v1242_v50, 16  ;;  %v646_v53 = vsel %vm644_vm14, %v634_v51, 0.0  ;;  %v663_v56 = vshll.u32 %v1242_v50, 16 }
 0x126   : > { %v1243_v54 = vpack.c.bf16 %v646_v53, %v646_v53 }
 0x127   : > { %v662_v55 = vrot.slane %v660_v52, 7 }
 0x128   : > { %v668_v58 = vshrl.u32 %v1243_v54, 16  ;;  %v671_v61 = vshll.u32 %v1243_v54, 16 }
 0x129   : > { %v665_v59 = vor.u32 %v663_v56, %v662_v55  ;;  %v666_v0 = vrot.slane %v662_v55, 4 }
 0x12a   : > { %v670_v60 = vrot.slane %v668_v58, 7 }
 0x12b   : > { %v680_v62 = vsel %vm1623_vm9, %v665_v59, %v679_v57 }
 0x12c   : > { %681 = vst [vmem:[#allocation3] sm:$0xf] %v680_v62  ;;  %v673_v2 = vor.u32 %v671_v61, %v670_v60  ;;  %v675_v3 = vrot.slane %v670_v60, 4 }
 0x12e   : > { %v674_v4 = vsel %vm1616_vm8, %v666_v0, %v673_v2  ;;  %v684_v5 = vsel %vm1589_vm4, %v675_v3, %v683_v63 }
 0x12f   : > { %682 = vst [vmem:[#allocation3 + $0x4] sm:$0xf] %v674_v4  ;;  %685 = vst [vmem:[#allocation3 + $0x8] sm:$0x1] %v684_v5 }
 0x133   : > { %v686_v6 = vld [vmem:[#allocation3] sm:$0xf] }
 0x134   : > { %v922_v22 = vld [vmem:[#allocation3] sm:$0xe] }
 0x136   : > { %v687_v7 = vld [vmem:[#allocation3 + $0x4] sm:$0xf]  ;;  %v1472_v9 = vld [vmem:[#allocation3 + $0x8] ss:$0 sps:$4 sm:$0x11]  }
 0x137   : > { %v1194_v8 = vcombine.low %v686_v6, %v687_v7  ;;  %v738_v10 = vshll.u32 %v1472_v9, 16  ;;  %v1228_v23 = vcombine.low %v922_v22, %v687_v7  ;;  %v944_v26 = vrot.slane %v1472_v9, 1 }
 0x139   : > { %1395 = vmatmul.mubr.bf16.vlgmr.msra.gmra.mrb[8].mxu0 %v1194_v8  ;;  %v733_v34 = vshll.u32 %v1194_v8, 16  ;;  %v731_v11 = vshrl.u32 %v1194_v8, 16  ;;  %v740_v15 = vrot.slane %v738_v10, 1  ;;  %v943_v25 = vrot.slane %v1228_v23, 1 }
 0x13b   : > { %v735_v12 = vrot.slane %v733_v34, 1  ;;  %v945_v27 = vsel %vm528_vm11, %v943_v25, %v944_v26 }
 0x13d   : > { %v736_v14 = vor.u32 %v735_v12, %v731_v11 }
 0x13f   : > { %v741_v13 = vsel %vm314_vm10, %v736_v14, %v740_v15 }
 0x140   : > { %1375 = vmatmul.mubr.bf16.vlgmr.msra.gmra.mrb[4].mxu1 %v741_v13 }
 0x141   : > { %1399 = vmatpush3.bf16.msra.mxu1 %v1473_v29  ;;  %1414 = vmatprep.mubr.msk.bf16.mxu1 %vm1495_vm0, %v1494_v1 }
 0x142   : > { %1400 = vmatprep.subr.bf16.mxu1 %v1494_v1 }
 0x145   : > { %1401 = vmatpush3.bf16.msra.mxu1 %v1474_v16 }
 0x146   : > { %1402 = vmatprep.subr.bf16.mxu1 %v1494_v1 }
 0x149   : > { %1403 = vmatpush3.bf16.msra.mxu1 %v1475_v17 }
 0x14a   : > { %1404 = vmatprep.subr.bf16.mxu1 %v1494_v1 }
 0x14d   : > { %1405 = vmatpush3.bf16.msra.mxu1 %v1476_v18 }
 0x14e   : > { %1406 = vmatprep.subr.bf16.mxu1 %v1494_v1 }
 0x151   : > { %1407 = vmatpush3.bf16.msra.mxu1 %v1477_v19 }
 0x152   : > { %1408 = vmatprep.subr.bf16.mxu1 %v1494_v1 }
 0x155   : > { %1409 = vmatpush3.bf16.msra.mxu1 %v1478_v20 }
 0x156   : > { %1410 = vmatprep.subr.bf16.mxu1 %v1494_v1 }
 0x159   : > { %1411 = vmatpush3.bf16.msra.mxu1 %v1479_v21 }
 0x15a   : > { %1412 = vmatprep.subr.bf16.mxu1 %v1494_v1  ;;  %v1237_v1 = vld [vmem:[%s1809_s4] ss:$0 sm:$0xff] }
 0x15d   : > { %1413 = vmatpush3.bf16.msra.mxu1 %v1480_v24 }
 0x160   : > { %1415 = vmatmul.mubr.bf16.vlgmr.msra.gmra.mrb[8].mxu1 %v945_v27 }
 0x20c   : > { %v915_v28 = vpop.f32.mrb[8].mxu0 }
 0x20d   : > { %v1396_v30 = vpop.f32.mrb[9].mxu0 }
 0x20e   : > { %v918_v31 = vpop.f32.mrb[10].mxu0 }
 0x20f   : > { %v1397_v32 = vpop.f32.mrb[11].mxu0 }
 0x213   : > { %v825_v33 = vpop.f32.mrb[4].mxu1 }
 0x214   : > { %v916_v35 = vadd.f32 %v915_v28, %v825_v33  ;;  %v1376_v36 = vpop.f32.mrb[5].mxu1 }
 0x215   : > { %v828_v37 = vpop.f32.mrb[6].mxu1 }
 0x216   : > { %v919_v38 = vadd.f32 %v918_v31, %v828_v37  ;;  %v1377_v39 = vpop.f32.mrb[7].mxu1 }
 0x233   : > { %v1029_v40 = vpop.f32.mrb[8].mxu1 }
 0x234   : > { %v1036_v41 = vadd.f32 %v1029_v40, %v916_v35  ;;  %v1416_v42 = vpop.f32.mrb[9].mxu1 }
 0x235   : > { %v1032_v43 = vpop.f32.mrb[10].mxu1 }
 0x236   : > { %v1045_v44 = vadd.f32 %v1237_v1, %v1036_v41  ;;  %v1037_v45 = vadd.f32 %v1032_v43, %v919_v38  ;;  %v1417_v46 = vpop.f32.mrb[11].mxu1 }
 0x238   : > { %1482 = vtanh.f32 %v1045_v44  ;;  %v1046_v47 = vadd.f32 %v1237_v1, %v1037_v45 }
 0x23a   : > { %1484 = vtanh.f32 %v1046_v47 }
 0x242   : > { %v1483_v48 = vpop.eup %1482 }
 0x243   : > { %1050 = vst.msk [vmem:[%s224_s10] sm:$0xff] %vm1049_vm15, %v1483_v48 }
 0x244   : > { %v1485_v49 = vpop.eup %1484 }
 0x245   : > { %1051 = vst.msk [vmem:[%s224_s10 + $0x8] sm:$0xff] %vm1049_vm15, %v1485_v49 }
 0x246 PF: > { %s15_s18 = sadd.s32 1, %s1492_s18  }
 0x247   : > { %p12_p4 = scmp.ge.s32.totalorder %s15_s18, 4  }
 0x249   :  { %14 = sbr.rel (!%p12_p4) target bundleno = 1 (0x1), region = 74 }

// kernel: squeeze.1
= control target key start
LH: loop header
LB: loop body
LE: loop exit
PB: predicated region body
PF: predicated region fallthrough
CT: control target
= control target key end

     0   :  { %s8_s6 = smov 3  ;;  %s22_s9 = smov 3  ;;  %s269_s0 = inlined_call_operand.vmem [shape: f32[2,16,4,1], index: 0, kind: input, shape index: {}]   ;;  %s270_s1 = inlined_call_operand.hbm [shape: f32[2,64], index: 1, kind: output, shape index: {}]  }
   0x1   :  { %v128_v0 = vld [vmem:[%s269_s0 + $0xf] ss:$16 sm:%s8_s6]   ;;  %s183_s10 = smov 60   ;;  %v130_v1 = vld [vmem:[%s269_s0 + $0xd] ss:$16 sm:%s22_s9]   ;;  %s15_s13 = smov 3 }
   0x2   :  { %10 = vrot.lane.b32.xlu0 %v128_v0, %s183_s10  ;;  %s184_s14 = smov 52   ;;  %v129_v2 = vld [vmem:[%s269_s0 + $0xe] ss:$16 sm:%s15_s13]   ;;  %s29_s17 = smov 3 }
   0x3   :  { %24 = vrot.lane.b32.xlu1 %v130_v1, %s184_s14  ;;  %v131_v3 = vld [vmem:[%s269_s0 + $0xc] ss:$16 sm:%s29_s17]   ;;  %s36_s20 = smov 3 }
   0x4   :  { %2 = vsyncpa [#allocation1], 0  ;;  %s43_s21 = smov 3  ;;  %s185_s22 = smov 56   ;;  %v132_v4 = vld [vmem:[%s269_s0 + $0xb] ss:$16 sm:%s36_s20]  }
   0x5   :  { %s186_s23 = smov 48   ;;  %v133_v5 = vld [vmem:[%s269_s0 + $0xa] ss:$16 sm:%s43_s21]   ;;  %s50_s28 = smov 3  ;;  %vm5_vm0 = vcmask 31744   ;;  %vm12_vm1 = vcmask 523744  }
   0x6   :  { %17 = vrot.lane.b32.xlu0 %v129_v2, %s185_s22  ;;  %s57_s29 = smov 3  ;;  %s187_s30 = smov 44   ;;  %v134_v6 = vld [vmem:[%s269_s0 + $0x9] ss:$16 sm:%s50_s28]   ;;  %vm19_vm2 = vcmask 490944   ;;  %vm26_vm3 = vcmask 458144  }
   0x7   :  { %31 = vrot.lane.b32.xlu1 %v131_v3, %s186_s23  ;;  %s188_s2 = smov 40   ;;  %v135_v7 = vld [vmem:[%s269_s0 + $0x8] ss:$16 sm:%s57_s29]   ;;  %s64_s7 = smov 3  ;;  %vm33_vm4 = vcmask 425344   ;;  %vm40_vm5 = vcmask 392544  }
   0x8   :  { %s71_s8 = smov 3  ;;  %s189_s9 = smov 36   ;;  %v136_v8 = vld [vmem:[%s269_s0 + $0x7] ss:$16 sm:%s64_s7]   ;;  %vm47_vm6 = vcmask 359744   ;;  %vm54_vm7 = vcmask 326944  }
   0x9   :  { %s190_s10 = smov 32   ;;  %s3_s13 = smov 3  ;;  %v137_v9 = vld [vmem:[%s269_s0 + $0x6] ss:$16 sm:%s71_s8]   ;;  %vm61_vm8 = vcmask 294144   ;;  %vm68_vm9 = vcmask 261344  }
   0xa   :  { %38 = vrot.lane.b32.xlu0 %v132_v4, %s187_s30  ;;  %s78_s16 = smov 3  ;;  %v4_v10 = vld [vmem:[%s269_s0] ss:$16 sm:%s3_s13]   ;;  %s85_s19 = smov 3  ;;  %vm75_vm10 = vcmask 228544   ;;  %vm82_vm11 = vcmask 195744  }
   0xb   :  { %45 = vrot.lane.b32.xlu1 %v133_v5, %s188_s2  ;;  %6 = vst.msk [vmem:[#allocation2] sm:$0x3] %vm5_vm0, %v4_v10   ;;  %s191_s20 = smov 28   ;;  %s192_s21 = smov 24   ;;  %v138_v11 = vld [vmem:[%s269_s0 + $0x5] ss:$16 sm:%s78_s16]  }
   0xc   :  { %v139_v12 = vld [vmem:[%s269_s0 + $0x4] ss:$16 sm:%s85_s19]   ;;  %s92_s26 = smov 3  ;;  %s99_s27 = smov 3  ;;  %vm89_vm12 = vcmask 162944   ;;  %vm96_vm13 = vcmask 130144  }
   0xd   :  { %s193_s28 = smov 20   ;;  %s194_s29 = smov 16   ;;  %v140_v13 = vld [vmem:[%s269_s0 + $0x3] ss:$16 sm:%s92_s26]   ;;  %v141_v14 = vld [vmem:[%s269_s0 + $0x2] ss:$16 sm:%s99_s27]  }
   0xe   :  { %52 = vrot.lane.b32.xlu0 %v134_v6, %s189_s9  ;;  %s106_s5 = smov 3  ;;  %s195_s6 = smov 12   ;;  %vm103_vm14 = vcmask 97344   ;;  %vm110_vm15 = vcmask 64544  }
   0xf   :  { %59 = vrot.lane.b32.xlu1 %v135_v7, %s190_s10  ;;  %s196_s7 = smov 8   ;;  %v142_v15 = vld [vmem:[%s269_s0 + $0x1] ss:$16 sm:%s106_s5]   ;;  %s197_s0 = smov 4  }
  0x10   :  { %s198_s10 = smov [#allocation0]  }
  0x11   :  { %s122_s11 = sshll.u32 %s198_s10, 4  ;;  %s123_s11 = int_to_ptr.vmem [resolvable:$true] %s122_s11 }
  0x12   :  { %66 = vrot.lane.b32.xlu0 %v136_v8, %s191_s20  ;;  %s159_s12 = scalar_lea.vmem %s123_s11, 32  ;;  %p164_p1 = scmp.lt.s32.totalorder %s123_s11, %s123_s11 }
  0x13   :  { %73 = vrot.lane.b32.xlu1 %v137_v9, %s192_s21  ;;  %p160_p0 = scmp.ne.s32.totalorder %s123_s11, %s159_s12  ;;  %p165_p2 = scmp.lt.s32.totalorder %s159_s12, %s159_s12 }
  0x15   :  { %p166_p3 = por %p165_p2, %p164_p1 }
  0x16   :  { %80 = vrot.lane.b32.xlu0 %v138_v11, %s193_s28 }
  0x17   :  { %87 = vrot.lane.b32.xlu1 %v139_v12, %s194_s29  ;;  %p167_p4 = pnand %p166_p3, %p160_p0 }
  0x1a   :  { %94 = vrot.lane.b32.xlu0 %v140_v13, %s195_s6 }
  0x1b   :  { %101 = vrot.lane.b32.xlu1 %v141_v14, %s196_s7 }
  0x1e   :  { %108 = vrot.lane.b32.xlu0 %v142_v15, %s197_s0 }
  0x74   :  { %v11_v16 = vpop.permute.xlu0 %10  }
  0x75   :  { %13 = vst.msk [vmem:[#allocation2] sm:$0x3] %vm12_vm1, %v11_v16   ;;  %v25_v17 = vpop.permute.xlu1 %24  }
  0x78   :  { %v18_v18 = vpop.permute.xlu0 %17  }
  0x79   :  { %20 = vst.msk [vmem:[#allocation2] sm:$0x3] %vm19_vm2, %v18_v18   ;;  %v32_v19 = vpop.permute.xlu1 %31  }
  0x7a   :  { %27 = vst.msk [vmem:[#allocation2] sm:$0x3] %vm26_vm3, %v25_v17  }
  0x7b   :  { %34 = vst.msk [vmem:[#allocation2] sm:$0x3] %vm33_vm4, %v32_v19  }
  0x7c   :  { %v39_v20 = vpop.permute.xlu0 %38  }
  0x7d   :  { %41 = vst.msk [vmem:[#allocation2] sm:$0x3] %vm40_vm5, %v39_v20   ;;  %v46_v21 = vpop.permute.xlu1 %45  }
  0x7e   :  { %48 = vst.msk [vmem:[#allocation2] sm:$0x3] %vm47_vm6, %v46_v21  }
  0x80   :  { %v53_v22 = vpop.permute.xlu0 %52  }
  0x81   :  { %55 = vst.msk [vmem:[#allocation2] sm:$0x3] %vm54_vm7, %v53_v22   ;;  %v60_v23 = vpop.permute.xlu1 %59  }
  0x82   :  { %62 = vst.msk [vmem:[#allocation2] sm:$0x3] %vm61_vm8, %v60_v23  }
  0x84   :  { %v67_v24 = vpop.permute.xlu0 %66  }
  0x85   :  { %69 = vst.msk [vmem:[#allocation2] sm:$0x3] %vm68_vm9, %v67_v24   ;;  %v74_v25 = vpop.permute.xlu1 %73  }
  0x86   :  { %76 = vst.msk [vmem:[#allocation2] sm:$0x3] %vm75_vm10, %v74_v25  }
  0x88   :  { %v81_v26 = vpop.permute.xlu0 %80  }
  0x89   :  { %83 = vst.msk [vmem:[#allocation2] sm:$0x3] %vm82_vm11, %v81_v26   ;;  %v88_v27 = vpop.permute.xlu1 %87  }
  0x8a   :  { %90 = vst.msk [vmem:[#allocation2] sm:$0x3] %vm89_vm12, %v88_v27  }
  0x8c   :  { %v95_v28 = vpop.permute.xlu0 %94  }
  0x8d   :  { %97 = vst.msk [vmem:[#allocation2] sm:$0x3] %vm96_vm13, %v95_v28   ;;  %v102_v29 = vpop.permute.xlu1 %101  }
  0x8e   :  { %104 = vst.msk [vmem:[#allocation2] sm:$0x3] %vm103_vm14, %v102_v29  }
  0x90   :  { %v109_v30 = vpop.permute.xlu0 %108  }
  0x91   :  { %111 = vst.msk [vmem:[#allocation2] sm:$0x3] %vm110_vm15, %v109_v30  }
  0x98   :  { %v115_v31 = vld [vmem:[#allocation2] sm:$0x3] }
  0x99   :  { %117 = vst [vmem:[#allocation0] sm:$0x3] %v115_v31 }
  0x9a   :  { %170 = shalt.err (!%p167_p4)
}
  0x9b   :  { %s171_s15 = scalar_lea.hbm %s270_s1, 32 }
  0x9c   :  { %p172_p5 = scmp.ne.s32.totalorder %s270_s1, %s171_s15  ;;  %p175_p6 = scmp.lt.u32.totalorder %s171_s15, %s270_s1 }
  0x9e   :  { %p177_p7 = pnand %p175_p6, %p172_p5 }
  0xa0   :  { %180 = shalt.err (!%p177_p7)
}
  0xa1   :  { %125 = dma.vmem_to_hbm [thread:$0]  %s123_s11, 32, %s270_s1, [#allocation1]  }
  0xa2   :  { %181 = dma.done.wait [#allocation1], 32  }
  0xa3   :  { %182 = vsyncadd [#allocation1], 4294967264 }
  0xa4   :  { %127 = vsyncpa [#allocation1], 1 }

// kernel: _lambda_.4
= control target key start
LH: loop header
LB: loop body
LE: loop exit
PB: predicated region body
PF: predicated region fallthrough
CT: control target
= control target key end

     0   :  { %s11463_s12 = smov 0   ;;  %s11465_s13 = smov 0   ;;  %s14816_s0 = inlined_call_operand.vmem [shape: bf16[2,2048], index: 0, kind: input, shape index: {}]   ;;  %s14817_s1 = inlined_call_operand.vmem [shape: bf16[2048,2048], index: 1, kind: input, shape index: {}]   ;;  %s14818_s2 = inlined_call_operand.vmem [shape: f32[1,2048], index: 2, kind: input, shape index: {}]   ;;  %s14819_s3 = inlined_call_operand.vmem [shape: bf16[2,2048], index: 3, kind: output, shape index: {}]  }
   0x1   :  { %s11467_s14 = smov 0   ;;  %s11469_s15 = smov 0  }
   0x2   :  { %s11471_s16 = smov 0  }
   0x3 LB: > { %s25_s17 = sadd.s32 1, %s11435_s15  ;;  %p67_p1 = scmp.ne.s32.totalorder %s11427_s13, %s11423_s12  ;;  %s11439_s16 = sphi %s11471_s16, %s13_s16   ;;  %s11435_s15 = sphi %s11469_s15, %s14823_s15   ;;  %s11431_s14 = sphi %s11467_s14, %s14822_s14   ;;  %s11427_s13 = sphi %s11465_s13, %s14821_s13   ;;  %s11423_s12 = sphi %s11463_s12, %s14820_s12  }
   0x4   : > { %p27_p0 = scmp.ge.s32.totalorder %s25_s17, 2  ;;  %p68_p2 = scmp.eq.s32.totalorder %s11439_s16, 0 }
   0x5   : > { %s60_s19 = sadd.s32 1, %s11427_s13  ;;  %p10206_p5 = scmp.ge.s32.totalorder %s11439_s16, 2 }
   0x6   : > { %s14825_s17 = smov (%p27_p0, %s25_s17), 0  ;;  %p69_p3 = por %p68_p2, %p67_p1 }
   0x7   : > { %s56_s18 = ssub.s32 %s11435_s15, %s14825_s17  ;;  %153 = sbr.rel (%p10206_p5) target bundleno = 530 (0x212), region = 20 }
   0x8   : > { %p58_p4 = scmp.eq.s32.totalorder %s56_s18, 0 }
   0xa   : > { %s11498_s20 = scalar_select %p58_p4, %s11427_s13, %s60_s19  }
   0xe   : > { %156 = sbr.rel (!%p69_p3) target bundleno = 530 (0x212), region = 24  ;;  %s158_s21 = sand.u32 (%p69_p3), 1, %s11427_s13  }
   0xf   : > { %s11244_s22 = sshll.u32 (%p69_p3), %s11435_s15, 5  ;;  %s10207_s23 = sshll.u32 (%p69_p3), %s158_s21, 13 }
  0x10   : > { %s11506_s26 = scalar_lea.vmem (%p69_p3), %s14817_s1, %s11244_s22  ;;  %s11511_s27 = scalar_lea.vmem (%p69_p3), [#allocation3], %s10207_s23 }
  0x11   : > { %v179_v0 = vld [vmem:[%s11506_s26] sm:$0xff] (%p69_p3)  ;;  %v181_v1 = vld [vmem:[%s11506_s26 + $0x8] sm:$0xff] (%p69_p3)  ;;  %v183_v2 = vld [vmem:[%s11506_s26 + $0x10] sm:$0xff] (%p69_p3) }
  0x12   : > { %180 = vst [vmem:[%s11511_s27] sm:$0xff] (%p69_p3), %v179_v0  ;;  %182 = vst [vmem:[%s11511_s27 + $0x8] sm:$0xff] (%p69_p3), %v181_v1  ;;  %v185_v3 = vld [vmem:[%s11506_s26 + $0x18] sm:$0xff] (%p69_p3)  ;;  %v187_v4 = vld [vmem:[%s11506_s26 + $0x40] sm:$0xff] (%p69_p3) }
  0x13   : > { %184 = vst [vmem:[%s11511_s27 + $0x10] sm:$0xff] (%p69_p3), %v183_v2  ;;  %v189_v5 = vld [vmem:[%s11506_s26 + $0x48] sm:$0xff] (%p69_p3)  ;;  %186 = vst [vmem:[%s11511_s27 + $0x18] sm:$0xff] (%p69_p3), %v185_v3  ;;  %v191_v6 = vld [vmem:[%s11506_s26 + $0x50] sm:$0xff] (%p69_p3) }
  0x14   : > { %188 = vst [vmem:[%s11511_s27 + $0x20] sm:$0xff] (%p69_p3), %v187_v4  ;;  %190 = vst [vmem:[%s11511_s27 + $0x28] sm:$0xff] (%p69_p3), %v189_v5  ;;  %v193_v7 = vld [vmem:[%s11506_s26 + $0x58] sm:$0xff] (%p69_p3)  ;;  %v195_v8 = vld [vmem:[%s11506_s26 + $0x80] sm:$0xff] (%p69_p3) }
  0x15   : > { %192 = vst [vmem:[%s11511_s27 + $0x30] sm:$0xff] %v191_v6  ;;  %194 = vst [vmem:[%s11511_s27 + $0x38] sm:$0xff] %v193_v7  ;;  %v197_v9 = vld [vmem:[%s11506_s26 + $0x88] sm:$0xff]  ;;  %v199_v10 = vld [vmem:[%s11506_s26 + $0x90] sm:$0xff] }
  0x16   : > { %196 = vst [vmem:[%s11511_s27 + $0x40] sm:$0xff] %v195_v8  ;;  %v201_v11 = vld [vmem:[%s11506_s26 + $0x98] sm:$0xff]  ;;  %198 = vst [vmem:[%s11511_s27 + $0x48] sm:$0xff] %v197_v9  ;;  %v203_v12 = vld [vmem:[%s11506_s26 + $0xc0] sm:$0xff] }
  0x17   : > { %200 = vst [vmem:[%s11511_s27 + $0x50] sm:$0xff] %v199_v10  ;;  %202 = vst [vmem:[%s11511_s27 + $0x58] sm:$0xff] %v201_v11  ;;  %v205_v13 = vld [vmem:[%s11506_s26 + $0xc8] sm:$0xff]  ;;  %v207_v14 = vld [vmem:[%s11506_s26 + $0xd0] sm:$0xff] }
  0x18   : > { %204 = vst [vmem:[%s11511_s27 + $0x60] sm:$0xff] %v203_v12  ;;  %206 = vst [vmem:[%s11511_s27 + $0x68] sm:$0xff] %v205_v13  ;;  %v209_v15 = vld [vmem:[%s11506_s26 + $0xd8] sm:$0xff]  ;;  %v211_v16 = vld [vmem:[%s11506_s26 + $0x100] sm:$0xff] }
  0x19   : > { %208 = vst [vmem:[%s11511_s27 + $0x70] sm:$0xff] %v207_v14  ;;  %v213_v17 = vld [vmem:[%s11506_s26 + $0x108] sm:$0xff]  ;;  %210 = vst [vmem:[%s11511_s27 + $0x78] sm:$0xff] %v209_v15  ;;  %v215_v18 = vld [vmem:[%s11506_s26 + $0x110] sm:$0xff] }
  0x1a   : > { %212 = vst [vmem:[%s11511_s27 + $0x80] sm:$0xff] %v211_v16  ;;  %214 = vst [vmem:[%s11511_s27 + $0x88] sm:$0xff] %v213_v17  ;;  %v217_v19 = vld [vmem:[%s11506_s26 + $0x118] sm:$0xff]  ;;  %v219_v20 = vld [vmem:[%s11506_s26 + $0x140] sm:$0xff] }
  0x1b   : > { %216 = vst [vmem:[%s11511_s27 + $0x90] sm:$0xff] %v215_v18  ;;  %218 = vst [vmem:[%s11511_s27 + $0x98] sm:$0xff] %v217_v19  ;;  %v221_v21 = vld [vmem:[%s11506_s26 + $0x148] sm:$0xff]  ;;  %v223_v22 = vld [vmem:[%s11506_s26 + $0x150] sm:$0xff] }
  0x1c   : > { %220 = vst [vmem:[%s11511_s27 + $0xa0] sm:$0xff] %v219_v20  ;;  %v225_v23 = vld [vmem:[%s11506_s26 + $0x158] sm:$0xff]  ;;  %222 = vst [vmem:[%s11511_s27 + $0xa8] sm:$0xff] %v221_v21  ;;  %v227_v24 = vld [vmem:[%s11506_s26 + $0x180] sm:$0xff] }
  0x1d   : > { %224 = vst [vmem:[%s11511_s27 + $0xb0] sm:$0xff] %v223_v22  ;;  %226 = vst [vmem:[%s11511_s27 + $0xb8] sm:$0xff] %v225_v23  ;;  %v229_v25 = vld [vmem:[%s11506_s26 + $0x188] sm:$0xff]  ;;  %v231_v26 = vld [vmem:[%s11506_s26 + $0x190] sm:$0xff] }
  0x1e   : > { %228 = vst [vmem:[%s11511_s27 + $0xc0] sm:$0xff] %v227_v24  ;;  %230 = vst [vmem:[%s11511_s27 + $0xc8] sm:$0xff] %v229_v25  ;;  %v233_v27 = vld [vmem:[%s11506_s26 + $0x198] sm:$0xff]  ;;  %v235_v28 = vld [vmem:[%s11506_s26 + $0x1c0] sm:$0xff] }
  0x1f   : > { %232 = vst [vmem:[%s11511_s27 + $0xd0] sm:$0xff] %v231_v26  ;;  %v237_v29 = vld [vmem:[%s11506_s26 + $0x1c8] sm:$0xff]  ;;  %234 = vst [vmem:[%s11511_s27 + $0xd8] sm:$0xff] %v233_v27  ;;  %v239_v30 = vld [vmem:[%s11506_s26 + $0x1d0] sm:$0xff] }
  0x20   : > { %236 = vst [vmem:[%s11511_s27 + $0xe0] sm:$0xff] %v235_v28  ;;  %238 = vst [vmem:[%s11511_s27 + $0xe8] sm:$0xff] %v237_v29  ;;  %v241_v31 = vld [vmem:[%s11506_s26 + $0x1d8] sm:$0xff]  ;;  %v243_v32 = vld [vmem:[%s11506_s26 + $0x200] sm:$0xff] }
  0x21   : > { %240 = vst [vmem:[%s11511_s27 + $0xf0] sm:$0xff] %v239_v30  ;;  %242 = vst [vmem:[%s11511_s27 + $0xf8] sm:$0xff] %v241_v31  ;;  %v245_v33 = vld [vmem:[%s11506_s26 + $0x208] sm:$0xff]  ;;  %v247_v34 = vld [vmem:[%s11506_s26 + $0x210] sm:$0xff] }
  0x22   : > { %244 = vst [vmem:[%s11511_s27 + $0x100] sm:$0xff] %v243_v32  ;;  %v249_v35 = vld [vmem:[%s11506_s26 + $0x218] sm:$0xff]  ;;  %246 = vst [vmem:[%s11511_s27 + $0x108] sm:$0xff] %v245_v33  ;;  %v251_v36 = vld [vmem:[%s11506_s26 + $0x240] sm:$0xff] }
  0x23   : > { %248 = vst [vmem:[%s11511_s27 + $0x110] sm:$0xff] %v247_v34  ;;  %250 = vst [vmem:[%s11511_s27 + $0x118] sm:$0xff] %v249_v35  ;;  %v253_v37 = vld [vmem:[%s11506_s26 + $0x248] sm:$0xff]  ;;  %v255_v38 = vld [vmem:[%s11506_s26 + $0x250] sm:$0xff] }
  0x24   : > { %252 = vst [vmem:[%s11511_s27 + $0x120] sm:$0xff] %v251_v36  ;;  %254 = vst [vmem:[%s11511_s27 + $0x128] sm:$0xff] %v253_v37  ;;  %v257_v39 = vld [vmem:[%s11506_s26 + $0x258] sm:$0xff]  ;;  %v259_v40 = vld [vmem:[%s11506_s26 + $0x280] sm:$0xff] }
  0x25   : > { %256 = vst [vmem:[%s11511_s27 + $0x130] sm:$0xff] %v255_v38  ;;  %v261_v41 = vld [vmem:[%s11506_s26 + $0x288] sm:$0xff]  ;;  %258 = vst [vmem:[%s11511_s27 + $0x138] sm:$0xff] %v257_v39  ;;  %v263_v42 = vld [vmem:[%s11506_s26 + $0x290] sm:$0xff] }
  0x26   : > { %260 = vst [vmem:[%s11511_s27 + $0x140] sm:$0xff] %v259_v40  ;;  %262 = vst [vmem:[%s11511_s27 + $0x148] sm:$0xff] %v261_v41  ;;  %v265_v43 = vld [vmem:[%s11506_s26 + $0x298] sm:$0xff]  ;;  %v267_v44 = vld [vmem:[%s11506_s26 + $0x2c0] sm:$0xff] }
  0x27   : > { %264 = vst [vmem:[%s11511_s27 + $0x150] sm:$0xff] %v263_v42  ;;  %266 = vst [vmem:[%s11511_s27 + $0x158] sm:$0xff] %v265_v43  ;;  %v269_v45 = vld [vmem:[%s11506_s26 + $0x2c8] sm:$0xff]  ;;  %v271_v46 = vld [vmem:[%s11506_s26 + $0x2d0] sm:$0xff] }
  0x28   : > { %268 = vst [vmem:[%s11511_s27 + $0x160] sm:$0xff] %v267_v44  ;;  %v273_v47 = vld [vmem:[%s11506_s26 + $0x2d8] sm:$0xff]  ;;  %270 = vst [vmem:[%s11511_s27 + $0x168] sm:$0xff] %v269_v45  ;;  %v275_v48 = vld [vmem:[%s11506_s26 + $0x300] sm:$0xff] }
  0x29   : > { %272 = vst [vmem:[%s11511_s27 + $0x170] sm:$0xff] %v271_v46  ;;  %274 = vst [vmem:[%s11511_s27 + $0x178] sm:$0xff] %v273_v47  ;;  %v277_v49 = vld [vmem:[%s11506_s26 + $0x308] sm:$0xff]  ;;  %v279_v50 = vld [vmem:[%s11506_s26 + $0x310] sm:$0xff] }
  0x2a   : > { %276 = vst [vmem:[%s11511_s27 + $0x180] sm:$0xff] %v275_v48  ;;  %278 = vst [vmem:[%s11511_s27 + $0x188] sm:$0xff] %v277_v49  ;;  %v281_v51 = vld [vmem:[%s11506_s26 + $0x318] sm:$0xff]  ;;  %v283_v52 = vld [vmem:[%s11506_s26 + $0x340] sm:$0xff] }
  0x2b   : > { %280 = vst [vmem:[%s11511_s27 + $0x190] sm:$0xff] %v279_v50  ;;  %v285_v53 = vld [vmem:[%s11506_s26 + $0x348] sm:$0xff]  ;;  %282 = vst [vmem:[%s11511_s27 + $0x198] sm:$0xff] %v281_v51  ;;  %v287_v54 = vld [vmem:[%s11506_s26 + $0x350] sm:$0xff] }
  0x2c   : > { %284 = vst [vmem:[%s11511_s27 + $0x1a0] sm:$0xff] %v283_v52  ;;  %286 = vst [vmem:[%s11511_s27 + $0x1a8] sm:$0xff] %v285_v53  ;;  %v289_v55 = vld [vmem:[%s11506_s26 + $0x358] sm:$0xff]  ;;  %v291_v56 = vld [vmem:[%s11506_s26 + $0x380] sm:$0xff] }
  0x2d   : > { %288 = vst [vmem:[%s11511_s27 + $0x1b0] sm:$0xff] %v287_v54  ;;  %290 = vst [vmem:[%s11511_s27 + $0x1b8] sm:$0xff] %v289_v55  ;;  %v293_v57 = vld [vmem:[%s11506_s26 + $0x388] sm:$0xff]  ;;  %v295_v58 = vld [vmem:[%s11506_s26 + $0x390] sm:$0xff] }
  0x2e   : > { %292 = vst [vmem:[%s11511_s27 + $0x1c0] sm:$0xff] %v291_v56  ;;  %v297_v59 = vld [vmem:[%s11506_s26 + $0x398] sm:$0xff]  ;;  %294 = vst [vmem:[%s11511_s27 + $0x1c8] sm:$0xff] %v293_v57  ;;  %v299_v60 = vld [vmem:[%s11506_s26 + $0x3c0] sm:$0xff] }
  0x2f   : > { %296 = vst [vmem:[%s11511_s27 + $0x1d0] sm:$0xff] %v295_v58  ;;  %298 = vst [vmem:[%s11511_s27 + $0x1d8] sm:$0xff] %v297_v59  ;;  %v301_v61 = vld [vmem:[%s11506_s26 + $0x3c8] sm:$0xff]  ;;  %v303_v62 = vld [vmem:[%s11506_s26 + $0x3d0] sm:$0xff] }
  0x30   : > { %300 = vst [vmem:[%s11511_s27 + $0x1e0] sm:$0xff] %v299_v60  ;;  %302 = vst [vmem:[%s11511_s27 + $0x1e8] sm:$0xff] %v301_v61  ;;  %v305_v63 = vld [vmem:[%s11506_s26 + $0x3d8] sm:$0xff]  ;;  %v307_v0 = vld [vmem:[%s11506_s26 + $0x400] sm:$0xff] }
  0x31   : > { %304 = vst [vmem:[%s11511_s27 + $0x1f0] sm:$0xff] %v303_v62  ;;  %v309_v1 = vld [vmem:[%s11506_s26 + $0x408] sm:$0xff]  ;;  %306 = vst [vmem:[%s11511_s27 + $0x1f8] sm:$0xff] %v305_v63  ;;  %v311_v2 = vld [vmem:[%s11506_s26 + $0x410] sm:$0xff] }
  0x32   : > { %308 = vst [vmem:[%s11511_s27 + $0x200] sm:$0xff] %v307_v0  ;;  %310 = vst [vmem:[%s11511_s27 + $0x208] sm:$0xff] %v309_v1  ;;  %v313_v3 = vld [vmem:[%s11506_s26 + $0x418] sm:$0xff]  ;;  %v315_v4 = vld [vmem:[%s11506_s26 + $0x440] sm:$0xff] }
  0x33   : > { %312 = vst [vmem:[%s11511_s27 + $0x210] sm:$0xff] %v311_v2  ;;  %314 = vst [vmem:[%s11511_s27 + $0x218] sm:$0xff] %v313_v3  ;;  %v317_v5 = vld [vmem:[%s11506_s26 + $0x448] sm:$0xff]  ;;  %v319_v6 = vld [vmem:[%s11506_s26 + $0x450] sm:$0xff] }
  0x34   : > { %316 = vst [vmem:[%s11511_s27 + $0x220] sm:$0xff] %v315_v4  ;;  %v321_v7 = vld [vmem:[%s11506_s26 + $0x458] sm:$0xff]  ;;  %318 = vst [vmem:[%s11511_s27 + $0x228] sm:$0xff] %v317_v5  ;;  %v323_v8 = vld [vmem:[%s11506_s26 + $0x480] sm:$0xff] }
  0x35   : > { %320 = vst [vmem:[%s11511_s27 + $0x230] sm:$0xff] %v319_v6  ;;  %322 = vst [vmem:[%s11511_s27 + $0x238] sm:$0xff] %v321_v7  ;;  %v325_v9 = vld [vmem:[%s11506_s26 + $0x488] sm:$0xff]  ;;  %v327_v10 = vld [vmem:[%s11506_s26 + $0x490] sm:$0xff] }
  0x36   : > { %324 = vst [vmem:[%s11511_s27 + $0x240] sm:$0xff] %v323_v8  ;;  %326 = vst [vmem:[%s11511_s27 + $0x248] sm:$0xff] %v325_v9  ;;  %v329_v11 = vld [vmem:[%s11506_s26 + $0x498] sm:$0xff]  ;;  %v331_v12 = vld [vmem:[%s11506_s26 + $0x4c0] sm:$0xff] }
  0x37   : > { %328 = vst [vmem:[%s11511_s27 + $0x250] sm:$0xff] %v327_v10  ;;  %v333_v13 = vld [vmem:[%s11506_s26 + $0x4c8] sm:$0xff]  ;;  %330 = vst [vmem:[%s11511_s27 + $0x258] sm:$0xff] %v329_v11  ;;  %v335_v14 = vld [vmem:[%s11506_s26 + $0x4d0] sm:$0xff] }
  0x38   : > { %332 = vst [vmem:[%s11511_s27 + $0x260] sm:$0xff] %v331_v12  ;;  %334 = vst [vmem:[%s11511_s27 + $0x268] sm:$0xff] %v333_v13  ;;  %v337_v15 = vld [vmem:[%s11506_s26 + $0x4d8] sm:$0xff]  ;;  %v339_v16 = vld [vmem:[%s11506_s26 + $0x500] sm:$0xff] }
  0x39   : > { %336 = vst [vmem:[%s11511_s27 + $0x270] sm:$0xff] %v335_v14  ;;  %338 = vst [vmem:[%s11511_s27 + $0x278] sm:$0xff] %v337_v15  ;;  %v341_v17 = vld [vmem:[%s11506_s26 + $0x508] sm:$0xff]  ;;  %v343_v18 = vld [vmem:[%s11506_s26 + $0x510] sm:$0xff] }
  0x3a   : > { %340 = vst [vmem:[%s11511_s27 + $0x280] sm:$0xff] %v339_v16  ;;  %v345_v19 = vld [vmem:[%s11506_s26 + $0x518] sm:$0xff]  ;;  %342 = vst [vmem:[%s11511_s27 + $0x288] sm:$0xff] %v341_v17  ;;  %v347_v20 = vld [vmem:[%s11506_s26 + $0x540] sm:$0xff] }
  0x3b   : > { %344 = vst [vmem:[%s11511_s27 + $0x290] sm:$0xff] %v343_v18  ;;  %346 = vst [vmem:[%s11511_s27 + $0x298] sm:$0xff] %v345_v19  ;;  %v349_v21 = vld [vmem:[%s11506_s26 + $0x548] sm:$0xff]  ;;  %v351_v22 = vld [vmem:[%s11506_s26 + $0x550] sm:$0xff] }
  0x3c   : > { %348 = vst [vmem:[%s11511_s27 + $0x2a0] sm:$0xff] %v347_v20  ;;  %350 = vst [vmem:[%s11511_s27 + $0x2a8] sm:$0xff] %v349_v21  ;;  %v353_v23 = vld [vmem:[%s11506_s26 + $0x558] sm:$0xff]  ;;  %v355_v24 = vld [vmem:[%s11506_s26 + $0x580] sm:$0xff] }
  0x3d   : > { %352 = vst [vmem:[%s11511_s27 + $0x2b0] sm:$0xff] %v351_v22  ;;  %v357_v25 = vld [vmem:[%s11506_s26 + $0x588] sm:$0xff]  ;;  %354 = vst [vmem:[%s11511_s27 + $0x2b8] sm:$0xff] %v353_v23  ;;  %v359_v26 = vld [vmem:[%s11506_s26 + $0x590] sm:$0xff] }
  0x3e   : > { %356 = vst [vmem:[%s11511_s27 + $0x2c0] sm:$0xff] %v355_v24  ;;  %358 = vst [vmem:[%s11511_s27 + $0x2c8] sm:$0xff] %v357_v25  ;;  %v361_v27 = vld [vmem:[%s11506_s26 + $0x598] sm:$0xff]  ;;  %v363_v28 = vld [vmem:[%s11506_s26 + $0x5c0] sm:$0xff] }
  0x3f   : > { %360 = vst [vmem:[%s11511_s27 + $0x2d0] sm:$0xff] %v359_v26  ;;  %362 = vst [vmem:[%s11511_s27 + $0x2d8] sm:$0xff] %v361_v27  ;;  %v365_v29 = vld [vmem:[%s11506_s26 + $0x5c8] sm:$0xff]  ;;  %v367_v30 = vld [vmem:[%s11506_s26 + $0x5d0] sm:$0xff] }
  0x40   : > { %364 = vst [vmem:[%s11511_s27 + $0x2e0] sm:$0xff] %v363_v28  ;;  %v369_v31 = vld [vmem:[%s11506_s26 + $0x5d8] sm:$0xff]  ;;  %366 = vst [vmem:[%s11511_s27 + $0x2e8] sm:$0xff] %v365_v29  ;;  %v371_v32 = vld [vmem:[%s11506_s26 + $0x600] sm:$0xff] }
  0x41   : > { %368 = vst [vmem:[%s11511_s27 + $0x2f0] sm:$0xff] %v367_v30  ;;  %370 = vst [vmem:[%s11511_s27 + $0x2f8] sm:$0xff] %v369_v31  ;;  %v373_v33 = vld [vmem:[%s11506_s26 + $0x608] sm:$0xff]  ;;  %v375_v34 = vld [vmem:[%s11506_s26 + $0x610] sm:$0xff] }
  0x42   : > { %372 = vst [vmem:[%s11511_s27 + $0x300] sm:$0xff] %v371_v32  ;;  %374 = vst [vmem:[%s11511_s27 + $0x308] sm:$0xff] %v373_v33  ;;  %v377_v35 = vld [vmem:[%s11506_s26 + $0x618] sm:$0xff]  ;;  %v379_v36 = vld [vmem:[%s11506_s26 + $0x640] sm:$0xff] }
  0x43   : > { %376 = vst [vmem:[%s11511_s27 + $0x310] sm:$0xff] %v375_v34  ;;  %v381_v37 = vld [vmem:[%s11506_s26 + $0x648] sm:$0xff]  ;;  %378 = vst [vmem:[%s11511_s27 + $0x318] sm:$0xff] %v377_v35  ;;  %v383_v38 = vld [vmem:[%s11506_s26 + $0x650] sm:$0xff] }
  0x44   : > { %380 = vst [vmem:[%s11511_s27 + $0x320] sm:$0xff] %v379_v36  ;;  %382 = vst [vmem:[%s11511_s27 + $0x328] sm:$0xff] %v381_v37  ;;  %v385_v39 = vld [vmem:[%s11506_s26 + $0x658] sm:$0xff]  ;;  %v387_v40 = vld [vmem:[%s11506_s26 + $0x680] sm:$0xff] }
  0x45   : > { %384 = vst [vmem:[%s11511_s27 + $0x330] sm:$0xff] %v383_v38  ;;  %386 = vst [vmem:[%s11511_s27 + $0x338] sm:$0xff] %v385_v39  ;;  %v389_v41 = vld [vmem:[%s11506_s26 + $0x688] sm:$0xff]  ;;  %v391_v42 = vld [vmem:[%s11506_s26 + $0x690] sm:$0xff] }
  0x46   : > { %388 = vst [vmem:[%s11511_s27 + $0x340] sm:$0xff] %v387_v40  ;;  %v393_v43 = vld [vmem:[%s11506_s26 + $0x698] sm:$0xff]  ;;  %390 = vst [vmem:[%s11511_s27 + $0x348] sm:$0xff] %v389_v41  ;;  %v395_v44 = vld [vmem:[%s11506_s26 + $0x6c0] sm:$0xff] }
  0x47   : > { %392 = vst [vmem:[%s11511_s27 + $0x350] sm:$0xff] %v391_v42  ;;  %394 = vst [vmem:[%s11511_s27 + $0x358] sm:$0xff] %v393_v43  ;;  %v397_v45 = vld [vmem:[%s11506_s26 + $0x6c8] sm:$0xff]  ;;  %v399_v46 = vld [vmem:[%s11506_s26 + $0x6d0] sm:$0xff] }
  0x48   : > { %396 = vst [vmem:[%s11511_s27 + $0x360] sm:$0xff] %v395_v44  ;;  %398 = vst [vmem:[%s11511_s27 + $0x368] sm:$0xff] %v397_v45  ;;  %v401_v47 = vld [vmem:[%s11506_s26 + $0x6d8] sm:$0xff]  ;;  %v403_v48 = vld [vmem:[%s11506_s26 + $0x700] sm:$0xff] }
  0x49   : > { %400 = vst [vmem:[%s11511_s27 + $0x370] sm:$0xff] %v399_v46  ;;  %v405_v49 = vld [vmem:[%s11506_s26 + $0x708] sm:$0xff]  ;;  %402 = vst [vmem:[%s11511_s27 + $0x378] sm:$0xff] %v401_v47  ;;  %v407_v50 = vld [vmem:[%s11506_s26 + $0x710] sm:$0xff] }
  0x4a   : > { %404 = vst [vmem:[%s11511_s27 + $0x380] sm:$0xff] %v403_v48  ;;  %406 = vst [vmem:[%s11511_s27 + $0x388] sm:$0xff] %v405_v49  ;;  %v409_v51 = vld [vmem:[%s11506_s26 + $0x718] sm:$0xff]  ;;  %v411_v52 = vld [vmem:[%s11506_s26 + $0x740] sm:$0xff] }
  0x4b   : > { %408 = vst [vmem:[%s11511_s27 + $0x390] sm:$0xff] %v407_v50  ;;  %410 = vst [vmem:[%s11511_s27 + $0x398] sm:$0xff] %v409_v51  ;;  %v413_v53 = vld [vmem:[%s11506_s26 + $0x748] sm:$0xff]  ;;  %v415_v54 = vld [vmem:[%s11506_s26 + $0x750] sm:$0xff] }
  0x4c   : > { %412 = vst [vmem:[%s11511_s27 + $0x3a0] sm:$0xff] %v411_v52  ;;  %v417_v55 = vld [vmem:[%s11506_s26 + $0x758] sm:$0xff]  ;;  %414 = vst [vmem:[%s11511_s27 + $0x3a8] sm:$0xff] %v413_v53  ;;  %v419_v56 = vld [vmem:[%s11506_s26 + $0x780] sm:$0xff] }
  0x4d   : > { %416 = vst [vmem:[%s11511_s27 + $0x3b0] sm:$0xff] %v415_v54  ;;  %418 = vst [vmem:[%s11511_s27 + $0x3b8] sm:$0xff] %v417_v55  ;;  %v421_v57 = vld [vmem:[%s11506_s26 + $0x788] sm:$0xff]  ;;  %v423_v58 = vld [vmem:[%s11506_s26 + $0x790] sm:$0xff] }
  0x4e   : > { %420 = vst [vmem:[%s11511_s27 + $0x3c0] sm:$0xff] %v419_v56  ;;  %422 = vst [vmem:[%s11511_s27 + $0x3c8] sm:$0xff] %v421_v57  ;;  %v425_v59 = vld [vmem:[%s11506_s26 + $0x798] sm:$0xff]  ;;  %v427_v60 = vld [vmem:[%s11506_s26 + $0x7c0] sm:$0xff] }
  0x4f   : > { %424 = vst [vmem:[%s11511_s27 + $0x3d0] sm:$0xff] %v423_v58  ;;  %v429_v61 = vld [vmem:[%s11506_s26 + $0x7c8] sm:$0xff]  ;;  %426 = vst [vmem:[%s11511_s27 + $0x3d8] sm:$0xff] %v425_v59  ;;  %v431_v62 = vld [vmem:[%s11506_s26 + $0x7d0] sm:$0xff] }
  0x50   : > { %428 = vst [vmem:[%s11511_s27 + $0x3e0] sm:$0xff] %v427_v60  ;;  %430 = vst [vmem:[%s11511_s27 + $0x3e8] sm:$0xff] %v429_v61  ;;  %v433_v63 = vld [vmem:[%s11506_s26 + $0x7d8] sm:$0xff]  ;;  %v435_v0 = vld [vmem:[%s11506_s26 + $0x800] sm:$0xff] }
  0x51   : > { %432 = vst [vmem:[%s11511_s27 + $0x3f0] sm:$0xff] %v431_v62  ;;  %434 = vst [vmem:[%s11511_s27 + $0x3f8] sm:$0xff] %v433_v63  ;;  %v437_v1 = vld [vmem:[%s11506_s26 + $0x808] sm:$0xff]  ;;  %v439_v2 = vld [vmem:[%s11506_s26 + $0x810] sm:$0xff] }
  0x52   : > { %436 = vst [vmem:[%s11511_s27 + $0x400] sm:$0xff] %v435_v0  ;;  %v441_v3 = vld [vmem:[%s11506_s26 + $0x818] sm:$0xff]  ;;  %438 = vst [vmem:[%s11511_s27 + $0x408] sm:$0xff] %v437_v1  ;;  %v443_v4 = vld [vmem:[%s11506_s26 + $0x840] sm:$0xff] }
  0x53   : > { %440 = vst [vmem:[%s11511_s27 + $0x410] sm:$0xff] %v439_v2  ;;  %442 = vst [vmem:[%s11511_s27 + $0x418] sm:$0xff] %v441_v3  ;;  %v445_v5 = vld [vmem:[%s11506_s26 + $0x848] sm:$0xff]  ;;  %v447_v6 = vld [vmem:[%s11506_s26 + $0x850] sm:$0xff] }
  0x54   : > { %444 = vst [vmem:[%s11511_s27 + $0x420] sm:$0xff] %v443_v4  ;;  %446 = vst [vmem:[%s11511_s27 + $0x428] sm:$0xff] %v445_v5  ;;  %v449_v7 = vld [vmem:[%s11506_s26 + $0x858] sm:$0xff]  ;;  %v451_v8 = vld [vmem:[%s11506_s26 + $0x880] sm:$0xff] }
  0x55   : > { %448 = vst [vmem:[%s11511_s27 + $0x430] sm:$0xff] %v447_v6  ;;  %v453_v9 = vld [vmem:[%s11506_s26 + $0x888] sm:$0xff]  ;;  %450 = vst [vmem:[%s11511_s27 + $0x438] sm:$0xff] %v449_v7  ;;  %v455_v10 = vld [vmem:[%s11506_s26 + $0x890] sm:$0xff] }
  0x56   : > { %452 = vst [vmem:[%s11511_s27 + $0x440] sm:$0xff] %v451_v8  ;;  %454 = vst [vmem:[%s11511_s27 + $0x448] sm:$0xff] %v453_v9  ;;  %v457_v11 = vld [vmem:[%s11506_s26 + $0x898] sm:$0xff]  ;;  %v459_v12 = vld [vmem:[%s11506_s26 + $0x8c0] sm:$0xff] }
  0x57   : > { %456 = vst [vmem:[%s11511_s27 + $0x450] sm:$0xff] %v455_v10  ;;  %458 = vst [vmem:[%s11511_s27 + $0x458] sm:$0xff] %v457_v11  ;;  %v461_v13 = vld [vmem:[%s11506_s26 + $0x8c8] sm:$0xff]  ;;  %v463_v14 = vld [vmem:[%s11506_s26 + $0x8d0] sm:$0xff] }
  0x58   : > { %460 = vst [vmem:[%s11511_s27 + $0x460] sm:$0xff] %v459_v12  ;;  %v465_v15 = vld [vmem:[%s11506_s26 + $0x8d8] sm:$0xff]  ;;  %462 = vst [vmem:[%s11511_s27 + $0x468] sm:$0xff] %v461_v13  ;;  %v467_v16 = vld [vmem:[%s11506_s26 + $0x900] sm:$0xff] }
  0x59   : > { %464 = vst [vmem:[%s11511_s27 + $0x470] sm:$0xff] %v463_v14  ;;  %466 = vst [vmem:[%s11511_s27 + $0x478] sm:$0xff] %v465_v15  ;;  %v469_v17 = vld [vmem:[%s11506_s26 + $0x908] sm:$0xff]  ;;  %v471_v18 = vld [vmem:[%s11506_s26 + $0x910] sm:$0xff] }
  0x5a   : > { %468 = vst [vmem:[%s11511_s27 + $0x480] sm:$0xff] %v467_v16  ;;  %470 = vst [vmem:[%s11511_s27 + $0x488] sm:$0xff] %v469_v17  ;;  %v473_v19 = vld [vmem:[%s11506_s26 + $0x918] sm:$0xff]  ;;  %v475_v20 = vld [vmem:[%s11506_s26 + $0x940] sm:$0xff] }
  0x5b   : > { %472 = vst [vmem:[%s11511_s27 + $0x490] sm:$0xff] %v471_v18  ;;  %v477_v21 = vld [vmem:[%s11506_s26 + $0x948] sm:$0xff]  ;;  %474 = vst [vmem:[%s11511_s27 + $0x498] sm:$0xff] %v473_v19  ;;  %v479_v22 = vld [vmem:[%s11506_s26 + $0x950] sm:$0xff] }
  0x5c   : > { %476 = vst [vmem:[%s11511_s27 + $0x4a0] sm:$0xff] %v475_v20  ;;  %478 = vst [vmem:[%s11511_s27 + $0x4a8] sm:$0xff] %v477_v21  ;;  %v481_v23 = vld [vmem:[%s11506_s26 + $0x958] sm:$0xff]  ;;  %v483_v24 = vld [vmem:[%s11506_s26 + $0x980] sm:$0xff] }
  0x5d   : > { %480 = vst [vmem:[%s11511_s27 + $0x4b0] sm:$0xff] %v479_v22  ;;  %482 = vst [vmem:[%s11511_s27 + $0x4b8] sm:$0xff] %v481_v23  ;;  %v485_v25 = vld [vmem:[%s11506_s26 + $0x988] sm:$0xff]  ;;  %v487_v26 = vld [vmem:[%s11506_s26 + $0x990] sm:$0xff] }
  0x5e   : > { %484 = vst [vmem:[%s11511_s27 + $0x4c0] sm:$0xff] %v483_v24  ;;  %v489_v27 = vld [vmem:[%s11506_s26 + $0x998] sm:$0xff]  ;;  %486 = vst [vmem:[%s11511_s27 + $0x4c8] sm:$0xff] %v485_v25  ;;  %v491_v28 = vld [vmem:[%s11506_s26 + $0x9c0] sm:$0xff] }
  0x5f   : > { %488 = vst [vmem:[%s11511_s27 + $0x4d0] sm:$0xff] %v487_v26  ;;  %490 = vst [vmem:[%s11511_s27 + $0x4d8] sm:$0xff] %v489_v27  ;;  %v493_v29 = vld [vmem:[%s11506_s26 + $0x9c8] sm:$0xff]  ;;  %v495_v30 = vld [vmem:[%s11506_s26 + $0x9d0] sm:$0xff] }
  0x60   : > { %492 = vst [vmem:[%s11511_s27 + $0x4e0] sm:$0xff] %v491_v28  ;;  %494 = vst [vmem:[%s11511_s27 + $0x4e8] sm:$0xff] %v493_v29  ;;  %v497_v31 = vld [vmem:[%s11506_s26 + $0x9d8] sm:$0xff]  ;;  %v499_v32 = vld [vmem:[%s11506_s26 + $0xa00] sm:$0xff] }
  0x61   : > { %496 = vst [vmem:[%s11511_s27 + $0x4f0] sm:$0xff] %v495_v30  ;;  %v501_v33 = vld [vmem:[%s11506_s26 + $0xa08] sm:$0xff]  ;;  %498 = vst [vmem:[%s11511_s27 + $0x4f8] sm:$0xff] %v497_v31  ;;  %v503_v34 = vld [vmem:[%s11506_s26 + $0xa10] sm:$0xff] }
  0x62   : > { %500 = vst [vmem:[%s11511_s27 + $0x500] sm:$0xff] %v499_v32  ;;  %502 = vst [vmem:[%s11511_s27 + $0x508] sm:$0xff] %v501_v33  ;;  %v505_v35 = vld [vmem:[%s11506_s26 + $0xa18] sm:$0xff]  ;;  %v507_v36 = vld [vmem:[%s11506_s26 + $0xa40] sm:$0xff] }
  0x63   : > { %504 = vst [vmem:[%s11511_s27 + $0x510] sm:$0xff] %v503_v34  ;;  %506 = vst [vmem:[%s11511_s27 + $0x518] sm:$0xff] %v505_v35  ;;  %v509_v37 = vld [vmem:[%s11506_s26 + $0xa48] sm:$0xff]  ;;  %v511_v38 = vld [vmem:[%s11506_s26 + $0xa50] sm:$0xff] }
  0x64   : > { %508 = vst [vmem:[%s11511_s27 + $0x520] sm:$0xff] %v507_v36  ;;  %v513_v39 = vld [vmem:[%s11506_s26 + $0xa58] sm:$0xff]  ;;  %510 = vst [vmem:[%s11511_s27 + $0x528] sm:$0xff] %v509_v37  ;;  %v515_v40 = vld [vmem:[%s11506_s26 + $0xa80] sm:$0xff] }
  0x65   : > { %512 = vst [vmem:[%s11511_s27 + $0x530] sm:$0xff] %v511_v38  ;;  %514 = vst [vmem:[%s11511_s27 + $0x538] sm:$0xff] %v513_v39  ;;  %v517_v41 = vld [vmem:[%s11506_s26 + $0xa88] sm:$0xff]  ;;  %v519_v42 = vld [vmem:[%s11506_s26 + $0xa90] sm:$0xff] }
  0x66   : > { %516 = vst [vmem:[%s11511_s27 + $0x540] sm:$0xff] %v515_v40  ;;  %518 = vst [vmem:[%s11511_s27 + $0x548] sm:$0xff] %v517_v41  ;;  %v521_v43 = vld [vmem:[%s11506_s26 + $0xa98] sm:$0xff]  ;;  %v523_v44 = vld [vmem:[%s11506_s26 + $0xac0] sm:$0xff] }
  0x67   : > { %520 = vst [vmem:[%s11511_s27 + $0x550] sm:$0xff] %v519_v42  ;;  %v525_v45 = vld [vmem:[%s11506_s26 + $0xac8] sm:$0xff]  ;;  %522 = vst [vmem:[%s11511_s27 + $0x558] sm:$0xff] %v521_v43  ;;  %v527_v46 = vld [vmem:[%s11506_s26 + $0xad0] sm:$0xff] }
  0x68   : > { %524 = vst [vmem:[%s11511_s27 + $0x560] sm:$0xff] %v523_v44  ;;  %526 = vst [vmem:[%s11511_s27 + $0x568] sm:$0xff] %v525_v45  ;;  %v529_v47 = vld [vmem:[%s11506_s26 + $0xad8] sm:$0xff]  ;;  %v531_v48 = vld [vmem:[%s11506_s26 + $0xb00] sm:$0xff] }
  0x69   : > { %528 = vst [vmem:[%s11511_s27 + $0x570] sm:$0xff] %v527_v46  ;;  %530 = vst [vmem:[%s11511_s27 + $0x578] sm:$0xff] %v529_v47  ;;  %v533_v49 = vld [vmem:[%s11506_s26 + $0xb08] sm:$0xff]  ;;  %v535_v50 = vld [vmem:[%s11506_s26 + $0xb10] sm:$0xff] }
  0x6a   : > { %532 = vst [vmem:[%s11511_s27 + $0x580] sm:$0xff] %v531_v48  ;;  %v537_v51 = vld [vmem:[%s11506_s26 + $0xb18] sm:$0xff]  ;;  %534 = vst [vmem:[%s11511_s27 + $0x588] sm:$0xff] %v533_v49  ;;  %v539_v52 = vld [vmem:[%s11506_s26 + $0xb40] sm:$0xff] }
  0x6b   : > { %536 = vst [vmem:[%s11511_s27 + $0x590] sm:$0xff] %v535_v50  ;;  %538 = vst [vmem:[%s11511_s27 + $0x598] sm:$0xff] %v537_v51  ;;  %v541_v53 = vld [vmem:[%s11506_s26 + $0xb48] sm:$0xff]  ;;  %v543_v54 = vld [vmem:[%s11506_s26 + $0xb50] sm:$0xff] }
  0x6c   : > { %540 = vst [vmem:[%s11511_s27 + $0x5a0] sm:$0xff] %v539_v52  ;;  %542 = vst [vmem:[%s11511_s27 + $0x5a8] sm:$0xff] %v541_v53  ;;  %v545_v55 = vld [vmem:[%s11506_s26 + $0xb58] sm:$0xff]  ;;  %v547_v56 = vld [vmem:[%s11506_s26 + $0xb80] sm:$0xff] }
  0x6d   : > { %544 = vst [vmem:[%s11511_s27 + $0x5b0] sm:$0xff] %v543_v54  ;;  %v549_v57 = vld [vmem:[%s11506_s26 + $0xb88] sm:$0xff]  ;;  %546 = vst [vmem:[%s11511_s27 + $0x5b8] sm:$0xff] %v545_v55  ;;  %v551_v58 = vld [vmem:[%s11506_s26 + $0xb90] sm:$0xff] }
  0x6e   : > { %548 = vst [vmem:[%s11511_s27 + $0x5c0] sm:$0xff] %v547_v56  ;;  %550 = vst [vmem:[%s11511_s27 + $0x5c8] sm:$0xff] %v549_v57  ;;  %v553_v59 = vld [vmem:[%s11506_s26 + $0xb98] sm:$0xff]  ;;  %v555_v60 = vld [vmem:[%s11506_s26 + $0xbc0] sm:$0xff] }
  0x6f   : > { %552 = vst [vmem:[%s11511_s27 + $0x5d0] sm:$0xff] %v551_v58  ;;  %554 = vst [vmem:[%s11511_s27 + $0x5d8] sm:$0xff] %v553_v59  ;;  %v557_v61 = vld [vmem:[%s11506_s26 + $0xbc8] sm:$0xff]  ;;  %v559_v62 = vld [vmem:[%s11506_s26 + $0xbd0] sm:$0xff] }
  0x70   : > { %556 = vst [vmem:[%s11511_s27 + $0x5e0] sm:$0xff] %v555_v60  ;;  %v561_v63 = vld [vmem:[%s11506_s26 + $0xbd8] sm:$0xff]  ;;  %558 = vst [vmem:[%s11511_s27 + $0x5e8] sm:$0xff] %v557_v61  ;;  %v563_v0 = vld [vmem:[%s11506_s26 + $0xc00] sm:$0xff] }
  0x71   : > { %560 = vst [vmem:[%s11511_s27 + $0x5f0] sm:$0xff] %v559_v62  ;;  %562 = vst [vmem:[%s11511_s27 + $0x5f8] sm:$0xff] %v561_v63  ;;  %v565_v1 = vld [vmem:[%s11506_s26 + $0xc08] sm:$0xff]  ;;  %v567_v2 = vld [vmem:[%s11506_s26 + $0xc10] sm:$0xff] }
  0x72   : > { %564 = vst [vmem:[%s11511_s27 + $0x600] sm:$0xff] %v563_v0  ;;  %566 = vst [vmem:[%s11511_s27 + $0x608] sm:$0xff] %v565_v1  ;;  %v569_v3 = vld [vmem:[%s11506_s26 + $0xc18] sm:$0xff]  ;;  %v571_v4 = vld [vmem:[%s11506_s26 + $0xc40] sm:$0xff] }
  0x73   : > { %568 = vst [vmem:[%s11511_s27 + $0x610] sm:$0xff] %v567_v2  ;;  %v573_v5 = vld [vmem:[%s11506_s26 + $0xc48] sm:$0xff]  ;;  %570 = vst [vmem:[%s11511_s27 + $0x618] sm:$0xff] %v569_v3  ;;  %v575_v6 = vld [vmem:[%s11506_s26 + $0xc50] sm:$0xff] }
  0x74   : > { %572 = vst [vmem:[%s11511_s27 + $0x620] sm:$0xff] %v571_v4  ;;  %574 = vst [vmem:[%s11511_s27 + $0x628] sm:$0xff] %v573_v5  ;;  %v577_v7 = vld [vmem:[%s11506_s26 + $0xc58] sm:$0xff]  ;;  %v579_v8 = vld [vmem:[%s11506_s26 + $0xc80] sm:$0xff] }
  0x75   : > { %576 = vst [vmem:[%s11511_s27 + $0x630] sm:$0xff] %v575_v6  ;;  %578 = vst [vmem:[%s11511_s27 + $0x638] sm:$0xff] %v577_v7  ;;  %v581_v9 = vld [vmem:[%s11506_s26 + $0xc88] sm:$0xff]  ;;  %v583_v10 = vld [vmem:[%s11506_s26 + $0xc90] sm:$0xff] }
  0x76   : > { %580 = vst [vmem:[%s11511_s27 + $0x640] sm:$0xff] %v579_v8  ;;  %v585_v11 = vld [vmem:[%s11506_s26 + $0xc98] sm:$0xff]  ;;  %582 = vst [vmem:[%s11511_s27 + $0x648] sm:$0xff] %v581_v9  ;;  %v587_v12 = vld [vmem:[%s11506_s26 + $0xcc0] sm:$0xff] }
  0x77   : > { %584 = vst [vmem:[%s11511_s27 + $0x650] sm:$0xff] %v583_v10  ;;  %586 = vst [vmem:[%s11511_s27 + $0x658] sm:$0xff] %v585_v11  ;;  %v589_v13 = vld [vmem:[%s11506_s26 + $0xcc8] sm:$0xff]  ;;  %v591_v14 = vld [vmem:[%s11506_s26 + $0xcd0] sm:$0xff] }
  0x78   : > { %588 = vst [vmem:[%s11511_s27 + $0x660] sm:$0xff] %v587_v12  ;;  %590 = vst [vmem:[%s11511_s27 + $0x668] sm:$0xff] %v589_v13  ;;  %v593_v15 = vld [vmem:[%s11506_s26 + $0xcd8] sm:$0xff]  ;;  %v595_v16 = vld [vmem:[%s11506_s26 + $0xd00] sm:$0xff] }
  0x79   : > { %592 = vst [vmem:[%s11511_s27 + $0x670] sm:$0xff] %v591_v14  ;;  %v597_v17 = vld [vmem:[%s11506_s26 + $0xd08] sm:$0xff]  ;;  %594 = vst [vmem:[%s11511_s27 + $0x678] sm:$0xff] %v593_v15  ;;  %v599_v18 = vld [vmem:[%s11506_s26 + $0xd10] sm:$0xff] }
  0x7a   : > { %596 = vst [vmem:[%s11511_s27 + $0x680] sm:$0xff] %v595_v16  ;;  %598 = vst [vmem:[%s11511_s27 + $0x688] sm:$0xff] %v597_v17  ;;  %v601_v19 = vld [vmem:[%s11506_s26 + $0xd18] sm:$0xff]  ;;  %v603_v20 = vld [vmem:[%s11506_s26 + $0xd40] sm:$0xff] }
  0x7b   : > { %600 = vst [vmem:[%s11511_s27 + $0x690] sm:$0xff] %v599_v18  ;;  %602 = vst [vmem:[%s11511_s27 + $0x698] sm:$0xff] %v601_v19  ;;  %v605_v21 = vld [vmem:[%s11506_s26 + $0xd48] sm:$0xff]  ;;  %v607_v22 = vld [vmem:[%s11506_s26 + $0xd50] sm:$0xff] }
  0x7c   : > { %604 = vst [vmem:[%s11511_s27 + $0x6a0] sm:$0xff] %v603_v20  ;;  %v609_v23 = vld [vmem:[%s11506_s26 + $0xd58] sm:$0xff]  ;;  %606 = vst [vmem:[%s11511_s27 + $0x6a8] sm:$0xff] %v605_v21  ;;  %v611_v24 = vld [vmem:[%s11506_s26 + $0xd80] sm:$0xff] }
  0x7d   : > { %608 = vst [vmem:[%s11511_s27 + $0x6b0] sm:$0xff] %v607_v22  ;;  %610 = vst [vmem:[%s11511_s27 + $0x6b8] sm:$0xff] %v609_v23  ;;  %v613_v25 = vld [vmem:[%s11506_s26 + $0xd88] sm:$0xff]  ;;  %v615_v26 = vld [vmem:[%s11506_s26 + $0xd90] sm:$0xff] }
  0x7e   : > { %612 = vst [vmem:[%s11511_s27 + $0x6c0] sm:$0xff] %v611_v24  ;;  %614 = vst [vmem:[%s11511_s27 + $0x6c8] sm:$0xff] %v613_v25  ;;  %v617_v27 = vld [vmem:[%s11506_s26 + $0xd98] sm:$0xff]  ;;  %v619_v28 = vld [vmem:[%s11506_s26 + $0xdc0] sm:$0xff] }
  0x7f   : > { %616 = vst [vmem:[%s11511_s27 + $0x6d0] sm:$0xff] %v615_v26  ;;  %v621_v29 = vld [vmem:[%s11506_s26 + $0xdc8] sm:$0xff]  ;;  %618 = vst [vmem:[%s11511_s27 + $0x6d8] sm:$0xff] %v617_v27  ;;  %v623_v30 = vld [vmem:[%s11506_s26 + $0xdd0] sm:$0xff] }
  0x80   : > { %620 = vst [vmem:[%s11511_s27 + $0x6e0] sm:$0xff] %v619_v28  ;;  %622 = vst [vmem:[%s11511_s27 + $0x6e8] sm:$0xff] %v621_v29  ;;  %v625_v31 = vld [vmem:[%s11506_s26 + $0xdd8] sm:$0xff]  ;;  %v627_v32 = vld [vmem:[%s11506_s26 + $0xe00] sm:$0xff] }
  0x81   : > { %624 = vst [vmem:[%s11511_s27 + $0x6f0] sm:$0xff] %v623_v30  ;;  %626 = vst [vmem:[%s11511_s27 + $0x6f8] sm:$0xff] %v625_v31  ;;  %v629_v33 = vld [vmem:[%s11506_s26 + $0xe08] sm:$0xff]  ;;  %v631_v34 = vld [vmem:[%s11506_s26 + $0xe10] sm:$0xff] }
  0x82   : > { %628 = vst [vmem:[%s11511_s27 + $0x700] sm:$0xff] %v627_v32  ;;  %v633_v35 = vld [vmem:[%s11506_s26 + $0xe18] sm:$0xff]  ;;  %630 = vst [vmem:[%s11511_s27 + $0x708] sm:$0xff] %v629_v33  ;;  %v635_v36 = vld [vmem:[%s11506_s26 + $0xe40] sm:$0xff] }
  0x83   : > { %632 = vst [vmem:[%s11511_s27 + $0x710] sm:$0xff] %v631_v34  ;;  %634 = vst [vmem:[%s11511_s27 + $0x718] sm:$0xff] %v633_v35  ;;  %v637_v37 = vld [vmem:[%s11506_s26 + $0xe48] sm:$0xff]  ;;  %v639_v38 = vld [vmem:[%s11506_s26 + $0xe50] sm:$0xff] }
  0x84   : > { %636 = vst [vmem:[%s11511_s27 + $0x720] sm:$0xff] %v635_v36  ;;  %638 = vst [vmem:[%s11511_s27 + $0x728] sm:$0xff] %v637_v37  ;;  %v641_v39 = vld [vmem:[%s11506_s26 + $0xe58] sm:$0xff]  ;;  %v643_v40 = vld [vmem:[%s11506_s26 + $0xe80] sm:$0xff] }
  0x85   : > { %640 = vst [vmem:[%s11511_s27 + $0x730] sm:$0xff] %v639_v38  ;;  %v645_v41 = vld [vmem:[%s11506_s26 + $0xe88] sm:$0xff]  ;;  %642 = vst [vmem:[%s11511_s27 + $0x738] sm:$0xff] %v641_v39  ;;  %v647_v42 = vld [vmem:[%s11506_s26 + $0xe90] sm:$0xff] }
  0x86   : > { %644 = vst [vmem:[%s11511_s27 + $0x740] sm:$0xff] %v643_v40  ;;  %646 = vst [vmem:[%s11511_s27 + $0x748] sm:$0xff] %v645_v41  ;;  %v649_v43 = vld [vmem:[%s11506_s26 + $0xe98] sm:$0xff]  ;;  %v651_v44 = vld [vmem:[%s11506_s26 + $0xec0] sm:$0xff] }
  0x87   : > { %648 = vst [vmem:[%s11511_s27 + $0x750] sm:$0xff] %v647_v42  ;;  %650 = vst [vmem:[%s11511_s27 + $0x758] sm:$0xff] %v649_v43  ;;  %v653_v45 = vld [vmem:[%s11506_s26 + $0xec8] sm:$0xff]  ;;  %v655_v46 = vld [vmem:[%s11506_s26 + $0xed0] sm:$0xff] }
  0x88   : > { %652 = vst [vmem:[%s11511_s27 + $0x760] sm:$0xff] %v651_v44  ;;  %v657_v47 = vld [vmem:[%s11506_s26 + $0xed8] sm:$0xff]  ;;  %654 = vst [vmem:[%s11511_s27 + $0x768] sm:$0xff] %v653_v45  ;;  %v659_v48 = vld [vmem:[%s11506_s26 + $0xf00] sm:$0xff] }
  0x89   : > { %656 = vst [vmem:[%s11511_s27 + $0x770] sm:$0xff] %v655_v46  ;;  %658 = vst [vmem:[%s11511_s27 + $0x778] sm:$0xff] %v657_v47  ;;  %v661_v49 = vld [vmem:[%s11506_s26 + $0xf08] sm:$0xff]  ;;  %v663_v50 = vld [vmem:[%s11506_s26 + $0xf10] sm:$0xff] }
  0x8a   : > { %660 = vst [vmem:[%s11511_s27 + $0x780] sm:$0xff] %v659_v48  ;;  %662 = vst [vmem:[%s11511_s27 + $0x788] sm:$0xff] %v661_v49  ;;  %v665_v51 = vld [vmem:[%s11506_s26 + $0xf18] sm:$0xff]  ;;  %v667_v52 = vld [vmem:[%s11506_s26 + $0xf40] sm:$0xff] }
  0x8b   : > { %664 = vst [vmem:[%s11511_s27 + $0x790] sm:$0xff] %v663_v50  ;;  %v669_v53 = vld [vmem:[%s11506_s26 + $0xf48] sm:$0xff]  ;;  %666 = vst [vmem:[%s11511_s27 + $0x798] sm:$0xff] %v665_v51  ;;  %v671_v54 = vld [vmem:[%s11506_s26 + $0xf50] sm:$0xff] }
  0x8c   : > { %668 = vst [vmem:[%s11511_s27 + $0x7a0] sm:$0xff] %v667_v52  ;;  %670 = vst [vmem:[%s11511_s27 + $0x7a8] sm:$0xff] %v669_v53  ;;  %v673_v55 = vld [vmem:[%s11506_s26 + $0xf58] sm:$0xff]  ;;  %v675_v56 = vld [vmem:[%s11506_s26 + $0xf80] sm:$0xff] }
  0x8d   : > { %672 = vst [vmem:[%s11511_s27 + $0x7b0] sm:$0xff] %v671_v54  ;;  %674 = vst [vmem:[%s11511_s27 + $0x7b8] sm:$0xff] %v673_v55  ;;  %v677_v57 = vld [vmem:[%s11506_s26 + $0xf88] sm:$0xff]  ;;  %v679_v58 = vld [vmem:[%s11506_s26 + $0xf90] sm:$0xff] }
  0x8e   : > { %676 = vst [vmem:[%s11511_s27 + $0x7c0] sm:$0xff] %v675_v56  ;;  %v681_v59 = vld [vmem:[%s11506_s26 + $0xf98] sm:$0xff]  ;;  %678 = vst [vmem:[%s11511_s27 + $0x7c8] sm:$0xff] %v677_v57  ;;  %v683_v60 = vld [vmem:[%s11506_s26 + $0xfc0] sm:$0xff] }
  0x8f   : > { %680 = vst [vmem:[%s11511_s27 + $0x7d0] sm:$0xff] %v679_v58  ;;  %682 = vst [vmem:[%s11511_s27 + $0x7d8] sm:$0xff] %v681_v59  ;;  %v685_v61 = vld [vmem:[%s11506_s26 + $0xfc8] sm:$0xff]  ;;  %v687_v62 = vld [vmem:[%s11506_s26 + $0xfd0] sm:$0xff] }
  0x90   : > { %684 = vst [vmem:[%s11511_s27 + $0x7e0] sm:$0xff] %v683_v60  ;;  %686 = vst [vmem:[%s11511_s27 + $0x7e8] sm:$0xff] %v685_v61  ;;  %v689_v63 = vld [vmem:[%s11506_s26 + $0xfd8] sm:$0xff]  ;;  %v691_v0 = vld [vmem:[%s11506_s26 + $0x1000] sm:$0xff] }
  0x91   : > { %688 = vst [vmem:[%s11511_s27 + $0x7f0] sm:$0xff] %v687_v62  ;;  %v693_v1 = vld [vmem:[%s11506_s26 + $0x1008] sm:$0xff]  ;;  %690 = vst [vmem:[%s11511_s27 + $0x7f8] sm:$0xff] %v689_v63  ;;  %v695_v2 = vld [vmem:[%s11506_s26 + $0x1010] sm:$0xff] }
  0x92   : > { %692 = vst [vmem:[%s11511_s27 + $0x800] sm:$0xff] %v691_v0  ;;  %694 = vst [vmem:[%s11511_s27 + $0x808] sm:$0xff] %v693_v1  ;;  %v697_v3 = vld [vmem:[%s11506_s26 + $0x1018] sm:$0xff]  ;;  %v699_v4 = vld [vmem:[%s11506_s26 + $0x1040] sm:$0xff] }
  0x93   : > { %696 = vst [vmem:[%s11511_s27 + $0x810] sm:$0xff] %v695_v2  ;;  %698 = vst [vmem:[%s11511_s27 + $0x818] sm:$0xff] %v697_v3  ;;  %v701_v5 = vld [vmem:[%s11506_s26 + $0x1048] sm:$0xff]  ;;  %v703_v6 = vld [vmem:[%s11506_s26 + $0x1050] sm:$0xff] }
  0x94   : > { %700 = vst [vmem:[%s11511_s27 + $0x820] sm:$0xff] %v699_v4  ;;  %v705_v7 = vld [vmem:[%s11506_s26 + $0x1058] sm:$0xff]  ;;  %702 = vst [vmem:[%s11511_s27 + $0x828] sm:$0xff] %v701_v5  ;;  %v707_v8 = vld [vmem:[%s11506_s26 + $0x1080] sm:$0xff] }
  0x95   : > { %704 = vst [vmem:[%s11511_s27 + $0x830] sm:$0xff] %v703_v6  ;;  %706 = vst [vmem:[%s11511_s27 + $0x838] sm:$0xff] %v705_v7  ;;  %v709_v9 = vld [vmem:[%s11506_s26 + $0x1088] sm:$0xff]  ;;  %v711_v10 = vld [vmem:[%s11506_s26 + $0x1090] sm:$0xff] }
  0x96   : > { %708 = vst [vmem:[%s11511_s27 + $0x840] sm:$0xff] %v707_v8  ;;  %710 = vst [vmem:[%s11511_s27 + $0x848] sm:$0xff] %v709_v9  ;;  %v713_v11 = vld [vmem:[%s11506_s26 + $0x1098] sm:$0xff]  ;;  %v715_v12 = vld [vmem:[%s11506_s26 + $0x10c0] sm:$0xff] }
  0x97   : > { %712 = vst [vmem:[%s11511_s27 + $0x850] sm:$0xff] %v711_v10  ;;  %v717_v13 = vld [vmem:[%s11506_s26 + $0x10c8] sm:$0xff]  ;;  %714 = vst [vmem:[%s11511_s27 + $0x858] sm:$0xff] %v713_v11  ;;  %v719_v14 = vld [vmem:[%s11506_s26 + $0x10d0] sm:$0xff] }
  0x98   : > { %716 = vst [vmem:[%s11511_s27 + $0x860] sm:$0xff] %v715_v12  ;;  %718 = vst [vmem:[%s11511_s27 + $0x868] sm:$0xff] %v717_v13  ;;  %v721_v15 = vld [vmem:[%s11506_s26 + $0x10d8] sm:$0xff]  ;;  %v723_v16 = vld [vmem:[%s11506_s26 + $0x1100] sm:$0xff] }
  0x99   : > { %720 = vst [vmem:[%s11511_s27 + $0x870] sm:$0xff] %v719_v14  ;;  %722 = vst [vmem:[%s11511_s27 + $0x878] sm:$0xff] %v721_v15  ;;  %v725_v17 = vld [vmem:[%s11506_s26 + $0x1108] sm:$0xff]  ;;  %v727_v18 = vld [vmem:[%s11506_s26 + $0x1110] sm:$0xff] }
  0x9a   : > { %724 = vst [vmem:[%s11511_s27 + $0x880] sm:$0xff] %v723_v16  ;;  %v729_v19 = vld [vmem:[%s11506_s26 + $0x1118] sm:$0xff]  ;;  %726 = vst [vmem:[%s11511_s27 + $0x888] sm:$0xff] %v725_v17  ;;  %v731_v20 = vld [vmem:[%s11506_s26 + $0x1140] sm:$0xff] }
  0x9b   : > { %728 = vst [vmem:[%s11511_s27 + $0x890] sm:$0xff] %v727_v18  ;;  %730 = vst [vmem:[%s11511_s27 + $0x898] sm:$0xff] %v729_v19  ;;  %v733_v21 = vld [vmem:[%s11506_s26 + $0x1148] sm:$0xff]  ;;  %v735_v22 = vld [vmem:[%s11506_s26 + $0x1150] sm:$0xff] }
  0x9c   : > { %732 = vst [vmem:[%s11511_s27 + $0x8a0] sm:$0xff] %v731_v20  ;;  %734 = vst [vmem:[%s11511_s27 + $0x8a8] sm:$0xff] %v733_v21  ;;  %v737_v23 = vld [vmem:[%s11506_s26 + $0x1158] sm:$0xff]  ;;  %v739_v24 = vld [vmem:[%s11506_s26 + $0x1180] sm:$0xff] }
  0x9d   : > { %736 = vst [vmem:[%s11511_s27 + $0x8b0] sm:$0xff] %v735_v22  ;;  %v741_v25 = vld [vmem:[%s11506_s26 + $0x1188] sm:$0xff]  ;;  %738 = vst [vmem:[%s11511_s27 + $0x8b8] sm:$0xff] %v737_v23  ;;  %v743_v26 = vld [vmem:[%s11506_s26 + $0x1190] sm:$0xff] }
  0x9e   : > { %740 = vst [vmem:[%s11511_s27 + $0x8c0] sm:$0xff] %v739_v24  ;;  %742 = vst [vmem:[%s11511_s27 + $0x8c8] sm:$0xff] %v741_v25  ;;  %v745_v27 = vld [vmem:[%s11506_s26 + $0x1198] sm:$0xff]  ;;  %v747_v28 = vld [vmem:[%s11506_s26 + $0x11c0] sm:$0xff] }
  0x9f   : > { %744 = vst [vmem:[%s11511_s27 + $0x8d0] sm:$0xff] %v743_v26  ;;  %746 = vst [vmem:[%s11511_s27 + $0x8d8] sm:$0xff] %v745_v27  ;;  %v749_v29 = vld [vmem:[%s11506_s26 + $0x11c8] sm:$0xff]  ;;  %v751_v30 = vld [vmem:[%s11506_s26 + $0x11d0] sm:$0xff] }
  0xa0   : > { %748 = vst [vmem:[%s11511_s27 + $0x8e0] sm:$0xff] %v747_v28  ;;  %v753_v31 = vld [vmem:[%s11506_s26 + $0x11d8] sm:$0xff]  ;;  %750 = vst [vmem:[%s11511_s27 + $0x8e8] sm:$0xff] %v749_v29  ;;  %v755_v32 = vld [vmem:[%s11506_s26 + $0x1200] sm:$0xff] }
  0xa1   : > { %752 = vst [vmem:[%s11511_s27 + $0x8f0] sm:$0xff] %v751_v30  ;;  %754 = vst [vmem:[%s11511_s27 + $0x8f8] sm:$0xff] %v753_v31  ;;  %v757_v33 = vld [vmem:[%s11506_s26 + $0x1208] sm:$0xff]  ;;  %v759_v34 = vld [vmem:[%s11506_s26 + $0x1210] sm:$0xff] }
  0xa2   : > { %756 = vst [vmem:[%s11511_s27 + $0x900] sm:$0xff] %v755_v32  ;;  %758 = vst [vmem:[%s11511_s27 + $0x908] sm:$0xff] %v757_v33  ;;  %v761_v35 = vld [vmem:[%s11506_s26 + $0x1218] sm:$0xff]  ;;  %v763_v36 = vld [vmem:[%s11506_s26 + $0x1240] sm:$0xff] }
  0xa3   : > { %760 = vst [vmem:[%s11511_s27 + $0x910] sm:$0xff] %v759_v34  ;;  %v765_v37 = vld [vmem:[%s11506_s26 + $0x1248] sm:$0xff]  ;;  %762 = vst [vmem:[%s11511_s27 + $0x918] sm:$0xff] %v761_v35  ;;  %v767_v38 = vld [vmem:[%s11506_s26 + $0x1250] sm:$0xff] }
  0xa4   : > { %764 = vst [vmem:[%s11511_s27 + $0x920] sm:$0xff] %v763_v36  ;;  %766 = vst [vmem:[%s11511_s27 + $0x928] sm:$0xff] %v765_v37  ;;  %v769_v39 = vld [vmem:[%s11506_s26 + $0x1258] sm:$0xff]  ;;  %v771_v40 = vld [vmem:[%s11506_s26 + $0x1280] sm:$0xff] }
  0xa5   : > { %768 = vst [vmem:[%s11511_s27 + $0x930] sm:$0xff] %v767_v38  ;;  %770 = vst [vmem:[%s11511_s27 + $0x938] sm:$0xff] %v769_v39  ;;  %v773_v41 = vld [vmem:[%s11506_s26 + $0x1288] sm:$0xff]  ;;  %v775_v42 = vld [vmem:[%s11506_s26 + $0x1290] sm:$0xff] }
  0xa6   : > { %772 = vst [vmem:[%s11511_s27 + $0x940] sm:$0xff] %v771_v40  ;;  %v777_v43 = vld [vmem:[%s11506_s26 + $0x1298] sm:$0xff]  ;;  %774 = vst [vmem:[%s11511_s27 + $0x948] sm:$0xff] %v773_v41  ;;  %v779_v44 = vld [vmem:[%s11506_s26 + $0x12c0] sm:$0xff] }
  0xa7   : > { %776 = vst [vmem:[%s11511_s27 + $0x950] sm:$0xff] %v775_v42  ;;  %778 = vst [vmem:[%s11511_s27 + $0x958] sm:$0xff] %v777_v43  ;;  %v781_v45 = vld [vmem:[%s11506_s26 + $0x12c8] sm:$0xff]  ;;  %v783_v46 = vld [vmem:[%s11506_s26 + $0x12d0] sm:$0xff] }
  0xa8   : > { %780 = vst [vmem:[%s11511_s27 + $0x960] sm:$0xff] %v779_v44  ;;  %782 = vst [vmem:[%s11511_s27 + $0x968] sm:$0xff] %v781_v45  ;;  %v785_v47 = vld [vmem:[%s11506_s26 + $0x12d8] sm:$0xff]  ;;  %v787_v48 = vld [vmem:[%s11506_s26 + $0x1300] sm:$0xff] }
  0xa9   : > { %784 = vst [vmem:[%s11511_s27 + $0x970] sm:$0xff] %v783_v46  ;;  %v789_v49 = vld [vmem:[%s11506_s26 + $0x1308] sm:$0xff]  ;;  %786 = vst [vmem:[%s11511_s27 + $0x978] sm:$0xff] %v785_v47  ;;  %v791_v50 = vld [vmem:[%s11506_s26 + $0x1310] sm:$0xff] }
  0xaa   : > { %788 = vst [vmem:[%s11511_s27 + $0x980] sm:$0xff] %v787_v48  ;;  %790 = vst [vmem:[%s11511_s27 + $0x988] sm:$0xff] %v789_v49  ;;  %v793_v51 = vld [vmem:[%s11506_s26 + $0x1318] sm:$0xff]  ;;  %v795_v52 = vld [vmem:[%s11506_s26 + $0x1340] sm:$0xff] }
  0xab   : > { %792 = vst [vmem:[%s11511_s27 + $0x990] sm:$0xff] %v791_v50  ;;  %794 = vst [vmem:[%s11511_s27 + $0x998] sm:$0xff] %v793_v51  ;;  %v797_v53 = vld [vmem:[%s11506_s26 + $0x1348] sm:$0xff]  ;;  %v799_v54 = vld [vmem:[%s11506_s26 + $0x1350] sm:$0xff] }
  0xac   : > { %796 = vst [vmem:[%s11511_s27 + $0x9a0] sm:$0xff] %v795_v52  ;;  %v801_v55 = vld [vmem:[%s11506_s26 + $0x1358] sm:$0xff]  ;;  %798 = vst [vmem:[%s11511_s27 + $0x9a8] sm:$0xff] %v797_v53  ;;  %v803_v56 = vld [vmem:[%s11506_s26 + $0x1380] sm:$0xff] }
  0xad   : > { %800 = vst [vmem:[%s11511_s27 + $0x9b0] sm:$0xff] %v799_v54  ;;  %802 = vst [vmem:[%s11511_s27 + $0x9b8] sm:$0xff] %v801_v55  ;;  %v805_v57 = vld [vmem:[%s11506_s26 + $0x1388] sm:$0xff]  ;;  %v807_v58 = vld [vmem:[%s11506_s26 + $0x1390] sm:$0xff] }
  0xae   : > { %804 = vst [vmem:[%s11511_s27 + $0x9c0] sm:$0xff] %v803_v56  ;;  %806 = vst [vmem:[%s11511_s27 + $0x9c8] sm:$0xff] %v805_v57  ;;  %v809_v59 = vld [vmem:[%s11506_s26 + $0x1398] sm:$0xff]  ;;  %v811_v60 = vld [vmem:[%s11506_s26 + $0x13c0] sm:$0xff] }
  0xaf   : > { %808 = vst [vmem:[%s11511_s27 + $0x9d0] sm:$0xff] %v807_v58  ;;  %v813_v61 = vld [vmem:[%s11506_s26 + $0x13c8] sm:$0xff]  ;;  %810 = vst [vmem:[%s11511_s27 + $0x9d8] sm:$0xff] %v809_v59  ;;  %v815_v62 = vld [vmem:[%s11506_s26 + $0x13d0] sm:$0xff] }
  0xb0   : > { %812 = vst [vmem:[%s11511_s27 + $0x9e0] sm:$0xff] %v811_v60  ;;  %814 = vst [vmem:[%s11511_s27 + $0x9e8] sm:$0xff] %v813_v61  ;;  %v817_v63 = vld [vmem:[%s11506_s26 + $0x13d8] sm:$0xff]  ;;  %v819_v0 = vld [vmem:[%s11506_s26 + $0x1400] sm:$0xff] }
  0xb1   : > { %816 = vst [vmem:[%s11511_s27 + $0x9f0] sm:$0xff] %v815_v62  ;;  %818 = vst [vmem:[%s11511_s27 + $0x9f8] sm:$0xff] %v817_v63  ;;  %v821_v1 = vld [vmem:[%s11506_s26 + $0x1408] sm:$0xff]  ;;  %v823_v2 = vld [vmem:[%s11506_s26 + $0x1410] sm:$0xff] }
  0xb2   : > { %820 = vst [vmem:[%s11511_s27 + $0xa00] sm:$0xff] %v819_v0  ;;  %v825_v3 = vld [vmem:[%s11506_s26 + $0x1418] sm:$0xff]  ;;  %822 = vst [vmem:[%s11511_s27 + $0xa08] sm:$0xff] %v821_v1  ;;  %v827_v4 = vld [vmem:[%s11506_s26 + $0x1440] sm:$0xff] }
  0xb3   : > { %824 = vst [vmem:[%s11511_s27 + $0xa10] sm:$0xff] %v823_v2  ;;  %826 = vst [vmem:[%s11511_s27 + $0xa18] sm:$0xff] %v825_v3  ;;  %v829_v5 = vld [vmem:[%s11506_s26 + $0x1448] sm:$0xff]  ;;  %v831_v6 = vld [vmem:[%s11506_s26 + $0x1450] sm:$0xff] }
  0xb4   : > { %828 = vst [vmem:[%s11511_s27 + $0xa20] sm:$0xff] %v827_v4  ;;  %830 = vst [vmem:[%s11511_s27 + $0xa28] sm:$0xff] %v829_v5  ;;  %v833_v7 = vld [vmem:[%s11506_s26 + $0x1458] sm:$0xff]  ;;  %v835_v8 = vld [vmem:[%s11506_s26 + $0x1480] sm:$0xff] }
  0xb5   : > { %832 = vst [vmem:[%s11511_s27 + $0xa30] sm:$0xff] %v831_v6  ;;  %v837_v9 = vld [vmem:[%s11506_s26 + $0x1488] sm:$0xff]  ;;  %834 = vst [vmem:[%s11511_s27 + $0xa38] sm:$0xff] %v833_v7  ;;  %v839_v10 = vld [vmem:[%s11506_s26 + $0x1490] sm:$0xff] }
  0xb6   : > { %836 = vst [vmem:[%s11511_s27 + $0xa40] sm:$0xff] %v835_v8  ;;  %838 = vst [vmem:[%s11511_s27 + $0xa48] sm:$0xff] %v837_v9  ;;  %v841_v11 = vld [vmem:[%s11506_s26 + $0x1498] sm:$0xff]  ;;  %v843_v12 = vld [vmem:[%s11506_s26 + $0x14c0] sm:$0xff] }
  0xb7   : > { %840 = vst [vmem:[%s11511_s27 + $0xa50] sm:$0xff] %v839_v10  ;;  %842 = vst [vmem:[%s11511_s27 + $0xa58] sm:$0xff] %v841_v11  ;;  %v845_v13 = vld [vmem:[%s11506_s26 + $0x14c8] sm:$0xff]  ;;  %v847_v14 = vld [vmem:[%s11506_s26 + $0x14d0] sm:$0xff] }
  0xb8   : > { %844 = vst [vmem:[%s11511_s27 + $0xa60] sm:$0xff] %v843_v12  ;;  %v849_v15 = vld [vmem:[%s11506_s26 + $0x14d8] sm:$0xff]  ;;  %846 = vst [vmem:[%s11511_s27 + $0xa68] sm:$0xff] %v845_v13  ;;  %v851_v16 = vld [vmem:[%s11506_s26 + $0x1500] sm:$0xff] }
  0xb9   : > { %848 = vst [vmem:[%s11511_s27 + $0xa70] sm:$0xff] %v847_v14  ;;  %850 = vst [vmem:[%s11511_s27 + $0xa78] sm:$0xff] %v849_v15  ;;  %v853_v17 = vld [vmem:[%s11506_s26 + $0x1508] sm:$0xff]  ;;  %v855_v18 = vld [vmem:[%s11506_s26 + $0x1510] sm:$0xff] }
  0xba   : > { %852 = vst [vmem:[%s11511_s27 + $0xa80] sm:$0xff] %v851_v16  ;;  %854 = vst [vmem:[%s11511_s27 + $0xa88] sm:$0xff] %v853_v17  ;;  %v857_v19 = vld [vmem:[%s11506_s26 + $0x1518] sm:$0xff]  ;;  %v859_v20 = vld [vmem:[%s11506_s26 + $0x1540] sm:$0xff] }
  0xbb   : > { %856 = vst [vmem:[%s11511_s27 + $0xa90] sm:$0xff] %v855_v18  ;;  %v861_v21 = vld [vmem:[%s11506_s26 + $0x1548] sm:$0xff]  ;;  %858 = vst [vmem:[%s11511_s27 + $0xa98] sm:$0xff] %v857_v19  ;;  %v863_v22 = vld [vmem:[%s11506_s26 + $0x1550] sm:$0xff] }
  0xbc   : > { %860 = vst [vmem:[%s11511_s27 + $0xaa0] sm:$0xff] %v859_v20  ;;  %862 = vst [vmem:[%s11511_s27 + $0xaa8] sm:$0xff] %v861_v21  ;;  %v865_v23 = vld [vmem:[%s11506_s26 + $0x1558] sm:$0xff]  ;;  %v867_v24 = vld [vmem:[%s11506_s26 + $0x1580] sm:$0xff] }
  0xbd   : > { %864 = vst [vmem:[%s11511_s27 + $0xab0] sm:$0xff] %v863_v22  ;;  %866 = vst [vmem:[%s11511_s27 + $0xab8] sm:$0xff] %v865_v23  ;;  %v869_v25 = vld [vmem:[%s11506_s26 + $0x1588] sm:$0xff]  ;;  %v871_v26 = vld [vmem:[%s11506_s26 + $0x1590] sm:$0xff] }
  0xbe   : > { %868 = vst [vmem:[%s11511_s27 + $0xac0] sm:$0xff] %v867_v24  ;;  %v873_v27 = vld [vmem:[%s11506_s26 + $0x1598] sm:$0xff]  ;;  %870 = vst [vmem:[%s11511_s27 + $0xac8] sm:$0xff] %v869_v25  ;;  %v875_v28 = vld [vmem:[%s11506_s26 + $0x15c0] sm:$0xff] }
  0xbf   : > { %872 = vst [vmem:[%s11511_s27 + $0xad0] sm:$0xff] %v871_v26  ;;  %874 = vst [vmem:[%s11511_s27 + $0xad8] sm:$0xff] %v873_v27  ;;  %v877_v29 = vld [vmem:[%s11506_s26 + $0x15c8] sm:$0xff]  ;;  %v879_v30 = vld [vmem:[%s11506_s26 + $0x15d0] sm:$0xff] }
  0xc0   : > { %876 = vst [vmem:[%s11511_s27 + $0xae0] sm:$0xff] %v875_v28  ;;  %878 = vst [vmem:[%s11511_s27 + $0xae8] sm:$0xff] %v877_v29  ;;  %v881_v31 = vld [vmem:[%s11506_s26 + $0x15d8] sm:$0xff]  ;;  %v883_v32 = vld [vmem:[%s11506_s26 + $0x1600] sm:$0xff] }
  0xc1   : > { %880 = vst [vmem:[%s11511_s27 + $0xaf0] sm:$0xff] %v879_v30  ;;  %v885_v33 = vld [vmem:[%s11506_s26 + $0x1608] sm:$0xff]  ;;  %882 = vst [vmem:[%s11511_s27 + $0xaf8] sm:$0xff] %v881_v31  ;;  %v887_v34 = vld [vmem:[%s11506_s26 + $0x1610] sm:$0xff] }
  0xc2   : > { %884 = vst [vmem:[%s11511_s27 + $0xb00] sm:$0xff] %v883_v32  ;;  %886 = vst [vmem:[%s11511_s27 + $0xb08] sm:$0xff] %v885_v33  ;;  %v889_v35 = vld [vmem:[%s11506_s26 + $0x1618] sm:$0xff]  ;;  %v891_v36 = vld [vmem:[%s11506_s26 + $0x1640] sm:$0xff] }
  0xc3   : > { %888 = vst [vmem:[%s11511_s27 + $0xb10] sm:$0xff] %v887_v34  ;;  %890 = vst [vmem:[%s11511_s27 + $0xb18] sm:$0xff] %v889_v35  ;;  %v893_v37 = vld [vmem:[%s11506_s26 + $0x1648] sm:$0xff]  ;;  %v895_v38 = vld [vmem:[%s11506_s26 + $0x1650] sm:$0xff] }
  0xc4   : > { %892 = vst [vmem:[%s11511_s27 + $0xb20] sm:$0xff] %v891_v36  ;;  %v897_v39 = vld [vmem:[%s11506_s26 + $0x1658] sm:$0xff]  ;;  %894 = vst [vmem:[%s11511_s27 + $0xb28] sm:$0xff] %v893_v37  ;;  %v899_v40 = vld [vmem:[%s11506_s26 + $0x1680] sm:$0xff] }
  0xc5   : > { %896 = vst [vmem:[%s11511_s27 + $0xb30] sm:$0xff] %v895_v38  ;;  %898 = vst [vmem:[%s11511_s27 + $0xb38] sm:$0xff] %v897_v39  ;;  %v901_v41 = vld [vmem:[%s11506_s26 + $0x1688] sm:$0xff]  ;;  %v903_v42 = vld [vmem:[%s11506_s26 + $0x1690] sm:$0xff] }
  0xc6   : > { %900 = vst [vmem:[%s11511_s27 + $0xb40] sm:$0xff] %v899_v40  ;;  %902 = vst [vmem:[%s11511_s27 + $0xb48] sm:$0xff] %v901_v41  ;;  %v905_v43 = vld [vmem:[%s11506_s26 + $0x1698] sm:$0xff]  ;;  %v907_v44 = vld [vmem:[%s11506_s26 + $0x16c0] sm:$0xff] }
  0xc7   : > { %904 = vst [vmem:[%s11511_s27 + $0xb50] sm:$0xff] %v903_v42  ;;  %v909_v45 = vld [vmem:[%s11506_s26 + $0x16c8] sm:$0xff]  ;;  %906 = vst [vmem:[%s11511_s27 + $0xb58] sm:$0xff] %v905_v43  ;;  %v911_v46 = vld [vmem:[%s11506_s26 + $0x16d0] sm:$0xff] }
  0xc8   : > { %908 = vst [vmem:[%s11511_s27 + $0xb60] sm:$0xff] %v907_v44  ;;  %910 = vst [vmem:[%s11511_s27 + $0xb68] sm:$0xff] %v909_v45  ;;  %v913_v47 = vld [vmem:[%s11506_s26 + $0x16d8] sm:$0xff]  ;;  %v915_v48 = vld [vmem:[%s11506_s26 + $0x1700] sm:$0xff] }
  0xc9   : > { %912 = vst [vmem:[%s11511_s27 + $0xb70] sm:$0xff] %v911_v46  ;;  %914 = vst [vmem:[%s11511_s27 + $0xb78] sm:$0xff] %v913_v47  ;;  %v917_v49 = vld [vmem:[%s11506_s26 + $0x1708] sm:$0xff]  ;;  %v919_v50 = vld [vmem:[%s11506_s26 + $0x1710] sm:$0xff] }
  0xca   : > { %916 = vst [vmem:[%s11511_s27 + $0xb80] sm:$0xff] %v915_v48  ;;  %v921_v51 = vld [vmem:[%s11506_s26 + $0x1718] sm:$0xff]  ;;  %918 = vst [vmem:[%s11511_s27 + $0xb88] sm:$0xff] %v917_v49  ;;  %v923_v52 = vld [vmem:[%s11506_s26 + $0x1740] sm:$0xff] }
  0xcb   : > { %920 = vst [vmem:[%s11511_s27 + $0xb90] sm:$0xff] %v919_v50  ;;  %922 = vst [vmem:[%s11511_s27 + $0xb98] sm:$0xff] %v921_v51  ;;  %v925_v53 = vld [vmem:[%s11506_s26 + $0x1748] sm:$0xff]  ;;  %v927_v54 = vld [vmem:[%s11506_s26 + $0x1750] sm:$0xff] }
  0xcc   : > { %924 = vst [vmem:[%s11511_s27 + $0xba0] sm:$0xff] %v923_v52  ;;  %926 = vst [vmem:[%s11511_s27 + $0xba8] sm:$0xff] %v925_v53  ;;  %v929_v55 = vld [vmem:[%s11506_s26 + $0x1758] sm:$0xff]  ;;  %v931_v56 = vld [vmem:[%s11506_s26 + $0x1780] sm:$0xff] }
  0xcd   : > { %928 = vst [vmem:[%s11511_s27 + $0xbb0] sm:$0xff] %v927_v54  ;;  %v933_v57 = vld [vmem:[%s11506_s26 + $0x1788] sm:$0xff]  ;;  %930 = vst [vmem:[%s11511_s27 + $0xbb8] sm:$0xff] %v929_v55  ;;  %v935_v58 = vld [vmem:[%s11506_s26 + $0x1790] sm:$0xff] }
  0xce   : > { %932 = vst [vmem:[%s11511_s27 + $0xbc0] sm:$0xff] %v931_v56  ;;  %934 = vst [vmem:[%s11511_s27 + $0xbc8] sm:$0xff] %v933_v57  ;;  %v937_v59 = vld [vmem:[%s11506_s26 + $0x1798] sm:$0xff]  ;;  %v939_v60 = vld [vmem:[%s11506_s26 + $0x17c0] sm:$0xff] }
  0xcf   : > { %936 = vst [vmem:[%s11511_s27 + $0xbd0] sm:$0xff] %v935_v58  ;;  %938 = vst [vmem:[%s11511_s27 + $0xbd8] sm:$0xff] %v937_v59  ;;  %v941_v61 = vld [vmem:[%s11506_s26 + $0x17c8] sm:$0xff]  ;;  %v943_v62 = vld [vmem:[%s11506_s26 + $0x17d0] sm:$0xff] }
  0xd0   : > { %940 = vst [vmem:[%s11511_s27 + $0xbe0] sm:$0xff] %v939_v60  ;;  %v945_v63 = vld [vmem:[%s11506_s26 + $0x17d8] sm:$0xff]  ;;  %942 = vst [vmem:[%s11511_s27 + $0xbe8] sm:$0xff] %v941_v61  ;;  %v947_v0 = vld [vmem:[%s11506_s26 + $0x1800] sm:$0xff] }
  0xd1   : > { %944 = vst [vmem:[%s11511_s27 + $0xbf0] sm:$0xff] %v943_v62  ;;  %946 = vst [vmem:[%s11511_s27 + $0xbf8] sm:$0xff] %v945_v63  ;;  %v949_v1 = vld [vmem:[%s11506_s26 + $0x1808] sm:$0xff]  ;;  %v951_v2 = vld [vmem:[%s11506_s26 + $0x1810] sm:$0xff] }
  0xd2   : > { %948 = vst [vmem:[%s11511_s27 + $0xc00] sm:$0xff] %v947_v0  ;;  %950 = vst [vmem:[%s11511_s27 + $0xc08] sm:$0xff] %v949_v1  ;;  %v953_v3 = vld [vmem:[%s11506_s26 + $0x1818] sm:$0xff]  ;;  %v955_v4 = vld [vmem:[%s11506_s26 + $0x1840] sm:$0xff] }
  0xd3   : > { %952 = vst [vmem:[%s11511_s27 + $0xc10] sm:$0xff] %v951_v2  ;;  %v957_v5 = vld [vmem:[%s11506_s26 + $0x1848] sm:$0xff]  ;;  %954 = vst [vmem:[%s11511_s27 + $0xc18] sm:$0xff] %v953_v3  ;;  %v959_v6 = vld [vmem:[%s11506_s26 + $0x1850] sm:$0xff] }
  0xd4   : > { %956 = vst [vmem:[%s11511_s27 + $0xc20] sm:$0xff] %v955_v4  ;;  %958 = vst [vmem:[%s11511_s27 + $0xc28] sm:$0xff] %v957_v5  ;;  %v961_v7 = vld [vmem:[%s11506_s26 + $0x1858] sm:$0xff]  ;;  %v963_v8 = vld [vmem:[%s11506_s26 + $0x1880] sm:$0xff] }
  0xd5   : > { %960 = vst [vmem:[%s11511_s27 + $0xc30] sm:$0xff] %v959_v6  ;;  %962 = vst [vmem:[%s11511_s27 + $0xc38] sm:$0xff] %v961_v7  ;;  %v965_v9 = vld [vmem:[%s11506_s26 + $0x1888] sm:$0xff]  ;;  %v967_v10 = vld [vmem:[%s11506_s26 + $0x1890] sm:$0xff] }
  0xd6   : > { %964 = vst [vmem:[%s11511_s27 + $0xc40] sm:$0xff] %v963_v8  ;;  %v969_v11 = vld [vmem:[%s11506_s26 + $0x1898] sm:$0xff]  ;;  %966 = vst [vmem:[%s11511_s27 + $0xc48] sm:$0xff] %v965_v9  ;;  %v971_v12 = vld [vmem:[%s11506_s26 + $0x18c0] sm:$0xff] }
  0xd7   : > { %968 = vst [vmem:[%s11511_s27 + $0xc50] sm:$0xff] %v967_v10  ;;  %970 = vst [vmem:[%s11511_s27 + $0xc58] sm:$0xff] %v969_v11  ;;  %v973_v13 = vld [vmem:[%s11506_s26 + $0x18c8] sm:$0xff]  ;;  %v975_v14 = vld [vmem:[%s11506_s26 + $0x18d0] sm:$0xff] }
  0xd8   : > { %972 = vst [vmem:[%s11511_s27 + $0xc60] sm:$0xff] %v971_v12  ;;  %974 = vst [vmem:[%s11511_s27 + $0xc68] sm:$0xff] %v973_v13  ;;  %v977_v15 = vld [vmem:[%s11506_s26 + $0x18d8] sm:$0xff]  ;;  %v979_v16 = vld [vmem:[%s11506_s26 + $0x1900] sm:$0xff] }
  0xd9   : > { %976 = vst [vmem:[%s11511_s27 + $0xc70] sm:$0xff] %v975_v14  ;;  %v981_v17 = vld [vmem:[%s11506_s26 + $0x1908] sm:$0xff]  ;;  %978 = vst [vmem:[%s11511_s27 + $0xc78] sm:$0xff] %v977_v15  ;;  %v983_v18 = vld [vmem:[%s11506_s26 + $0x1910] sm:$0xff] }
  0xda   : > { %980 = vst [vmem:[%s11511_s27 + $0xc80] sm:$0xff] %v979_v16  ;;  %982 = vst [vmem:[%s11511_s27 + $0xc88] sm:$0xff] %v981_v17  ;;  %v985_v19 = vld [vmem:[%s11506_s26 + $0x1918] sm:$0xff]  ;;  %v987_v20 = vld [vmem:[%s11506_s26 + $0x1940] sm:$0xff] }
  0xdb   : > { %984 = vst [vmem:[%s11511_s27 + $0xc90] sm:$0xff] %v983_v18  ;;  %986 = vst [vmem:[%s11511_s27 + $0xc98] sm:$0xff] %v985_v19  ;;  %v989_v21 = vld [vmem:[%s11506_s26 + $0x1948] sm:$0xff]  ;;  %v991_v22 = vld [vmem:[%s11506_s26 + $0x1950] sm:$0xff] }
  0xdc   : > { %988 = vst [vmem:[%s11511_s27 + $0xca0] sm:$0xff] %v987_v20  ;;  %v993_v23 = vld [vmem:[%s11506_s26 + $0x1958] sm:$0xff]  ;;  %990 = vst [vmem:[%s11511_s27 + $0xca8] sm:$0xff] %v989_v21  ;;  %v995_v24 = vld [vmem:[%s11506_s26 + $0x1980] sm:$0xff] }
  0xdd   : > { %992 = vst [vmem:[%s11511_s27 + $0xcb0] sm:$0xff] %v991_v22  ;;  %994 = vst [vmem:[%s11511_s27 + $0xcb8] sm:$0xff] %v993_v23  ;;  %v997_v25 = vld [vmem:[%s11506_s26 + $0x1988] sm:$0xff]  ;;  %v999_v26 = vld [vmem:[%s11506_s26 + $0x1990] sm:$0xff] }
  0xde   : > { %996 = vst [vmem:[%s11511_s27 + $0xcc0] sm:$0xff] %v995_v24  ;;  %998 = vst [vmem:[%s11511_s27 + $0xcc8] sm:$0xff] %v997_v25  ;;  %v1001_v27 = vld [vmem:[%s11506_s26 + $0x1998] sm:$0xff]  ;;  %v1003_v28 = vld [vmem:[%s11506_s26 + $0x19c0] sm:$0xff] }
  0xdf   : > { %1000 = vst [vmem:[%s11511_s27 + $0xcd0] sm:$0xff] %v999_v26  ;;  %v1005_v29 = vld [vmem:[%s11506_s26 + $0x19c8] sm:$0xff]  ;;  %1002 = vst [vmem:[%s11511_s27 + $0xcd8] sm:$0xff] %v1001_v27  ;;  %v1007_v30 = vld [vmem:[%s11506_s26 + $0x19d0] sm:$0xff] }
  0xe0   : > { %1004 = vst [vmem:[%s11511_s27 + $0xce0] sm:$0xff] %v1003_v28  ;;  %1006 = vst [vmem:[%s11511_s27 + $0xce8] sm:$0xff] %v1005_v29  ;;  %v1009_v31 = vld [vmem:[%s11506_s26 + $0x19d8] sm:$0xff]  ;;  %v1011_v32 = vld [vmem:[%s11506_s26 + $0x1a00] sm:$0xff] }
  0xe1   : > { %1008 = vst [vmem:[%s11511_s27 + $0xcf0] sm:$0xff] %v1007_v30  ;;  %1010 = vst [vmem:[%s11511_s27 + $0xcf8] sm:$0xff] %v1009_v31  ;;  %v1013_v33 = vld [vmem:[%s11506_s26 + $0x1a08] sm:$0xff]  ;;  %v1015_v34 = vld [vmem:[%s11506_s26 + $0x1a10] sm:$0xff] }
  0xe2   : > { %1012 = vst [vmem:[%s11511_s27 + $0xd00] sm:$0xff] %v1011_v32  ;;  %v1017_v35 = vld [vmem:[%s11506_s26 + $0x1a18] sm:$0xff]  ;;  %1014 = vst [vmem:[%s11511_s27 + $0xd08] sm:$0xff] %v1013_v33  ;;  %v1019_v36 = vld [vmem:[%s11506_s26 + $0x1a40] sm:$0xff] }
  0xe3   : > { %1016 = vst [vmem:[%s11511_s27 + $0xd10] sm:$0xff] %v1015_v34  ;;  %1018 = vst [vmem:[%s11511_s27 + $0xd18] sm:$0xff] %v1017_v35  ;;  %v1021_v37 = vld [vmem:[%s11506_s26 + $0x1a48] sm:$0xff]  ;;  %v1023_v38 = vld [vmem:[%s11506_s26 + $0x1a50] sm:$0xff] }
  0xe4   : > { %1020 = vst [vmem:[%s11511_s27 + $0xd20] sm:$0xff] %v1019_v36  ;;  %1022 = vst [vmem:[%s11511_s27 + $0xd28] sm:$0xff] %v1021_v37  ;;  %v1025_v39 = vld [vmem:[%s11506_s26 + $0x1a58] sm:$0xff]  ;;  %v1027_v40 = vld [vmem:[%s11506_s26 + $0x1a80] sm:$0xff] }
  0xe5   : > { %1024 = vst [vmem:[%s11511_s27 + $0xd30] sm:$0xff] %v1023_v38  ;;  %v1029_v41 = vld [vmem:[%s11506_s26 + $0x1a88] sm:$0xff]  ;;  %1026 = vst [vmem:[%s11511_s27 + $0xd38] sm:$0xff] %v1025_v39  ;;  %v1031_v42 = vld [vmem:[%s11506_s26 + $0x1a90] sm:$0xff] }
  0xe6   : > { %1028 = vst [vmem:[%s11511_s27 + $0xd40] sm:$0xff] %v1027_v40  ;;  %1030 = vst [vmem:[%s11511_s27 + $0xd48] sm:$0xff] %v1029_v41  ;;  %v1033_v43 = vld [vmem:[%s11506_s26 + $0x1a98] sm:$0xff]  ;;  %v1035_v44 = vld [vmem:[%s11506_s26 + $0x1ac0] sm:$0xff] }
  0xe7   : > { %1032 = vst [vmem:[%s11511_s27 + $0xd50] sm:$0xff] %v1031_v42  ;;  %1034 = vst [vmem:[%s11511_s27 + $0xd58] sm:$0xff] %v1033_v43  ;;  %v1037_v45 = vld [vmem:[%s11506_s26 + $0x1ac8] sm:$0xff]  ;;  %v1039_v46 = vld [vmem:[%s11506_s26 + $0x1ad0] sm:$0xff] }
  0xe8   : > { %1036 = vst [vmem:[%s11511_s27 + $0xd60] sm:$0xff] %v1035_v44  ;;  %v1041_v47 = vld [vmem:[%s11506_s26 + $0x1ad8] sm:$0xff]  ;;  %1038 = vst [vmem:[%s11511_s27 + $0xd68] sm:$0xff] %v1037_v45  ;;  %v1043_v48 = vld [vmem:[%s11506_s26 + $0x1b00] sm:$0xff] }
  0xe9   : > { %1040 = vst [vmem:[%s11511_s27 + $0xd70] sm:$0xff] %v1039_v46  ;;  %1042 = vst [vmem:[%s11511_s27 + $0xd78] sm:$0xff] %v1041_v47  ;;  %v1045_v49 = vld [vmem:[%s11506_s26 + $0x1b08] sm:$0xff]  ;;  %v1047_v50 = vld [vmem:[%s11506_s26 + $0x1b10] sm:$0xff] }
  0xea   : > { %1044 = vst [vmem:[%s11511_s27 + $0xd80] sm:$0xff] %v1043_v48  ;;  %1046 = vst [vmem:[%s11511_s27 + $0xd88] sm:$0xff] %v1045_v49  ;;  %v1049_v51 = vld [vmem:[%s11506_s26 + $0x1b18] sm:$0xff]  ;;  %v1051_v52 = vld [vmem:[%s11506_s26 + $0x1b40] sm:$0xff] }
  0xeb   : > { %1048 = vst [vmem:[%s11511_s27 + $0xd90] sm:$0xff] %v1047_v50  ;;  %v1053_v53 = vld [vmem:[%s11506_s26 + $0x1b48] sm:$0xff]  ;;  %1050 = vst [vmem:[%s11511_s27 + $0xd98] sm:$0xff] %v1049_v51  ;;  %v1055_v54 = vld [vmem:[%s11506_s26 + $0x1b50] sm:$0xff] }
  0xec   : > { %1052 = vst [vmem:[%s11511_s27 + $0xda0] sm:$0xff] %v1051_v52  ;;  %1054 = vst [vmem:[%s11511_s27 + $0xda8] sm:$0xff] %v1053_v53  ;;  %v1057_v55 = vld [vmem:[%s11506_s26 + $0x1b58] sm:$0xff]  ;;  %v1059_v56 = vld [vmem:[%s11506_s26 + $0x1b80] sm:$0xff] }
  0xed   : > { %1056 = vst [vmem:[%s11511_s27 + $0xdb0] sm:$0xff] %v1055_v54  ;;  %1058 = vst [vmem:[%s11511_s27 + $0xdb8] sm:$0xff] %v1057_v55  ;;  %v1061_v57 = vld [vmem:[%s11506_s26 + $0x1b88] sm:$0xff]  ;;  %v1063_v58 = vld [vmem:[%s11506_s26 + $0x1b90] sm:$0xff] }
  0xee   : > { %1060 = vst [vmem:[%s11511_s27 + $0xdc0] sm:$0xff] %v1059_v56  ;;  %v1065_v59 = vld [vmem:[%s11506_s26 + $0x1b98] sm:$0xff]  ;;  %1062 = vst [vmem:[%s11511_s27 + $0xdc8] sm:$0xff] %v1061_v57  ;;  %v1067_v60 = vld [vmem:[%s11506_s26 + $0x1bc0] sm:$0xff] }
  0xef   : > { %1064 = vst [vmem:[%s11511_s27 + $0xdd0] sm:$0xff] %v1063_v58  ;;  %1066 = vst [vmem:[%s11511_s27 + $0xdd8] sm:$0xff] %v1065_v59  ;;  %v1069_v61 = vld [vmem:[%s11506_s26 + $0x1bc8] sm:$0xff]  ;;  %v1071_v62 = vld [vmem:[%s11506_s26 + $0x1bd0] sm:$0xff] }
  0xf0   : > { %1068 = vst [vmem:[%s11511_s27 + $0xde0] sm:$0xff] %v1067_v60  ;;  %1070 = vst [vmem:[%s11511_s27 + $0xde8] sm:$0xff] %v1069_v61  ;;  %v1073_v63 = vld [vmem:[%s11506_s26 + $0x1bd8] sm:$0xff]  ;;  %v1075_v0 = vld [vmem:[%s11506_s26 + $0x1c00] sm:$0xff] }
  0xf1   : > { %1072 = vst [vmem:[%s11511_s27 + $0xdf0] sm:$0xff] %v1071_v62  ;;  %v1077_v1 = vld [vmem:[%s11506_s26 + $0x1c08] sm:$0xff]  ;;  %1074 = vst [vmem:[%s11511_s27 + $0xdf8] sm:$0xff] %v1073_v63  ;;  %v1079_v2 = vld [vmem:[%s11506_s26 + $0x1c10] sm:$0xff] }
  0xf2   : > { %1076 = vst [vmem:[%s11511_s27 + $0xe00] sm:$0xff] %v1075_v0  ;;  %1078 = vst [vmem:[%s11511_s27 + $0xe08] sm:$0xff] %v1077_v1  ;;  %v1081_v3 = vld [vmem:[%s11506_s26 + $0x1c18] sm:$0xff]  ;;  %v1083_v4 = vld [vmem:[%s11506_s26 + $0x1c40] sm:$0xff] }
  0xf3   : > { %1080 = vst [vmem:[%s11511_s27 + $0xe10] sm:$0xff] %v1079_v2  ;;  %1082 = vst [vmem:[%s11511_s27 + $0xe18] sm:$0xff] %v1081_v3  ;;  %v1085_v5 = vld [vmem:[%s11506_s26 + $0x1c48] sm:$0xff]  ;;  %v1087_v6 = vld [vmem:[%s11506_s26 + $0x1c50] sm:$0xff] }
  0xf4   : > { %1084 = vst [vmem:[%s11511_s27 + $0xe20] sm:$0xff] %v1083_v4  ;;  %v1089_v7 = vld [vmem:[%s11506_s26 + $0x1c58] sm:$0xff]  ;;  %1086 = vst [vmem:[%s11511_s27 + $0xe28] sm:$0xff] %v1085_v5  ;;  %v1091_v8 = vld [vmem:[%s11506_s26 + $0x1c80] sm:$0xff] }
  0xf5   : > { %1088 = vst [vmem:[%s11511_s27 + $0xe30] sm:$0xff] %v1087_v6  ;;  %1090 = vst [vmem:[%s11511_s27 + $0xe38] sm:$0xff] %v1089_v7  ;;  %v1093_v9 = vld [vmem:[%s11506_s26 + $0x1c88] sm:$0xff]  ;;  %v1095_v10 = vld [vmem:[%s11506_s26 + $0x1c90] sm:$0xff] }
  0xf6   : > { %1092 = vst [vmem:[%s11511_s27 + $0xe40] sm:$0xff] %v1091_v8  ;;  %1094 = vst [vmem:[%s11511_s27 + $0xe48] sm:$0xff] %v1093_v9  ;;  %v1097_v11 = vld [vmem:[%s11506_s26 + $0x1c98] sm:$0xff]  ;;  %v1099_v12 = vld [vmem:[%s11506_s26 + $0x1cc0] sm:$0xff] }
  0xf7   : > { %1096 = vst [vmem:[%s11511_s27 + $0xe50] sm:$0xff] %v1095_v10  ;;  %v1101_v13 = vld [vmem:[%s11506_s26 + $0x1cc8] sm:$0xff]  ;;  %1098 = vst [vmem:[%s11511_s27 + $0xe58] sm:$0xff] %v1097_v11  ;;  %v1103_v14 = vld [vmem:[%s11506_s26 + $0x1cd0] sm:$0xff] }
  0xf8   : > { %1100 = vst [vmem:[%s11511_s27 + $0xe60] sm:$0xff] %v1099_v12  ;;  %1102 = vst [vmem:[%s11511_s27 + $0xe68] sm:$0xff] %v1101_v13  ;;  %v1105_v15 = vld [vmem:[%s11506_s26 + $0x1cd8] sm:$0xff]  ;;  %v1107_v16 = vld [vmem:[%s11506_s26 + $0x1d00] sm:$0xff] }
  0xf9   : > { %1104 = vst [vmem:[%s11511_s27 + $0xe70] sm:$0xff] %v1103_v14  ;;  %1106 = vst [vmem:[%s11511_s27 + $0xe78] sm:$0xff] %v1105_v15  ;;  %v1109_v17 = vld [vmem:[%s11506_s26 + $0x1d08] sm:$0xff]  ;;  %v1111_v18 = vld [vmem:[%s11506_s26 + $0x1d10] sm:$0xff] }
  0xfa   : > { %1108 = vst [vmem:[%s11511_s27 + $0xe80] sm:$0xff] %v1107_v16  ;;  %v1113_v19 = vld [vmem:[%s11506_s26 + $0x1d18] sm:$0xff]  ;;  %1110 = vst [vmem:[%s11511_s27 + $0xe88] sm:$0xff] %v1109_v17  ;;  %v1115_v20 = vld [vmem:[%s11506_s26 + $0x1d40] sm:$0xff] }
  0xfb   : > { %1112 = vst [vmem:[%s11511_s27 + $0xe90] sm:$0xff] %v1111_v18  ;;  %1114 = vst [vmem:[%s11511_s27 + $0xe98] sm:$0xff] %v1113_v19  ;;  %v1117_v21 = vld [vmem:[%s11506_s26 + $0x1d48] sm:$0xff]  ;;  %v1119_v22 = vld [vmem:[%s11506_s26 + $0x1d50] sm:$0xff] }
  0xfc   : > { %1116 = vst [vmem:[%s11511_s27 + $0xea0] sm:$0xff] %v1115_v20  ;;  %1118 = vst [vmem:[%s11511_s27 + $0xea8] sm:$0xff] %v1117_v21  ;;  %v1121_v23 = vld [vmem:[%s11506_s26 + $0x1d58] sm:$0xff]  ;;  %v1123_v24 = vld [vmem:[%s11506_s26 + $0x1d80] sm:$0xff] }
  0xfd   : > { %1120 = vst [vmem:[%s11511_s27 + $0xeb0] sm:$0xff] %v1119_v22  ;;  %v1125_v25 = vld [vmem:[%s11506_s26 + $0x1d88] sm:$0xff]  ;;  %1122 = vst [vmem:[%s11511_s27 + $0xeb8] sm:$0xff] %v1121_v23  ;;  %v1127_v26 = vld [vmem:[%s11506_s26 + $0x1d90] sm:$0xff] }
  0xfe   : > { %1124 = vst [vmem:[%s11511_s27 + $0xec0] sm:$0xff] %v1123_v24  ;;  %1126 = vst [vmem:[%s11511_s27 + $0xec8] sm:$0xff] %v1125_v25  ;;  %v1129_v27 = vld [vmem:[%s11506_s26 + $0x1d98] sm:$0xff]  ;;  %v1131_v28 = vld [vmem:[%s11506_s26 + $0x1dc0] sm:$0xff] }
  0xff   : > { %1128 = vst [vmem:[%s11511_s27 + $0xed0] sm:$0xff] %v1127_v26  ;;  %1130 = vst [vmem:[%s11511_s27 + $0xed8] sm:$0xff] %v1129_v27  ;;  %v1133_v29 = vld [vmem:[%s11506_s26 + $0x1dc8] sm:$0xff]  ;;  %v1135_v30 = vld [vmem:[%s11506_s26 + $0x1dd0] sm:$0xff] }
 0x100   : > { %1132 = vst [vmem:[%s11511_s27 + $0xee0] sm:$0xff] %v1131_v28  ;;  %v1137_v31 = vld [vmem:[%s11506_s26 + $0x1dd8] sm:$0xff]  ;;  %1134 = vst [vmem:[%s11511_s27 + $0xee8] sm:$0xff] %v1133_v29  ;;  %v1139_v32 = vld [vmem:[%s11506_s26 + $0x1e00] sm:$0xff] }
 0x101   : > { %1136 = vst [vmem:[%s11511_s27 + $0xef0] sm:$0xff] %v1135_v30  ;;  %1138 = vst [vmem:[%s11511_s27 + $0xef8] sm:$0xff] %v1137_v31  ;;  %v1141_v33 = vld [vmem:[%s11506_s26 + $0x1e08] sm:$0xff]  ;;  %v1143_v34 = vld [vmem:[%s11506_s26 + $0x1e10] sm:$0xff] }
 0x102   : > { %1140 = vst [vmem:[%s11511_s27 + $0xf00] sm:$0xff] %v1139_v32  ;;  %1142 = vst [vmem:[%s11511_s27 + $0xf08] sm:$0xff] %v1141_v33  ;;  %v1145_v35 = vld [vmem:[%s11506_s26 + $0x1e18] sm:$0xff]  ;;  %v1147_v36 = vld [vmem:[%s11506_s26 + $0x1e40] sm:$0xff] }
 0x103   : > { %1144 = vst [vmem:[%s11511_s27 + $0xf10] sm:$0xff] %v1143_v34  ;;  %v1149_v37 = vld [vmem:[%s11506_s26 + $0x1e48] sm:$0xff]  ;;  %1146 = vst [vmem:[%s11511_s27 + $0xf18] sm:$0xff] %v1145_v35  ;;  %v1151_v38 = vld [vmem:[%s11506_s26 + $0x1e50] sm:$0xff] }
 0x104   : > { %1148 = vst [vmem:[%s11511_s27 + $0xf20] sm:$0xff] %v1147_v36  ;;  %1150 = vst [vmem:[%s11511_s27 + $0xf28] sm:$0xff] %v1149_v37  ;;  %v1153_v39 = vld [vmem:[%s11506_s26 + $0x1e58] sm:$0xff]  ;;  %v1155_v40 = vld [vmem:[%s11506_s26 + $0x1e80] sm:$0xff] }
 0x105   : > { %1152 = vst [vmem:[%s11511_s27 + $0xf30] sm:$0xff] %v1151_v38  ;;  %1154 = vst [vmem:[%s11511_s27 + $0xf38] sm:$0xff] %v1153_v39  ;;  %v1157_v41 = vld [vmem:[%s11506_s26 + $0x1e88] sm:$0xff]  ;;  %v1159_v42 = vld [vmem:[%s11506_s26 + $0x1e90] sm:$0xff] }
 0x106   : > { %1156 = vst [vmem:[%s11511_s27 + $0xf40] sm:$0xff] %v1155_v40  ;;  %v1161_v43 = vld [vmem:[%s11506_s26 + $0x1e98] sm:$0xff]  ;;  %1158 = vst [vmem:[%s11511_s27 + $0xf48] sm:$0xff] %v1157_v41  ;;  %v1163_v44 = vld [vmem:[%s11506_s26 + $0x1ec0] sm:$0xff] }
 0x107   : > { %1160 = vst [vmem:[%s11511_s27 + $0xf50] sm:$0xff] %v1159_v42  ;;  %1162 = vst [vmem:[%s11511_s27 + $0xf58] sm:$0xff] %v1161_v43  ;;  %v1165_v45 = vld [vmem:[%s11506_s26 + $0x1ec8] sm:$0xff]  ;;  %v1167_v46 = vld [vmem:[%s11506_s26 + $0x1ed0] sm:$0xff] }
 0x108   : > { %1164 = vst [vmem:[%s11511_s27 + $0xf60] sm:$0xff] %v1163_v44  ;;  %1166 = vst [vmem:[%s11511_s27 + $0xf68] sm:$0xff] %v1165_v45  ;;  %v1169_v47 = vld [vmem:[%s11506_s26 + $0x1ed8] sm:$0xff]  ;;  %v1171_v48 = vld [vmem:[%s11506_s26 + $0x1f00] sm:$0xff] }
 0x109   : > { %1168 = vst [vmem:[%s11511_s27 + $0xf70] sm:$0xff] %v1167_v46  ;;  %v1173_v49 = vld [vmem:[%s11506_s26 + $0x1f08] sm:$0xff]  ;;  %1170 = vst [vmem:[%s11511_s27 + $0xf78] sm:$0xff] %v1169_v47  ;;  %v1175_v50 = vld [vmem:[%s11506_s26 + $0x1f10] sm:$0xff] }
 0x10a   : > { %1172 = vst [vmem:[%s11511_s27 + $0xf80] sm:$0xff] %v1171_v48  ;;  %1174 = vst [vmem:[%s11511_s27 + $0xf88] sm:$0xff] %v1173_v49  ;;  %v1177_v51 = vld [vmem:[%s11506_s26 + $0x1f18] sm:$0xff]  ;;  %v1179_v52 = vld [vmem:[%s11506_s26 + $0x1f40] sm:$0xff] }
 0x10b   : > { %1176 = vst [vmem:[%s11511_s27 + $0xf90] sm:$0xff] %v1175_v50  ;;  %1178 = vst [vmem:[%s11511_s27 + $0xf98] sm:$0xff] %v1177_v51  ;;  %v1181_v53 = vld [vmem:[%s11506_s26 + $0x1f48] sm:$0xff]  ;;  %v1183_v54 = vld [vmem:[%s11506_s26 + $0x1f50] sm:$0xff] }
 0x10c   : > { %1180 = vst [vmem:[%s11511_s27 + $0xfa0] sm:$0xff] %v1179_v52  ;;  %v1185_v55 = vld [vmem:[%s11506_s26 + $0x1f58] sm:$0xff]  ;;  %1182 = vst [vmem:[%s11511_s27 + $0xfa8] sm:$0xff] %v1181_v53  ;;  %v1187_v56 = vld [vmem:[%s11506_s26 + $0x1f80] sm:$0xff] }
 0x10d   : > { %1184 = vst [vmem:[%s11511_s27 + $0xfb0] sm:$0xff] %v1183_v54  ;;  %1186 = vst [vmem:[%s11511_s27 + $0xfb8] sm:$0xff] %v1185_v55  ;;  %v1189_v57 = vld [vmem:[%s11506_s26 + $0x1f88] sm:$0xff]  ;;  %v1191_v58 = vld [vmem:[%s11506_s26 + $0x1f90] sm:$0xff] }
 0x10e   : > { %1188 = vst [vmem:[%s11511_s27 + $0xfc0] sm:$0xff] %v1187_v56  ;;  %1190 = vst [vmem:[%s11511_s27 + $0xfc8] sm:$0xff] %v1189_v57  ;;  %v1193_v59 = vld [vmem:[%s11506_s26 + $0x1f98] sm:$0xff]  ;;  %v1195_v60 = vld [vmem:[%s11506_s26 + $0x1fc0] sm:$0xff] }
 0x10f   : > { %1192 = vst [vmem:[%s11511_s27 + $0xfd0] sm:$0xff] %v1191_v58  ;;  %v1197_v61 = vld [vmem:[%s11506_s26 + $0x1fc8] sm:$0xff]  ;;  %1194 = vst [vmem:[%s11511_s27 + $0xfd8] sm:$0xff] %v1193_v59  ;;  %v1199_v62 = vld [vmem:[%s11506_s26 + $0x1fd0] sm:$0xff] }
 0x110   : > { %1196 = vst [vmem:[%s11511_s27 + $0xfe0] sm:$0xff] %v1195_v60  ;;  %1198 = vst [vmem:[%s11511_s27 + $0xfe8] sm:$0xff] %v1197_v61  ;;  %v1201_v63 = vld [vmem:[%s11506_s26 + $0x1fd8] sm:$0xff]  ;;  %v1203_v0 = vld [vmem:[%s11506_s26 + $0x2000] sm:$0xff] }
 0x111   : > { %1200 = vst [vmem:[%s11511_s27 + $0xff0] sm:$0xff] %v1199_v62  ;;  %1202 = vst [vmem:[%s11511_s27 + $0xff8] sm:$0xff] %v1201_v63  ;;  %v1205_v1 = vld [vmem:[%s11506_s26 + $0x2008] sm:$0xff]  ;;  %v1207_v2 = vld [vmem:[%s11506_s26 + $0x2010] sm:$0xff] }
 0x112   : > { %1204 = vst [vmem:[%s11511_s27 + $0x1000] sm:$0xff] %v1203_v0  ;;  %v1209_v3 = vld [vmem:[%s11506_s26 + $0x2018] sm:$0xff]  ;;  %1206 = vst [vmem:[%s11511_s27 + $0x1008] sm:$0xff] %v1205_v1  ;;  %v1211_v4 = vld [vmem:[%s11506_s26 + $0x2040] sm:$0xff] }
 0x113   : > { %1208 = vst [vmem:[%s11511_s27 + $0x1010] sm:$0xff] %v1207_v2  ;;  %1210 = vst [vmem:[%s11511_s27 + $0x1018] sm:$0xff] %v1209_v3  ;;  %v1213_v5 = vld [vmem:[%s11506_s26 + $0x2048] sm:$0xff]  ;;  %v1215_v6 = vld [vmem:[%s11506_s26 + $0x2050] sm:$0xff] }
 0x114   : > { %1212 = vst [vmem:[%s11511_s27 + $0x1020] sm:$0xff] %v1211_v4  ;;  %1214 = vst [vmem:[%s11511_s27 + $0x1028] sm:$0xff] %v1213_v5  ;;  %v1217_v7 = vld [vmem:[%s11506_s26 + $0x2058] sm:$0xff]  ;;  %v1219_v8 = vld [vmem:[%s11506_s26 + $0x2080] sm:$0xff] }
 0x115   : > { %1216 = vst [vmem:[%s11511_s27 + $0x1030] sm:$0xff] %v1215_v6  ;;  %v1221_v9 = vld [vmem:[%s11506_s26 + $0x2088] sm:$0xff]  ;;  %1218 = vst [vmem:[%s11511_s27 + $0x1038] sm:$0xff] %v1217_v7  ;;  %v1223_v10 = vld [vmem:[%s11506_s26 + $0x2090] sm:$0xff] }
 0x116   : > { %1220 = vst [vmem:[%s11511_s27 + $0x1040] sm:$0xff] %v1219_v8  ;;  %1222 = vst [vmem:[%s11511_s27 + $0x1048] sm:$0xff] %v1221_v9  ;;  %v1225_v11 = vld [vmem:[%s11506_s26 + $0x2098] sm:$0xff]  ;;  %v1227_v12 = vld [vmem:[%s11506_s26 + $0x20c0] sm:$0xff] }
 0x117   : > { %1224 = vst [vmem:[%s11511_s27 + $0x1050] sm:$0xff] %v1223_v10  ;;  %1226 = vst [vmem:[%s11511_s27 + $0x1058] sm:$0xff] %v1225_v11  ;;  %v1229_v13 = vld [vmem:[%s11506_s26 + $0x20c8] sm:$0xff]  ;;  %v1231_v14 = vld [vmem:[%s11506_s26 + $0x20d0] sm:$0xff] }
 0x118   : > { %1228 = vst [vmem:[%s11511_s27 + $0x1060] sm:$0xff] %v1227_v12  ;;  %v1233_v15 = vld [vmem:[%s11506_s26 + $0x20d8] sm:$0xff]  ;;  %1230 = vst [vmem:[%s11511_s27 + $0x1068] sm:$0xff] %v1229_v13  ;;  %v1235_v16 = vld [vmem:[%s11506_s26 + $0x2100] sm:$0xff] }
 0x119   : > { %1232 = vst [vmem:[%s11511_s27 + $0x1070] sm:$0xff] %v1231_v14  ;;  %1234 = vst [vmem:[%s11511_s27 + $0x1078] sm:$0xff] %v1233_v15  ;;  %v1237_v17 = vld [vmem:[%s11506_s26 + $0x2108] sm:$0xff]  ;;  %v1239_v18 = vld [vmem:[%s11506_s26 + $0x2110] sm:$0xff] }
 0x11a   : > { %1236 = vst [vmem:[%s11511_s27 + $0x1080] sm:$0xff] %v1235_v16  ;;  %1238 = vst [vmem:[%s11511_s27 + $0x1088] sm:$0xff] %v1237_v17  ;;  %v1241_v19 = vld [vmem:[%s11506_s26 + $0x2118] sm:$0xff]  ;;  %v1243_v20 = vld [vmem:[%s11506_s26 + $0x2140] sm:$0xff] }
 0x11b   : > { %1240 = vst [vmem:[%s11511_s27 + $0x1090] sm:$0xff] %v1239_v18  ;;  %v1245_v21 = vld [vmem:[%s11506_s26 + $0x2148] sm:$0xff]  ;;  %1242 = vst [vmem:[%s11511_s27 + $0x1098] sm:$0xff] %v1241_v19  ;;  %v1247_v22 = vld [vmem:[%s11506_s26 + $0x2150] sm:$0xff] }
 0x11c   : > { %1244 = vst [vmem:[%s11511_s27 + $0x10a0] sm:$0xff] %v1243_v20  ;;  %1246 = vst [vmem:[%s11511_s27 + $0x10a8] sm:$0xff] %v1245_v21  ;;  %v1249_v23 = vld [vmem:[%s11506_s26 + $0x2158] sm:$0xff]  ;;  %v1251_v24 = vld [vmem:[%s11506_s26 + $0x2180] sm:$0xff] }
 0x11d   : > { %1248 = vst [vmem:[%s11511_s27 + $0x10b0] sm:$0xff] %v1247_v22  ;;  %1250 = vst [vmem:[%s11511_s27 + $0x10b8] sm:$0xff] %v1249_v23  ;;  %v1253_v25 = vld [vmem:[%s11506_s26 + $0x2188] sm:$0xff]  ;;  %v1255_v26 = vld [vmem:[%s11506_s26 + $0x2190] sm:$0xff] }
 0x11e   : > { %1252 = vst [vmem:[%s11511_s27 + $0x10c0] sm:$0xff] %v1251_v24  ;;  %v1257_v27 = vld [vmem:[%s11506_s26 + $0x2198] sm:$0xff]  ;;  %1254 = vst [vmem:[%s11511_s27 + $0x10c8] sm:$0xff] %v1253_v25  ;;  %v1259_v28 = vld [vmem:[%s11506_s26 + $0x21c0] sm:$0xff] }
 0x11f   : > { %1256 = vst [vmem:[%s11511_s27 + $0x10d0] sm:$0xff] %v1255_v26  ;;  %1258 = vst [vmem:[%s11511_s27 + $0x10d8] sm:$0xff] %v1257_v27  ;;  %v1261_v29 = vld [vmem:[%s11506_s26 + $0x21c8] sm:$0xff]  ;;  %v1263_v30 = vld [vmem:[%s11506_s26 + $0x21d0] sm:$0xff] }
 0x120   : > { %1260 = vst [vmem:[%s11511_s27 + $0x10e0] sm:$0xff] %v1259_v28  ;;  %1262 = vst [vmem:[%s11511_s27 + $0x10e8] sm:$0xff] %v1261_v29  ;;  %v1265_v31 = vld [vmem:[%s11506_s26 + $0x21d8] sm:$0xff]  ;;  %v1267_v32 = vld [vmem:[%s11506_s26 + $0x2200] sm:$0xff] }
 0x121   : > { %1264 = vst [vmem:[%s11511_s27 + $0x10f0] sm:$0xff] %v1263_v30  ;;  %v1269_v33 = vld [vmem:[%s11506_s26 + $0x2208] sm:$0xff]  ;;  %1266 = vst [vmem:[%s11511_s27 + $0x10f8] sm:$0xff] %v1265_v31  ;;  %v1271_v34 = vld [vmem:[%s11506_s26 + $0x2210] sm:$0xff] }
 0x122   : > { %1268 = vst [vmem:[%s11511_s27 + $0x1100] sm:$0xff] %v1267_v32  ;;  %1270 = vst [vmem:[%s11511_s27 + $0x1108] sm:$0xff] %v1269_v33  ;;  %v1273_v35 = vld [vmem:[%s11506_s26 + $0x2218] sm:$0xff]  ;;  %v1275_v36 = vld [vmem:[%s11506_s26 + $0x2240] sm:$0xff] }
 0x123   : > { %1272 = vst [vmem:[%s11511_s27 + $0x1110] sm:$0xff] %v1271_v34  ;;  %1274 = vst [vmem:[%s11511_s27 + $0x1118] sm:$0xff] %v1273_v35  ;;  %v1277_v37 = vld [vmem:[%s11506_s26 + $0x2248] sm:$0xff]  ;;  %v1279_v38 = vld [vmem:[%s11506_s26 + $0x2250] sm:$0xff] }
 0x124   : > { %1276 = vst [vmem:[%s11511_s27 + $0x1120] sm:$0xff] %v1275_v36  ;;  %v1281_v39 = vld [vmem:[%s11506_s26 + $0x2258] sm:$0xff]  ;;  %1278 = vst [vmem:[%s11511_s27 + $0x1128] sm:$0xff] %v1277_v37  ;;  %v1283_v40 = vld [vmem:[%s11506_s26 + $0x2280] sm:$0xff] }
 0x125   : > { %1280 = vst [vmem:[%s11511_s27 + $0x1130] sm:$0xff] %v1279_v38  ;;  %1282 = vst [vmem:[%s11511_s27 + $0x1138] sm:$0xff] %v1281_v39  ;;  %v1285_v41 = vld [vmem:[%s11506_s26 + $0x2288] sm:$0xff]  ;;  %v1287_v42 = vld [vmem:[%s11506_s26 + $0x2290] sm:$0xff] }
 0x126   : > { %1284 = vst [vmem:[%s11511_s27 + $0x1140] sm:$0xff] %v1283_v40  ;;  %1286 = vst [vmem:[%s11511_s27 + $0x1148] sm:$0xff] %v1285_v41  ;;  %v1289_v43 = vld [vmem:[%s11506_s26 + $0x2298] sm:$0xff]  ;;  %v1291_v44 = vld [vmem:[%s11506_s26 + $0x22c0] sm:$0xff] }
 0x127   : > { %1288 = vst [vmem:[%s11511_s27 + $0x1150] sm:$0xff] %v1287_v42  ;;  %v1293_v45 = vld [vmem:[%s11506_s26 + $0x22c8] sm:$0xff]  ;;  %1290 = vst [vmem:[%s11511_s27 + $0x1158] sm:$0xff] %v1289_v43  ;;  %v1295_v46 = vld [vmem:[%s11506_s26 + $0x22d0] sm:$0xff] }
 0x128   : > { %1292 = vst [vmem:[%s11511_s27 + $0x1160] sm:$0xff] %v1291_v44  ;;  %1294 = vst [vmem:[%s11511_s27 + $0x1168] sm:$0xff] %v1293_v45  ;;  %v1297_v47 = vld [vmem:[%s11506_s26 + $0x22d8] sm:$0xff]  ;;  %v1299_v48 = vld [vmem:[%s11506_s26 + $0x2300] sm:$0xff] }
 0x129   : > { %1296 = vst [vmem:[%s11511_s27 + $0x1170] sm:$0xff] %v1295_v46  ;;  %1298 = vst [vmem:[%s11511_s27 + $0x1178] sm:$0xff] %v1297_v47  ;;  %v1301_v49 = vld [vmem:[%s11506_s26 + $0x2308] sm:$0xff]  ;;  %v1303_v50 = vld [vmem:[%s11506_s26 + $0x2310] sm:$0xff] }
 0x12a   : > { %1300 = vst [vmem:[%s11511_s27 + $0x1180] sm:$0xff] %v1299_v48  ;;  %v1305_v51 = vld [vmem:[%s11506_s26 + $0x2318] sm:$0xff]  ;;  %1302 = vst [vmem:[%s11511_s27 + $0x1188] sm:$0xff] %v1301_v49  ;;  %v1307_v52 = vld [vmem:[%s11506_s26 + $0x2340] sm:$0xff] }
 0x12b   : > { %1304 = vst [vmem:[%s11511_s27 + $0x1190] sm:$0xff] %v1303_v50  ;;  %1306 = vst [vmem:[%s11511_s27 + $0x1198] sm:$0xff] %v1305_v51  ;;  %v1309_v53 = vld [vmem:[%s11506_s26 + $0x2348] sm:$0xff]  ;;  %v1311_v54 = vld [vmem:[%s11506_s26 + $0x2350] sm:$0xff] }
 0x12c   : > { %1308 = vst [vmem:[%s11511_s27 + $0x11a0] sm:$0xff] %v1307_v52  ;;  %1310 = vst [vmem:[%s11511_s27 + $0x11a8] sm:$0xff] %v1309_v53  ;;  %v1313_v55 = vld [vmem:[%s11506_s26 + $0x2358] sm:$0xff]  ;;  %v1315_v56 = vld [vmem:[%s11506_s26 + $0x2380] sm:$0xff] }
 0x12d   : > { %1312 = vst [vmem:[%s11511_s27 + $0x11b0] sm:$0xff] %v1311_v54  ;;  %v1317_v57 = vld [vmem:[%s11506_s26 + $0x2388] sm:$0xff]  ;;  %1314 = vst [vmem:[%s11511_s27 + $0x11b8] sm:$0xff] %v1313_v55  ;;  %v1319_v58 = vld [vmem:[%s11506_s26 + $0x2390] sm:$0xff] }
 0x12e   : > { %1316 = vst [vmem:[%s11511_s27 + $0x11c0] sm:$0xff] %v1315_v56  ;;  %1318 = vst [vmem:[%s11511_s27 + $0x11c8] sm:$0xff] %v1317_v57  ;;  %v1321_v59 = vld [vmem:[%s11506_s26 + $0x2398] sm:$0xff]  ;;  %v1323_v60 = vld [vmem:[%s11506_s26 + $0x23c0] sm:$0xff] }
 0x12f   : > { %1320 = vst [vmem:[%s11511_s27 + $0x11d0] sm:$0xff] %v1319_v58  ;;  %1322 = vst [vmem:[%s11511_s27 + $0x11d8] sm:$0xff] %v1321_v59  ;;  %v1325_v61 = vld [vmem:[%s11506_s26 + $0x23c8] sm:$0xff]  ;;  %v1327_v62 = vld [vmem:[%s11506_s26 + $0x23d0] sm:$0xff] }
 0x130   : > { %1324 = vst [vmem:[%s11511_s27 + $0x11e0] sm:$0xff] %v1323_v60  ;;  %v1329_v63 = vld [vmem:[%s11506_s26 + $0x23d8] sm:$0xff]  ;;  %1326 = vst [vmem:[%s11511_s27 + $0x11e8] sm:$0xff] %v1325_v61  ;;  %v1331_v0 = vld [vmem:[%s11506_s26 + $0x2400] sm:$0xff] }
 0x131   : > { %1328 = vst [vmem:[%s11511_s27 + $0x11f0] sm:$0xff] %v1327_v62  ;;  %1330 = vst [vmem:[%s11511_s27 + $0x11f8] sm:$0xff] %v1329_v63  ;;  %v1333_v1 = vld [vmem:[%s11506_s26 + $0x2408] sm:$0xff]  ;;  %v1335_v2 = vld [vmem:[%s11506_s26 + $0x2410] sm:$0xff] }
 0x132   : > { %1332 = vst [vmem:[%s11511_s27 + $0x1200] sm:$0xff] %v1331_v0  ;;  %1334 = vst [vmem:[%s11511_s27 + $0x1208] sm:$0xff] %v1333_v1  ;;  %v1337_v3 = vld [vmem:[%s11506_s26 + $0x2418] sm:$0xff]  ;;  %v1339_v4 = vld [vmem:[%s11506_s26 + $0x2440] sm:$0xff] }
 0x133   : > { %1336 = vst [vmem:[%s11511_s27 + $0x1210] sm:$0xff] %v1335_v2  ;;  %v1341_v5 = vld [vmem:[%s11506_s26 + $0x2448] sm:$0xff]  ;;  %1338 = vst [vmem:[%s11511_s27 + $0x1218] sm:$0xff] %v1337_v3  ;;  %v1343_v6 = vld [vmem:[%s11506_s26 + $0x2450] sm:$0xff] }
 0x134   : > { %1340 = vst [vmem:[%s11511_s27 + $0x1220] sm:$0xff] %v1339_v4  ;;  %1342 = vst [vmem:[%s11511_s27 + $0x1228] sm:$0xff] %v1341_v5  ;;  %v1345_v7 = vld [vmem:[%s11506_s26 + $0x2458] sm:$0xff]  ;;  %v1347_v8 = vld [vmem:[%s11506_s26 + $0x2480] sm:$0xff] }
 0x135   : > { %1344 = vst [vmem:[%s11511_s27 + $0x1230] sm:$0xff] %v1343_v6  ;;  %1346 = vst [vmem:[%s11511_s27 + $0x1238] sm:$0xff] %v1345_v7  ;;  %v1349_v9 = vld [vmem:[%s11506_s26 + $0x2488] sm:$0xff]  ;;  %v1351_v10 = vld [vmem:[%s11506_s26 + $0x2490] sm:$0xff] }
 0x136   : > { %1348 = vst [vmem:[%s11511_s27 + $0x1240] sm:$0xff] %v1347_v8  ;;  %v1353_v11 = vld [vmem:[%s11506_s26 + $0x2498] sm:$0xff]  ;;  %1350 = vst [vmem:[%s11511_s27 + $0x1248] sm:$0xff] %v1349_v9  ;;  %v1355_v12 = vld [vmem:[%s11506_s26 + $0x24c0] sm:$0xff] }
 0x137   : > { %1352 = vst [vmem:[%s11511_s27 + $0x1250] sm:$0xff] %v1351_v10  ;;  %1354 = vst [vmem:[%s11511_s27 + $0x1258] sm:$0xff] %v1353_v11  ;;  %v1357_v13 = vld [vmem:[%s11506_s26 + $0x24c8] sm:$0xff]  ;;  %v1359_v14 = vld [vmem:[%s11506_s26 + $0x24d0] sm:$0xff] }
 0x138   : > { %1356 = vst [vmem:[%s11511_s27 + $0x1260] sm:$0xff] %v1355_v12  ;;  %1358 = vst [vmem:[%s11511_s27 + $0x1268] sm:$0xff] %v1357_v13  ;;  %v1361_v15 = vld [vmem:[%s11506_s26 + $0x24d8] sm:$0xff]  ;;  %v1363_v16 = vld [vmem:[%s11506_s26 + $0x2500] sm:$0xff] }
 0x139   : > { %1360 = vst [vmem:[%s11511_s27 + $0x1270] sm:$0xff] %v1359_v14  ;;  %v1365_v17 = vld [vmem:[%s11506_s26 + $0x2508] sm:$0xff]  ;;  %1362 = vst [vmem:[%s11511_s27 + $0x1278] sm:$0xff] %v1361_v15  ;;  %v1367_v18 = vld [vmem:[%s11506_s26 + $0x2510] sm:$0xff] }
 0x13a   : > { %1364 = vst [vmem:[%s11511_s27 + $0x1280] sm:$0xff] %v1363_v16  ;;  %1366 = vst [vmem:[%s11511_s27 + $0x1288] sm:$0xff] %v1365_v17  ;;  %v1369_v19 = vld [vmem:[%s11506_s26 + $0x2518] sm:$0xff]  ;;  %v1371_v20 = vld [vmem:[%s11506_s26 + $0x2540] sm:$0xff] }
 0x13b   : > { %1368 = vst [vmem:[%s11511_s27 + $0x1290] sm:$0xff] %v1367_v18  ;;  %1370 = vst [vmem:[%s11511_s27 + $0x1298] sm:$0xff] %v1369_v19  ;;  %v1373_v21 = vld [vmem:[%s11506_s26 + $0x2548] sm:$0xff]  ;;  %v1375_v22 = vld [vmem:[%s11506_s26 + $0x2550] sm:$0xff] }
 0x13c   : > { %1372 = vst [vmem:[%s11511_s27 + $0x12a0] sm:$0xff] %v1371_v20  ;;  %v1377_v23 = vld [vmem:[%s11506_s26 + $0x2558] sm:$0xff]  ;;  %1374 = vst [vmem:[%s11511_s27 + $0x12a8] sm:$0xff] %v1373_v21  ;;  %v1379_v24 = vld [vmem:[%s11506_s26 + $0x2580] sm:$0xff] }
 0x13d   : > { %1376 = vst [vmem:[%s11511_s27 + $0x12b0] sm:$0xff] %v1375_v22  ;;  %1378 = vst [vmem:[%s11511_s27 + $0x12b8] sm:$0xff] %v1377_v23  ;;  %v1381_v25 = vld [vmem:[%s11506_s26 + $0x2588] sm:$0xff]  ;;  %v1383_v26 = vld [vmem:[%s11506_s26 + $0x2590] sm:$0xff] }
 0x13e   : > { %1380 = vst [vmem:[%s11511_s27 + $0x12c0] sm:$0xff] %v1379_v24  ;;  %1382 = vst [vmem:[%s11511_s27 + $0x12c8] sm:$0xff] %v1381_v25  ;;  %v1385_v27 = vld [vmem:[%s11506_s26 + $0x2598] sm:$0xff]  ;;  %v1387_v28 = vld [vmem:[%s11506_s26 + $0x25c0] sm:$0xff] }
 0x13f   : > { %1384 = vst [vmem:[%s11511_s27 + $0x12d0] sm:$0xff] %v1383_v26  ;;  %v1389_v29 = vld [vmem:[%s11506_s26 + $0x25c8] sm:$0xff]  ;;  %1386 = vst [vmem:[%s11511_s27 + $0x12d8] sm:$0xff] %v1385_v27  ;;  %v1391_v30 = vld [vmem:[%s11506_s26 + $0x25d0] sm:$0xff] }
 0x140   : > { %1388 = vst [vmem:[%s11511_s27 + $0x12e0] sm:$0xff] %v1387_v28  ;;  %1390 = vst [vmem:[%s11511_s27 + $0x12e8] sm:$0xff] %v1389_v29  ;;  %v1393_v31 = vld [vmem:[%s11506_s26 + $0x25d8] sm:$0xff]  ;;  %v1395_v32 = vld [vmem:[%s11506_s26 + $0x2600] sm:$0xff] }
 0x141   : > { %1392 = vst [vmem:[%s11511_s27 + $0x12f0] sm:$0xff] %v1391_v30  ;;  %1394 = vst [vmem:[%s11511_s27 + $0x12f8] sm:$0xff] %v1393_v31  ;;  %v1397_v33 = vld [vmem:[%s11506_s26 + $0x2608] sm:$0xff]  ;;  %v1399_v34 = vld [vmem:[%s11506_s26 + $0x2610] sm:$0xff] }
 0x142   : > { %1396 = vst [vmem:[%s11511_s27 + $0x1300] sm:$0xff] %v1395_v32  ;;  %v1401_v35 = vld [vmem:[%s11506_s26 + $0x2618] sm:$0xff]  ;;  %1398 = vst [vmem:[%s11511_s27 + $0x1308] sm:$0xff] %v1397_v33  ;;  %v1403_v36 = vld [vmem:[%s11506_s26 + $0x2640] sm:$0xff] }
 0x143   : > { %1400 = vst [vmem:[%s11511_s27 + $0x1310] sm:$0xff] %v1399_v34  ;;  %1402 = vst [vmem:[%s11511_s27 + $0x1318] sm:$0xff] %v1401_v35  ;;  %v1405_v37 = vld [vmem:[%s11506_s26 + $0x2648] sm:$0xff]  ;;  %v1407_v38 = vld [vmem:[%s11506_s26 + $0x2650] sm:$0xff] }
 0x144   : > { %1404 = vst [vmem:[%s11511_s27 + $0x1320] sm:$0xff] %v1403_v36  ;;  %1406 = vst [vmem:[%s11511_s27 + $0x1328] sm:$0xff] %v1405_v37  ;;  %v1409_v39 = vld [vmem:[%s11506_s26 + $0x2658] sm:$0xff]  ;;  %v1411_v40 = vld [vmem:[%s11506_s26 + $0x2680] sm:$0xff] }
 0x145   : > { %1408 = vst [vmem:[%s11511_s27 + $0x1330] sm:$0xff] %v1407_v38  ;;  %v1413_v41 = vld [vmem:[%s11506_s26 + $0x2688] sm:$0xff]  ;;  %1410 = vst [vmem:[%s11511_s27 + $0x1338] sm:$0xff] %v1409_v39  ;;  %v1415_v42 = vld [vmem:[%s11506_s26 + $0x2690] sm:$0xff] }
 0x146   : > { %1412 = vst [vmem:[%s11511_s27 + $0x1340] sm:$0xff] %v1411_v40  ;;  %1414 = vst [vmem:[%s11511_s27 + $0x1348] sm:$0xff] %v1413_v41  ;;  %v1417_v43 = vld [vmem:[%s11506_s26 + $0x2698] sm:$0xff]  ;;  %v1419_v44 = vld [vmem:[%s11506_s26 + $0x26c0] sm:$0xff] }
 0x147   : > { %1416 = vst [vmem:[%s11511_s27 + $0x1350] sm:$0xff] %v1415_v42  ;;  %1418 = vst [vmem:[%s11511_s27 + $0x1358] sm:$0xff] %v1417_v43  ;;  %v1421_v45 = vld [vmem:[%s11506_s26 + $0x26c8] sm:$0xff]  ;;  %v1423_v46 = vld [vmem:[%s11506_s26 + $0x26d0] sm:$0xff] }
 0x148   : > { %1420 = vst [vmem:[%s11511_s27 + $0x1360] sm:$0xff] %v1419_v44  ;;  %v1425_v47 = vld [vmem:[%s11506_s26 + $0x26d8] sm:$0xff]  ;;  %1422 = vst [vmem:[%s11511_s27 + $0x1368] sm:$0xff] %v1421_v45  ;;  %v1427_v48 = vld [vmem:[%s11506_s26 + $0x2700] sm:$0xff] }
 0x149   : > { %1424 = vst [vmem:[%s11511_s27 + $0x1370] sm:$0xff] %v1423_v46  ;;  %1426 = vst [vmem:[%s11511_s27 + $0x1378] sm:$0xff] %v1425_v47  ;;  %v1429_v49 = vld [vmem:[%s11506_s26 + $0x2708] sm:$0xff]  ;;  %v1431_v50 = vld [vmem:[%s11506_s26 + $0x2710] sm:$0xff] }
 0x14a   : > { %1428 = vst [vmem:[%s11511_s27 + $0x1380] sm:$0xff] %v1427_v48  ;;  %1430 = vst [vmem:[%s11511_s27 + $0x1388] sm:$0xff] %v1429_v49  ;;  %v1433_v51 = vld [vmem:[%s11506_s26 + $0x2718] sm:$0xff]  ;;  %v1435_v52 = vld [vmem:[%s11506_s26 + $0x2740] sm:$0xff] }
 0x14b   : > { %1432 = vst [vmem:[%s11511_s27 + $0x1390] sm:$0xff] %v1431_v50  ;;  %v1437_v53 = vld [vmem:[%s11506_s26 + $0x2748] sm:$0xff]  ;;  %1434 = vst [vmem:[%s11511_s27 + $0x1398] sm:$0xff] %v1433_v51  ;;  %v1439_v54 = vld [vmem:[%s11506_s26 + $0x2750] sm:$0xff] }
 0x14c   : > { %1436 = vst [vmem:[%s11511_s27 + $0x13a0] sm:$0xff] %v1435_v52  ;;  %1438 = vst [vmem:[%s11511_s27 + $0x13a8] sm:$0xff] %v1437_v53  ;;  %v1441_v55 = vld [vmem:[%s11506_s26 + $0x2758] sm:$0xff]  ;;  %v1443_v56 = vld [vmem:[%s11506_s26 + $0x2780] sm:$0xff] }
 0x14d   : > { %1440 = vst [vmem:[%s11511_s27 + $0x13b0] sm:$0xff] %v1439_v54  ;;  %1442 = vst [vmem:[%s11511_s27 + $0x13b8] sm:$0xff] %v1441_v55  ;;  %v1445_v57 = vld [vmem:[%s11506_s26 + $0x2788] sm:$0xff]  ;;  %v1447_v58 = vld [vmem:[%s11506_s26 + $0x2790] sm:$0xff] }
 0x14e   : > { %1444 = vst [vmem:[%s11511_s27 + $0x13c0] sm:$0xff] %v1443_v56  ;;  %v1449_v59 = vld [vmem:[%s11506_s26 + $0x2798] sm:$0xff]  ;;  %1446 = vst [vmem:[%s11511_s27 + $0x13c8] sm:$0xff] %v1445_v57  ;;  %v1451_v60 = vld [vmem:[%s11506_s26 + $0x27c0] sm:$0xff] }
 0x14f   : > { %1448 = vst [vmem:[%s11511_s27 + $0x13d0] sm:$0xff] %v1447_v58  ;;  %1450 = vst [vmem:[%s11511_s27 + $0x13d8] sm:$0xff] %v1449_v59  ;;  %v1453_v61 = vld [vmem:[%s11506_s26 + $0x27c8] sm:$0xff]  ;;  %v1455_v62 = vld [vmem:[%s11506_s26 + $0x27d0] sm:$0xff] }
 0x150   : > { %1452 = vst [vmem:[%s11511_s27 + $0x13e0] sm:$0xff] %v1451_v60  ;;  %1454 = vst [vmem:[%s11511_s27 + $0x13e8] sm:$0xff] %v1453_v61  ;;  %v1457_v63 = vld [vmem:[%s11506_s26 + $0x27d8] sm:$0xff]  ;;  %v1459_v0 = vld [vmem:[%s11506_s26 + $0x2800] sm:$0xff] }
 0x151   : > { %1456 = vst [vmem:[%s11511_s27 + $0x13f0] sm:$0xff] %v1455_v62  ;;  %v1461_v1 = vld [vmem:[%s11506_s26 + $0x2808] sm:$0xff]  ;;  %1458 = vst [vmem:[%s11511_s27 + $0x13f8] sm:$0xff] %v1457_v63  ;;  %v1463_v2 = vld [vmem:[%s11506_s26 + $0x2810] sm:$0xff] }
 0x152   : > { %1460 = vst [vmem:[%s11511_s27 + $0x1400] sm:$0xff] %v1459_v0  ;;  %1462 = vst [vmem:[%s11511_s27 + $0x1408] sm:$0xff] %v1461_v1  ;;  %v1465_v3 = vld [vmem:[%s11506_s26 + $0x2818] sm:$0xff]  ;;  %v1467_v4 = vld [vmem:[%s11506_s26 + $0x2840] sm:$0xff] }
 0x153   : > { %1464 = vst [vmem:[%s11511_s27 + $0x1410] sm:$0xff] %v1463_v2  ;;  %1466 = vst [vmem:[%s11511_s27 + $0x1418] sm:$0xff] %v1465_v3  ;;  %v1469_v5 = vld [vmem:[%s11506_s26 + $0x2848] sm:$0xff]  ;;  %v1471_v6 = vld [vmem:[%s11506_s26 + $0x2850] sm:$0xff] }
 0x154   : > { %1468 = vst [vmem:[%s11511_s27 + $0x1420] sm:$0xff] %v1467_v4  ;;  %v1473_v7 = vld [vmem:[%s11506_s26 + $0x2858] sm:$0xff]  ;;  %1470 = vst [vmem:[%s11511_s27 + $0x1428] sm:$0xff] %v1469_v5  ;;  %v1475_v8 = vld [vmem:[%s11506_s26 + $0x2880] sm:$0xff] }
 0x155   : > { %1472 = vst [vmem:[%s11511_s27 + $0x1430] sm:$0xff] %v1471_v6  ;;  %1474 = vst [vmem:[%s11511_s27 + $0x1438] sm:$0xff] %v1473_v7  ;;  %v1477_v9 = vld [vmem:[%s11506_s26 + $0x2888] sm:$0xff]  ;;  %v1479_v10 = vld [vmem:[%s11506_s26 + $0x2890] sm:$0xff] }
 0x156   : > { %1476 = vst [vmem:[%s11511_s27 + $0x1440] sm:$0xff] %v1475_v8  ;;  %1478 = vst [vmem:[%s11511_s27 + $0x1448] sm:$0xff] %v1477_v9  ;;  %v1481_v11 = vld [vmem:[%s11506_s26 + $0x2898] sm:$0xff]  ;;  %v1483_v12 = vld [vmem:[%s11506_s26 + $0x28c0] sm:$0xff] }
 0x157   : > { %1480 = vst [vmem:[%s11511_s27 + $0x1450] sm:$0xff] %v1479_v10  ;;  %v1485_v13 = vld [vmem:[%s11506_s26 + $0x28c8] sm:$0xff]  ;;  %1482 = vst [vmem:[%s11511_s27 + $0x1458] sm:$0xff] %v1481_v11  ;;  %v1487_v14 = vld [vmem:[%s11506_s26 + $0x28d0] sm:$0xff] }
 0x158   : > { %1484 = vst [vmem:[%s11511_s27 + $0x1460] sm:$0xff] %v1483_v12  ;;  %1486 = vst [vmem:[%s11511_s27 + $0x1468] sm:$0xff] %v1485_v13  ;;  %v1489_v15 = vld [vmem:[%s11506_s26 + $0x28d8] sm:$0xff]  ;;  %v1491_v16 = vld [vmem:[%s11506_s26 + $0x2900] sm:$0xff] }
 0x159   : > { %1488 = vst [vmem:[%s11511_s27 + $0x1470] sm:$0xff] %v1487_v14  ;;  %1490 = vst [vmem:[%s11511_s27 + $0x1478] sm:$0xff] %v1489_v15  ;;  %v1493_v17 = vld [vmem:[%s11506_s26 + $0x2908] sm:$0xff]  ;;  %v1495_v18 = vld [vmem:[%s11506_s26 + $0x2910] sm:$0xff] }
 0x15a   : > { %1492 = vst [vmem:[%s11511_s27 + $0x1480] sm:$0xff] %v1491_v16  ;;  %v1497_v19 = vld [vmem:[%s11506_s26 + $0x2918] sm:$0xff]  ;;  %1494 = vst [vmem:[%s11511_s27 + $0x1488] sm:$0xff] %v1493_v17  ;;  %v1499_v20 = vld [vmem:[%s11506_s26 + $0x2940] sm:$0xff] }
 0x15b   : > { %1496 = vst [vmem:[%s11511_s27 + $0x1490] sm:$0xff] %v1495_v18  ;;  %1498 = vst [vmem:[%s11511_s27 + $0x1498] sm:$0xff] %v1497_v19  ;;  %v1501_v21 = vld [vmem:[%s11506_s26 + $0x2948] sm:$0xff]  ;;  %v1503_v22 = vld [vmem:[%s11506_s26 + $0x2950] sm:$0xff] }
 0x15c   : > { %1500 = vst [vmem:[%s11511_s27 + $0x14a0] sm:$0xff] %v1499_v20  ;;  %1502 = vst [vmem:[%s11511_s27 + $0x14a8] sm:$0xff] %v1501_v21  ;;  %v1505_v23 = vld [vmem:[%s11506_s26 + $0x2958] sm:$0xff]  ;;  %v1507_v24 = vld [vmem:[%s11506_s26 + $0x2980] sm:$0xff] }
 0x15d   : > { %1504 = vst [vmem:[%s11511_s27 + $0x14b0] sm:$0xff] %v1503_v22  ;;  %v1509_v25 = vld [vmem:[%s11506_s26 + $0x2988] sm:$0xff]  ;;  %1506 = vst [vmem:[%s11511_s27 + $0x14b8] sm:$0xff] %v1505_v23  ;;  %v1511_v26 = vld [vmem:[%s11506_s26 + $0x2990] sm:$0xff] }
 0x15e   : > { %1508 = vst [vmem:[%s11511_s27 + $0x14c0] sm:$0xff] %v1507_v24  ;;  %1510 = vst [vmem:[%s11511_s27 + $0x14c8] sm:$0xff] %v1509_v25  ;;  %v1513_v27 = vld [vmem:[%s11506_s26 + $0x2998] sm:$0xff]  ;;  %v1515_v28 = vld [vmem:[%s11506_s26 + $0x29c0] sm:$0xff] }
 0x15f   : > { %1512 = vst [vmem:[%s11511_s27 + $0x14d0] sm:$0xff] %v1511_v26  ;;  %1514 = vst [vmem:[%s11511_s27 + $0x14d8] sm:$0xff] %v1513_v27  ;;  %v1517_v29 = vld [vmem:[%s11506_s26 + $0x29c8] sm:$0xff]  ;;  %v1519_v30 = vld [vmem:[%s11506_s26 + $0x29d0] sm:$0xff] }
 0x160   : > { %1516 = vst [vmem:[%s11511_s27 + $0x14e0] sm:$0xff] %v1515_v28  ;;  %v1521_v31 = vld [vmem:[%s11506_s26 + $0x29d8] sm:$0xff]  ;;  %1518 = vst [vmem:[%s11511_s27 + $0x14e8] sm:$0xff] %v1517_v29  ;;  %v1523_v32 = vld [vmem:[%s11506_s26 + $0x2a00] sm:$0xff] }
 0x161   : > { %1520 = vst [vmem:[%s11511_s27 + $0x14f0] sm:$0xff] %v1519_v30  ;;  %1522 = vst [vmem:[%s11511_s27 + $0x14f8] sm:$0xff] %v1521_v31  ;;  %v1525_v33 = vld [vmem:[%s11506_s26 + $0x2a08] sm:$0xff]  ;;  %v1527_v34 = vld [vmem:[%s11506_s26 + $0x2a10] sm:$0xff] }
 0x162   : > { %1524 = vst [vmem:[%s11511_s27 + $0x1500] sm:$0xff] %v1523_v32  ;;  %1526 = vst [vmem:[%s11511_s27 + $0x1508] sm:$0xff] %v1525_v33  ;;  %v1529_v35 = vld [vmem:[%s11506_s26 + $0x2a18] sm:$0xff]  ;;  %v1531_v36 = vld [vmem:[%s11506_s26 + $0x2a40] sm:$0xff] }
 0x163   : > { %1528 = vst [vmem:[%s11511_s27 + $0x1510] sm:$0xff] %v1527_v34  ;;  %v1533_v37 = vld [vmem:[%s11506_s26 + $0x2a48] sm:$0xff]  ;;  %1530 = vst [vmem:[%s11511_s27 + $0x1518] sm:$0xff] %v1529_v35  ;;  %v1535_v38 = vld [vmem:[%s11506_s26 + $0x2a50] sm:$0xff] }
 0x164   : > { %1532 = vst [vmem:[%s11511_s27 + $0x1520] sm:$0xff] %v1531_v36  ;;  %1534 = vst [vmem:[%s11511_s27 + $0x1528] sm:$0xff] %v1533_v37  ;;  %v1537_v39 = vld [vmem:[%s11506_s26 + $0x2a58] sm:$0xff]  ;;  %v1539_v40 = vld [vmem:[%s11506_s26 + $0x2a80] sm:$0xff] }
 0x165   : > { %1536 = vst [vmem:[%s11511_s27 + $0x1530] sm:$0xff] %v1535_v38  ;;  %1538 = vst [vmem:[%s11511_s27 + $0x1538] sm:$0xff] %v1537_v39  ;;  %v1541_v41 = vld [vmem:[%s11506_s26 + $0x2a88] sm:$0xff]  ;;  %v1543_v42 = vld [vmem:[%s11506_s26 + $0x2a90] sm:$0xff] }
 0x166   : > { %1540 = vst [vmem:[%s11511_s27 + $0x1540] sm:$0xff] %v1539_v40  ;;  %v1545_v43 = vld [vmem:[%s11506_s26 + $0x2a98] sm:$0xff]  ;;  %1542 = vst [vmem:[%s11511_s27 + $0x1548] sm:$0xff] %v1541_v41  ;;  %v1547_v44 = vld [vmem:[%s11506_s26 + $0x2ac0] sm:$0xff] }
 0x167   : > { %1544 = vst [vmem:[%s11511_s27 + $0x1550] sm:$0xff] %v1543_v42  ;;  %1546 = vst [vmem:[%s11511_s27 + $0x1558] sm:$0xff] %v1545_v43  ;;  %v1549_v45 = vld [vmem:[%s11506_s26 + $0x2ac8] sm:$0xff]  ;;  %v1551_v46 = vld [vmem:[%s11506_s26 + $0x2ad0] sm:$0xff] }
 0x168   : > { %1548 = vst [vmem:[%s11511_s27 + $0x1560] sm:$0xff] %v1547_v44  ;;  %1550 = vst [vmem:[%s11511_s27 + $0x1568] sm:$0xff] %v1549_v45  ;;  %v1553_v47 = vld [vmem:[%s11506_s26 + $0x2ad8] sm:$0xff]  ;;  %v1555_v48 = vld [vmem:[%s11506_s26 + $0x2b00] sm:$0xff] }
 0x169   : > { %1552 = vst [vmem:[%s11511_s27 + $0x1570] sm:$0xff] %v1551_v46  ;;  %v1557_v49 = vld [vmem:[%s11506_s26 + $0x2b08] sm:$0xff]  ;;  %1554 = vst [vmem:[%s11511_s27 + $0x1578] sm:$0xff] %v1553_v47  ;;  %v1559_v50 = vld [vmem:[%s11506_s26 + $0x2b10] sm:$0xff] }
 0x16a   : > { %1556 = vst [vmem:[%s11511_s27 + $0x1580] sm:$0xff] %v1555_v48  ;;  %1558 = vst [vmem:[%s11511_s27 + $0x1588] sm:$0xff] %v1557_v49  ;;  %v1561_v51 = vld [vmem:[%s11506_s26 + $0x2b18] sm:$0xff]  ;;  %v1563_v52 = vld [vmem:[%s11506_s26 + $0x2b40] sm:$0xff] }
 0x16b   : > { %1560 = vst [vmem:[%s11511_s27 + $0x1590] sm:$0xff] %v1559_v50  ;;  %1562 = vst [vmem:[%s11511_s27 + $0x1598] sm:$0xff] %v1561_v51  ;;  %v1565_v53 = vld [vmem:[%s11506_s26 + $0x2b48] sm:$0xff]  ;;  %v1567_v54 = vld [vmem:[%s11506_s26 + $0x2b50] sm:$0xff] }
 0x16c   : > { %1564 = vst [vmem:[%s11511_s27 + $0x15a0] sm:$0xff] %v1563_v52  ;;  %v1569_v55 = vld [vmem:[%s11506_s26 + $0x2b58] sm:$0xff]  ;;  %1566 = vst [vmem:[%s11511_s27 + $0x15a8] sm:$0xff] %v1565_v53  ;;  %v1571_v56 = vld [vmem:[%s11506_s26 + $0x2b80] sm:$0xff] }
 0x16d   : > { %1568 = vst [vmem:[%s11511_s27 + $0x15b0] sm:$0xff] %v1567_v54  ;;  %1570 = vst [vmem:[%s11511_s27 + $0x15b8] sm:$0xff] %v1569_v55  ;;  %v1573_v57 = vld [vmem:[%s11506_s26 + $0x2b88] sm:$0xff]  ;;  %v1575_v58 = vld [vmem:[%s11506_s26 + $0x2b90] sm:$0xff] }
 0x16e   : > { %1572 = vst [vmem:[%s11511_s27 + $0x15c0] sm:$0xff] %v1571_v56  ;;  %1574 = vst [vmem:[%s11511_s27 + $0x15c8] sm:$0xff] %v1573_v57  ;;  %v1577_v59 = vld [vmem:[%s11506_s26 + $0x2b98] sm:$0xff]  ;;  %v1579_v60 = vld [vmem:[%s11506_s26 + $0x2bc0] sm:$0xff] }
 0x16f   : > { %1576 = vst [vmem:[%s11511_s27 + $0x15d0] sm:$0xff] %v1575_v58  ;;  %v1581_v61 = vld [vmem:[%s11506_s26 + $0x2bc8] sm:$0xff]  ;;  %1578 = vst [vmem:[%s11511_s27 + $0x15d8] sm:$0xff] %v1577_v59  ;;  %v1583_v62 = vld [vmem:[%s11506_s26 + $0x2bd0] sm:$0xff] }
 0x170   : > { %1580 = vst [vmem:[%s11511_s27 + $0x15e0] sm:$0xff] %v1579_v60  ;;  %1582 = vst [vmem:[%s11511_s27 + $0x15e8] sm:$0xff] %v1581_v61  ;;  %v1585_v63 = vld [vmem:[%s11506_s26 + $0x2bd8] sm:$0xff]  ;;  %v1587_v0 = vld [vmem:[%s11506_s26 + $0x2c00] sm:$0xff] }
 0x171   : > { %1584 = vst [vmem:[%s11511_s27 + $0x15f0] sm:$0xff] %v1583_v62  ;;  %1586 = vst [vmem:[%s11511_s27 + $0x15f8] sm:$0xff] %v1585_v63  ;;  %v1589_v1 = vld [vmem:[%s11506_s26 + $0x2c08] sm:$0xff]  ;;  %v1591_v2 = vld [vmem:[%s11506_s26 + $0x2c10] sm:$0xff] }
 0x172   : > { %1588 = vst [vmem:[%s11511_s27 + $0x1600] sm:$0xff] %v1587_v0  ;;  %v1593_v3 = vld [vmem:[%s11506_s26 + $0x2c18] sm:$0xff]  ;;  %1590 = vst [vmem:[%s11511_s27 + $0x1608] sm:$0xff] %v1589_v1  ;;  %v1595_v4 = vld [vmem:[%s11506_s26 + $0x2c40] sm:$0xff] }
 0x173   : > { %1592 = vst [vmem:[%s11511_s27 + $0x1610] sm:$0xff] %v1591_v2  ;;  %1594 = vst [vmem:[%s11511_s27 + $0x1618] sm:$0xff] %v1593_v3  ;;  %v1597_v5 = vld [vmem:[%s11506_s26 + $0x2c48] sm:$0xff]  ;;  %v1599_v6 = vld [vmem:[%s11506_s26 + $0x2c50] sm:$0xff] }
 0x174   : > { %1596 = vst [vmem:[%s11511_s27 + $0x1620] sm:$0xff] %v1595_v4  ;;  %1598 = vst [vmem:[%s11511_s27 + $0x1628] sm:$0xff] %v1597_v5  ;;  %v1601_v7 = vld [vmem:[%s11506_s26 + $0x2c58] sm:$0xff]  ;;  %v1603_v8 = vld [vmem:[%s11506_s26 + $0x2c80] sm:$0xff] }
 0x175   : > { %1600 = vst [vmem:[%s11511_s27 + $0x1630] sm:$0xff] %v1599_v6  ;;  %v1605_v9 = vld [vmem:[%s11506_s26 + $0x2c88] sm:$0xff]  ;;  %1602 = vst [vmem:[%s11511_s27 + $0x1638] sm:$0xff] %v1601_v7  ;;  %v1607_v10 = vld [vmem:[%s11506_s26 + $0x2c90] sm:$0xff] }
 0x176   : > { %1604 = vst [vmem:[%s11511_s27 + $0x1640] sm:$0xff] %v1603_v8  ;;  %1606 = vst [vmem:[%s11511_s27 + $0x1648] sm:$0xff] %v1605_v9  ;;  %v1609_v11 = vld [vmem:[%s11506_s26 + $0x2c98] sm:$0xff]  ;;  %v1611_v12 = vld [vmem:[%s11506_s26 + $0x2cc0] sm:$0xff] }
 0x177   : > { %1608 = vst [vmem:[%s11511_s27 + $0x1650] sm:$0xff] %v1607_v10  ;;  %1610 = vst [vmem:[%s11511_s27 + $0x1658] sm:$0xff] %v1609_v11  ;;  %v1613_v13 = vld [vmem:[%s11506_s26 + $0x2cc8] sm:$0xff]  ;;  %v1615_v14 = vld [vmem:[%s11506_s26 + $0x2cd0] sm:$0xff] }
 0x178   : > { %1612 = vst [vmem:[%s11511_s27 + $0x1660] sm:$0xff] %v1611_v12  ;;  %v1617_v15 = vld [vmem:[%s11506_s26 + $0x2cd8] sm:$0xff]  ;;  %1614 = vst [vmem:[%s11511_s27 + $0x1668] sm:$0xff] %v1613_v13  ;;  %v1619_v16 = vld [vmem:[%s11506_s26 + $0x2d00] sm:$0xff] }
 0x179   : > { %1616 = vst [vmem:[%s11511_s27 + $0x1670] sm:$0xff] %v1615_v14  ;;  %1618 = vst [vmem:[%s11511_s27 + $0x1678] sm:$0xff] %v1617_v15  ;;  %v1621_v17 = vld [vmem:[%s11506_s26 + $0x2d08] sm:$0xff]  ;;  %v1623_v18 = vld [vmem:[%s11506_s26 + $0x2d10] sm:$0xff] }
 0x17a   : > { %1620 = vst [vmem:[%s11511_s27 + $0x1680] sm:$0xff] %v1619_v16  ;;  %1622 = vst [vmem:[%s11511_s27 + $0x1688] sm:$0xff] %v1621_v17  ;;  %v1625_v19 = vld [vmem:[%s11506_s26 + $0x2d18] sm:$0xff]  ;;  %v1627_v20 = vld [vmem:[%s11506_s26 + $0x2d40] sm:$0xff] }
 0x17b   : > { %1624 = vst [vmem:[%s11511_s27 + $0x1690] sm:$0xff] %v1623_v18  ;;  %v1629_v21 = vld [vmem:[%s11506_s26 + $0x2d48] sm:$0xff]  ;;  %1626 = vst [vmem:[%s11511_s27 + $0x1698] sm:$0xff] %v1625_v19  ;;  %v1631_v22 = vld [vmem:[%s11506_s26 + $0x2d50] sm:$0xff] }
 0x17c   : > { %1628 = vst [vmem:[%s11511_s27 + $0x16a0] sm:$0xff] %v1627_v20  ;;  %1630 = vst [vmem:[%s11511_s27 + $0x16a8] sm:$0xff] %v1629_v21  ;;  %v1633_v23 = vld [vmem:[%s11506_s26 + $0x2d58] sm:$0xff]  ;;  %v1635_v24 = vld [vmem:[%s11506_s26 + $0x2d80] sm:$0xff] }
 0x17d   : > { %1632 = vst [vmem:[%s11511_s27 + $0x16b0] sm:$0xff] %v1631_v22  ;;  %1634 = vst [vmem:[%s11511_s27 + $0x16b8] sm:$0xff] %v1633_v23  ;;  %v1637_v25 = vld [vmem:[%s11506_s26 + $0x2d88] sm:$0xff]  ;;  %v1639_v26 = vld [vmem:[%s11506_s26 + $0x2d90] sm:$0xff] }
 0x17e   : > { %1636 = vst [vmem:[%s11511_s27 + $0x16c0] sm:$0xff] %v1635_v24  ;;  %v1641_v27 = vld [vmem:[%s11506_s26 + $0x2d98] sm:$0xff]  ;;  %1638 = vst [vmem:[%s11511_s27 + $0x16c8] sm:$0xff] %v1637_v25  ;;  %v1643_v28 = vld [vmem:[%s11506_s26 + $0x2dc0] sm:$0xff] }
 0x17f   : > { %1640 = vst [vmem:[%s11511_s27 + $0x16d0] sm:$0xff] %v1639_v26  ;;  %1642 = vst [vmem:[%s11511_s27 + $0x16d8] sm:$0xff] %v1641_v27  ;;  %v1645_v29 = vld [vmem:[%s11506_s26 + $0x2dc8] sm:$0xff]  ;;  %v1647_v30 = vld [vmem:[%s11506_s26 + $0x2dd0] sm:$0xff] }
 0x180   : > { %1644 = vst [vmem:[%s11511_s27 + $0x16e0] sm:$0xff] %v1643_v28  ;;  %1646 = vst [vmem:[%s11511_s27 + $0x16e8] sm:$0xff] %v1645_v29  ;;  %v1649_v31 = vld [vmem:[%s11506_s26 + $0x2dd8] sm:$0xff]  ;;  %v1651_v32 = vld [vmem:[%s11506_s26 + $0x2e00] sm:$0xff] }
 0x181   : > { %1648 = vst [vmem:[%s11511_s27 + $0x16f0] sm:$0xff] %v1647_v30  ;;  %v1653_v33 = vld [vmem:[%s11506_s26 + $0x2e08] sm:$0xff]  ;;  %1650 = vst [vmem:[%s11511_s27 + $0x16f8] sm:$0xff] %v1649_v31  ;;  %v1655_v34 = vld [vmem:[%s11506_s26 + $0x2e10] sm:$0xff] }
 0x182   : > { %1652 = vst [vmem:[%s11511_s27 + $0x1700] sm:$0xff] %v1651_v32  ;;  %1654 = vst [vmem:[%s11511_s27 + $0x1708] sm:$0xff] %v1653_v33  ;;  %v1657_v35 = vld [vmem:[%s11506_s26 + $0x2e18] sm:$0xff]  ;;  %v1659_v36 = vld [vmem:[%s11506_s26 + $0x2e40] sm:$0xff] }
 0x183   : > { %1656 = vst [vmem:[%s11511_s27 + $0x1710] sm:$0xff] %v1655_v34  ;;  %1658 = vst [vmem:[%s11511_s27 + $0x1718] sm:$0xff] %v1657_v35  ;;  %v1661_v37 = vld [vmem:[%s11506_s26 + $0x2e48] sm:$0xff]  ;;  %v1663_v38 = vld [vmem:[%s11506_s26 + $0x2e50] sm:$0xff] }
 0x184   : > { %1660 = vst [vmem:[%s11511_s27 + $0x1720] sm:$0xff] %v1659_v36  ;;  %v1665_v39 = vld [vmem:[%s11506_s26 + $0x2e58] sm:$0xff]  ;;  %1662 = vst [vmem:[%s11511_s27 + $0x1728] sm:$0xff] %v1661_v37  ;;  %v1667_v40 = vld [vmem:[%s11506_s26 + $0x2e80] sm:$0xff] }
 0x185   : > { %1664 = vst [vmem:[%s11511_s27 + $0x1730] sm:$0xff] %v1663_v38  ;;  %1666 = vst [vmem:[%s11511_s27 + $0x1738] sm:$0xff] %v1665_v39  ;;  %v1669_v41 = vld [vmem:[%s11506_s26 + $0x2e88] sm:$0xff]  ;;  %v1671_v42 = vld [vmem:[%s11506_s26 + $0x2e90] sm:$0xff] }
 0x186   : > { %1668 = vst [vmem:[%s11511_s27 + $0x1740] sm:$0xff] %v1667_v40  ;;  %1670 = vst [vmem:[%s11511_s27 + $0x1748] sm:$0xff] %v1669_v41  ;;  %v1673_v43 = vld [vmem:[%s11506_s26 + $0x2e98] sm:$0xff]  ;;  %v1675_v44 = vld [vmem:[%s11506_s26 + $0x2ec0] sm:$0xff] }
 0x187   : > { %1672 = vst [vmem:[%s11511_s27 + $0x1750] sm:$0xff] %v1671_v42  ;;  %v1677_v45 = vld [vmem:[%s11506_s26 + $0x2ec8] sm:$0xff]  ;;  %1674 = vst [vmem:[%s11511_s27 + $0x1758] sm:$0xff] %v1673_v43  ;;  %v1679_v46 = vld [vmem:[%s11506_s26 + $0x2ed0] sm:$0xff] }
 0x188   : > { %1676 = vst [vmem:[%s11511_s27 + $0x1760] sm:$0xff] %v1675_v44  ;;  %1678 = vst [vmem:[%s11511_s27 + $0x1768] sm:$0xff] %v1677_v45  ;;  %v1681_v47 = vld [vmem:[%s11506_s26 + $0x2ed8] sm:$0xff]  ;;  %v1683_v48 = vld [vmem:[%s11506_s26 + $0x2f00] sm:$0xff] }
 0x189   : > { %1680 = vst [vmem:[%s11511_s27 + $0x1770] sm:$0xff] %v1679_v46  ;;  %1682 = vst [vmem:[%s11511_s27 + $0x1778] sm:$0xff] %v1681_v47  ;;  %v1685_v49 = vld [vmem:[%s11506_s26 + $0x2f08] sm:$0xff]  ;;  %v1687_v50 = vld [vmem:[%s11506_s26 + $0x2f10] sm:$0xff] }
 0x18a   : > { %1684 = vst [vmem:[%s11511_s27 + $0x1780] sm:$0xff] %v1683_v48  ;;  %v1689_v51 = vld [vmem:[%s11506_s26 + $0x2f18] sm:$0xff]  ;;  %1686 = vst [vmem:[%s11511_s27 + $0x1788] sm:$0xff] %v1685_v49  ;;  %v1691_v52 = vld [vmem:[%s11506_s26 + $0x2f40] sm:$0xff] }
 0x18b   : > { %1688 = vst [vmem:[%s11511_s27 + $0x1790] sm:$0xff] %v1687_v50  ;;  %1690 = vst [vmem:[%s11511_s27 + $0x1798] sm:$0xff] %v1689_v51  ;;  %v1693_v53 = vld [vmem:[%s11506_s26 + $0x2f48] sm:$0xff]  ;;  %v1695_v54 = vld [vmem:[%s11506_s26 + $0x2f50] sm:$0xff] }
 0x18c   : > { %1692 = vst [vmem:[%s11511_s27 + $0x17a0] sm:$0xff] %v1691_v52  ;;  %1694 = vst [vmem:[%s11511_s27 + $0x17a8] sm:$0xff] %v1693_v53  ;;  %v1697_v55 = vld [vmem:[%s11506_s26 + $0x2f58] sm:$0xff]  ;;  %v1699_v56 = vld [vmem:[%s11506_s26 + $0x2f80] sm:$0xff] }
 0x18d   : > { %1696 = vst [vmem:[%s11511_s27 + $0x17b0] sm:$0xff] %v1695_v54  ;;  %v1701_v57 = vld [vmem:[%s11506_s26 + $0x2f88] sm:$0xff]  ;;  %1698 = vst [vmem:[%s11511_s27 + $0x17b8] sm:$0xff] %v1697_v55  ;;  %v1703_v58 = vld [vmem:[%s11506_s26 + $0x2f90] sm:$0xff] }
 0x18e   : > { %1700 = vst [vmem:[%s11511_s27 + $0x17c0] sm:$0xff] %v1699_v56  ;;  %1702 = vst [vmem:[%s11511_s27 + $0x17c8] sm:$0xff] %v1701_v57  ;;  %v1705_v59 = vld [vmem:[%s11506_s26 + $0x2f98] sm:$0xff]  ;;  %v1707_v60 = vld [vmem:[%s11506_s26 + $0x2fc0] sm:$0xff] }
 0x18f   : > { %1704 = vst [vmem:[%s11511_s27 + $0x17d0] sm:$0xff] %v1703_v58  ;;  %1706 = vst [vmem:[%s11511_s27 + $0x17d8] sm:$0xff] %v1705_v59  ;;  %v1709_v61 = vld [vmem:[%s11506_s26 + $0x2fc8] sm:$0xff]  ;;  %v1711_v62 = vld [vmem:[%s11506_s26 + $0x2fd0] sm:$0xff] }
 0x190   : > { %1708 = vst [vmem:[%s11511_s27 + $0x17e0] sm:$0xff] %v1707_v60  ;;  %v1713_v63 = vld [vmem:[%s11506_s26 + $0x2fd8] sm:$0xff]  ;;  %1710 = vst [vmem:[%s11511_s27 + $0x17e8] sm:$0xff] %v1709_v61  ;;  %v1715_v0 = vld [vmem:[%s11506_s26 + $0x3000] sm:$0xff] }
 0x191   : > { %1712 = vst [vmem:[%s11511_s27 + $0x17f0] sm:$0xff] %v1711_v62  ;;  %1714 = vst [vmem:[%s11511_s27 + $0x17f8] sm:$0xff] %v1713_v63  ;;  %v1717_v1 = vld [vmem:[%s11506_s26 + $0x3008] sm:$0xff]  ;;  %v1719_v2 = vld [vmem:[%s11506_s26 + $0x3010] sm:$0xff] }
 0x192   : > { %1716 = vst [vmem:[%s11511_s27 + $0x1800] sm:$0xff] %v1715_v0  ;;  %1718 = vst [vmem:[%s11511_s27 + $0x1808] sm:$0xff] %v1717_v1  ;;  %v1721_v3 = vld [vmem:[%s11506_s26 + $0x3018] sm:$0xff]  ;;  %v1723_v4 = vld [vmem:[%s11506_s26 + $0x3040] sm:$0xff] }
 0x193   : > { %1720 = vst [vmem:[%s11511_s27 + $0x1810] sm:$0xff] %v1719_v2  ;;  %v1725_v5 = vld [vmem:[%s11506_s26 + $0x3048] sm:$0xff]  ;;  %1722 = vst [vmem:[%s11511_s27 + $0x1818] sm:$0xff] %v1721_v3  ;;  %v1727_v6 = vld [vmem:[%s11506_s26 + $0x3050] sm:$0xff] }
 0x194   : > { %1724 = vst [vmem:[%s11511_s27 + $0x1820] sm:$0xff] %v1723_v4  ;;  %1726 = vst [vmem:[%s11511_s27 + $0x1828] sm:$0xff] %v1725_v5  ;;  %v1729_v7 = vld [vmem:[%s11506_s26 + $0x3058] sm:$0xff]  ;;  %v1731_v8 = vld [vmem:[%s11506_s26 + $0x3080] sm:$0xff] }
 0x195   : > { %1728 = vst [vmem:[%s11511_s27 + $0x1830] sm:$0xff] %v1727_v6  ;;  %1730 = vst [vmem:[%s11511_s27 + $0x1838] sm:$0xff] %v1729_v7  ;;  %v1733_v9 = vld [vmem:[%s11506_s26 + $0x3088] sm:$0xff]  ;;  %v1735_v10 = vld [vmem:[%s11506_s26 + $0x3090] sm:$0xff] }
 0x196   : > { %1732 = vst [vmem:[%s11511_s27 + $0x1840] sm:$0xff] %v1731_v8  ;;  %v1737_v11 = vld [vmem:[%s11506_s26 + $0x3098] sm:$0xff]  ;;  %1734 = vst [vmem:[%s11511_s27 + $0x1848] sm:$0xff] %v1733_v9  ;;  %v1739_v12 = vld [vmem:[%s11506_s26 + $0x30c0] sm:$0xff] }
 0x197   : > { %1736 = vst [vmem:[%s11511_s27 + $0x1850] sm:$0xff] %v1735_v10  ;;  %1738 = vst [vmem:[%s11511_s27 + $0x1858] sm:$0xff] %v1737_v11  ;;  %v1741_v13 = vld [vmem:[%s11506_s26 + $0x30c8] sm:$0xff]  ;;  %v1743_v14 = vld [vmem:[%s11506_s26 + $0x30d0] sm:$0xff] }
 0x198   : > { %1740 = vst [vmem:[%s11511_s27 + $0x1860] sm:$0xff] %v1739_v12  ;;  %1742 = vst [vmem:[%s11511_s27 + $0x1868] sm:$0xff] %v1741_v13  ;;  %v1745_v15 = vld [vmem:[%s11506_s26 + $0x30d8] sm:$0xff]  ;;  %v1747_v16 = vld [vmem:[%s11506_s26 + $0x3100] sm:$0xff] }
 0x199   : > { %1744 = vst [vmem:[%s11511_s27 + $0x1870] sm:$0xff] %v1743_v14  ;;  %v1749_v17 = vld [vmem:[%s11506_s26 + $0x3108] sm:$0xff]  ;;  %1746 = vst [vmem:[%s11511_s27 + $0x1878] sm:$0xff] %v1745_v15  ;;  %v1751_v18 = vld [vmem:[%s11506_s26 + $0x3110] sm:$0xff] }
 0x19a   : > { %1748 = vst [vmem:[%s11511_s27 + $0x1880] sm:$0xff] %v1747_v16  ;;  %1750 = vst [vmem:[%s11511_s27 + $0x1888] sm:$0xff] %v1749_v17  ;;  %v1753_v19 = vld [vmem:[%s11506_s26 + $0x3118] sm:$0xff]  ;;  %v1755_v20 = vld [vmem:[%s11506_s26 + $0x3140] sm:$0xff] }
 0x19b   : > { %1752 = vst [vmem:[%s11511_s27 + $0x1890] sm:$0xff] %v1751_v18  ;;  %1754 = vst [vmem:[%s11511_s27 + $0x1898] sm:$0xff] %v1753_v19  ;;  %v1757_v21 = vld [vmem:[%s11506_s26 + $0x3148] sm:$0xff]  ;;  %v1759_v22 = vld [vmem:[%s11506_s26 + $0x3150] sm:$0xff] }
 0x19c   : > { %1756 = vst [vmem:[%s11511_s27 + $0x18a0] sm:$0xff] %v1755_v20  ;;  %v1761_v23 = vld [vmem:[%s11506_s26 + $0x3158] sm:$0xff]  ;;  %1758 = vst [vmem:[%s11511_s27 + $0x18a8] sm:$0xff] %v1757_v21  ;;  %v1763_v24 = vld [vmem:[%s11506_s26 + $0x3180] sm:$0xff] }
 0x19d   : > { %1760 = vst [vmem:[%s11511_s27 + $0x18b0] sm:$0xff] %v1759_v22  ;;  %1762 = vst [vmem:[%s11511_s27 + $0x18b8] sm:$0xff] %v1761_v23  ;;  %v1765_v25 = vld [vmem:[%s11506_s26 + $0x3188] sm:$0xff]  ;;  %v1767_v26 = vld [vmem:[%s11506_s26 + $0x3190] sm:$0xff] }
 0x19e   : > { %1764 = vst [vmem:[%s11511_s27 + $0x18c0] sm:$0xff] %v1763_v24  ;;  %1766 = vst [vmem:[%s11511_s27 + $0x18c8] sm:$0xff] %v1765_v25  ;;  %v1769_v27 = vld [vmem:[%s11506_s26 + $0x3198] sm:$0xff]  ;;  %v1771_v28 = vld [vmem:[%s11506_s26 + $0x31c0] sm:$0xff] }
 0x19f   : > { %1768 = vst [vmem:[%s11511_s27 + $0x18d0] sm:$0xff] %v1767_v26  ;;  %v1773_v29 = vld [vmem:[%s11506_s26 + $0x31c8] sm:$0xff]  ;;  %1770 = vst [vmem:[%s11511_s27 + $0x18d8] sm:$0xff] %v1769_v27  ;;  %v1775_v30 = vld [vmem:[%s11506_s26 + $0x31d0] sm:$0xff] }
 0x1a0   : > { %1772 = vst [vmem:[%s11511_s27 + $0x18e0] sm:$0xff] %v1771_v28  ;;  %1774 = vst [vmem:[%s11511_s27 + $0x18e8] sm:$0xff] %v1773_v29  ;;  %v1777_v31 = vld [vmem:[%s11506_s26 + $0x31d8] sm:$0xff]  ;;  %v1779_v32 = vld [vmem:[%s11506_s26 + $0x3200] sm:$0xff] }
 0x1a1   : > { %1776 = vst [vmem:[%s11511_s27 + $0x18f0] sm:$0xff] %v1775_v30  ;;  %1778 = vst [vmem:[%s11511_s27 + $0x18f8] sm:$0xff] %v1777_v31  ;;  %v1781_v33 = vld [vmem:[%s11506_s26 + $0x3208] sm:$0xff]  ;;  %v1783_v34 = vld [vmem:[%s11506_s26 + $0x3210] sm:$0xff] }
 0x1a2   : > { %1780 = vst [vmem:[%s11511_s27 + $0x1900] sm:$0xff] %v1779_v32  ;;  %v1785_v35 = vld [vmem:[%s11506_s26 + $0x3218] sm:$0xff]  ;;  %1782 = vst [vmem:[%s11511_s27 + $0x1908] sm:$0xff] %v1781_v33  ;;  %v1787_v36 = vld [vmem:[%s11506_s26 + $0x3240] sm:$0xff] }
 0x1a3   : > { %1784 = vst [vmem:[%s11511_s27 + $0x1910] sm:$0xff] %v1783_v34  ;;  %1786 = vst [vmem:[%s11511_s27 + $0x1918] sm:$0xff] %v1785_v35  ;;  %v1789_v37 = vld [vmem:[%s11506_s26 + $0x3248] sm:$0xff]  ;;  %v1791_v38 = vld [vmem:[%s11506_s26 + $0x3250] sm:$0xff] }
 0x1a4   : > { %1788 = vst [vmem:[%s11511_s27 + $0x1920] sm:$0xff] %v1787_v36  ;;  %1790 = vst [vmem:[%s11511_s27 + $0x1928] sm:$0xff] %v1789_v37  ;;  %v1793_v39 = vld [vmem:[%s11506_s26 + $0x3258] sm:$0xff]  ;;  %v1795_v40 = vld [vmem:[%s11506_s26 + $0x3280] sm:$0xff] }
 0x1a5   : > { %1792 = vst [vmem:[%s11511_s27 + $0x1930] sm:$0xff] %v1791_v38  ;;  %v1797_v41 = vld [vmem:[%s11506_s26 + $0x3288] sm:$0xff]  ;;  %1794 = vst [vmem:[%s11511_s27 + $0x1938] sm:$0xff] %v1793_v39  ;;  %v1799_v42 = vld [vmem:[%s11506_s26 + $0x3290] sm:$0xff] }
 0x1a6   : > { %1796 = vst [vmem:[%s11511_s27 + $0x1940] sm:$0xff] %v1795_v40  ;;  %1798 = vst [vmem:[%s11511_s27 + $0x1948] sm:$0xff] %v1797_v41  ;;  %v1801_v43 = vld [vmem:[%s11506_s26 + $0x3298] sm:$0xff]  ;;  %v1803_v44 = vld [vmem:[%s11506_s26 + $0x32c0] sm:$0xff] }
 0x1a7   : > { %1800 = vst [vmem:[%s11511_s27 + $0x1950] sm:$0xff] %v1799_v42  ;;  %1802 = vst [vmem:[%s11511_s27 + $0x1958] sm:$0xff] %v1801_v43  ;;  %v1805_v45 = vld [vmem:[%s11506_s26 + $0x32c8] sm:$0xff]  ;;  %v1807_v46 = vld [vmem:[%s11506_s26 + $0x32d0] sm:$0xff] }
 0x1a8   : > { %1804 = vst [vmem:[%s11511_s27 + $0x1960] sm:$0xff] %v1803_v44  ;;  %v1809_v47 = vld [vmem:[%s11506_s26 + $0x32d8] sm:$0xff]  ;;  %1806 = vst [vmem:[%s11511_s27 + $0x1968] sm:$0xff] %v1805_v45  ;;  %v1811_v48 = vld [vmem:[%s11506_s26 + $0x3300] sm:$0xff] }
 0x1a9   : > { %1808 = vst [vmem:[%s11511_s27 + $0x1970] sm:$0xff] %v1807_v46  ;;  %1810 = vst [vmem:[%s11511_s27 + $0x1978] sm:$0xff] %v1809_v47  ;;  %v1813_v49 = vld [vmem:[%s11506_s26 + $0x3308] sm:$0xff]  ;;  %v1815_v50 = vld [vmem:[%s11506_s26 + $0x3310] sm:$0xff] }
 0x1aa   : > { %1812 = vst [vmem:[%s11511_s27 + $0x1980] sm:$0xff] %v1811_v48  ;;  %1814 = vst [vmem:[%s11511_s27 + $0x1988] sm:$0xff] %v1813_v49  ;;  %v1817_v51 = vld [vmem:[%s11506_s26 + $0x3318] sm:$0xff]  ;;  %v1819_v52 = vld [vmem:[%s11506_s26 + $0x3340] sm:$0xff] }
 0x1ab   : > { %1816 = vst [vmem:[%s11511_s27 + $0x1990] sm:$0xff] %v1815_v50  ;;  %v1821_v53 = vld [vmem:[%s11506_s26 + $0x3348] sm:$0xff]  ;;  %1818 = vst [vmem:[%s11511_s27 + $0x1998] sm:$0xff] %v1817_v51  ;;  %v1823_v54 = vld [vmem:[%s11506_s26 + $0x3350] sm:$0xff] }
 0x1ac   : > { %1820 = vst [vmem:[%s11511_s27 + $0x19a0] sm:$0xff] %v1819_v52  ;;  %1822 = vst [vmem:[%s11511_s27 + $0x19a8] sm:$0xff] %v1821_v53  ;;  %v1825_v55 = vld [vmem:[%s11506_s26 + $0x3358] sm:$0xff]  ;;  %v1827_v56 = vld [vmem:[%s11506_s26 + $0x3380] sm:$0xff] }
 0x1ad   : > { %1824 = vst [vmem:[%s11511_s27 + $0x19b0] sm:$0xff] %v1823_v54  ;;  %1826 = vst [vmem:[%s11511_s27 + $0x19b8] sm:$0xff] %v1825_v55  ;;  %v1829_v57 = vld [vmem:[%s11506_s26 + $0x3388] sm:$0xff]  ;;  %v1831_v58 = vld [vmem:[%s11506_s26 + $0x3390] sm:$0xff] }
 0x1ae   : > { %1828 = vst [vmem:[%s11511_s27 + $0x19c0] sm:$0xff] %v1827_v56  ;;  %v1833_v59 = vld [vmem:[%s11506_s26 + $0x3398] sm:$0xff]  ;;  %1830 = vst [vmem:[%s11511_s27 + $0x19c8] sm:$0xff] %v1829_v57  ;;  %v1835_v60 = vld [vmem:[%s11506_s26 + $0x33c0] sm:$0xff] }
 0x1af   : > { %1832 = vst [vmem:[%s11511_s27 + $0x19d0] sm:$0xff] %v1831_v58  ;;  %1834 = vst [vmem:[%s11511_s27 + $0x19d8] sm:$0xff] %v1833_v59  ;;  %v1837_v61 = vld [vmem:[%s11506_s26 + $0x33c8] sm:$0xff]  ;;  %v1839_v62 = vld [vmem:[%s11506_s26 + $0x33d0] sm:$0xff] }
 0x1b0   : > { %1836 = vst [vmem:[%s11511_s27 + $0x19e0] sm:$0xff] %v1835_v60  ;;  %1838 = vst [vmem:[%s11511_s27 + $0x19e8] sm:$0xff] %v1837_v61  ;;  %v1841_v63 = vld [vmem:[%s11506_s26 + $0x33d8] sm:$0xff]  ;;  %v1843_v0 = vld [vmem:[%s11506_s26 + $0x3400] sm:$0xff] }
 0x1b1   : > { %1840 = vst [vmem:[%s11511_s27 + $0x19f0] sm:$0xff] %v1839_v62  ;;  %v1845_v1 = vld [vmem:[%s11506_s26 + $0x3408] sm:$0xff]  ;;  %1842 = vst [vmem:[%s11511_s27 + $0x19f8] sm:$0xff] %v1841_v63  ;;  %v1847_v2 = vld [vmem:[%s11506_s26 + $0x3410] sm:$0xff] }
 0x1b2   : > { %1844 = vst [vmem:[%s11511_s27 + $0x1a00] sm:$0xff] %v1843_v0  ;;  %1846 = vst [vmem:[%s11511_s27 + $0x1a08] sm:$0xff] %v1845_v1  ;;  %v1849_v3 = vld [vmem:[%s11506_s26 + $0x3418] sm:$0xff]  ;;  %v1851_v4 = vld [vmem:[%s11506_s26 + $0x3440] sm:$0xff] }
 0x1b3   : > { %1848 = vst [vmem:[%s11511_s27 + $0x1a10] sm:$0xff] %v1847_v2  ;;  %1850 = vst [vmem:[%s11511_s27 + $0x1a18] sm:$0xff] %v1849_v3  ;;  %v1853_v5 = vld [vmem:[%s11506_s26 + $0x3448] sm:$0xff]  ;;  %v1855_v6 = vld [vmem:[%s11506_s26 + $0x3450] sm:$0xff] }
 0x1b4   : > { %1852 = vst [vmem:[%s11511_s27 + $0x1a20] sm:$0xff] %v1851_v4  ;;  %v1857_v7 = vld [vmem:[%s11506_s26 + $0x3458] sm:$0xff]  ;;  %1854 = vst [vmem:[%s11511_s27 + $0x1a28] sm:$0xff] %v1853_v5  ;;  %v1859_v8 = vld [vmem:[%s11506_s26 + $0x3480] sm:$0xff] }
 0x1b5   : > { %1856 = vst [vmem:[%s11511_s27 + $0x1a30] sm:$0xff] %v1855_v6  ;;  %1858 = vst [vmem:[%s11511_s27 + $0x1a38] sm:$0xff] %v1857_v7  ;;  %v1861_v9 = vld [vmem:[%s11506_s26 + $0x3488] sm:$0xff]  ;;  %v1863_v10 = vld [vmem:[%s11506_s26 + $0x3490] sm:$0xff] }
 0x1b6   : > { %1860 = vst [vmem:[%s11511_s27 + $0x1a40] sm:$0xff] %v1859_v8  ;;  %1862 = vst [vmem:[%s11511_s27 + $0x1a48] sm:$0xff] %v1861_v9  ;;  %v1865_v11 = vld [vmem:[%s11506_s26 + $0x3498] sm:$0xff]  ;;  %v1867_v12 = vld [vmem:[%s11506_s26 + $0x34c0] sm:$0xff] }
 0x1b7   : > { %1864 = vst [vmem:[%s11511_s27 + $0x1a50] sm:$0xff] %v1863_v10  ;;  %v1869_v13 = vld [vmem:[%s11506_s26 + $0x34c8] sm:$0xff]  ;;  %1866 = vst [vmem:[%s11511_s27 + $0x1a58] sm:$0xff] %v1865_v11  ;;  %v1871_v14 = vld [vmem:[%s11506_s26 + $0x34d0] sm:$0xff] }
 0x1b8   : > { %1868 = vst [vmem:[%s11511_s27 + $0x1a60] sm:$0xff] %v1867_v12  ;;  %1870 = vst [vmem:[%s11511_s27 + $0x1a68] sm:$0xff] %v1869_v13  ;;  %v1873_v15 = vld [vmem:[%s11506_s26 + $0x34d8] sm:$0xff]  ;;  %v1875_v16 = vld [vmem:[%s11506_s26 + $0x3500] sm:$0xff] }
 0x1b9   : > { %1872 = vst [vmem:[%s11511_s27 + $0x1a70] sm:$0xff] %v1871_v14  ;;  %1874 = vst [vmem:[%s11511_s27 + $0x1a78] sm:$0xff] %v1873_v15  ;;  %v1877_v17 = vld [vmem:[%s11506_s26 + $0x3508] sm:$0xff]  ;;  %v1879_v18 = vld [vmem:[%s11506_s26 + $0x3510] sm:$0xff] }
 0x1ba   : > { %1876 = vst [vmem:[%s11511_s27 + $0x1a80] sm:$0xff] %v1875_v16  ;;  %v1881_v19 = vld [vmem:[%s11506_s26 + $0x3518] sm:$0xff]  ;;  %1878 = vst [vmem:[%s11511_s27 + $0x1a88] sm:$0xff] %v1877_v17  ;;  %v1883_v20 = vld [vmem:[%s11506_s26 + $0x3540] sm:$0xff] }
 0x1bb   : > { %1880 = vst [vmem:[%s11511_s27 + $0x1a90] sm:$0xff] %v1879_v18  ;;  %1882 = vst [vmem:[%s11511_s27 + $0x1a98] sm:$0xff] %v1881_v19  ;;  %v1885_v21 = vld [vmem:[%s11506_s26 + $0x3548] sm:$0xff]  ;;  %v1887_v22 = vld [vmem:[%s11506_s26 + $0x3550] sm:$0xff] }
 0x1bc   : > { %1884 = vst [vmem:[%s11511_s27 + $0x1aa0] sm:$0xff] %v1883_v20  ;;  %1886 = vst [vmem:[%s11511_s27 + $0x1aa8] sm:$0xff] %v1885_v21  ;;  %v1889_v23 = vld [vmem:[%s11506_s26 + $0x3558] sm:$0xff]  ;;  %v1891_v24 = vld [vmem:[%s11506_s26 + $0x3580] sm:$0xff] }
 0x1bd   : > { %1888 = vst [vmem:[%s11511_s27 + $0x1ab0] sm:$0xff] %v1887_v22  ;;  %v1893_v25 = vld [vmem:[%s11506_s26 + $0x3588] sm:$0xff]  ;;  %1890 = vst [vmem:[%s11511_s27 + $0x1ab8] sm:$0xff] %v1889_v23  ;;  %v1895_v26 = vld [vmem:[%s11506_s26 + $0x3590] sm:$0xff] }
 0x1be   : > { %1892 = vst [vmem:[%s11511_s27 + $0x1ac0] sm:$0xff] %v1891_v24  ;;  %1894 = vst [vmem:[%s11511_s27 + $0x1ac8] sm:$0xff] %v1893_v25  ;;  %v1897_v27 = vld [vmem:[%s11506_s26 + $0x3598] sm:$0xff]  ;;  %v1899_v28 = vld [vmem:[%s11506_s26 + $0x35c0] sm:$0xff] }
 0x1bf   : > { %1896 = vst [vmem:[%s11511_s27 + $0x1ad0] sm:$0xff] %v1895_v26  ;;  %1898 = vst [vmem:[%s11511_s27 + $0x1ad8] sm:$0xff] %v1897_v27  ;;  %v1901_v29 = vld [vmem:[%s11506_s26 + $0x35c8] sm:$0xff]  ;;  %v1903_v30 = vld [vmem:[%s11506_s26 + $0x35d0] sm:$0xff] }
 0x1c0   : > { %1900 = vst [vmem:[%s11511_s27 + $0x1ae0] sm:$0xff] %v1899_v28  ;;  %v1905_v31 = vld [vmem:[%s11506_s26 + $0x35d8] sm:$0xff]  ;;  %1902 = vst [vmem:[%s11511_s27 + $0x1ae8] sm:$0xff] %v1901_v29  ;;  %v1907_v32 = vld [vmem:[%s11506_s26 + $0x3600] sm:$0xff] }
 0x1c1   : > { %1904 = vst [vmem:[%s11511_s27 + $0x1af0] sm:$0xff] %v1903_v30  ;;  %1906 = vst [vmem:[%s11511_s27 + $0x1af8] sm:$0xff] %v1905_v31  ;;  %v1909_v33 = vld [vmem:[%s11506_s26 + $0x3608] sm:$0xff]  ;;  %v1911_v34 = vld [vmem:[%s11506_s26 + $0x3610] sm:$0xff] }
 0x1c2   : > { %1908 = vst [vmem:[%s11511_s27 + $0x1b00] sm:$0xff] %v1907_v32  ;;  %1910 = vst [vmem:[%s11511_s27 + $0x1b08] sm:$0xff] %v1909_v33  ;;  %v1913_v35 = vld [vmem:[%s11506_s26 + $0x3618] sm:$0xff]  ;;  %v1915_v36 = vld [vmem:[%s11506_s26 + $0x3640] sm:$0xff] }
 0x1c3   : > { %1912 = vst [vmem:[%s11511_s27 + $0x1b10] sm:$0xff] %v1911_v34  ;;  %v1917_v37 = vld [vmem:[%s11506_s26 + $0x3648] sm:$0xff]  ;;  %1914 = vst [vmem:[%s11511_s27 + $0x1b18] sm:$0xff] %v1913_v35  ;;  %v1919_v38 = vld [vmem:[%s11506_s26 + $0x3650] sm:$0xff] }
 0x1c4   : > { %1916 = vst [vmem:[%s11511_s27 + $0x1b20] sm:$0xff] %v1915_v36  ;;  %1918 = vst [vmem:[%s11511_s27 + $0x1b28] sm:$0xff] %v1917_v37  ;;  %v1921_v39 = vld [vmem:[%s11506_s26 + $0x3658] sm:$0xff]  ;;  %v1923_v40 = vld [vmem:[%s11506_s26 + $0x3680] sm:$0xff] }
 0x1c5   : > { %1920 = vst [vmem:[%s11511_s27 + $0x1b30] sm:$0xff] %v1919_v38  ;;  %1922 = vst [vmem:[%s11511_s27 + $0x1b38] sm:$0xff] %v1921_v39  ;;  %v1925_v41 = vld [vmem:[%s11506_s26 + $0x3688] sm:$0xff]  ;;  %v1927_v42 = vld [vmem:[%s11506_s26 + $0x3690] sm:$0xff] }
 0x1c6   : > { %1924 = vst [vmem:[%s11511_s27 + $0x1b40] sm:$0xff] %v1923_v40  ;;  %v1929_v43 = vld [vmem:[%s11506_s26 + $0x3698] sm:$0xff]  ;;  %1926 = vst [vmem:[%s11511_s27 + $0x1b48] sm:$0xff] %v1925_v41  ;;  %v1931_v44 = vld [vmem:[%s11506_s26 + $0x36c0] sm:$0xff] }
 0x1c7   : > { %1928 = vst [vmem:[%s11511_s27 + $0x1b50] sm:$0xff] %v1927_v42  ;;  %1930 = vst [vmem:[%s11511_s27 + $0x1b58] sm:$0xff] %v1929_v43  ;;  %v1933_v45 = vld [vmem:[%s11506_s26 + $0x36c8] sm:$0xff]  ;;  %v1935_v46 = vld [vmem:[%s11506_s26 + $0x36d0] sm:$0xff] }
 0x1c8   : > { %1932 = vst [vmem:[%s11511_s27 + $0x1b60] sm:$0xff] %v1931_v44  ;;  %1934 = vst [vmem:[%s11511_s27 + $0x1b68] sm:$0xff] %v1933_v45  ;;  %v1937_v47 = vld [vmem:[%s11506_s26 + $0x36d8] sm:$0xff]  ;;  %v1939_v48 = vld [vmem:[%s11506_s26 + $0x3700] sm:$0xff] }
 0x1c9   : > { %1936 = vst [vmem:[%s11511_s27 + $0x1b70] sm:$0xff] %v1935_v46  ;;  %v1941_v49 = vld [vmem:[%s11506_s26 + $0x3708] sm:$0xff]  ;;  %1938 = vst [vmem:[%s11511_s27 + $0x1b78] sm:$0xff] %v1937_v47  ;;  %v1943_v50 = vld [vmem:[%s11506_s26 + $0x3710] sm:$0xff] }
 0x1ca   : > { %1940 = vst [vmem:[%s11511_s27 + $0x1b80] sm:$0xff] %v1939_v48  ;;  %1942 = vst [vmem:[%s11511_s27 + $0x1b88] sm:$0xff] %v1941_v49  ;;  %v1945_v51 = vld [vmem:[%s11506_s26 + $0x3718] sm:$0xff]  ;;  %v1947_v52 = vld [vmem:[%s11506_s26 + $0x3740] sm:$0xff] }
 0x1cb   : > { %1944 = vst [vmem:[%s11511_s27 + $0x1b90] sm:$0xff] %v1943_v50  ;;  %1946 = vst [vmem:[%s11511_s27 + $0x1b98] sm:$0xff] %v1945_v51  ;;  %v1949_v53 = vld [vmem:[%s11506_s26 + $0x3748] sm:$0xff]  ;;  %v1951_v54 = vld [vmem:[%s11506_s26 + $0x3750] sm:$0xff] }
 0x1cc   : > { %1948 = vst [vmem:[%s11511_s27 + $0x1ba0] sm:$0xff] %v1947_v52  ;;  %v1953_v55 = vld [vmem:[%s11506_s26 + $0x3758] sm:$0xff]  ;;  %1950 = vst [vmem:[%s11511_s27 + $0x1ba8] sm:$0xff] %v1949_v53  ;;  %v1955_v56 = vld [vmem:[%s11506_s26 + $0x3780] sm:$0xff] }
 0x1cd   : > { %1952 = vst [vmem:[%s11511_s27 + $0x1bb0] sm:$0xff] %v1951_v54  ;;  %1954 = vst [vmem:[%s11511_s27 + $0x1bb8] sm:$0xff] %v1953_v55  ;;  %v1957_v57 = vld [vmem:[%s11506_s26 + $0x3788] sm:$0xff]  ;;  %v1959_v58 = vld [vmem:[%s11506_s26 + $0x3790] sm:$0xff] }
 0x1ce   : > { %1956 = vst [vmem:[%s11511_s27 + $0x1bc0] sm:$0xff] %v1955_v56  ;;  %1958 = vst [vmem:[%s11511_s27 + $0x1bc8] sm:$0xff] %v1957_v57  ;;  %v1961_v59 = vld [vmem:[%s11506_s26 + $0x3798] sm:$0xff]  ;;  %v1963_v60 = vld [vmem:[%s11506_s26 + $0x37c0] sm:$0xff] }
 0x1cf   : > { %1960 = vst [vmem:[%s11511_s27 + $0x1bd0] sm:$0xff] %v1959_v58  ;;  %v1965_v61 = vld [vmem:[%s11506_s26 + $0x37c8] sm:$0xff]  ;;  %1962 = vst [vmem:[%s11511_s27 + $0x1bd8] sm:$0xff] %v1961_v59  ;;  %v1967_v62 = vld [vmem:[%s11506_s26 + $0x37d0] sm:$0xff] }
 0x1d0   : > { %1964 = vst [vmem:[%s11511_s27 + $0x1be0] sm:$0xff] %v1963_v60  ;;  %1966 = vst [vmem:[%s11511_s27 + $0x1be8] sm:$0xff] %v1965_v61  ;;  %v1969_v63 = vld [vmem:[%s11506_s26 + $0x37d8] sm:$0xff]  ;;  %v1971_v0 = vld [vmem:[%s11506_s26 + $0x3800] sm:$0xff] }
 0x1d1   : > { %1968 = vst [vmem:[%s11511_s27 + $0x1bf0] sm:$0xff] %v1967_v62  ;;  %1970 = vst [vmem:[%s11511_s27 + $0x1bf8] sm:$0xff] %v1969_v63  ;;  %v1973_v1 = vld [vmem:[%s11506_s26 + $0x3808] sm:$0xff]  ;;  %v1975_v2 = vld [vmem:[%s11506_s26 + $0x3810] sm:$0xff] }
 0x1d2   : > { %1972 = vst [vmem:[%s11511_s27 + $0x1c00] sm:$0xff] %v1971_v0  ;;  %v1977_v3 = vld [vmem:[%s11506_s26 + $0x3818] sm:$0xff]  ;;  %1974 = vst [vmem:[%s11511_s27 + $0x1c08] sm:$0xff] %v1973_v1  ;;  %v1979_v4 = vld [vmem:[%s11506_s26 + $0x3840] sm:$0xff] }
 0x1d3   : > { %1976 = vst [vmem:[%s11511_s27 + $0x1c10] sm:$0xff] %v1975_v2  ;;  %1978 = vst [vmem:[%s11511_s27 + $0x1c18] sm:$0xff] %v1977_v3  ;;  %v1981_v5 = vld [vmem:[%s11506_s26 + $0x3848] sm:$0xff]  ;;  %v1983_v6 = vld [vmem:[%s11506_s26 + $0x3850] sm:$0xff] }
 0x1d4   : > { %1980 = vst [vmem:[%s11511_s27 + $0x1c20] sm:$0xff] %v1979_v4  ;;  %1982 = vst [vmem:[%s11511_s27 + $0x1c28] sm:$0xff] %v1981_v5  ;;  %v1985_v7 = vld [vmem:[%s11506_s26 + $0x3858] sm:$0xff]  ;;  %v1987_v8 = vld [vmem:[%s11506_s26 + $0x3880] sm:$0xff] }
 0x1d5   : > { %1984 = vst [vmem:[%s11511_s27 + $0x1c30] sm:$0xff] %v1983_v6  ;;  %v1989_v9 = vld [vmem:[%s11506_s26 + $0x3888] sm:$0xff]  ;;  %1986 = vst [vmem:[%s11511_s27 + $0x1c38] sm:$0xff] %v1985_v7  ;;  %v1991_v10 = vld [vmem:[%s11506_s26 + $0x3890] sm:$0xff] }
 0x1d6   : > { %1988 = vst [vmem:[%s11511_s27 + $0x1c40] sm:$0xff] %v1987_v8  ;;  %1990 = vst [vmem:[%s11511_s27 + $0x1c48] sm:$0xff] %v1989_v9  ;;  %v1993_v11 = vld [vmem:[%s11506_s26 + $0x3898] sm:$0xff]  ;;  %v1995_v12 = vld [vmem:[%s11506_s26 + $0x38c0] sm:$0xff] }
 0x1d7   : > { %1992 = vst [vmem:[%s11511_s27 + $0x1c50] sm:$0xff] %v1991_v10  ;;  %1994 = vst [vmem:[%s11511_s27 + $0x1c58] sm:$0xff] %v1993_v11  ;;  %v1997_v13 = vld [vmem:[%s11506_s26 + $0x38c8] sm:$0xff]  ;;  %v1999_v14 = vld [vmem:[%s11506_s26 + $0x38d0] sm:$0xff] }
 0x1d8   : > { %1996 = vst [vmem:[%s11511_s27 + $0x1c60] sm:$0xff] %v1995_v12  ;;  %v2001_v15 = vld [vmem:[%s11506_s26 + $0x38d8] sm:$0xff]  ;;  %1998 = vst [vmem:[%s11511_s27 + $0x1c68] sm:$0xff] %v1997_v13  ;;  %v2003_v16 = vld [vmem:[%s11506_s26 + $0x3900] sm:$0xff] }
 0x1d9   : > { %2000 = vst [vmem:[%s11511_s27 + $0x1c70] sm:$0xff] %v1999_v14  ;;  %2002 = vst [vmem:[%s11511_s27 + $0x1c78] sm:$0xff] %v2001_v15  ;;  %v2005_v17 = vld [vmem:[%s11506_s26 + $0x3908] sm:$0xff]  ;;  %v2007_v18 = vld [vmem:[%s11506_s26 + $0x3910] sm:$0xff] }
 0x1da   : > { %2004 = vst [vmem:[%s11511_s27 + $0x1c80] sm:$0xff] %v2003_v16  ;;  %2006 = vst [vmem:[%s11511_s27 + $0x1c88] sm:$0xff] %v2005_v17  ;;  %v2009_v19 = vld [vmem:[%s11506_s26 + $0x3918] sm:$0xff]  ;;  %v2011_v20 = vld [vmem:[%s11506_s26 + $0x3940] sm:$0xff] }
 0x1db   : > { %2008 = vst [vmem:[%s11511_s27 + $0x1c90] sm:$0xff] %v2007_v18  ;;  %v2013_v21 = vld [vmem:[%s11506_s26 + $0x3948] sm:$0xff]  ;;  %2010 = vst [vmem:[%s11511_s27 + $0x1c98] sm:$0xff] %v2009_v19  ;;  %v2015_v22 = vld [vmem:[%s11506_s26 + $0x3950] sm:$0xff] }
 0x1dc   : > { %2012 = vst [vmem:[%s11511_s27 + $0x1ca0] sm:$0xff] %v2011_v20  ;;  %2014 = vst [vmem:[%s11511_s27 + $0x1ca8] sm:$0xff] %v2013_v21  ;;  %v2017_v23 = vld [vmem:[%s11506_s26 + $0x3958] sm:$0xff]  ;;  %v2019_v24 = vld [vmem:[%s11506_s26 + $0x3980] sm:$0xff] }
 0x1dd   : > { %2016 = vst [vmem:[%s11511_s27 + $0x1cb0] sm:$0xff] %v2015_v22  ;;  %2018 = vst [vmem:[%s11511_s27 + $0x1cb8] sm:$0xff] %v2017_v23  ;;  %v2021_v25 = vld [vmem:[%s11506_s26 + $0x3988] sm:$0xff]  ;;  %v2023_v26 = vld [vmem:[%s11506_s26 + $0x3990] sm:$0xff] }
 0x1de   : > { %2020 = vst [vmem:[%s11511_s27 + $0x1cc0] sm:$0xff] %v2019_v24  ;;  %v2025_v27 = vld [vmem:[%s11506_s26 + $0x3998] sm:$0xff]  ;;  %2022 = vst [vmem:[%s11511_s27 + $0x1cc8] sm:$0xff] %v2021_v25  ;;  %v2027_v28 = vld [vmem:[%s11506_s26 + $0x39c0] sm:$0xff] }
 0x1df   : > { %2024 = vst [vmem:[%s11511_s27 + $0x1cd0] sm:$0xff] %v2023_v26  ;;  %2026 = vst [vmem:[%s11511_s27 + $0x1cd8] sm:$0xff] %v2025_v27  ;;  %v2029_v29 = vld [vmem:[%s11506_s26 + $0x39c8] sm:$0xff]  ;;  %v2031_v30 = vld [vmem:[%s11506_s26 + $0x39d0] sm:$0xff] }
 0x1e0   : > { %2028 = vst [vmem:[%s11511_s27 + $0x1ce0] sm:$0xff] %v2027_v28  ;;  %2030 = vst [vmem:[%s11511_s27 + $0x1ce8] sm:$0xff] %v2029_v29  ;;  %v2033_v31 = vld [vmem:[%s11506_s26 + $0x39d8] sm:$0xff]  ;;  %v2035_v32 = vld [vmem:[%s11506_s26 + $0x3a00] sm:$0xff] }
 0x1e1   : > { %2032 = vst [vmem:[%s11511_s27 + $0x1cf0] sm:$0xff] %v2031_v30  ;;  %v2037_v33 = vld [vmem:[%s11506_s26 + $0x3a08] sm:$0xff]  ;;  %2034 = vst [vmem:[%s11511_s27 + $0x1cf8] sm:$0xff] %v2033_v31  ;;  %v2039_v34 = vld [vmem:[%s11506_s26 + $0x3a10] sm:$0xff] }
 0x1e2   : > { %2036 = vst [vmem:[%s11511_s27 + $0x1d00] sm:$0xff] %v2035_v32  ;;  %2038 = vst [vmem:[%s11511_s27 + $0x1d08] sm:$0xff] %v2037_v33  ;;  %v2041_v35 = vld [vmem:[%s11506_s26 + $0x3a18] sm:$0xff]  ;;  %v2043_v36 = vld [vmem:[%s11506_s26 + $0x3a40] sm:$0xff] }
 0x1e3   : > { %2040 = vst [vmem:[%s11511_s27 + $0x1d10] sm:$0xff] %v2039_v34  ;;  %2042 = vst [vmem:[%s11511_s27 + $0x1d18] sm:$0xff] %v2041_v35  ;;  %v2045_v37 = vld [vmem:[%s11506_s26 + $0x3a48] sm:$0xff]  ;;  %v2047_v38 = vld [vmem:[%s11506_s26 + $0x3a50] sm:$0xff] }
 0x1e4   : > { %2044 = vst [vmem:[%s11511_s27 + $0x1d20] sm:$0xff] %v2043_v36  ;;  %v2049_v39 = vld [vmem:[%s11506_s26 + $0x3a58] sm:$0xff]  ;;  %2046 = vst [vmem:[%s11511_s27 + $0x1d28] sm:$0xff] %v2045_v37  ;;  %v2051_v40 = vld [vmem:[%s11506_s26 + $0x3a80] sm:$0xff] }
 0x1e5   : > { %2048 = vst [vmem:[%s11511_s27 + $0x1d30] sm:$0xff] %v2047_v38  ;;  %2050 = vst [vmem:[%s11511_s27 + $0x1d38] sm:$0xff] %v2049_v39  ;;  %v2053_v41 = vld [vmem:[%s11506_s26 + $0x3a88] sm:$0xff]  ;;  %v2055_v42 = vld [vmem:[%s11506_s26 + $0x3a90] sm:$0xff] }
 0x1e6   : > { %2052 = vst [vmem:[%s11511_s27 + $0x1d40] sm:$0xff] %v2051_v40  ;;  %2054 = vst [vmem:[%s11511_s27 + $0x1d48] sm:$0xff] %v2053_v41  ;;  %v2057_v43 = vld [vmem:[%s11506_s26 + $0x3a98] sm:$0xff]  ;;  %v2059_v44 = vld [vmem:[%s11506_s26 + $0x3ac0] sm:$0xff] }
 0x1e7   : > { %2056 = vst [vmem:[%s11511_s27 + $0x1d50] sm:$0xff] %v2055_v42  ;;  %v2061_v45 = vld [vmem:[%s11506_s26 + $0x3ac8] sm:$0xff]  ;;  %2058 = vst [vmem:[%s11511_s27 + $0x1d58] sm:$0xff] %v2057_v43  ;;  %v2063_v46 = vld [vmem:[%s11506_s26 + $0x3ad0] sm:$0xff] }
 0x1e8   : > { %2060 = vst [vmem:[%s11511_s27 + $0x1d60] sm:$0xff] %v2059_v44  ;;  %2062 = vst [vmem:[%s11511_s27 + $0x1d68] sm:$0xff] %v2061_v45  ;;  %v2065_v47 = vld [vmem:[%s11506_s26 + $0x3ad8] sm:$0xff]  ;;  %v2067_v48 = vld [vmem:[%s11506_s26 + $0x3b00] sm:$0xff] }
 0x1e9   : > { %2064 = vst [vmem:[%s11511_s27 + $0x1d70] sm:$0xff] %v2063_v46  ;;  %2066 = vst [vmem:[%s11511_s27 + $0x1d78] sm:$0xff] %v2065_v47  ;;  %v2069_v49 = vld [vmem:[%s11506_s26 + $0x3b08] sm:$0xff]  ;;  %v2071_v50 = vld [vmem:[%s11506_s26 + $0x3b10] sm:$0xff] }
 0x1ea   : > { %2068 = vst [vmem:[%s11511_s27 + $0x1d80] sm:$0xff] %v2067_v48  ;;  %v2073_v51 = vld [vmem:[%s11506_s26 + $0x3b18] sm:$0xff]  ;;  %2070 = vst [vmem:[%s11511_s27 + $0x1d88] sm:$0xff] %v2069_v49  ;;  %v2075_v52 = vld [vmem:[%s11506_s26 + $0x3b40] sm:$0xff] }
 0x1eb   : > { %2072 = vst [vmem:[%s11511_s27 + $0x1d90] sm:$0xff] %v2071_v50  ;;  %2074 = vst [vmem:[%s11511_s27 + $0x1d98] sm:$0xff] %v2073_v51  ;;  %v2077_v53 = vld [vmem:[%s11506_s26 + $0x3b48] sm:$0xff]  ;;  %v2079_v54 = vld [vmem:[%s11506_s26 + $0x3b50] sm:$0xff] }
 0x1ec   : > { %2076 = vst [vmem:[%s11511_s27 + $0x1da0] sm:$0xff] %v2075_v52  ;;  %2078 = vst [vmem:[%s11511_s27 + $0x1da8] sm:$0xff] %v2077_v53  ;;  %v2081_v55 = vld [vmem:[%s11506_s26 + $0x3b58] sm:$0xff]  ;;  %v2083_v56 = vld [vmem:[%s11506_s26 + $0x3b80] sm:$0xff] }
 0x1ed   : > { %2080 = vst [vmem:[%s11511_s27 + $0x1db0] sm:$0xff] %v2079_v54  ;;  %v2085_v57 = vld [vmem:[%s11506_s26 + $0x3b88] sm:$0xff]  ;;  %2082 = vst [vmem:[%s11511_s27 + $0x1db8] sm:$0xff] %v2081_v55  ;;  %v2087_v58 = vld [vmem:[%s11506_s26 + $0x3b90] sm:$0xff] }
 0x1ee   : > { %2084 = vst [vmem:[%s11511_s27 + $0x1dc0] sm:$0xff] %v2083_v56  ;;  %2086 = vst [vmem:[%s11511_s27 + $0x1dc8] sm:$0xff] %v2085_v57  ;;  %v2089_v59 = vld [vmem:[%s11506_s26 + $0x3b98] sm:$0xff]  ;;  %v2091_v60 = vld [vmem:[%s11506_s26 + $0x3bc0] sm:$0xff] }
 0x1ef   : > { %2088 = vst [vmem:[%s11511_s27 + $0x1dd0] sm:$0xff] %v2087_v58  ;;  %2090 = vst [vmem:[%s11511_s27 + $0x1dd8] sm:$0xff] %v2089_v59  ;;  %v2093_v61 = vld [vmem:[%s11506_s26 + $0x3bc8] sm:$0xff]  ;;  %v2095_v62 = vld [vmem:[%s11506_s26 + $0x3bd0] sm:$0xff] }
 0x1f0   : > { %2092 = vst [vmem:[%s11511_s27 + $0x1de0] sm:$0xff] %v2091_v60  ;;  %v2097_v63 = vld [vmem:[%s11506_s26 + $0x3bd8] sm:$0xff]  ;;  %2094 = vst [vmem:[%s11511_s27 + $0x1de8] sm:$0xff] %v2093_v61  ;;  %v2099_v0 = vld [vmem:[%s11506_s26 + $0x3c00] sm:$0xff] }
 0x1f1   : > { %2096 = vst [vmem:[%s11511_s27 + $0x1df0] sm:$0xff] %v2095_v62  ;;  %2098 = vst [vmem:[%s11511_s27 + $0x1df8] sm:$0xff] %v2097_v63  ;;  %v2101_v1 = vld [vmem:[%s11506_s26 + $0x3c08] sm:$0xff]  ;;  %v2103_v2 = vld [vmem:[%s11506_s26 + $0x3c10] sm:$0xff] }
 0x1f2   : > { %2100 = vst [vmem:[%s11511_s27 + $0x1e00] sm:$0xff] %v2099_v0  ;;  %2102 = vst [vmem:[%s11511_s27 + $0x1e08] sm:$0xff] %v2101_v1  ;;  %v2105_v3 = vld [vmem:[%s11506_s26 + $0x3c18] sm:$0xff]  ;;  %v2107_v4 = vld [vmem:[%s11506_s26 + $0x3c40] sm:$0xff] }
 0x1f3   : > { %2104 = vst [vmem:[%s11511_s27 + $0x1e10] sm:$0xff] %v2103_v2  ;;  %v2109_v5 = vld [vmem:[%s11506_s26 + $0x3c48] sm:$0xff]  ;;  %2106 = vst [vmem:[%s11511_s27 + $0x1e18] sm:$0xff] %v2105_v3  ;;  %v2111_v6 = vld [vmem:[%s11506_s26 + $0x3c50] sm:$0xff] }
 0x1f4   : > { %2108 = vst [vmem:[%s11511_s27 + $0x1e20] sm:$0xff] %v2107_v4  ;;  %2110 = vst [vmem:[%s11511_s27 + $0x1e28] sm:$0xff] %v2109_v5  ;;  %v2113_v7 = vld [vmem:[%s11506_s26 + $0x3c58] sm:$0xff]  ;;  %v2115_v8 = vld [vmem:[%s11506_s26 + $0x3c80] sm:$0xff] }
 0x1f5   : > { %2112 = vst [vmem:[%s11511_s27 + $0x1e30] sm:$0xff] %v2111_v6  ;;  %2114 = vst [vmem:[%s11511_s27 + $0x1e38] sm:$0xff] %v2113_v7  ;;  %v2117_v9 = vld [vmem:[%s11506_s26 + $0x3c88] sm:$0xff]  ;;  %v2119_v10 = vld [vmem:[%s11506_s26 + $0x3c90] sm:$0xff] }
 0x1f6   : > { %2116 = vst [vmem:[%s11511_s27 + $0x1e40] sm:$0xff] %v2115_v8  ;;  %v2121_v11 = vld [vmem:[%s11506_s26 + $0x3c98] sm:$0xff]  ;;  %2118 = vst [vmem:[%s11511_s27 + $0x1e48] sm:$0xff] %v2117_v9  ;;  %v2123_v12 = vld [vmem:[%s11506_s26 + $0x3cc0] sm:$0xff] }
 0x1f7   : > { %2120 = vst [vmem:[%s11511_s27 + $0x1e50] sm:$0xff] %v2119_v10  ;;  %2122 = vst [vmem:[%s11511_s27 + $0x1e58] sm:$0xff] %v2121_v11  ;;  %v2125_v13 = vld [vmem:[%s11506_s26 + $0x3cc8] sm:$0xff]  ;;  %v2127_v14 = vld [vmem:[%s11506_s26 + $0x3cd0] sm:$0xff] }
 0x1f8   : > { %2124 = vst [vmem:[%s11511_s27 + $0x1e60] sm:$0xff] %v2123_v12  ;;  %2126 = vst [vmem:[%s11511_s27 + $0x1e68] sm:$0xff] %v2125_v13  ;;  %v2129_v15 = vld [vmem:[%s11506_s26 + $0x3cd8] sm:$0xff]  ;;  %v2131_v16 = vld [vmem:[%s11506_s26 + $0x3d00] sm:$0xff] }
 0x1f9   : > { %2128 = vst [vmem:[%s11511_s27 + $0x1e70] sm:$0xff] %v2127_v14  ;;  %v2133_v17 = vld [vmem:[%s11506_s26 + $0x3d08] sm:$0xff]  ;;  %2130 = vst [vmem:[%s11511_s27 + $0x1e78] sm:$0xff] %v2129_v15  ;;  %v2135_v18 = vld [vmem:[%s11506_s26 + $0x3d10] sm:$0xff] }
 0x1fa   : > { %2132 = vst [vmem:[%s11511_s27 + $0x1e80] sm:$0xff] %v2131_v16  ;;  %2134 = vst [vmem:[%s11511_s27 + $0x1e88] sm:$0xff] %v2133_v17  ;;  %v2137_v19 = vld [vmem:[%s11506_s26 + $0x3d18] sm:$0xff]  ;;  %v2139_v20 = vld [vmem:[%s11506_s26 + $0x3d40] sm:$0xff] }
 0x1fb   : > { %2136 = vst [vmem:[%s11511_s27 + $0x1e90] sm:$0xff] %v2135_v18  ;;  %2138 = vst [vmem:[%s11511_s27 + $0x1e98] sm:$0xff] %v2137_v19  ;;  %v2141_v21 = vld [vmem:[%s11506_s26 + $0x3d48] sm:$0xff]  ;;  %v2143_v22 = vld [vmem:[%s11506_s26 + $0x3d50] sm:$0xff] }
 0x1fc   : > { %2140 = vst [vmem:[%s11511_s27 + $0x1ea0] sm:$0xff] %v2139_v20  ;;  %v2145_v23 = vld [vmem:[%s11506_s26 + $0x3d58] sm:$0xff]  ;;  %2142 = vst [vmem:[%s11511_s27 + $0x1ea8] sm:$0xff] %v2141_v21  ;;  %v2147_v24 = vld [vmem:[%s11506_s26 + $0x3d80] sm:$0xff] }
 0x1fd   : > { %2144 = vst [vmem:[%s11511_s27 + $0x1eb0] sm:$0xff] %v2143_v22  ;;  %2146 = vst [vmem:[%s11511_s27 + $0x1eb8] sm:$0xff] %v2145_v23  ;;  %v2149_v25 = vld [vmem:[%s11506_s26 + $0x3d88] sm:$0xff]  ;;  %v2151_v26 = vld [vmem:[%s11506_s26 + $0x3d90] sm:$0xff] }
 0x1fe   : > { %2148 = vst [vmem:[%s11511_s27 + $0x1ec0] sm:$0xff] %v2147_v24  ;;  %2150 = vst [vmem:[%s11511_s27 + $0x1ec8] sm:$0xff] %v2149_v25  ;;  %v2153_v27 = vld [vmem:[%s11506_s26 + $0x3d98] sm:$0xff]  ;;  %v2155_v28 = vld [vmem:[%s11506_s26 + $0x3dc0] sm:$0xff] }
 0x1ff   : > { %2152 = vst [vmem:[%s11511_s27 + $0x1ed0] sm:$0xff] %v2151_v26  ;;  %v2157_v29 = vld [vmem:[%s11506_s26 + $0x3dc8] sm:$0xff]  ;;  %2154 = vst [vmem:[%s11511_s27 + $0x1ed8] sm:$0xff] %v2153_v27  ;;  %v2159_v30 = vld [vmem:[%s11506_s26 + $0x3dd0] sm:$0xff] }
 0x200   : > { %2156 = vst [vmem:[%s11511_s27 + $0x1ee0] sm:$0xff] %v2155_v28  ;;  %2158 = vst [vmem:[%s11511_s27 + $0x1ee8] sm:$0xff] %v2157_v29  ;;  %v2161_v31 = vld [vmem:[%s11506_s26 + $0x3dd8] sm:$0xff]  ;;  %v2163_v32 = vld [vmem:[%s11506_s26 + $0x3e00] sm:$0xff] }
 0x201   : > { %2160 = vst [vmem:[%s11511_s27 + $0x1ef0] sm:$0xff] %v2159_v30  ;;  %2162 = vst [vmem:[%s11511_s27 + $0x1ef8] sm:$0xff] %v2161_v31  ;;  %v2165_v33 = vld [vmem:[%s11506_s26 + $0x3e08] sm:$0xff]  ;;  %v2167_v34 = vld [vmem:[%s11506_s26 + $0x3e10] sm:$0xff] }
 0x202   : > { %2164 = vst [vmem:[%s11511_s27 + $0x1f00] sm:$0xff] %v2163_v32  ;;  %v2169_v35 = vld [vmem:[%s11506_s26 + $0x3e18] sm:$0xff]  ;;  %2166 = vst [vmem:[%s11511_s27 + $0x1f08] sm:$0xff] %v2165_v33  ;;  %v2171_v36 = vld [vmem:[%s11506_s26 + $0x3e40] sm:$0xff] }
 0x203   : > { %2168 = vst [vmem:[%s11511_s27 + $0x1f10] sm:$0xff] %v2167_v34  ;;  %2170 = vst [vmem:[%s11511_s27 + $0x1f18] sm:$0xff] %v2169_v35  ;;  %v2173_v37 = vld [vmem:[%s11506_s26 + $0x3e48] sm:$0xff]  ;;  %v2175_v38 = vld [vmem:[%s11506_s26 + $0x3e50] sm:$0xff] }
 0x204   : > { %2172 = vst [vmem:[%s11511_s27 + $0x1f20] sm:$0xff] %v2171_v36  ;;  %2174 = vst [vmem:[%s11511_s27 + $0x1f28] sm:$0xff] %v2173_v37  ;;  %v2177_v39 = vld [vmem:[%s11506_s26 + $0x3e58] sm:$0xff]  ;;  %v2179_v40 = vld [vmem:[%s11506_s26 + $0x3e80] sm:$0xff] }
 0x205   : > { %2176 = vst [vmem:[%s11511_s27 + $0x1f30] sm:$0xff] %v2175_v38  ;;  %v2181_v41 = vld [vmem:[%s11506_s26 + $0x3e88] sm:$0xff]  ;;  %2178 = vst [vmem:[%s11511_s27 + $0x1f38] sm:$0xff] %v2177_v39  ;;  %v2183_v42 = vld [vmem:[%s11506_s26 + $0x3e90] sm:$0xff] }
 0x206   : > { %2180 = vst [vmem:[%s11511_s27 + $0x1f40] sm:$0xff] %v2179_v40  ;;  %2182 = vst [vmem:[%s11511_s27 + $0x1f48] sm:$0xff] %v2181_v41  ;;  %v2185_v43 = vld [vmem:[%s11506_s26 + $0x3e98] sm:$0xff]  ;;  %v2187_v44 = vld [vmem:[%s11506_s26 + $0x3ec0] sm:$0xff] }
 0x207   : > { %2184 = vst [vmem:[%s11511_s27 + $0x1f50] sm:$0xff] %v2183_v42  ;;  %2186 = vst [vmem:[%s11511_s27 + $0x1f58] sm:$0xff] %v2185_v43  ;;  %v2189_v45 = vld [vmem:[%s11506_s26 + $0x3ec8] sm:$0xff]  ;;  %v2191_v46 = vld [vmem:[%s11506_s26 + $0x3ed0] sm:$0xff] }
 0x208   : > { %2188 = vst [vmem:[%s11511_s27 + $0x1f60] sm:$0xff] %v2187_v44  ;;  %v2193_v47 = vld [vmem:[%s11506_s26 + $0x3ed8] sm:$0xff]  ;;  %2190 = vst [vmem:[%s11511_s27 + $0x1f68] sm:$0xff] %v2189_v45  ;;  %v2195_v48 = vld [vmem:[%s11506_s26 + $0x3f00] sm:$0xff] }
 0x209   : > { %2192 = vst [vmem:[%s11511_s27 + $0x1f70] sm:$0xff] %v2191_v46  ;;  %2194 = vst [vmem:[%s11511_s27 + $0x1f78] sm:$0xff] %v2193_v47  ;;  %v2197_v49 = vld [vmem:[%s11506_s26 + $0x3f08] sm:$0xff]  ;;  %v2199_v50 = vld [vmem:[%s11506_s26 + $0x3f10] sm:$0xff] }
 0x20a   : > { %2196 = vst [vmem:[%s11511_s27 + $0x1f80] sm:$0xff] %v2195_v48  ;;  %2198 = vst [vmem:[%s11511_s27 + $0x1f88] sm:$0xff] %v2197_v49  ;;  %v2201_v51 = vld [vmem:[%s11506_s26 + $0x3f18] sm:$0xff]  ;;  %v2203_v52 = vld [vmem:[%s11506_s26 + $0x3f40] sm:$0xff] }
 0x20b   : > { %2200 = vst [vmem:[%s11511_s27 + $0x1f90] sm:$0xff] %v2199_v50  ;;  %v2205_v53 = vld [vmem:[%s11506_s26 + $0x3f48] sm:$0xff]  ;;  %2202 = vst [vmem:[%s11511_s27 + $0x1f98] sm:$0xff] %v2201_v51  ;;  %v2207_v54 = vld [vmem:[%s11506_s26 + $0x3f50] sm:$0xff] }
 0x20c   : > { %2204 = vst [vmem:[%s11511_s27 + $0x1fa0] sm:$0xff] %v2203_v52  ;;  %2206 = vst [vmem:[%s11511_s27 + $0x1fa8] sm:$0xff] %v2205_v53  ;;  %v2209_v55 = vld [vmem:[%s11506_s26 + $0x3f58] sm:$0xff]  ;;  %v2211_v56 = vld [vmem:[%s11506_s26 + $0x3f80] sm:$0xff] }
 0x20d   : > { %2208 = vst [vmem:[%s11511_s27 + $0x1fb0] sm:$0xff] %v2207_v54  ;;  %2210 = vst [vmem:[%s11511_s27 + $0x1fb8] sm:$0xff] %v2209_v55  ;;  %v2213_v57 = vld [vmem:[%s11506_s26 + $0x3f88] sm:$0xff]  ;;  %v2215_v58 = vld [vmem:[%s11506_s26 + $0x3f90] sm:$0xff] }
 0x20e   : > { %2212 = vst [vmem:[%s11511_s27 + $0x1fc0] sm:$0xff] %v2211_v56  ;;  %v2217_v59 = vld [vmem:[%s11506_s26 + $0x3f98] sm:$0xff]  ;;  %2214 = vst [vmem:[%s11511_s27 + $0x1fc8] sm:$0xff] %v2213_v57  ;;  %v2219_v60 = vld [vmem:[%s11506_s26 + $0x3fc0] sm:$0xff] }
 0x20f   : > { %2216 = vst [vmem:[%s11511_s27 + $0x1fd0] sm:$0xff] %v2215_v58  ;;  %2218 = vst [vmem:[%s11511_s27 + $0x1fd8] sm:$0xff] %v2217_v59  ;;  %v2221_v61 = vld [vmem:[%s11506_s26 + $0x3fc8] sm:$0xff]  ;;  %v2223_v62 = vld [vmem:[%s11506_s26 + $0x3fd0] sm:$0xff] }
 0x210   : > { %2220 = vst [vmem:[%s11511_s27 + $0x1fe0] sm:$0xff] %v2219_v60  ;;  %2222 = vst [vmem:[%s11511_s27 + $0x1fe8] sm:$0xff] %v2221_v61  ;;  %v2225_v63 = vld [vmem:[%s11506_s26 + $0x3fd8] sm:$0xff] }
 0x211   : > { %2224 = vst [vmem:[%s11511_s27 + $0x1ff0] sm:$0xff] %v2223_v62  ;;  %2226 = vst [vmem:[%s11511_s27 + $0x1ff8] sm:$0xff] %v2225_v63 }
 0x212 PF: > { %p10210_p6 = scmp.ge.s32.totalorder %s11439_s16, 1  ;;  %p2239_p7 = scmp.lt.s32.totalorder %s11439_s16, 3 }
 0x214   : > { %p2240_p8 = pnand %p10210_p6, %p2239_p7 }
 0x215   : > { %s2246_s28 = sand.u32 (!%p2240_p8), 1, %s11423_s12   ;;  %v3333_v0 = vlaneseq (!%p2240_p8)  ;;  %v11441_v1 = vmov (!%p2240_p8), 1966171168   ;;  %v13583_v25 = vld [vmem:[%s14816_s0] sm:$0xff] (!%p2240_p8)  ;;  %s10212_s8 = sshll.u32 (!%p2240_p8), %s11431_s14, 3 }
 0x216   : > { %2243 = sbr.rel (%p2240_p8) target bundleno = 1804 (0x70c), region = 51  ;;  %s10211_s29 = sshll.u32 (!%p2240_p8), %s2246_s28, 13  ;;  %v3331_v2 = vunpack.c.l.s4 (!%p2240_p8), %v11441_v1 }
 0x217   : > { %v13561_v3 = vshrl.u32 (!%p2240_p8), %v3333_v0, 7  ;;  %s13563_s30 = scalar_lea.vmem (!%p2240_p8), [#allocation3], %s10211_s29  ;;  %p2284_p9 = scmp.lt.s32.totalorder (!%p2240_p8), %s10212_s8, 15 }
 0x218   : > { %v2303_v4 = vld [vmem:[%s13563_s30] sm:$0xff] (!%p2240_p8)  ;;  %v2304_v6 = vld [vmem:[%s13563_s30 + $0x8] sm:$0xff] (!%p2240_p8)  ;;  %v3332_v7 = vunpack.c.0.s8 (!%p2240_p8), %v3331_v2 }
 0x219   : > { %v2307_v5 = vld [vmem:[%s13563_s30 + $0x20] sm:$0xff] (!%p2240_p8)  ;;  %v2308_v9 = vld [vmem:[%s13563_s30 + $0x28] sm:$0xff] (!%p2240_p8) }
 0x21a   : > { %v10215_v8 = vcombine.high (!%p2240_p8), %v2303_v4, %v2307_v5  ;;  %v10214_v10 = vcombine.low (!%p2240_p8), %v2303_v4, %v2307_v5  ;;  %v2311_v11 = vld [vmem:[%s13563_s30 + $0x40] sm:$0xff] (!%p2240_p8)  ;;  %v10217_v13 = vcombine.high (!%p2240_p8), %v2304_v6, %v2308_v9  ;;  %v10216_v14 = vcombine.low (!%p2240_p8), %v2304_v6, %v2308_v9  ;;  %v2312_v16 = vld [vmem:[%s13563_s30 + $0x48] sm:$0xff] (!%p2240_p8) }
 0x21b   : > { %v2315_v12 = vld [vmem:[%s13563_s30 + $0x60] sm:$0xff] (!%p2240_p8)  ;;  %v2316_v17 = vld [vmem:[%s13563_s30 + $0x68] sm:$0xff] (!%p2240_p8)  ;;  %v13578_v23 = vsub.s32 (!%p2240_p8), %v3332_v7, %v13561_v3 }
 0x21c   : > { %v10223_v15 = vcombine.high (!%p2240_p8), %v2311_v11, %v2315_v12  ;;  %v2319_v18 = vld [vmem:[%s13563_s30 + $0x80] sm:$0xff] (!%p2240_p8)  ;;  %8563 = vmatprep.subr.bf16.mxu0 (!%p2240_p8), %v10215_v8  ;;  %v10225_v19 = vcombine.high (!%p2240_p8), %v2312_v16, %v2316_v17  ;;  %v2320_v21 = vld [vmem:[%s13563_s30 + $0x88] sm:$0xff] (!%p2240_p8)  ;;  %8891 = vmatprep.subr.bf16.mxu1 (!%p2240_p8), %v10217_v13  ;;  %v10222_v24 = vcombine.low (!%p2240_p8), %v2311_v11, %v2315_v12 }
 0x21d   : > { %v2323_v20 = vld [vmem:[%s13563_s30 + $0xa0] sm:$0xff]  ;;  %v2324_v22 = vld [vmem:[%s13563_s30 + $0xa8] sm:$0xff]  ;;  %8564 = vmatpush1.bf16.msra.mxu0 %v10214_v10  ;;  %8892 = vmatpush1.bf16.msra.mxu1 %v10216_v14  ;;  %v10224_v26 = vcombine.low %v2312_v16, %v2316_v17  ;;  %v13591_v33 = vrot.slane %v13583_v25, %v13578_v23  ;;  %s14827_s8 = smov (!%p2284_p9, %s10212_s8), 15 }
 0x21e   : > { %8565 = vmatprep.subr.bf16.mxu0 %v10223_v15  ;;  %v10231_v27 = vcombine.high %v2319_v18, %v2323_v20  ;;  %8893 = vmatprep.subr.bf16.mxu1 %v10225_v19  ;;  %v10233_v28 = vcombine.high %v2320_v21, %v2324_v22  ;;  %v2327_v29 = vld [vmem:[%s13563_s30 + $0xc0] sm:$0xff]  ;;  %v2328_v31 = vld [vmem:[%s13563_s30 + $0xc8] sm:$0xff]  ;;  %v10230_v34 = vcombine.low %v2319_v18, %v2323_v20  ;;  %s2286_s11 = scalar_lea.vmem %s14818_s2, %s14827_s8  ;;  %s2291_s18 = scalar_lea.vmem %s14819_s3, %s14827_s8 }
 0x21f   : > { %v2331_v30 = vld [vmem:[%s13563_s30 + $0xe0] sm:$0xff]  ;;  %v2332_v32 = vld [vmem:[%s13563_s30 + $0xe8] sm:$0xff]  ;;  %v10232_v35 = vcombine.low %v2320_v21, %v2324_v22  ;;  %v3344_v37 = vcombine.high %v13591_v33, %v13591_v33 }
 0x220   : > { %v10239_v36 = vcombine.high %v2327_v29, %v2331_v30  ;;  %v10241_v38 = vcombine.high %v2328_v31, %v2332_v32  ;;  %v2335_v39 = vld [vmem:[%s13563_s30 + $0x100] sm:$0xff]  ;;  %v2336_v41 = vld [vmem:[%s13563_s30 + $0x108] sm:$0xff]  ;;  %v10238_v44 = vcombine.low %v2327_v29, %v2331_v30  ;;  %v10240_v45 = vcombine.low %v2328_v31, %v2332_v32 }
 0x221   : > { %8566 = vmatpush1.bf16.msra.mxu0 %v10222_v24  ;;  %8894 = vmatpush1.bf16.msra.mxu1 %v10224_v26  ;;  %v2339_v40 = vld [vmem:[%s13563_s30 + $0x120] sm:$0xff]  ;;  %v2340_v42 = vld [vmem:[%s13563_s30 + $0x128] sm:$0xff]  ;;  %v13600_v43 = vrot.slane %v3344_v37, %v13578_v23 }
 0x222   : > { %8567 = vmatprep.subr.bf16.mxu0 %v10231_v27  ;;  %8895 = vmatprep.subr.bf16.mxu1 %v10233_v28  ;;  %v10247_v46 = vcombine.high %v2335_v39, %v2339_v40  ;;  %v10249_v47 = vcombine.high %v2336_v41, %v2340_v42  ;;  %v2343_v48 = vld [vmem:[%s13563_s30 + $0x140] sm:$0xff]  ;;  %v2344_v50 = vld [vmem:[%s13563_s30 + $0x148] sm:$0xff]  ;;  %v10246_v52 = vcombine.low %v2335_v39, %v2339_v40 }
 0x223   : > { %v2347_v49 = vld [vmem:[%s13563_s30 + $0x160] sm:$0xff]  ;;  %v2348_v51 = vld [vmem:[%s13563_s30 + $0x168] sm:$0xff]  ;;  %8595 = vmatprep.mubr.bf16.mxu0 %v13600_v43  ;;  %8923 = vmatprep.mubr.bf16.mxu1 %v13600_v43  ;;  %v10248_v53 = vcombine.low %v2336_v41, %v2340_v42 }
 0x224   : > { %v10255_v54 = vcombine.high %v2343_v48, %v2347_v49  ;;  %v10257_v55 = vcombine.high %v2344_v50, %v2348_v51  ;;  %v2351_v56 = vld [vmem:[%s13563_s30 + $0x180] sm:$0xff]  ;;  %v2352_v58 = vld [vmem:[%s13563_s30 + $0x188] sm:$0xff]  ;;  %v10254_v60 = vcombine.low %v2343_v48, %v2347_v49  ;;  %v10256_v61 = vcombine.low %v2344_v50, %v2348_v51 }
 0x225   : > { %8568 = vmatpush1.bf16.msra.mxu0 %v10230_v34  ;;  %8896 = vmatpush1.bf16.msra.mxu1 %v10232_v35  ;;  %v2355_v57 = vld [vmem:[%s13563_s30 + $0x1a0] sm:$0xff]  ;;  %v2356_v59 = vld [vmem:[%s13563_s30 + $0x1a8] sm:$0xff] }
 0x226   : > { %8569 = vmatprep.subr.bf16.mxu0 %v10239_v36  ;;  %8897 = vmatprep.subr.bf16.mxu1 %v10241_v38  ;;  %v10263_v62 = vcombine.high %v2351_v56, %v2355_v57  ;;  %v10265_v63 = vcombine.high %v2352_v58, %v2356_v59  ;;  %v2359_v0 = vld [vmem:[%s13563_s30 + $0x1c0] sm:$0xff]  ;;  %v2360_v2 = vld [vmem:[%s13563_s30 + $0x1c8] sm:$0xff]  ;;  %v10262_v5 = vcombine.low %v2351_v56, %v2355_v57 }
 0x227   : > { %v2363_v1 = vld [vmem:[%s13563_s30 + $0x1e0] sm:$0xff]  ;;  %v2364_v4 = vld [vmem:[%s13563_s30 + $0x1e8] sm:$0xff]  ;;  %v10264_v6 = vcombine.low %v2352_v58, %v2356_v59 }
 0x228   : > { %v10271_v7 = vcombine.high %v2359_v0, %v2363_v1  ;;  %v10273_v8 = vcombine.high %v2360_v2, %v2364_v4  ;;  %v2367_v9 = vld [vmem:[%s13563_s30 + $0x200] sm:$0xff]  ;;  %v2368_v11 = vld [vmem:[%s13563_s30 + $0x208] sm:$0xff]  ;;  %v10270_v13 = vcombine.low %v2359_v0, %v2363_v1  ;;  %v10272_v14 = vcombine.low %v2360_v2, %v2364_v4 }
 0x229   : > { %8570 = vmatpush1.bf16.msra.mxu0 %v10238_v44  ;;  %8898 = vmatpush1.bf16.msra.mxu1 %v10240_v45  ;;  %v2371_v10 = vld [vmem:[%s13563_s30 + $0x220] sm:$0xff]  ;;  %v2372_v12 = vld [vmem:[%s13563_s30 + $0x228] sm:$0xff] }
 0x22a   : > { %8571 = vmatprep.subr.bf16.mxu0 %v10247_v46  ;;  %8899 = vmatprep.subr.bf16.mxu1 %v10249_v47  ;;  %v10279_v15 = vcombine.high %v2367_v9, %v2371_v10  ;;  %v10281_v16 = vcombine.high %v2368_v11, %v2372_v12  ;;  %v2375_v17 = vld [vmem:[%s13563_s30 + $0x240] sm:$0xff]  ;;  %v2376_v19 = vld [vmem:[%s13563_s30 + $0x248] sm:$0xff]  ;;  %v10278_v21 = vcombine.low %v2367_v9, %v2371_v10 }
 0x22b   : > { %v2379_v18 = vld [vmem:[%s13563_s30 + $0x260] sm:$0xff]  ;;  %v2380_v20 = vld [vmem:[%s13563_s30 + $0x268] sm:$0xff]  ;;  %v10280_v22 = vcombine.low %v2368_v11, %v2372_v12 }
 0x22c   : > { %v10287_v24 = vcombine.high %v2375_v17, %v2379_v18  ;;  %v10289_v26 = vcombine.high %v2376_v19, %v2380_v20  ;;  %v2383_v27 = vld [vmem:[%s13563_s30 + $0x280] sm:$0xff]  ;;  %v2384_v29 = vld [vmem:[%s13563_s30 + $0x288] sm:$0xff]  ;;  %v10286_v31 = vcombine.low %v2375_v17, %v2379_v18  ;;  %v10288_v32 = vcombine.low %v2376_v19, %v2380_v20 }
 0x22d   : > { %8572 = vmatpush1.bf16.msra.mxu0 %v10246_v52  ;;  %8900 = vmatpush1.bf16.msra.mxu1 %v10248_v53  ;;  %v2387_v28 = vld [vmem:[%s13563_s30 + $0x2a0] sm:$0xff]  ;;  %v2388_v30 = vld [vmem:[%s13563_s30 + $0x2a8] sm:$0xff] }
 0x22e   : > { %8573 = vmatprep.subr.bf16.mxu0 %v10255_v54  ;;  %8901 = vmatprep.subr.bf16.mxu1 %v10257_v55  ;;  %v10295_v34 = vcombine.high %v2383_v27, %v2387_v28  ;;  %v10297_v35 = vcombine.high %v2384_v29, %v2388_v30  ;;  %v2391_v36 = vld [vmem:[%s13563_s30 + $0x2c0] sm:$0xff]  ;;  %v2392_v38 = vld [vmem:[%s13563_s30 + $0x2c8] sm:$0xff]  ;;  %v10294_v40 = vcombine.low %v2383_v27, %v2387_v28 }
 0x22f   : > { %v2395_v37 = vld [vmem:[%s13563_s30 + $0x2e0] sm:$0xff]  ;;  %v2396_v39 = vld [vmem:[%s13563_s30 + $0x2e8] sm:$0xff]  ;;  %v10296_v41 = vcombine.low %v2384_v29, %v2388_v30 }
 0x230   : > { %v10303_v42 = vcombine.high %v2391_v36, %v2395_v37  ;;  %v10305_v44 = vcombine.high %v2392_v38, %v2396_v39  ;;  %v2399_v45 = vld [vmem:[%s13563_s30 + $0x300] sm:$0xff]  ;;  %v2400_v47 = vld [vmem:[%s13563_s30 + $0x308] sm:$0xff]  ;;  %v10302_v49 = vcombine.low %v2391_v36, %v2395_v37  ;;  %v10304_v50 = vcombine.low %v2392_v38, %v2396_v39 }
 0x231   : > { %8574 = vmatpush1.bf16.msra.mxu0 %v10254_v60  ;;  %8902 = vmatpush1.bf16.msra.mxu1 %v10256_v61  ;;  %v2403_v46 = vld [vmem:[%s13563_s30 + $0x320] sm:$0xff]  ;;  %v2404_v48 = vld [vmem:[%s13563_s30 + $0x328] sm:$0xff]  ;;  %v13664_v36 = vcombine.high %v13600_v43, %v13600_v43 }
 0x232   : > { %8575 = vmatprep.subr.bf16.mxu0 %v10263_v62  ;;  %8903 = vmatprep.subr.bf16.mxu1 %v10265_v63  ;;  %v10311_v51 = vcombine.high %v2399_v45, %v2403_v46  ;;  %v10313_v52 = vcombine.high %v2400_v47, %v2404_v48  ;;  %v2407_v53 = vld [vmem:[%s13563_s30 + $0x340] sm:$0xff]  ;;  %v2408_v55 = vld [vmem:[%s13563_s30 + $0x348] sm:$0xff]  ;;  %v10310_v57 = vcombine.low %v2399_v45, %v2403_v46 }
 0x233   : > { %v2411_v54 = vld [vmem:[%s13563_s30 + $0x360] sm:$0xff]  ;;  %v2412_v56 = vld [vmem:[%s13563_s30 + $0x368] sm:$0xff]  ;;  %v10312_v58 = vcombine.low %v2400_v47, %v2404_v48 }
 0x234   : > { %v10319_v59 = vcombine.high %v2407_v53, %v2411_v54  ;;  %v10321_v60 = vcombine.high %v2408_v55, %v2412_v56  ;;  %v2415_v61 = vld [vmem:[%s13563_s30 + $0x380] sm:$0xff]  ;;  %v2416_v63 = vld [vmem:[%s13563_s30 + $0x388] sm:$0xff]  ;;  %v10318_v1 = vcombine.low %v2407_v53, %v2411_v54  ;;  %v10320_v2 = vcombine.low %v2408_v55, %v2412_v56 }
 0x235   : > { %8576 = vmatpush1.bf16.msra.mxu0 %v10262_v5  ;;  %8904 = vmatpush1.bf16.msra.mxu1 %v10264_v6  ;;  %v2419_v62 = vld [vmem:[%s13563_s30 + $0x3a0] sm:$0xff]  ;;  %v2420_v0 = vld [vmem:[%s13563_s30 + $0x3a8] sm:$0xff] }
 0x236   : > { %8577 = vmatprep.subr.bf16.mxu0 %v10271_v7  ;;  %8905 = vmatprep.subr.bf16.mxu1 %v10273_v8  ;;  %v10327_v4 = vcombine.high %v2415_v61, %v2419_v62  ;;  %v10329_v5 = vcombine.high %v2416_v63, %v2420_v0  ;;  %v2423_v6 = vld [vmem:[%s13563_s30 + $0x3c0] sm:$0xff]  ;;  %v2424_v8 = vld [vmem:[%s13563_s30 + $0x3c8] sm:$0xff]  ;;  %v10326_v10 = vcombine.low %v2415_v61, %v2419_v62 }
 0x237   : > { %v2427_v7 = vld [vmem:[%s13563_s30 + $0x3e0] sm:$0xff]  ;;  %v2428_v9 = vld [vmem:[%s13563_s30 + $0x3e8] sm:$0xff]  ;;  %v10328_v11 = vcombine.low %v2416_v63, %v2420_v0 }
 0x238   : > { %v10335_v12 = vcombine.high %v2423_v6, %v2427_v7  ;;  %v2436_v17 = vld [vmem:[%s13563_s30 + $0x428] sm:$0xff]  ;;  %v10334_v18 = vcombine.low %v2423_v6, %v2427_v7  ;;  %v10336_v19 = vcombine.low %v2424_v8, %v2428_v9 }
 0x239   : > { %8578 = vmatpush1.bf16.msra.mxu0 %v10270_v13  ;;  %8906 = vmatpush1.bf16.msra.mxu1 %v10272_v14  ;;  %v10337_v13 = vcombine.high %v2424_v8, %v2428_v9  ;;  %v2431_v14 = vld [vmem:[%s13563_s30 + $0x400] sm:$0xff]  ;;  %v2440_v27 = vld [vmem:[%s13563_s30 + $0x448] sm:$0xff] }
 0x23a   : > { %8579 = vmatprep.subr.bf16.mxu0 %v10279_v15  ;;  %8907 = vmatprep.subr.bf16.mxu1 %v10281_v16  ;;  %v2435_v15 = vld [vmem:[%s13563_s30 + $0x420] sm:$0xff]  ;;  %v2432_v16 = vld [vmem:[%s13563_s30 + $0x408] sm:$0xff] }
 0x23b   : > { %v10343_v20 = vcombine.high %v2431_v14, %v2435_v15  ;;  %v2444_v28 = vld [vmem:[%s13563_s30 + $0x468] sm:$0xff]  ;;  %v10342_v29 = vcombine.low %v2431_v14, %v2435_v15  ;;  %v10344_v30 = vcombine.low %v2432_v16, %v2436_v17 }
 0x23c   : > { %v2452_v37 = vld [vmem:[%s13563_s30 + $0x4a8] sm:$0xff]  ;;  %v10352_v39 = vcombine.low %v2440_v27, %v2444_v28 }
 0x23d   : > { %8580 = vmatpush1.bf16.msra.mxu0 %v10278_v21  ;;  %8908 = vmatpush1.bf16.msra.mxu1 %v10280_v22  ;;  %v10345_v21 = vcombine.high %v2432_v16, %v2436_v17  ;;  %v2439_v22 = vld [vmem:[%s13563_s30 + $0x440] sm:$0xff]  ;;  %v2456_v45 = vld [vmem:[%s13563_s30 + $0x4c8] sm:$0xff] }
 0x23e   : > { %8581 = vmatprep.subr.bf16.mxu0 %v10287_v24  ;;  %8909 = vmatprep.subr.bf16.mxu1 %v10289_v26  ;;  %v2443_v24 = vld [vmem:[%s13563_s30 + $0x460] sm:$0xff]  ;;  %v13656_v26 = vrot.slane %v13591_v33, %v13578_v23  ;;  %v2448_v33 = vld [vmem:[%s13563_s30 + $0x488] sm:$0xff] }
 0x23f   : > { %v10350_v38 = vcombine.low %v2439_v22, %v2443_v24  ;;  %v2460_v46 = vld [vmem:[%s13563_s30 + $0x4e8] sm:$0xff]  ;;  %v10360_v48 = vcombine.low %v2448_v33, %v2452_v37 }
 0x240   : > { %v2464_v53 = vld [vmem:[%s13563_s30 + $0x508] sm:$0xff]  ;;  %v10368_v56 = vcombine.low %v2456_v45, %v2460_v46 }
 0x241   : > { %8582 = vmatpush1.bf16.msra.mxu0 %v10286_v31  ;;  %8910 = vmatpush1.bf16.msra.mxu1 %v10288_v32  ;;  %v10351_v31 = vcombine.high %v2439_v22, %v2443_v24  ;;  %v10353_v32 = vcombine.high %v2440_v27, %v2444_v28  ;;  %v2468_v54 = vld [vmem:[%s13563_s30 + $0x528] sm:$0xff] }
 0x242   : > { %8583 = vmatprep.subr.bf16.mxu0 %v10295_v34  ;;  %8911 = vmatprep.subr.bf16.mxu1 %v10297_v35  ;;  %v2447_v34 = vld [vmem:[%s13563_s30 + $0x480] sm:$0xff]  ;;  %v2472_v61 = vld [vmem:[%s13563_s30 + $0x548] sm:$0xff]  ;;  %v10376_v0 = vcombine.low %v2464_v53, %v2468_v54 }
 0x243   : > { %v2451_v35 = vld [vmem:[%s13563_s30 + $0x4a0] sm:$0xff]  ;;  %v2476_v62 = vld [vmem:[%s13563_s30 + $0x568] sm:$0xff] }
 0x244   : > { %v10358_v47 = vcombine.low %v2447_v34, %v2451_v35  ;;  %v2480_v6 = vld [vmem:[%s13563_s30 + $0x588] sm:$0xff]  ;;  %v10384_v9 = vcombine.low %v2472_v61, %v2476_v62 }
 0x245   : > { %8584 = vmatpush1.bf16.msra.mxu0 %v10294_v40  ;;  %8912 = vmatpush1.bf16.msra.mxu1 %v10296_v41  ;;  %v10359_v40 = vcombine.high %v2447_v34, %v2451_v35  ;;  %v10361_v41 = vcombine.high %v2448_v33, %v2452_v37  ;;  %v2484_v7 = vld [vmem:[%s13563_s30 + $0x5a8] sm:$0xff] }
 0x246   : > { %8585 = vmatprep.subr.bf16.mxu0 %v10303_v42  ;;  %8913 = vmatprep.subr.bf16.mxu1 %v10305_v44  ;;  %v2455_v42 = vld [vmem:[%s13563_s30 + $0x4c0] sm:$0xff]  ;;  %v2488_v14 = vld [vmem:[%s13563_s30 + $0x5c8] sm:$0xff]  ;;  %v10392_v17 = vcombine.low %v2480_v6, %v2484_v7 }
 0x247   : > { %v2459_v44 = vld [vmem:[%s13563_s30 + $0x4e0] sm:$0xff]  ;;  %v2492_v15 = vld [vmem:[%s13563_s30 + $0x5e8] sm:$0xff] }
 0x248   : > { %v10366_v55 = vcombine.low %v2455_v42, %v2459_v44  ;;  %v2496_v22 = vld [vmem:[%s13563_s30 + $0x608] sm:$0xff]  ;;  %v10400_v28 = vcombine.low %v2488_v14, %v2492_v15 }
 0x249   : > { %8586 = vmatpush1.bf16.msra.mxu0 %v10302_v49  ;;  %8914 = vmatpush1.bf16.msra.mxu1 %v10304_v50  ;;  %v10367_v49 = vcombine.high %v2455_v42, %v2459_v44  ;;  %v10369_v50 = vcombine.high %v2456_v45, %v2460_v46  ;;  %v2500_v24 = vld [vmem:[%s13563_s30 + $0x628] sm:$0xff] }
 0x24a   : > { %8587 = vmatprep.subr.bf16.mxu0 %v10311_v51  ;;  %8915 = vmatprep.subr.bf16.mxu1 %v10313_v52  ;;  %v2463_v51 = vld [vmem:[%s13563_s30 + $0x500] sm:$0xff]  ;;  %v2504_v34 = vld [vmem:[%s13563_s30 + $0x648] sm:$0xff]  ;;  %v10408_v37 = vcombine.low %v2496_v22, %v2500_v24 }
 0x24b   : > { %v2467_v52 = vld [vmem:[%s13563_s30 + $0x520] sm:$0xff]  ;;  %v2508_v35 = vld [vmem:[%s13563_s30 + $0x668] sm:$0xff] }
 0x24c   : > { %v10374_v63 = vcombine.low %v2463_v51, %v2467_v52  ;;  %v2512_v42 = vld [vmem:[%s13563_s30 + $0x688] sm:$0xff]  ;;  %v10416_v46 = vcombine.low %v2504_v34, %v2508_v35 }
 0x24d   : > { %8588 = vmatpush1.bf16.msra.mxu0 %v10310_v57  ;;  %8916 = vmatpush1.bf16.msra.mxu1 %v10312_v58  ;;  %v10375_v57 = vcombine.high %v2463_v51, %v2467_v52  ;;  %v10377_v58 = vcombine.high %v2464_v53, %v2468_v54  ;;  %v2516_v44 = vld [vmem:[%s13563_s30 + $0x6a8] sm:$0xff] }
 0x24e   : > { %8589 = vmatprep.subr.bf16.mxu0 %v10319_v59  ;;  %8917 = vmatprep.subr.bf16.mxu1 %v10321_v60  ;;  %v2471_v59 = vld [vmem:[%s13563_s30 + $0x540] sm:$0xff]  ;;  %v2520_v51 = vld [vmem:[%s13563_s30 + $0x6c8] sm:$0xff]  ;;  %v10424_v54 = vcombine.low %v2512_v42, %v2516_v44 }
 0x24f   : > { %v2475_v60 = vld [vmem:[%s13563_s30 + $0x560] sm:$0xff]  ;;  %v2524_v52 = vld [vmem:[%s13563_s30 + $0x6e8] sm:$0xff] }
 0x250   : > { %v10382_v8 = vcombine.low %v2471_v59, %v2475_v60 }
 0x251   : > { %8590 = vmatpush1.bf16.msra.mxu0 %v10318_v1  ;;  %8918 = vmatpush1.bf16.msra.mxu1 %v10320_v2  ;;  %v10383_v1 = vcombine.high %v2471_v59, %v2475_v60  ;;  %v10385_v2 = vcombine.high %v2472_v61, %v2476_v62  ;;  %v2528_v59 = vld [vmem:[%s13563_s30 + $0x708] sm:$0xff]  ;;  %v10432_v62 = vcombine.low %v2520_v51, %v2524_v52 }
 0x252   : > { %8591 = vmatprep.subr.bf16.mxu0 %v10327_v4  ;;  %8919 = vmatprep.subr.bf16.mxu1 %v10329_v5  ;;  %v2479_v4 = vld [vmem:[%s13563_s30 + $0x580] sm:$0xff]  ;;  %v2532_v60 = vld [vmem:[%s13563_s30 + $0x728] sm:$0xff] }
 0x253   : > { %v2483_v5 = vld [vmem:[%s13563_s30 + $0x5a0] sm:$0xff] }
 0x254   : > { %v10390_v16 = vcombine.low %v2479_v4, %v2483_v5 }
 0x255   : > { %8592 = vmatpush1.bf16.msra.mxu0 %v10326_v10  ;;  %8920 = vmatpush1.bf16.msra.mxu1 %v10328_v11  ;;  %v10391_v10 = vcombine.high %v2479_v4, %v2483_v5  ;;  %v10393_v11 = vcombine.high %v2480_v6, %v2484_v7  ;;  %v2536_v4 = vld [vmem:[%s13563_s30 + $0x748] sm:$0xff]  ;;  %v10440_v7 = vcombine.low %v2528_v59, %v2532_v60 }
 0x256   : > { %8593 = vmatprep.subr.bf16.mxu0 %v10335_v12  ;;  %8921 = vmatprep.subr.bf16.mxu1 %v10337_v13  ;;  %v2487_v12 = vld [vmem:[%s13563_s30 + $0x5c0] sm:$0xff]  ;;  %v2540_v5 = vld [vmem:[%s13563_s30 + $0x768] sm:$0xff] }
 0x257   : > { %v2491_v13 = vld [vmem:[%s13563_s30 + $0x5e0] sm:$0xff] }
 0x258   : > { %v10398_v27 = vcombine.low %v2487_v12, %v2491_v13 }
 0x259   : > { %8594 = vmatpush1.bf16.msra.mxu0 %v10334_v18  ;;  %8922 = vmatpush1.bf16.msra.mxu1 %v10336_v19  ;;  %v10399_v18 = vcombine.high %v2487_v12, %v2491_v13  ;;  %v10401_v19 = vcombine.high %v2488_v14, %v2492_v15  ;;  %v2544_v12 = vld [vmem:[%s13563_s30 + $0x788] sm:$0xff]  ;;  %v10448_v15 = vcombine.low %v2536_v4, %v2540_v5 }
 0x25a   : > { %8604 = vmatprep.subr.bf16.mxu0 %v10343_v20  ;;  %8932 = vmatprep.subr.bf16.mxu1 %v10345_v21  ;;  %v2495_v20 = vld [vmem:[%s13563_s30 + $0x600] sm:$0xff]  ;;  %v2548_v13 = vld [vmem:[%s13563_s30 + $0x7a8] sm:$0xff] }
 0x25b   : > { %v2499_v21 = vld [vmem:[%s13563_s30 + $0x620] sm:$0xff] }
 0x25c   : > { %8596 = vmatmul.mubr.bf16.vlgmr.msra.gmra.mrb[0].mxu0 %v13656_v26  ;;  %8924 = vmatmul.mubr.bf16.vlgmr.msra.gmra.mrb[0].mxu1 %v13656_v26  ;;  %v10406_v33 = vcombine.low %v2495_v20, %v2499_v21 }
 0x25d   : > { %8605 = vmatpush1.bf16.msra.mxu0 %v10342_v29  ;;  %8933 = vmatpush1.bf16.msra.mxu1 %v10344_v30  ;;  %v10407_v29 = vcombine.high %v2495_v20, %v2499_v21  ;;  %v10409_v30 = vcombine.high %v2496_v22, %v2500_v24  ;;  %v3329_v20 = vcombine.high %v13583_v25, %v13583_v25  ;;  %v2552_v21 = vld [vmem:[%s13563_s30 + $0x7c8] sm:$0xff] }
 0x25e   : > { %8606 = vmatprep.subr.bf16.mxu0 %v10351_v31  ;;  %8934 = vmatprep.subr.bf16.mxu1 %v10353_v32  ;;  %v2503_v31 = vld [vmem:[%s13563_s30 + $0x640] sm:$0xff]  ;;  %v2556_v22 = vld [vmem:[%s13563_s30 + $0x7e8] sm:$0xff] }
 0x25f   : > { %8636 = vmatprep.mubr.bf16.mxu0 %v13664_v36  ;;  %8964 = vmatprep.mubr.bf16.mxu1 %v13664_v36  ;;  %v2507_v32 = vld [vmem:[%s13563_s30 + $0x660] sm:$0xff]  ;;  %v2560_v25 = vld [vmem:[%s13563_s30 + $0x808] sm:$0xff] }
 0x260   : > { %v10414_v45 = vcombine.low %v2503_v31, %v2507_v32 }
 0x261   : > { %8607 = vmatpush1.bf16.msra.mxu0 %v10350_v38  ;;  %8935 = vmatpush1.bf16.msra.mxu1 %v10352_v39  ;;  %v10415_v38 = vcombine.high %v2503_v31, %v2507_v32  ;;  %v10417_v39 = vcombine.high %v2504_v34, %v2508_v35  ;;  %v2563_v31 = vld [vmem:[%s13563_s30 + $0x820] sm:$0xff]  ;;  %v13729_v32 = vrot.slane %v3329_v20, %v13578_v23  ;;  %v2564_v34 = vld [vmem:[%s13563_s30 + $0x828] sm:$0xff] }
 0x262   : > { %8608 = vmatprep.subr.bf16.mxu0 %v10359_v40  ;;  %8936 = vmatprep.subr.bf16.mxu1 %v10361_v41  ;;  %v2511_v40 = vld [vmem:[%s13563_s30 + $0x680] sm:$0xff] }
 0x263   : > { %v2515_v41 = vld [vmem:[%s13563_s30 + $0x6a0] sm:$0xff] }
 0x264   : > { %v10422_v53 = vcombine.low %v2511_v40, %v2515_v41  ;;  %v2607_v20 = vld [vmem:[%s13563_s30 + $0x980] sm:$0xff] }
 0x265   : > { %8609 = vmatpush1.bf16.msra.mxu0 %v10358_v47  ;;  %8937 = vmatpush1.bf16.msra.mxu1 %v10360_v48  ;;  %v10423_v47 = vcombine.high %v2511_v40, %v2515_v41  ;;  %v10425_v48 = vcombine.high %v2512_v42, %v2516_v44  ;;  %v2571_v40 = vld [vmem:[%s13563_s30 + $0x860] sm:$0xff]  ;;  %v3345_v41 = vcombine.high %v13729_v32, %v13729_v32  ;;  %v2568_v44 = vld [vmem:[%s13563_s30 + $0x848] sm:$0xff] }
 0x266   : > { %8610 = vmatprep.subr.bf16.mxu0 %v10367_v49  ;;  %8938 = vmatprep.subr.bf16.mxu1 %v10369_v50  ;;  %v2519_v49 = vld [vmem:[%s13563_s30 + $0x6c0] sm:$0xff]  ;;  %v13739_v42 = vcombine.high %v13656_v26, %v13656_v26 }
 0x267   : > { %v2523_v50 = vld [vmem:[%s13563_s30 + $0x6e0] sm:$0xff] }
 0x268   : > { %v10430_v61 = vcombine.low %v2519_v49, %v2523_v50 }
 0x269   : > { %8611 = vmatpush1.bf16.msra.mxu0 %v10366_v55  ;;  %8939 = vmatpush1.bf16.msra.mxu1 %v10368_v56  ;;  %v10431_v55 = vcombine.high %v2519_v49, %v2523_v50  ;;  %v10433_v56 = vcombine.high %v2520_v51, %v2524_v52  ;;  %v2575_v50 = vld [vmem:[%s13563_s30 + $0x880] sm:$0xff]  ;;  %v13746_v52 = vrot.slane %v3345_v41, %v13578_v23 }
 0x26a   : > { %8612 = vmatprep.subr.bf16.mxu0 %v10375_v57  ;;  %8940 = vmatprep.subr.bf16.mxu1 %v10377_v58  ;;  %v2527_v57 = vld [vmem:[%s13563_s30 + $0x700] sm:$0xff] }
 0x26b   : > { %v2531_v58 = vld [vmem:[%s13563_s30 + $0x720] sm:$0xff] }
 0x26c   : > { %v10438_v6 = vcombine.low %v2527_v57, %v2531_v58  ;;  %v2579_v51 = vld [vmem:[%s13563_s30 + $0x8a0] sm:$0xff] }
 0x26d   : > { %8613 = vmatpush1.bf16.msra.mxu0 %v10374_v63  ;;  %8941 = vmatpush1.bf16.msra.mxu1 %v10376_v0  ;;  %v10439_v63 = vcombine.high %v2527_v57, %v2531_v58  ;;  %v10441_v0 = vcombine.high %v2528_v59, %v2532_v60  ;;  %v10487_v57 = vcombine.high %v2575_v50, %v2579_v51  ;;  %v2583_v59 = vld [vmem:[%s13563_s30 + $0x8c0] sm:$0xff] }
 0x26e   : > { %8614 = vmatprep.subr.bf16.mxu0 %v10383_v1  ;;  %8942 = vmatprep.subr.bf16.mxu1 %v10385_v2  ;;  %v2535_v1 = vld [vmem:[%s13563_s30 + $0x740] sm:$0xff] }
 0x26f   : > { %v2539_v2 = vld [vmem:[%s13563_s30 + $0x760] sm:$0xff] }
 0x270   : > { %v10446_v14 = vcombine.low %v2535_v1, %v2539_v2  ;;  %v2587_v60 = vld [vmem:[%s13563_s30 + $0x8e0] sm:$0xff] }
 0x271   : > { %8615 = vmatpush1.bf16.msra.mxu0 %v10382_v8  ;;  %8943 = vmatpush1.bf16.msra.mxu1 %v10384_v9  ;;  %v10447_v8 = vcombine.high %v2535_v1, %v2539_v2  ;;  %v10449_v9 = vcombine.high %v2536_v4, %v2540_v5  ;;  %v10495_v1 = vcombine.high %v2583_v59, %v2587_v60  ;;  %v2591_v4 = vld [vmem:[%s13563_s30 + $0x900] sm:$0xff] }
 0x272   : > { %8616 = vmatprep.subr.bf16.mxu0 %v10391_v10  ;;  %8944 = vmatprep.subr.bf16.mxu1 %v10393_v11  ;;  %v2543_v10 = vld [vmem:[%s13563_s30 + $0x780] sm:$0xff] }
 0x273   : > { %v2547_v11 = vld [vmem:[%s13563_s30 + $0x7a0] sm:$0xff] }
 0x274   : > { %v10454_v24 = vcombine.low %v2543_v10, %v2547_v11  ;;  %v2595_v5 = vld [vmem:[%s13563_s30 + $0x920] sm:$0xff] }
 0x275   : > { %8617 = vmatpush1.bf16.msra.mxu0 %v10390_v16  ;;  %8945 = vmatpush1.bf16.msra.mxu1 %v10392_v17  ;;  %v10455_v16 = vcombine.high %v2543_v10, %v2547_v11  ;;  %v10457_v17 = vcombine.high %v2544_v12, %v2548_v13  ;;  %v10503_v10 = vcombine.high %v2591_v4, %v2595_v5  ;;  %v2627_v41 = vld [vmem:[%s13563_s30 + $0xa20] sm:$0xff] }
 0x276   : > { %8618 = vmatprep.subr.bf16.mxu0 %v10399_v18  ;;  %8946 = vmatprep.subr.bf16.mxu1 %v10401_v19  ;;  %v2551_v18 = vld [vmem:[%s13563_s30 + $0x7c0] sm:$0xff] }
 0x277   : > { %v2555_v19 = vld [vmem:[%s13563_s30 + $0x7e0] sm:$0xff] }
 0x278   : > { %v10462_v35 = vcombine.low %v2551_v18, %v2555_v19 }
 0x279   : > { %8619 = vmatpush1.bf16.msra.mxu0 %v10398_v27  ;;  %8947 = vmatpush1.bf16.msra.mxu1 %v10400_v28  ;;  %v10456_v27 = vcombine.low %v2544_v12, %v2548_v13  ;;  %v10463_v28 = vcombine.high %v2551_v18, %v2555_v19  ;;  %v2599_v12 = vld [vmem:[%s13563_s30 + $0x940] sm:$0xff] }
 0x27a   : > { %8620 = vmatprep.subr.bf16.mxu0 %v10407_v29  ;;  %8948 = vmatprep.subr.bf16.mxu1 %v10409_v30  ;;  %v10465_v29 = vcombine.high %v2552_v21, %v2556_v22  ;;  %v2559_v30 = vld [vmem:[%s13563_s30 + $0x800] sm:$0xff] }
 0x27b   : > { %v2603_v13 = vld [vmem:[%s13563_s30 + $0x960] sm:$0xff] }
 0x27c   : > { %v10511_v18 = vcombine.high %v2599_v12, %v2603_v13 }
 0x27d   : > { %8621 = vmatpush1.bf16.msra.mxu0 %v10406_v33  ;;  %8949 = vmatpush1.bf16.msra.mxu1 %v10408_v37  ;;  %v10464_v33 = vcombine.low %v2552_v21, %v2556_v22  ;;  %v10471_v37 = vcombine.high %v2559_v30, %v2563_v31  ;;  %v2611_v21 = vld [vmem:[%s13563_s30 + $0x9a0] sm:$0xff]  ;;  %v2608_v22 = vld [vmem:[%s13563_s30 + $0x988] sm:$0xff] }
 0x27e   : > { %8622 = vmatprep.subr.bf16.mxu0 %v10415_v38  ;;  %8950 = vmatprep.subr.bf16.mxu1 %v10417_v39  ;;  %v10473_v38 = vcombine.high %v2560_v25, %v2564_v34  ;;  %v2567_v39 = vld [vmem:[%s13563_s30 + $0x840] sm:$0xff] }
 0x281   : > { %8623 = vmatpush1.bf16.msra.mxu0 %v10414_v45  ;;  %8951 = vmatpush1.bf16.msra.mxu1 %v10416_v46  ;;  %v2572_v45 = vld [vmem:[%s13563_s30 + $0x868] sm:$0xff]  ;;  %v10470_v46 = vcombine.low %v2559_v30, %v2563_v31  ;;  %v2615_v31 = vld [vmem:[%s13563_s30 + $0x9c0] sm:$0xff] }
 0x282   : > { %8624 = vmatprep.subr.bf16.mxu0 %v10423_v47  ;;  %8952 = vmatprep.subr.bf16.mxu1 %v10425_v48  ;;  %v10472_v47 = vcombine.low %v2560_v25, %v2564_v34  ;;  %v10479_v48 = vcombine.high %v2567_v39, %v2571_v40  ;;  %v10481_v49 = vcombine.high %v2568_v44, %v2572_v45  ;;  %v2619_v25 = vld [vmem:[%s13563_s30 + $0x9e0] sm:$0xff]  ;;  %v2616_v34 = vld [vmem:[%s13563_s30 + $0x9c8] sm:$0xff] }
 0x285   : > { %8625 = vmatpush1.bf16.msra.mxu0 %v10422_v53  ;;  %8953 = vmatpush1.bf16.msra.mxu1 %v10424_v54  ;;  %v2576_v53 = vld [vmem:[%s13563_s30 + $0x888] sm:$0xff] }
 0x286   : > { %8626 = vmatprep.subr.bf16.mxu0 %v10431_v55  ;;  %8954 = vmatprep.subr.bf16.mxu1 %v10433_v56  ;;  %v2580_v54 = vld [vmem:[%s13563_s30 + $0x8a8] sm:$0xff]  ;;  %v10478_v55 = vcombine.low %v2567_v39, %v2571_v40  ;;  %v10480_v56 = vcombine.low %v2568_v44, %v2572_v45  ;;  %v2623_v40 = vld [vmem:[%s13563_s30 + $0xa00] sm:$0xff] }
 0x287   : > { %v10489_v58 = vcombine.high %v2576_v53, %v2580_v54  ;;  %v2624_v44 = vld [vmem:[%s13563_s30 + $0xa08] sm:$0xff] }
 0x288   : > { %v2628_v45 = vld [vmem:[%s13563_s30 + $0xa28] sm:$0xff] }
 0x289   : > { %8627 = vmatpush1.bf16.msra.mxu0 %v10430_v61  ;;  %8955 = vmatpush1.bf16.msra.mxu1 %v10432_v62  ;;  %v2584_v61 = vld [vmem:[%s13563_s30 + $0x8c8] sm:$0xff] }
 0x28a   : > { %8628 = vmatprep.subr.bf16.mxu0 %v10439_v63  ;;  %8956 = vmatprep.subr.bf16.mxu1 %v10441_v0  ;;  %v2588_v62 = vld [vmem:[%s13563_s30 + $0x8e8] sm:$0xff]  ;;  %v10486_v63 = vcombine.low %v2575_v50, %v2579_v51  ;;  %v10488_v0 = vcombine.low %v2576_v53, %v2580_v54  ;;  %v2631_v50 = vld [vmem:[%s13563_s30 + $0xa40] sm:$0xff] }
 0x28b   : > { %v10497_v2 = vcombine.high %v2584_v61, %v2588_v62  ;;  %v2635_v51 = vld [vmem:[%s13563_s30 + $0xa60] sm:$0xff]  ;;  %v2632_v53 = vld [vmem:[%s13563_s30 + $0xa48] sm:$0xff] }
 0x28c   : > { %v2636_v54 = vld [vmem:[%s13563_s30 + $0xa68] sm:$0xff] }
 0x28d   : > { %8629 = vmatpush1.bf16.msra.mxu0 %v10438_v6  ;;  %8957 = vmatpush1.bf16.msra.mxu1 %v10440_v7  ;;  %v2592_v6 = vld [vmem:[%s13563_s30 + $0x908] sm:$0xff] }
 0x28e   : > { %8630 = vmatprep.subr.bf16.mxu0 %v10447_v8  ;;  %8958 = vmatprep.subr.bf16.mxu1 %v10449_v9  ;;  %v2596_v7 = vld [vmem:[%s13563_s30 + $0x928] sm:$0xff]  ;;  %v10494_v8 = vcombine.low %v2583_v59, %v2587_v60  ;;  %v10496_v9 = vcombine.low %v2584_v61, %v2588_v62  ;;  %v2639_v59 = vld [vmem:[%s13563_s30 + $0xa80] sm:$0xff] }
 0x28f   : > { %v10505_v11 = vcombine.high %v2592_v6, %v2596_v7  ;;  %v2643_v60 = vld [vmem:[%s13563_s30 + $0xaa0] sm:$0xff]  ;;  %v2640_v61 = vld [vmem:[%s13563_s30 + $0xa88] sm:$0xff] }
 0x290   : > { %v2644_v62 = vld [vmem:[%s13563_s30 + $0xaa8] sm:$0xff] }
 0x291   : > { %8631 = vmatpush1.bf16.msra.mxu0 %v10446_v14  ;;  %8959 = vmatpush1.bf16.msra.mxu1 %v10448_v15  ;;  %v2600_v14 = vld [vmem:[%s13563_s30 + $0x948] sm:$0xff] }
 0x292   : > { %8632 = vmatprep.subr.bf16.mxu0 %v10455_v16  ;;  %8960 = vmatprep.subr.bf16.mxu1 %v10457_v17  ;;  %v2604_v15 = vld [vmem:[%s13563_s30 + $0x968] sm:$0xff]  ;;  %v10502_v16 = vcombine.low %v2591_v4, %v2595_v5  ;;  %v10504_v17 = vcombine.low %v2592_v6, %v2596_v7  ;;  %v2647_v4 = vld [vmem:[%s13563_s30 + $0xac0] sm:$0xff] }
 0x293   : > { %v10513_v19 = vcombine.high %v2600_v14, %v2604_v15  ;;  %v2651_v5 = vld [vmem:[%s13563_s30 + $0xae0] sm:$0xff]  ;;  %v2648_v6 = vld [vmem:[%s13563_s30 + $0xac8] sm:$0xff] }
 0x294   : > { %v2652_v7 = vld [vmem:[%s13563_s30 + $0xae8] sm:$0xff] }
 0x295   : > { %8633 = vmatpush1.bf16.msra.mxu0 %v10454_v24  ;;  %8961 = vmatpush1.bf16.msra.mxu1 %v10456_v27  ;;  %v2612_v24 = vld [vmem:[%s13563_s30 + $0x9a8] sm:$0xff]  ;;  %v10510_v27 = vcombine.low %v2599_v12, %v2603_v13  ;;  %v2655_v12 = vld [vmem:[%s13563_s30 + $0xb00] sm:$0xff] }
 0x296   : > { %8634 = vmatprep.subr.bf16.mxu0 %v10463_v28  ;;  %8962 = vmatprep.subr.bf16.mxu1 %v10465_v29  ;;  %v10512_v28 = vcombine.low %v2600_v14, %v2604_v15  ;;  %v10519_v29 = vcombine.high %v2607_v20, %v2611_v21  ;;  %v10521_v30 = vcombine.high %v2608_v22, %v2612_v24  ;;  %v2659_v13 = vld [vmem:[%s13563_s30 + $0xb20] sm:$0xff]  ;;  %v2656_v14 = vld [vmem:[%s13563_s30 + $0xb08] sm:$0xff] }
 0x297   : > { %v2660_v15 = vld [vmem:[%s13563_s30 + $0xb28] sm:$0xff] }
 0x299   : > { %8635 = vmatpush1.bf16.msra.mxu0 %v10462_v35  ;;  %8963 = vmatpush1.bf16.msra.mxu1 %v10464_v33  ;;  %v2620_v35 = vld [vmem:[%s13563_s30 + $0x9e8] sm:$0xff]  ;;  %v10518_v33 = vcombine.low %v2607_v20, %v2611_v21  ;;  %v2663_v20 = vld [vmem:[%s13563_s30 + $0xb40] sm:$0xff] }
 0x29a   : > { %8645 = vmatprep.subr.bf16.mxu0 %v10471_v37  ;;  %8973 = vmatprep.subr.bf16.mxu1 %v10473_v38  ;;  %v10520_v37 = vcombine.low %v2608_v22, %v2612_v24  ;;  %v10527_v38 = vcombine.high %v2615_v31, %v2619_v25  ;;  %v10529_v39 = vcombine.high %v2616_v34, %v2620_v35  ;;  %v2667_v21 = vld [vmem:[%s13563_s30 + $0xb60] sm:$0xff]  ;;  %v2664_v22 = vld [vmem:[%s13563_s30 + $0xb48] sm:$0xff] }
 0x29b   : > { %v2668_v24 = vld [vmem:[%s13563_s30 + $0xb68] sm:$0xff] }
 0x29c   : > { %8637 = vmatmul.mubr.bf16.vlgmr.msra.gmra.mrb[0].mxu0 %v13739_v42  ;;  %8965 = vmatmul.mubr.bf16.vlgmr.msra.gmra.mrb[0].mxu1 %v13739_v42 }
 0x29d   : > { %8646 = vmatpush1.bf16.msra.mxu0 %v10470_v46  ;;  %8974 = vmatpush1.bf16.msra.mxu1 %v10472_v47  ;;  %v10526_v46 = vcombine.low %v2615_v31, %v2619_v25  ;;  %v10528_v47 = vcombine.low %v2616_v34, %v2620_v35  ;;  %v2671_v31 = vld [vmem:[%s13563_s30 + $0xb80] sm:$0xff]  ;;  %v2672_v34 = vld [vmem:[%s13563_s30 + $0xb88] sm:$0xff] }
 0x29e   : > { %8647 = vmatprep.subr.bf16.mxu0 %v10479_v48  ;;  %8975 = vmatprep.subr.bf16.mxu1 %v10481_v49  ;;  %v10535_v48 = vcombine.high %v2623_v40, %v2627_v41  ;;  %v10537_v49 = vcombine.high %v2624_v44, %v2628_v45  ;;  %v2675_v25 = vld [vmem:[%s13563_s30 + $0xba0] sm:$0xff]  ;;  %v2676_v35 = vld [vmem:[%s13563_s30 + $0xba8] sm:$0xff] }
 0x29f   : > { %8677 = vmatprep.mubr.bf16.mxu0 %v13746_v52  ;;  %9005 = vmatprep.mubr.bf16.mxu1 %v13746_v52 }
 0x2a1   : > { %8648 = vmatpush1.bf16.msra.mxu0 %v10478_v55  ;;  %8976 = vmatpush1.bf16.msra.mxu1 %v10480_v56  ;;  %v10534_v55 = vcombine.low %v2623_v40, %v2627_v41  ;;  %v10536_v56 = vcombine.low %v2624_v44, %v2628_v45  ;;  %v2679_v40 = vld [vmem:[%s13563_s30 + $0xbc0] sm:$0xff]  ;;  %v2680_v44 = vld [vmem:[%s13563_s30 + $0xbc8] sm:$0xff] }
 0x2a2   : > { %8649 = vmatprep.subr.bf16.mxu0 %v10487_v57  ;;  %8977 = vmatprep.subr.bf16.mxu1 %v10489_v58  ;;  %v10543_v57 = vcombine.high %v2631_v50, %v2635_v51  ;;  %v10545_v58 = vcombine.high %v2632_v53, %v2636_v54  ;;  %v2683_v41 = vld [vmem:[%s13563_s30 + $0xbe0] sm:$0xff]  ;;  %v2684_v45 = vld [vmem:[%s13563_s30 + $0xbe8] sm:$0xff] }
 0x2a5   : > { %8650 = vmatpush1.bf16.msra.mxu0 %v10486_v63  ;;  %8978 = vmatpush1.bf16.msra.mxu1 %v10488_v0  ;;  %v10542_v63 = vcombine.low %v2631_v50, %v2635_v51  ;;  %v10544_v0 = vcombine.low %v2632_v53, %v2636_v54  ;;  %v2687_v50 = vld [vmem:[%s13563_s30 + $0xc00] sm:$0xff]  ;;  %v2688_v53 = vld [vmem:[%s13563_s30 + $0xc08] sm:$0xff] }
 0x2a6   : > { %8651 = vmatprep.subr.bf16.mxu0 %v10495_v1  ;;  %8979 = vmatprep.subr.bf16.mxu1 %v10497_v2  ;;  %v10551_v1 = vcombine.high %v2639_v59, %v2643_v60  ;;  %v10553_v2 = vcombine.high %v2640_v61, %v2644_v62  ;;  %v2691_v51 = vld [vmem:[%s13563_s30 + $0xc20] sm:$0xff]  ;;  %v2692_v54 = vld [vmem:[%s13563_s30 + $0xc28] sm:$0xff] }
 0x2a9   : > { %8652 = vmatpush1.bf16.msra.mxu0 %v10494_v8  ;;  %8980 = vmatpush1.bf16.msra.mxu1 %v10496_v9  ;;  %v10550_v8 = vcombine.low %v2639_v59, %v2643_v60  ;;  %v10552_v9 = vcombine.low %v2640_v61, %v2644_v62  ;;  %v2695_v59 = vld [vmem:[%s13563_s30 + $0xc40] sm:$0xff]  ;;  %v13814_v61 = vrot.slane %v13729_v32, %v13578_v23  ;;  %v2696_v62 = vld [vmem:[%s13563_s30 + $0xc48] sm:$0xff] }
 0x2aa   : > { %8653 = vmatprep.subr.bf16.mxu0 %v10503_v10  ;;  %8981 = vmatprep.subr.bf16.mxu1 %v10505_v11  ;;  %v10559_v10 = vcombine.high %v2647_v4, %v2651_v5  ;;  %v10561_v11 = vcombine.high %v2648_v6, %v2652_v7  ;;  %v2699_v60 = vld [vmem:[%s13563_s30 + $0xc60] sm:$0xff]  ;;  %v2704_v32 = vld [vmem:[%s13563_s30 + $0xc88] sm:$0xff] }
 0x2ad   : > { %8654 = vmatpush1.bf16.msra.mxu0 %v10502_v16  ;;  %8982 = vmatpush1.bf16.msra.mxu1 %v10504_v17  ;;  %v10558_v16 = vcombine.low %v2647_v4, %v2651_v5  ;;  %v10560_v17 = vcombine.low %v2648_v6, %v2652_v7  ;;  %v2703_v5 = vld [vmem:[%s13563_s30 + $0xc80] sm:$0xff]  ;;  %v13822_v7 = vcombine.high %v13746_v52, %v13746_v52 }
 0x2ae   : > { %8655 = vmatprep.subr.bf16.mxu0 %v10511_v18  ;;  %8983 = vmatprep.subr.bf16.mxu1 %v10513_v19  ;;  %v10567_v18 = vcombine.high %v2655_v12, %v2659_v13  ;;  %v10569_v19 = vcombine.high %v2656_v14, %v2660_v15  ;;  %v2707_v6 = vld [vmem:[%s13563_s30 + $0xca0] sm:$0xff] }
 0x2b1   : > { %8656 = vmatpush1.bf16.msra.mxu0 %v10510_v27  ;;  %8984 = vmatpush1.bf16.msra.mxu1 %v10512_v28  ;;  %v10566_v27 = vcombine.low %v2655_v12, %v2659_v13  ;;  %v10568_v28 = vcombine.low %v2656_v14, %v2660_v15  ;;  %v2711_v13 = vld [vmem:[%s13563_s30 + $0xcc0] sm:$0xff]  ;;  %v2712_v15 = vld [vmem:[%s13563_s30 + $0xcc8] sm:$0xff] }
 0x2b2   : > { %8657 = vmatprep.subr.bf16.mxu0 %v10519_v29  ;;  %8985 = vmatprep.subr.bf16.mxu1 %v10521_v30  ;;  %v10575_v29 = vcombine.high %v2663_v20, %v2667_v21  ;;  %v10577_v30 = vcombine.high %v2664_v22, %v2668_v24  ;;  %v2715_v14 = vld [vmem:[%s13563_s30 + $0xce0] sm:$0xff] }
 0x2b5   : > { %8658 = vmatpush1.bf16.msra.mxu0 %v10518_v33  ;;  %8986 = vmatpush1.bf16.msra.mxu1 %v10520_v37  ;;  %v10574_v33 = vcombine.low %v2663_v20, %v2667_v21  ;;  %v10576_v37 = vcombine.low %v2664_v22, %v2668_v24  ;;  %v2719_v21 = vld [vmem:[%s13563_s30 + $0xd00] sm:$0xff]  ;;  %v2720_v24 = vld [vmem:[%s13563_s30 + $0xd08] sm:$0xff] }
 0x2b6   : > { %8659 = vmatprep.subr.bf16.mxu0 %v10527_v38  ;;  %8987 = vmatprep.subr.bf16.mxu1 %v10529_v39  ;;  %v10583_v38 = vcombine.high %v2671_v31, %v2675_v25  ;;  %v10585_v39 = vcombine.high %v2672_v34, %v2676_v35  ;;  %v2723_v22 = vld [vmem:[%s13563_s30 + $0xd20] sm:$0xff] }
 0x2b9   : > { %8660 = vmatpush1.bf16.msra.mxu0 %v10526_v46  ;;  %8988 = vmatpush1.bf16.msra.mxu1 %v10528_v47  ;;  %v10582_v46 = vcombine.low %v2671_v31, %v2675_v25  ;;  %v10584_v47 = vcombine.low %v2672_v34, %v2676_v35  ;;  %v2727_v25 = vld [vmem:[%s13563_s30 + $0xd40] sm:$0xff]  ;;  %v2728_v35 = vld [vmem:[%s13563_s30 + $0xd48] sm:$0xff] }
 0x2ba   : > { %8661 = vmatprep.subr.bf16.mxu0 %v10535_v48  ;;  %8989 = vmatprep.subr.bf16.mxu1 %v10537_v49  ;;  %v10591_v48 = vcombine.high %v2679_v40, %v2683_v41  ;;  %v10593_v49 = vcombine.high %v2680_v44, %v2684_v45  ;;  %v2731_v34 = vld [vmem:[%s13563_s30 + $0xd60] sm:$0xff] }
 0x2bd   : > { %8662 = vmatpush1.bf16.msra.mxu0 %v10534_v55  ;;  %8990 = vmatpush1.bf16.msra.mxu1 %v10536_v56  ;;  %v10590_v55 = vcombine.low %v2679_v40, %v2683_v41  ;;  %v10592_v56 = vcombine.low %v2680_v44, %v2684_v45  ;;  %v2735_v41 = vld [vmem:[%s13563_s30 + $0xd80] sm:$0xff]  ;;  %v2736_v45 = vld [vmem:[%s13563_s30 + $0xd88] sm:$0xff] }
 0x2be   : > { %8663 = vmatprep.subr.bf16.mxu0 %v10543_v57  ;;  %8991 = vmatprep.subr.bf16.mxu1 %v10545_v58  ;;  %v10599_v57 = vcombine.high %v2687_v50, %v2691_v51  ;;  %v10601_v58 = vcombine.high %v2688_v53, %v2692_v54  ;;  %v2739_v44 = vld [vmem:[%s13563_s30 + $0xda0] sm:$0xff] }
 0x2c1   : > { %8664 = vmatpush1.bf16.msra.mxu0 %v10542_v63  ;;  %8992 = vmatpush1.bf16.msra.mxu1 %v10544_v0  ;;  %v2700_v63 = vld [vmem:[%s13563_s30 + $0xc68] sm:$0xff]  ;;  %v10598_v0 = vcombine.low %v2687_v50, %v2691_v51  ;;  %v2743_v51 = vld [vmem:[%s13563_s30 + $0xdc0] sm:$0xff] }
 0x2c2   : > { %8665 = vmatprep.subr.bf16.mxu0 %v10551_v1  ;;  %8993 = vmatprep.subr.bf16.mxu1 %v10553_v2  ;;  %v10600_v1 = vcombine.low %v2688_v53, %v2692_v54  ;;  %v10607_v2 = vcombine.high %v2695_v59, %v2699_v60  ;;  %v10609_v4 = vcombine.high %v2696_v62, %v2700_v63  ;;  %v2747_v53 = vld [vmem:[%s13563_s30 + $0xde0] sm:$0xff]  ;;  %v2744_v54 = vld [vmem:[%s13563_s30 + $0xdc8] sm:$0xff] }
 0x2c5   : > { %8666 = vmatpush1.bf16.msra.mxu0 %v10550_v8  ;;  %8994 = vmatpush1.bf16.msra.mxu1 %v10552_v9  ;;  %v2708_v8 = vld [vmem:[%s13563_s30 + $0xca8] sm:$0xff]  ;;  %v10606_v9 = vcombine.low %v2695_v59, %v2699_v60  ;;  %v2751_v60 = vld [vmem:[%s13563_s30 + $0xe00] sm:$0xff] }
 0x2c6   : > { %8667 = vmatprep.subr.bf16.mxu0 %v10559_v10  ;;  %8995 = vmatprep.subr.bf16.mxu1 %v10561_v11  ;;  %v10608_v10 = vcombine.low %v2696_v62, %v2700_v63  ;;  %v10615_v11 = vcombine.high %v2703_v5, %v2707_v6  ;;  %v10617_v12 = vcombine.high %v2704_v32, %v2708_v8  ;;  %v2755_v62 = vld [vmem:[%s13563_s30 + $0xe20] sm:$0xff]  ;;  %v2752_v63 = vld [vmem:[%s13563_s30 + $0xe08] sm:$0xff] }
 0x2c9   : > { %8668 = vmatpush1.bf16.msra.mxu0 %v10558_v16  ;;  %8996 = vmatpush1.bf16.msra.mxu1 %v10560_v17  ;;  %v2716_v16 = vld [vmem:[%s13563_s30 + $0xce8] sm:$0xff]  ;;  %v10614_v17 = vcombine.low %v2703_v5, %v2707_v6  ;;  %v2759_v6 = vld [vmem:[%s13563_s30 + $0xe40] sm:$0xff] }
 0x2ca   : > { %8669 = vmatprep.subr.bf16.mxu0 %v10567_v18  ;;  %8997 = vmatprep.subr.bf16.mxu1 %v10569_v19  ;;  %v10616_v18 = vcombine.low %v2704_v32, %v2708_v8  ;;  %v10623_v19 = vcombine.high %v2711_v13, %v2715_v14  ;;  %v10625_v20 = vcombine.high %v2712_v15, %v2716_v16  ;;  %v2763_v32 = vld [vmem:[%s13563_s30 + $0xe60] sm:$0xff]  ;;  %v2760_v8 = vld [vmem:[%s13563_s30 + $0xe48] sm:$0xff] }
 0x2cd   : > { %8670 = vmatpush1.bf16.msra.mxu0 %v10566_v27  ;;  %8998 = vmatpush1.bf16.msra.mxu1 %v10568_v28  ;;  %v2724_v27 = vld [vmem:[%s13563_s30 + $0xd28] sm:$0xff]  ;;  %v10622_v28 = vcombine.low %v2711_v13, %v2715_v14  ;;  %v2767_v14 = vld [vmem:[%s13563_s30 + $0xe80] sm:$0xff] }
 0x2ce   : > { %8671 = vmatprep.subr.bf16.mxu0 %v10575_v29  ;;  %8999 = vmatprep.subr.bf16.mxu1 %v10577_v30  ;;  %v10624_v29 = vcombine.low %v2712_v15, %v2716_v16  ;;  %v10631_v30 = vcombine.high %v2719_v21, %v2723_v22  ;;  %v10633_v31 = vcombine.high %v2720_v24, %v2724_v27  ;;  %v2771_v15 = vld [vmem:[%s13563_s30 + $0xea0] sm:$0xff]  ;;  %v2768_v16 = vld [vmem:[%s13563_s30 + $0xe88] sm:$0xff] }
 0x2d1   : > { %8672 = vmatpush1.bf16.msra.mxu0 %v10574_v33  ;;  %9000 = vmatpush1.bf16.msra.mxu1 %v10576_v37  ;;  %v2732_v33 = vld [vmem:[%s13563_s30 + $0xd68] sm:$0xff]  ;;  %v10630_v37 = vcombine.low %v2719_v21, %v2723_v22  ;;  %v2775_v22 = vld [vmem:[%s13563_s30 + $0xec0] sm:$0xff] }
 0x2d2   : > { %8673 = vmatprep.subr.bf16.mxu0 %v10583_v38  ;;  %9001 = vmatprep.subr.bf16.mxu1 %v10585_v39  ;;  %v10632_v38 = vcombine.low %v2720_v24, %v2724_v27  ;;  %v10639_v39 = vcombine.high %v2727_v25, %v2731_v34  ;;  %v10641_v40 = vcombine.high %v2728_v35, %v2732_v33  ;;  %v2779_v24 = vld [vmem:[%s13563_s30 + $0xee0] sm:$0xff]  ;;  %v2776_v27 = vld [vmem:[%s13563_s30 + $0xec8] sm:$0xff] }
 0x2d5   : > { %8674 = vmatpush1.bf16.msra.mxu0 %v10582_v46  ;;  %9002 = vmatpush1.bf16.msra.mxu1 %v10584_v47  ;;  %v2740_v46 = vld [vmem:[%s13563_s30 + $0xda8] sm:$0xff]  ;;  %v10638_v47 = vcombine.low %v2727_v25, %v2731_v34  ;;  %v2783_v34 = vld [vmem:[%s13563_s30 + $0xf00] sm:$0xff] }
 0x2d6   : > { %8675 = vmatprep.subr.bf16.mxu0 %v10591_v48  ;;  %9003 = vmatprep.subr.bf16.mxu1 %v10593_v49  ;;  %v10640_v48 = vcombine.low %v2728_v35, %v2732_v33  ;;  %v10647_v49 = vcombine.high %v2735_v41, %v2739_v44  ;;  %v10649_v50 = vcombine.high %v2736_v45, %v2740_v46  ;;  %v2787_v35 = vld [vmem:[%s13563_s30 + $0xf20] sm:$0xff]  ;;  %v2784_v33 = vld [vmem:[%s13563_s30 + $0xf08] sm:$0xff] }
 0x2d9   : > { %8676 = vmatpush1.bf16.msra.mxu0 %v10590_v55  ;;  %9004 = vmatpush1.bf16.msra.mxu1 %v10592_v56  ;;  %v2748_v55 = vld [vmem:[%s13563_s30 + $0xde8] sm:$0xff]  ;;  %v10646_v56 = vcombine.low %v2735_v41, %v2739_v44  ;;  %v2791_v44 = vld [vmem:[%s13563_s30 + $0xf40] sm:$0xff] }
 0x2da   : > { %8686 = vmatprep.subr.bf16.mxu0 %v10599_v57  ;;  %9014 = vmatprep.subr.bf16.mxu1 %v10601_v58  ;;  %v10648_v57 = vcombine.low %v2736_v45, %v2740_v46  ;;  %v10655_v58 = vcombine.high %v2743_v51, %v2747_v53  ;;  %v10657_v59 = vcombine.high %v2744_v54, %v2748_v55  ;;  %v2795_v45 = vld [vmem:[%s13563_s30 + $0xf60] sm:$0xff]  ;;  %v2792_v46 = vld [vmem:[%s13563_s30 + $0xf48] sm:$0xff] }
 0x2dc   : > { %8678 = vmatmul.mubr.bf16.vlgmr.msra.gmra.mrb[0].mxu0 %v13814_v61  ;;  %9006 = vmatmul.mubr.bf16.vlgmr.msra.gmra.mrb[0].mxu1 %v13814_v61 }
 0x2dd   : > { %8687 = vmatpush1.bf16.msra.mxu0 %v10598_v0  ;;  %9015 = vmatpush1.bf16.msra.mxu1 %v10600_v1  ;;  %v2756_v0 = vld [vmem:[%s13563_s30 + $0xe28] sm:$0xff]  ;;  %v10654_v1 = vcombine.low %v2743_v51, %v2747_v53  ;;  %v2799_v53 = vld [vmem:[%s13563_s30 + $0xf80] sm:$0xff] }
 0x2de   : > { %8688 = vmatprep.subr.bf16.mxu0 %v10607_v2  ;;  %9016 = vmatprep.subr.bf16.mxu1 %v10609_v4  ;;  %v10656_v2 = vcombine.low %v2744_v54, %v2748_v55  ;;  %v10663_v4 = vcombine.high %v2751_v60, %v2755_v62  ;;  %v10665_v5 = vcombine.high %v2752_v63, %v2756_v0  ;;  %v2803_v54 = vld [vmem:[%s13563_s30 + $0xfa0] sm:$0xff]  ;;  %v2800_v55 = vld [vmem:[%s13563_s30 + $0xf88] sm:$0xff] }
 0x2df   : > { %8718 = vmatprep.mubr.bf16.mxu0 %v13822_v7  ;;  %9046 = vmatprep.mubr.bf16.mxu1 %v13822_v7 }
 0x2e1   : > { %8689 = vmatpush1.bf16.msra.mxu0 %v10606_v9  ;;  %9017 = vmatpush1.bf16.msra.mxu1 %v10608_v10  ;;  %v2764_v9 = vld [vmem:[%s13563_s30 + $0xe68] sm:$0xff]  ;;  %v10662_v10 = vcombine.low %v2751_v60, %v2755_v62  ;;  %v2807_v62 = vld [vmem:[%s13563_s30 + $0xfc0] sm:$0xff] }
 0x2e2   : > { %8690 = vmatprep.subr.bf16.mxu0 %v10615_v11  ;;  %9018 = vmatprep.subr.bf16.mxu1 %v10617_v12  ;;  %v10664_v11 = vcombine.low %v2752_v63, %v2756_v0  ;;  %v10671_v12 = vcombine.high %v2759_v6, %v2763_v32  ;;  %v10673_v13 = vcombine.high %v2760_v8, %v2764_v9  ;;  %v2811_v63 = vld [vmem:[%s13563_s30 + $0xfe0] sm:$0xff]  ;;  %v2808_v0 = vld [vmem:[%s13563_s30 + $0xfc8] sm:$0xff] }
 0x2e5   : > { %8691 = vmatpush1.bf16.msra.mxu0 %v10614_v17  ;;  %9019 = vmatpush1.bf16.msra.mxu1 %v10616_v18  ;;  %v2772_v17 = vld [vmem:[%s13563_s30 + $0xea8] sm:$0xff]  ;;  %v10670_v18 = vcombine.low %v2759_v6, %v2763_v32  ;;  %v10719_v6 = vcombine.high %v2807_v62, %v2811_v63 }
 0x2e6   : > { %8692 = vmatprep.subr.bf16.mxu0 %v10623_v19  ;;  %9020 = vmatprep.subr.bf16.mxu1 %v10625_v20  ;;  %v10672_v19 = vcombine.low %v2760_v8, %v2764_v9  ;;  %v10679_v20 = vcombine.high %v2767_v14, %v2771_v15  ;;  %v10681_v21 = vcombine.high %v2768_v16, %v2772_v17  ;;  %v2815_v8 = vld [vmem:[%s13563_s30 + $0x1000] sm:$0xff] }
 0x2e7   : > { %v2819_v9 = vld [vmem:[%s13563_s30 + $0x1020] sm:$0xff] }
 0x2e9   : > { %8693 = vmatpush1.bf16.msra.mxu0 %v10622_v28  ;;  %9021 = vmatpush1.bf16.msra.mxu1 %v10624_v29  ;;  %v2780_v28 = vld [vmem:[%s13563_s30 + $0xee8] sm:$0xff]  ;;  %v10678_v29 = vcombine.low %v2767_v14, %v2771_v15  ;;  %v10727_v15 = vcombine.high %v2815_v8, %v2819_v9 }
 0x2ea   : > { %8694 = vmatprep.subr.bf16.mxu0 %v10631_v30  ;;  %9022 = vmatprep.subr.bf16.mxu1 %v10633_v31  ;;  %v10680_v30 = vcombine.low %v2768_v16, %v2772_v17  ;;  %v10687_v31 = vcombine.high %v2775_v22, %v2779_v24  ;;  %v10689_v25 = vcombine.high %v2776_v27, %v2780_v28  ;;  %v2823_v17 = vld [vmem:[%s13563_s30 + $0x1040] sm:$0xff] }
 0x2ed   : > { %8695 = vmatpush1.bf16.msra.mxu0 %v10630_v37  ;;  %9023 = vmatpush1.bf16.msra.mxu1 %v10632_v38  ;;  %v2788_v37 = vld [vmem:[%s13563_s30 + $0xf28] sm:$0xff]  ;;  %v10686_v38 = vcombine.low %v2775_v22, %v2779_v24  ;;  %v10726_v24 = vcombine.low %v2815_v8, %v2819_v9 }
 0x2ee   : > { %8696 = vmatprep.subr.bf16.mxu0 %v10639_v39  ;;  %9024 = vmatprep.subr.bf16.mxu1 %v10641_v40  ;;  %v10688_v39 = vcombine.low %v2776_v27, %v2780_v28  ;;  %v10695_v40 = vcombine.high %v2783_v34, %v2787_v35  ;;  %v10697_v41 = vcombine.high %v2784_v33, %v2788_v37  ;;  %v2828_v22 = vld [vmem:[%s13563_s30 + $0x1068] sm:$0xff] }
 0x2ef   : > { %v2864_v8 = vld [vmem:[%s13563_s30 + $0x1188] sm:$0xff] }
 0x2f0   : > { %v2868_v9 = vld [vmem:[%s13563_s30 + $0x11a8] sm:$0xff] }
 0x2f1   : > { %8697 = vmatpush1.bf16.msra.mxu0 %v10638_v47  ;;  %9025 = vmatpush1.bf16.msra.mxu1 %v10640_v48  ;;  %v2796_v47 = vld [vmem:[%s13563_s30 + $0xf68] sm:$0xff]  ;;  %v10694_v48 = vcombine.low %v2783_v34, %v2787_v35 }
 0x2f2   : > { %8698 = vmatprep.subr.bf16.mxu0 %v10647_v49  ;;  %9026 = vmatprep.subr.bf16.mxu1 %v10649_v50  ;;  %v10696_v49 = vcombine.low %v2784_v33, %v2788_v37  ;;  %v10703_v50 = vcombine.high %v2791_v44, %v2795_v45  ;;  %v10705_v51 = vcombine.high %v2792_v46, %v2796_v47  ;;  %v2832_v34 = vld [vmem:[%s13563_s30 + $0x1088] sm:$0xff] }
 0x2f3   : > { %v2836_v35 = vld [vmem:[%s13563_s30 + $0x10a8] sm:$0xff] }
 0x2f5   : > { %8699 = vmatpush1.bf16.msra.mxu0 %v10646_v56  ;;  %9027 = vmatpush1.bf16.msra.mxu1 %v10648_v57  ;;  %v2804_v56 = vld [vmem:[%s13563_s30 + $0xfa8] sm:$0xff]  ;;  %v10702_v57 = vcombine.low %v2791_v44, %v2795_v45 }
 0x2f6   : > { %8700 = vmatprep.subr.bf16.mxu0 %v10655_v58  ;;  %9028 = vmatprep.subr.bf16.mxu1 %v10657_v59  ;;  %v10704_v58 = vcombine.low %v2792_v46, %v2796_v47  ;;  %v10711_v59 = vcombine.high %v2799_v53, %v2803_v54  ;;  %v10713_v60 = vcombine.high %v2800_v55, %v2804_v56  ;;  %v2840_v44 = vld [vmem:[%s13563_s30 + $0x10c8] sm:$0xff] }
 0x2f7   : > { %v2844_v45 = vld [vmem:[%s13563_s30 + $0x10e8] sm:$0xff]  ;;  %v10744_v47 = vcombine.low %v2832_v34, %v2836_v35 }
 0x2f9   : > { %8701 = vmatpush1.bf16.msra.mxu0 %v10654_v1  ;;  %9029 = vmatpush1.bf16.msra.mxu1 %v10656_v2  ;;  %v2812_v1 = vld [vmem:[%s13563_s30 + $0xfe8] sm:$0xff] }
 0x2fa   : > { %8702 = vmatprep.subr.bf16.mxu0 %v10663_v4  ;;  %9030 = vmatprep.subr.bf16.mxu1 %v10665_v5  ;;  %v13885_v2 = vld [vmem:[%s14816_s0 + $0x8] sm:$0xff]  ;;  %v10710_v4 = vcombine.low %v2799_v53, %v2803_v54  ;;  %v10712_v5 = vcombine.low %v2800_v55, %v2804_v56  ;;  %v10721_v32 = vcombine.high %v2808_v0, %v2812_v1 }
 0x2fb   : > { %v10720_v14 = vcombine.low %v2808_v0, %v2812_v1  ;;  %v2848_v53 = vld [vmem:[%s13563_s30 + $0x1108] sm:$0xff]  ;;  %v10752_v56 = vcombine.low %v2840_v44, %v2844_v45 }
 0x2fc   : > { %v2852_v54 = vld [vmem:[%s13563_s30 + $0x1128] sm:$0xff] }
 0x2fd   : > { %8703 = vmatpush1.bf16.msra.mxu0 %v10662_v10  ;;  %9031 = vmatpush1.bf16.msra.mxu1 %v10664_v11  ;;  %v13891_v10 = vrot.slane %v13885_v2, %v13578_v23  ;;  %v2816_v11 = vld [vmem:[%s13563_s30 + $0x1008] sm:$0xff]  ;;  %v10760_v1 = vcombine.low %v2848_v53, %v2852_v54 }
 0x2fe   : > { %8704 = vmatprep.subr.bf16.mxu0 %v10671_v12  ;;  %9032 = vmatprep.subr.bf16.mxu1 %v10673_v13  ;;  %v2820_v12 = vld [vmem:[%s13563_s30 + $0x1028] sm:$0xff]  ;;  %v10718_v13 = vcombine.low %v2807_v62, %v2811_v63 }
 0x2ff   : > { %v10729_v16 = vcombine.high %v2816_v11, %v2820_v12  ;;  %v10728_v27 = vcombine.low %v2816_v11, %v2820_v12  ;;  %v2856_v62 = vld [vmem:[%s13563_s30 + $0x1148] sm:$0xff] }
 0x300   : > { %v2860_v63 = vld [vmem:[%s13563_s30 + $0x1168] sm:$0xff] }
 0x301   : > { %8705 = vmatpush1.bf16.msra.mxu0 %v10670_v18  ;;  %9033 = vmatpush1.bf16.msra.mxu1 %v10672_v19  ;;  %v2827_v18 = vld [vmem:[%s13563_s30 + $0x1060] sm:$0xff]  ;;  %v3393_v19 = vcombine.high %v13891_v10, %v13891_v10  ;;  %v10768_v12 = vcombine.low %v2856_v62, %v2860_v63 }
 0x302   : > { %8706 = vmatprep.subr.bf16.mxu0 %v10679_v20  ;;  %9034 = vmatprep.subr.bf16.mxu1 %v10681_v21  ;;  %v13901_v20 = vcombine.high %v13814_v61, %v13814_v61  ;;  %v2824_v21 = vld [vmem:[%s13563_s30 + $0x1048] sm:$0xff]  ;;  %v10735_v28 = vcombine.high %v2823_v17, %v2827_v18  ;;  %v10734_v33 = vcombine.low %v2823_v17, %v2827_v18 }
 0x303   : > { %v10736_v37 = vcombine.low %v2824_v21, %v2828_v22  ;;  %v2872_v17 = vld [vmem:[%s13563_s30 + $0x11c8] sm:$0xff] }
 0x304   : > { %v2876_v18 = vld [vmem:[%s13563_s30 + $0x11e8] sm:$0xff] }
 0x305   : > { %8707 = vmatpush1.bf16.msra.mxu0 %v10678_v29  ;;  %9035 = vmatpush1.bf16.msra.mxu1 %v10680_v30  ;;  %v10737_v29 = vcombine.high %v2824_v21, %v2828_v22  ;;  %v2831_v30 = vld [vmem:[%s13563_s30 + $0x1080] sm:$0xff]  ;;  %v10776_v21 = vcombine.low %v2864_v8, %v2868_v9 }
 0x306   : > { %8708 = vmatprep.subr.bf16.mxu0 %v10687_v31  ;;  %9036 = vmatprep.subr.bf16.mxu1 %v10689_v25  ;;  %v2835_v31 = vld [vmem:[%s13563_s30 + $0x10a0] sm:$0xff]  ;;  %v13908_v25 = vrot.slane %v3393_v19, %v13578_v23 }
 0x307   : > { %v10742_v46 = vcombine.low %v2831_v30, %v2835_v31 }
 0x309   : > { %8709 = vmatpush1.bf16.msra.mxu0 %v10686_v38  ;;  %9037 = vmatpush1.bf16.msra.mxu1 %v10688_v39  ;;  %v10743_v38 = vcombine.high %v2831_v30, %v2835_v31  ;;  %v10745_v39 = vcombine.high %v2832_v34, %v2836_v35  ;;  %v2884_v30 = vld [vmem:[%s13563_s30 + $0x1228] sm:$0xff]  ;;  %v10784_v34 = vcombine.low %v2872_v17, %v2876_v18 }
 0x30a   : > { %8710 = vmatprep.subr.bf16.mxu0 %v10695_v40  ;;  %9038 = vmatprep.subr.bf16.mxu1 %v10697_v41  ;;  %v2839_v40 = vld [vmem:[%s13563_s30 + $0x10c0] sm:$0xff] }
 0x30b   : > { %v2843_v41 = vld [vmem:[%s13563_s30 + $0x10e0] sm:$0xff] }
 0x30c   : > { %v10750_v55 = vcombine.low %v2839_v40, %v2843_v41 }
 0x30d   : > { %8711 = vmatpush1.bf16.msra.mxu0 %v10694_v48  ;;  %9039 = vmatpush1.bf16.msra.mxu1 %v10696_v49  ;;  %v10751_v48 = vcombine.high %v2839_v40, %v2843_v41  ;;  %v10753_v49 = vcombine.high %v2840_v44, %v2844_v45  ;;  %v2892_v40 = vld [vmem:[%s13563_s30 + $0x1268] sm:$0xff] }
 0x30e   : > { %8712 = vmatprep.subr.bf16.mxu0 %v10703_v50  ;;  %9040 = vmatprep.subr.bf16.mxu1 %v10705_v51  ;;  %v2847_v50 = vld [vmem:[%s13563_s30 + $0x1100] sm:$0xff] }
 0x30f   : > { %v2851_v51 = vld [vmem:[%s13563_s30 + $0x1120] sm:$0xff] }
 0x310   : > { %v10758_v0 = vcombine.low %v2847_v50, %v2851_v51 }
 0x311   : > { %8713 = vmatpush1.bf16.msra.mxu0 %v10702_v57  ;;  %9041 = vmatpush1.bf16.msra.mxu1 %v10704_v58  ;;  %v10759_v57 = vcombine.high %v2847_v50, %v2851_v51  ;;  %v10761_v58 = vcombine.high %v2848_v53, %v2852_v54  ;;  %v2900_v50 = vld [vmem:[%s13563_s30 + $0x12a8] sm:$0xff] }
 0x312   : > { %8714 = vmatprep.subr.bf16.mxu0 %v10711_v59  ;;  %9042 = vmatprep.subr.bf16.mxu1 %v10713_v60  ;;  %v2855_v59 = vld [vmem:[%s13563_s30 + $0x1140] sm:$0xff] }
 0x313   : > { %v2859_v60 = vld [vmem:[%s13563_s30 + $0x1160] sm:$0xff] }
 0x314   : > { %v10766_v11 = vcombine.low %v2855_v59, %v2859_v60 }
 0x315   : > { %8715 = vmatpush1.bf16.msra.mxu0 %v10710_v4  ;;  %9043 = vmatpush1.bf16.msra.mxu1 %v10712_v5  ;;  %v10767_v4 = vcombine.high %v2855_v59, %v2859_v60  ;;  %v10769_v5 = vcombine.high %v2856_v62, %v2860_v63  ;;  %v2908_v59 = vld [vmem:[%s13563_s30 + $0x12e8] sm:$0xff] }
 0x316   : > { %8716 = vmatprep.subr.bf16.mxu0 %v10719_v6  ;;  %9044 = vmatprep.subr.bf16.mxu1 %v10721_v32  ;;  %v2863_v6 = vld [vmem:[%s13563_s30 + $0x1180] sm:$0xff] }
 0x317   : > { %v2867_v32 = vld [vmem:[%s13563_s30 + $0x11a0] sm:$0xff] }
 0x318   : > { %v10774_v19 = vcombine.low %v2863_v6, %v2867_v32 }
 0x319   : > { %8717 = vmatpush1.bf16.msra.mxu0 %v10718_v13  ;;  %9045 = vmatpush1.bf16.msra.mxu1 %v10720_v14  ;;  %v10775_v13 = vcombine.high %v2863_v6, %v2867_v32  ;;  %v10777_v14 = vcombine.high %v2864_v8, %v2868_v9  ;;  %v2916_v6 = vld [vmem:[%s13563_s30 + $0x1328] sm:$0xff] }
 0x31a   : > { %8727 = vmatprep.subr.bf16.mxu0 %v10727_v15  ;;  %9055 = vmatprep.subr.bf16.mxu1 %v10729_v16  ;;  %v2871_v15 = vld [vmem:[%s13563_s30 + $0x11c0] sm:$0xff] }
 0x31b   : > { %v2875_v16 = vld [vmem:[%s13563_s30 + $0x11e0] sm:$0xff] }
 0x31c   : > { %8719 = vmatmul.mubr.bf16.vlgmr.msra.gmra.mrb[0].mxu0 %v13901_v20  ;;  %9047 = vmatmul.mubr.bf16.vlgmr.msra.gmra.mrb[0].mxu1 %v13901_v20  ;;  %v10783_v22 = vcombine.high %v2871_v15, %v2875_v16  ;;  %v10782_v31 = vcombine.low %v2871_v15, %v2875_v16  ;;  %v2924_v15 = vld [vmem:[%s13563_s30 + $0x1368] sm:$0xff] }
 0x31d   : > { %8728 = vmatpush1.bf16.msra.mxu0 %v10726_v24  ;;  %9056 = vmatpush1.bf16.msra.mxu1 %v10728_v27  ;;  %v10785_v24 = vcombine.high %v2872_v17, %v2876_v18  ;;  %v2879_v27 = vld [vmem:[%s13563_s30 + $0x1200] sm:$0xff] }
 0x31e   : > { %8729 = vmatprep.subr.bf16.mxu0 %v10735_v28  ;;  %9057 = vmatprep.subr.bf16.mxu1 %v10737_v29  ;;  %v2883_v28 = vld [vmem:[%s13563_s30 + $0x1220] sm:$0xff]  ;;  %v2880_v29 = vld [vmem:[%s13563_s30 + $0x1208] sm:$0xff] }
 0x31f   : > { %8759 = vmatprep.mubr.bf16.mxu0 %v13908_v25  ;;  %9087 = vmatprep.mubr.bf16.mxu1 %v13908_v25  ;;  %v10791_v35 = vcombine.high %v2879_v27, %v2883_v28  ;;  %v10790_v41 = vcombine.low %v2879_v27, %v2883_v28  ;;  %v10792_v44 = vcombine.low %v2880_v29, %v2884_v30  ;;  %v2932_v27 = vld [vmem:[%s13563_s30 + $0x13a8] sm:$0xff] }
 0x321   : > { %8730 = vmatpush1.bf16.msra.mxu0 %v10734_v33  ;;  %9058 = vmatpush1.bf16.msra.mxu1 %v10736_v37  ;;  %v10793_v33 = vcombine.high %v2880_v29, %v2884_v30  ;;  %v2887_v37 = vld [vmem:[%s13563_s30 + $0x1240] sm:$0xff] }
 0x322   : > { %8731 = vmatprep.subr.bf16.mxu0 %v10743_v38  ;;  %9059 = vmatprep.subr.bf16.mxu1 %v10745_v39  ;;  %v2891_v38 = vld [vmem:[%s13563_s30 + $0x1260] sm:$0xff]  ;;  %v2888_v39 = vld [vmem:[%s13563_s30 + $0x1248] sm:$0xff] }
 0x323   : > { %v10799_v45 = vcombine.high %v2887_v37, %v2891_v38  ;;  %v10798_v51 = vcombine.low %v2887_v37, %v2891_v38  ;;  %v10800_v53 = vcombine.low %v2888_v39, %v2892_v40  ;;  %v2940_v37 = vld [vmem:[%s13563_s30 + $0x13e8] sm:$0xff] }
 0x325   : > { %8732 = vmatpush1.bf16.msra.mxu0 %v10742_v46  ;;  %9060 = vmatpush1.bf16.msra.mxu1 %v10744_v47  ;;  %v10801_v46 = vcombine.high %v2888_v39, %v2892_v40  ;;  %v2895_v47 = vld [vmem:[%s13563_s30 + $0x1280] sm:$0xff] }
 0x326   : > { %8733 = vmatprep.subr.bf16.mxu0 %v10751_v48  ;;  %9061 = vmatprep.subr.bf16.mxu1 %v10753_v49  ;;  %v2899_v48 = vld [vmem:[%s13563_s30 + $0x12a0] sm:$0xff]  ;;  %v2896_v49 = vld [vmem:[%s13563_s30 + $0x1288] sm:$0xff] }
 0x327   : > { %v10807_v54 = vcombine.high %v2895_v47, %v2899_v48  ;;  %v10806_v60 = vcombine.low %v2895_v47, %v2899_v48  ;;  %v10808_v62 = vcombine.low %v2896_v49, %v2900_v50  ;;  %v2948_v47 = vld [vmem:[%s13563_s30 + $0x1428] sm:$0xff] }
 0x329   : > { %8734 = vmatpush1.bf16.msra.mxu0 %v10750_v55  ;;  %9062 = vmatpush1.bf16.msra.mxu1 %v10752_v56  ;;  %v10809_v55 = vcombine.high %v2896_v49, %v2900_v50  ;;  %v2903_v56 = vld [vmem:[%s13563_s30 + $0x12c0] sm:$0xff] }
 0x32a   : > { %8735 = vmatprep.subr.bf16.mxu0 %v10759_v57  ;;  %9063 = vmatprep.subr.bf16.mxu1 %v10761_v58  ;;  %v2907_v57 = vld [vmem:[%s13563_s30 + $0x12e0] sm:$0xff]  ;;  %v2904_v58 = vld [vmem:[%s13563_s30 + $0x12c8] sm:$0xff] }
 0x32b   : > { %v10815_v63 = vcombine.high %v2903_v56, %v2907_v57  ;;  %v10814_v32 = vcombine.low %v2903_v56, %v2907_v57  ;;  %v10816_v8 = vcombine.low %v2904_v58, %v2908_v59  ;;  %v2952_v56 = vld [vmem:[%s13563_s30 + $0x1448] sm:$0xff] }
 0x32c   : > { %v2956_v57 = vld [vmem:[%s13563_s30 + $0x1468] sm:$0xff] }
 0x32d   : > { %8736 = vmatpush1.bf16.msra.mxu0 %v10758_v0  ;;  %9064 = vmatpush1.bf16.msra.mxu1 %v10760_v1  ;;  %v10817_v0 = vcombine.high %v2904_v58, %v2908_v59  ;;  %v2911_v1 = vld [vmem:[%s13563_s30 + $0x1300] sm:$0xff] }
 0x32e   : > { %8737 = vmatprep.subr.bf16.mxu0 %v10767_v4  ;;  %9065 = vmatprep.subr.bf16.mxu1 %v10769_v5  ;;  %v2915_v4 = vld [vmem:[%s13563_s30 + $0x1320] sm:$0xff]  ;;  %v2912_v5 = vld [vmem:[%s13563_s30 + $0x1308] sm:$0xff] }
 0x32f   : > { %v10823_v9 = vcombine.high %v2911_v1, %v2915_v4  ;;  %v10822_v16 = vcombine.low %v2911_v1, %v2915_v4  ;;  %v10824_v17 = vcombine.low %v2912_v5, %v2916_v6  ;;  %v13984_v1 = vcombine.high %v13908_v25, %v13908_v25  ;;  %v2964_v4 = vld [vmem:[%s13563_s30 + $0x14a8] sm:$0xff] }
 0x331   : > { %8738 = vmatpush1.bf16.msra.mxu0 %v10766_v11  ;;  %9066 = vmatpush1.bf16.msra.mxu1 %v10768_v12  ;;  %v10825_v11 = vcombine.high %v2912_v5, %v2916_v6  ;;  %v2919_v12 = vld [vmem:[%s13563_s30 + $0x1340] sm:$0xff]  ;;  %v10864_v6 = vcombine.low %v2952_v56, %v2956_v57 }
 0x332   : > { %8739 = vmatprep.subr.bf16.mxu0 %v10775_v13  ;;  %9067 = vmatprep.subr.bf16.mxu1 %v10777_v14  ;;  %v2923_v13 = vld [vmem:[%s13563_s30 + $0x1360] sm:$0xff]  ;;  %v2920_v14 = vld [vmem:[%s13563_s30 + $0x1348] sm:$0xff] }
 0x333   : > { %v10831_v18 = vcombine.high %v2919_v12, %v2923_v13  ;;  %v10830_v28 = vcombine.low %v2919_v12, %v2923_v13  ;;  %v10832_v29 = vcombine.low %v2920_v14, %v2924_v15  ;;  %v2968_v12 = vld [vmem:[%s13563_s30 + $0x14c8] sm:$0xff] }
 0x334   : > { %v2972_v13 = vld [vmem:[%s13563_s30 + $0x14e8] sm:$0xff] }
 0x335   : > { %8740 = vmatpush1.bf16.msra.mxu0 %v10774_v19  ;;  %9068 = vmatpush1.bf16.msra.mxu1 %v10776_v21  ;;  %v10833_v19 = vcombine.high %v2920_v14, %v2924_v15  ;;  %v2927_v21 = vld [vmem:[%s13563_s30 + $0x1380] sm:$0xff] }
 0x336   : > { %8741 = vmatprep.subr.bf16.mxu0 %v10783_v22  ;;  %9069 = vmatprep.subr.bf16.mxu1 %v10785_v24  ;;  %v2931_v22 = vld [vmem:[%s13563_s30 + $0x13a0] sm:$0xff]  ;;  %v2928_v24 = vld [vmem:[%s13563_s30 + $0x1388] sm:$0xff] }
 0x337   : > { %v10839_v30 = vcombine.high %v2927_v21, %v2931_v22  ;;  %v10838_v38 = vcombine.low %v2927_v21, %v2931_v22  ;;  %v10840_v39 = vcombine.low %v2928_v24, %v2932_v27  ;;  %v2976_v21 = vld [vmem:[%s13563_s30 + $0x1508] sm:$0xff] }
 0x338   : > { %v2980_v22 = vld [vmem:[%s13563_s30 + $0x1528] sm:$0xff] }
 0x339   : > { %8742 = vmatpush1.bf16.msra.mxu0 %v10782_v31  ;;  %9070 = vmatpush1.bf16.msra.mxu1 %v10784_v34  ;;  %v10841_v31 = vcombine.high %v2928_v24, %v2932_v27  ;;  %v2935_v34 = vld [vmem:[%s13563_s30 + $0x13c0] sm:$0xff]  ;;  %v10880_v27 = vcombine.low %v2968_v12, %v2972_v13 }
 0x33a   : > { %8743 = vmatprep.subr.bf16.mxu0 %v10791_v35  ;;  %9071 = vmatprep.subr.bf16.mxu1 %v10793_v33  ;;  %v2939_v35 = vld [vmem:[%s13563_s30 + $0x13e0] sm:$0xff]  ;;  %v2936_v33 = vld [vmem:[%s13563_s30 + $0x13c8] sm:$0xff] }
 0x33b   : > { %v10847_v40 = vcombine.high %v2935_v34, %v2939_v35  ;;  %v10846_v48 = vcombine.low %v2935_v34, %v2939_v35  ;;  %v10848_v49 = vcombine.low %v2936_v33, %v2940_v37  ;;  %v2984_v34 = vld [vmem:[%s13563_s30 + $0x1548] sm:$0xff] }
 0x33c   : > { %v2988_v35 = vld [vmem:[%s13563_s30 + $0x1568] sm:$0xff] }
 0x33d   : > { %8744 = vmatpush1.bf16.msra.mxu0 %v10790_v41  ;;  %9072 = vmatpush1.bf16.msra.mxu1 %v10792_v44  ;;  %v10849_v41 = vcombine.high %v2936_v33, %v2940_v37  ;;  %v2943_v44 = vld [vmem:[%s13563_s30 + $0x1400] sm:$0xff]  ;;  %v10888_v37 = vcombine.low %v2976_v21, %v2980_v22 }
 0x33e   : > { %8745 = vmatprep.subr.bf16.mxu0 %v10799_v45  ;;  %9073 = vmatprep.subr.bf16.mxu1 %v10801_v46  ;;  %v2947_v45 = vld [vmem:[%s13563_s30 + $0x1420] sm:$0xff]  ;;  %v2944_v46 = vld [vmem:[%s13563_s30 + $0x1408] sm:$0xff] }
 0x33f   : > { %v10855_v50 = vcombine.high %v2943_v44, %v2947_v45  ;;  %v10854_v58 = vcombine.low %v2943_v44, %v2947_v45  ;;  %v10856_v59 = vcombine.low %v2944_v46, %v2948_v47  ;;  %v2992_v44 = vld [vmem:[%s13563_s30 + $0x1588] sm:$0xff] }
 0x340   : > { %v2996_v45 = vld [vmem:[%s13563_s30 + $0x15a8] sm:$0xff] }
 0x341   : > { %8746 = vmatpush1.bf16.msra.mxu0 %v10798_v51  ;;  %9074 = vmatpush1.bf16.msra.mxu1 %v10800_v53  ;;  %v10857_v51 = vcombine.high %v2944_v46, %v2948_v47  ;;  %v2951_v53 = vld [vmem:[%s13563_s30 + $0x1440] sm:$0xff]  ;;  %v10896_v47 = vcombine.low %v2984_v34, %v2988_v35 }
 0x342   : > { %8747 = vmatprep.subr.bf16.mxu0 %v10807_v54  ;;  %9075 = vmatprep.subr.bf16.mxu1 %v10809_v55  ;;  %v2955_v54 = vld [vmem:[%s13563_s30 + $0x1460] sm:$0xff]  ;;  %v13976_v55 = vrot.slane %v13891_v10, %v13578_v23  ;;  %v2960_v10 = vld [vmem:[%s13563_s30 + $0x1488] sm:$0xff] }
 0x343   : > { %v10862_v5 = vcombine.low %v2951_v53, %v2955_v54  ;;  %v10872_v15 = vcombine.low %v2960_v10, %v2964_v4 }
 0x345   : > { %8748 = vmatpush1.bf16.msra.mxu0 %v10806_v60  ;;  %9076 = vmatpush1.bf16.msra.mxu1 %v10808_v62  ;;  %v10863_v60 = vcombine.high %v2951_v53, %v2955_v54  ;;  %v10865_v62 = vcombine.high %v2952_v56, %v2956_v57  ;;  %v3000_v53 = vld [vmem:[%s13563_s30 + $0x15c8] sm:$0xff]  ;;  %v10904_v57 = vcombine.low %v2992_v44, %v2996_v45 }
 0x346   : > { %8749 = vmatprep.subr.bf16.mxu0 %v10815_v63  ;;  %9077 = vmatprep.subr.bf16.mxu1 %v10817_v0  ;;  %v2959_v63 = vld [vmem:[%s13563_s30 + $0x1480] sm:$0xff]  ;;  %v3004_v54 = vld [vmem:[%s13563_s30 + $0x15e8] sm:$0xff] }
 0x347   : > { %v2963_v0 = vld [vmem:[%s13563_s30 + $0x14a0] sm:$0xff] }
 0x348   : > { %v10870_v14 = vcombine.low %v2959_v63, %v2963_v0 }
 0x349   : > { %8750 = vmatpush1.bf16.msra.mxu0 %v10814_v32  ;;  %9078 = vmatpush1.bf16.msra.mxu1 %v10816_v8  ;;  %v10871_v32 = vcombine.high %v2959_v63, %v2963_v0  ;;  %v10873_v8 = vcombine.high %v2960_v10, %v2964_v4  ;;  %v3008_v63 = vld [vmem:[%s13563_s30 + $0x1608] sm:$0xff]  ;;  %v10912_v4 = vcombine.low %v3000_v53, %v3004_v54 }
 0x34a   : > { %8751 = vmatprep.subr.bf16.mxu0 %v10823_v9  ;;  %9079 = vmatprep.subr.bf16.mxu1 %v10825_v11  ;;  %v2967_v9 = vld [vmem:[%s13563_s30 + $0x14c0] sm:$0xff]  ;;  %v3012_v0 = vld [vmem:[%s13563_s30 + $0x1628] sm:$0xff] }
 0x34b   : > { %v2971_v11 = vld [vmem:[%s13563_s30 + $0x14e0] sm:$0xff] }
 0x34c   : > { %v10878_v24 = vcombine.low %v2967_v9, %v2971_v11 }
 0x34d   : > { %8752 = vmatpush1.bf16.msra.mxu0 %v10822_v16  ;;  %9080 = vmatpush1.bf16.msra.mxu1 %v10824_v17  ;;  %v10879_v16 = vcombine.high %v2967_v9, %v2971_v11  ;;  %v10881_v17 = vcombine.high %v2968_v12, %v2972_v13  ;;  %v3016_v9 = vld [vmem:[%s13563_s30 + $0x1648] sm:$0xff]  ;;  %v10920_v13 = vcombine.low %v3008_v63, %v3012_v0 }
 0x34e   : > { %8753 = vmatprep.subr.bf16.mxu0 %v10831_v18  ;;  %9081 = vmatprep.subr.bf16.mxu1 %v10833_v19  ;;  %v2975_v18 = vld [vmem:[%s13563_s30 + $0x1500] sm:$0xff]  ;;  %v3020_v11 = vld [vmem:[%s13563_s30 + $0x1668] sm:$0xff] }
 0x34f   : > { %v2979_v19 = vld [vmem:[%s13563_s30 + $0x1520] sm:$0xff] }
 0x350   : > { %v10886_v33 = vcombine.low %v2975_v18, %v2979_v19 }
 0x351   : > { %8754 = vmatpush1.bf16.msra.mxu0 %v10830_v28  ;;  %9082 = vmatpush1.bf16.msra.mxu1 %v10832_v29  ;;  %v10887_v28 = vcombine.high %v2975_v18, %v2979_v19  ;;  %v10889_v29 = vcombine.high %v2976_v21, %v2980_v22  ;;  %v3024_v18 = vld [vmem:[%s13563_s30 + $0x1688] sm:$0xff]  ;;  %v10928_v22 = vcombine.low %v3016_v9, %v3020_v11 }
 0x352   : > { %8755 = vmatprep.subr.bf16.mxu0 %v10839_v30  ;;  %9083 = vmatprep.subr.bf16.mxu1 %v10841_v31  ;;  %v2983_v30 = vld [vmem:[%s13563_s30 + $0x1540] sm:$0xff]  ;;  %v3028_v19 = vld [vmem:[%s13563_s30 + $0x16a8] sm:$0xff] }
 0x353   : > { %v2987_v31 = vld [vmem:[%s13563_s30 + $0x1560] sm:$0xff] }
 0x354   : > { %v10894_v46 = vcombine.low %v2983_v30, %v2987_v31 }
 0x355   : > { %8756 = vmatpush1.bf16.msra.mxu0 %v10838_v38  ;;  %9084 = vmatpush1.bf16.msra.mxu1 %v10840_v39  ;;  %v10895_v38 = vcombine.high %v2983_v30, %v2987_v31  ;;  %v10897_v39 = vcombine.high %v2984_v34, %v2988_v35  ;;  %v3032_v30 = vld [vmem:[%s13563_s30 + $0x16c8] sm:$0xff]  ;;  %v10936_v35 = vcombine.low %v3024_v18, %v3028_v19 }
 0x356   : > { %8757 = vmatprep.subr.bf16.mxu0 %v10847_v40  ;;  %9085 = vmatprep.subr.bf16.mxu1 %v10849_v41  ;;  %v2991_v40 = vld [vmem:[%s13563_s30 + $0x1580] sm:$0xff]  ;;  %v3036_v31 = vld [vmem:[%s13563_s30 + $0x16e8] sm:$0xff] }
 0x357   : > { %v2995_v41 = vld [vmem:[%s13563_s30 + $0x15a0] sm:$0xff] }
 0x358   : > { %v10902_v56 = vcombine.low %v2991_v40, %v2995_v41 }
 0x359   : > { %8758 = vmatpush1.bf16.msra.mxu0 %v10846_v48  ;;  %9086 = vmatpush1.bf16.msra.mxu1 %v10848_v49  ;;  %v10903_v48 = vcombine.high %v2991_v40, %v2995_v41  ;;  %v10905_v49 = vcombine.high %v2992_v44, %v2996_v45  ;;  %v3040_v40 = vld [vmem:[%s13563_s30 + $0x1708] sm:$0xff]  ;;  %v10944_v45 = vcombine.low %v3032_v30, %v3036_v31 }
 0x35a   : > { %8768 = vmatprep.subr.bf16.mxu0 %v10855_v50  ;;  %9096 = vmatprep.subr.bf16.mxu1 %v10857_v51  ;;  %v2999_v50 = vld [vmem:[%s13563_s30 + $0x15c0] sm:$0xff]  ;;  %v3044_v41 = vld [vmem:[%s13563_s30 + $0x1728] sm:$0xff] }
 0x35b   : > { %v3003_v51 = vld [vmem:[%s13563_s30 + $0x15e0] sm:$0xff] }
 0x35c   : > { %8760 = vmatmul.mubr.bf16.vlgmr.msra.gmra.mrb[0].mxu0 %v13976_v55  ;;  %9088 = vmatmul.mubr.bf16.vlgmr.msra.gmra.mrb[0].mxu1 %v13976_v55  ;;  %v10910_v10 = vcombine.low %v2999_v50, %v3003_v51 }
 0x35d   : > { %8769 = vmatpush1.bf16.msra.mxu0 %v10854_v58  ;;  %9097 = vmatpush1.bf16.msra.mxu1 %v10856_v59  ;;  %v10911_v58 = vcombine.high %v2999_v50, %v3003_v51  ;;  %v10913_v59 = vcombine.high %v3000_v53, %v3004_v54  ;;  %v3048_v50 = vld [vmem:[%s13563_s30 + $0x1748] sm:$0xff]  ;;  %v10952_v54 = vcombine.low %v3040_v40, %v3044_v41 }
 0x35e   : > { %8770 = vmatprep.subr.bf16.mxu0 %v10863_v60  ;;  %9098 = vmatprep.subr.bf16.mxu1 %v10865_v62  ;;  %v3007_v60 = vld [vmem:[%s13563_s30 + $0x1600] sm:$0xff]  ;;  %v3052_v51 = vld [vmem:[%s13563_s30 + $0x1768] sm:$0xff] }
 0x35f   : > { %8800 = vmatprep.mubr.bf16.mxu0 %v13984_v1  ;;  %9128 = vmatprep.mubr.bf16.mxu1 %v13984_v1  ;;  %v3011_v62 = vld [vmem:[%s13563_s30 + $0x1620] sm:$0xff] }
 0x360   : > { %v10918_v12 = vcombine.low %v3007_v60, %v3011_v62 }
 0x361   : > { %8771 = vmatpush1.bf16.msra.mxu0 %v10862_v5  ;;  %9099 = vmatpush1.bf16.msra.mxu1 %v10864_v6  ;;  %v10919_v5 = vcombine.high %v3007_v60, %v3011_v62  ;;  %v10921_v6 = vcombine.high %v3008_v63, %v3012_v0  ;;  %v3056_v60 = vld [vmem:[%s13563_s30 + $0x1788] sm:$0xff]  ;;  %v10960_v0 = vcombine.low %v3048_v50, %v3052_v51 }
 0x362   : > { %8772 = vmatprep.subr.bf16.mxu0 %v10871_v32  ;;  %9100 = vmatprep.subr.bf16.mxu1 %v10873_v8  ;;  %v3015_v32 = vld [vmem:[%s13563_s30 + $0x1640] sm:$0xff]  ;;  %v3060_v62 = vld [vmem:[%s13563_s30 + $0x17a8] sm:$0xff] }
 0x363   : > { %v3019_v8 = vld [vmem:[%s13563_s30 + $0x1660] sm:$0xff] }
 0x364   : > { %v10926_v21 = vcombine.low %v3015_v32, %v3019_v8 }
 0x365   : > { %8773 = vmatpush1.bf16.msra.mxu0 %v10870_v14  ;;  %9101 = vmatpush1.bf16.msra.mxu1 %v10872_v15  ;;  %v10927_v14 = vcombine.high %v3015_v32, %v3019_v8  ;;  %v10929_v15 = vcombine.high %v3016_v9, %v3020_v11  ;;  %v3378_v32 = vcombine.high %v13885_v2, %v13885_v2  ;;  %v3064_v8 = vld [vmem:[%s13563_s30 + $0x17c8] sm:$0xff] }
 0x366   : > { %8774 = vmatprep.subr.bf16.mxu0 %v10879_v16  ;;  %9102 = vmatprep.subr.bf16.mxu1 %v10881_v17  ;;  %v3023_v16 = vld [vmem:[%s13563_s30 + $0x1680] sm:$0xff]  ;;  %v3068_v9 = vld [vmem:[%s13563_s30 + $0x17e8] sm:$0xff] }
 0x367   : > { %v3027_v17 = vld [vmem:[%s13563_s30 + $0x16a0] sm:$0xff]  ;;  %v3072_v2 = vld [vmem:[%s13563_s30 + $0x1808] sm:$0xff] }
 0x368   : > { %v10934_v34 = vcombine.low %v3023_v16, %v3027_v17 }
 0x369   : > { %8775 = vmatpush1.bf16.msra.mxu0 %v10878_v24  ;;  %9103 = vmatpush1.bf16.msra.mxu1 %v10880_v27  ;;  %v10935_v24 = vcombine.high %v3023_v16, %v3027_v17  ;;  %v10937_v27 = vcombine.high %v3024_v18, %v3028_v19  ;;  %v3075_v16 = vld [vmem:[%s13563_s30 + $0x1820] sm:$0xff]  ;;  %v14049_v17 = vrot.slane %v3378_v32, %v13578_v23  ;;  %v3076_v18 = vld [vmem:[%s13563_s30 + $0x1828] sm:$0xff] }
 0x36a   : > { %8776 = vmatprep.subr.bf16.mxu0 %v10887_v28  ;;  %9104 = vmatprep.subr.bf16.mxu1 %v10889_v29  ;;  %v3031_v28 = vld [vmem:[%s13563_s30 + $0x16c0] sm:$0xff] }
 0x36b   : > { %v3035_v29 = vld [vmem:[%s13563_s30 + $0x16e0] sm:$0xff] }
 0x36c   : > { %v10942_v44 = vcombine.low %v3031_v28, %v3035_v29  ;;  %v3111_v32 = vld [vmem:[%s13563_s30 + $0x1940] sm:$0xff] }
 0x36d   : > { %8777 = vmatpush1.bf16.msra.mxu0 %v10886_v33  ;;  %9105 = vmatpush1.bf16.msra.mxu1 %v10888_v37  ;;  %v10943_v33 = vcombine.high %v3031_v28, %v3035_v29  ;;  %v10945_v37 = vcombine.high %v3032_v30, %v3036_v31  ;;  %v3083_v28 = vld [vmem:[%s13563_s30 + $0x1860] sm:$0xff]  ;;  %v3394_v29 = vcombine.high %v14049_v17, %v14049_v17  ;;  %v3080_v31 = vld [vmem:[%s13563_s30 + $0x1848] sm:$0xff] }
 0x36e   : > { %8778 = vmatprep.subr.bf16.mxu0 %v10895_v38  ;;  %9106 = vmatprep.subr.bf16.mxu1 %v10897_v39  ;;  %v3039_v38 = vld [vmem:[%s13563_s30 + $0x1700] sm:$0xff]  ;;  %v14059_v30 = vcombine.high %v13976_v55, %v13976_v55 }
 0x36f   : > { %v3043_v39 = vld [vmem:[%s13563_s30 + $0x1720] sm:$0xff] }
 0x370   : > { %v10950_v53 = vcombine.low %v3039_v38, %v3043_v39 }
 0x371   : > { %8779 = vmatpush1.bf16.msra.mxu0 %v10894_v46  ;;  %9107 = vmatpush1.bf16.msra.mxu1 %v10896_v47  ;;  %v10951_v46 = vcombine.high %v3039_v38, %v3043_v39  ;;  %v10953_v47 = vcombine.high %v3040_v40, %v3044_v41  ;;  %v3087_v39 = vld [vmem:[%s13563_s30 + $0x1880] sm:$0xff]  ;;  %v14066_v41 = vrot.slane %v3394_v29, %v13578_v23 }
 0x372   : > { %8780 = vmatprep.subr.bf16.mxu0 %v10903_v48  ;;  %9108 = vmatprep.subr.bf16.mxu1 %v10905_v49  ;;  %v3047_v48 = vld [vmem:[%s13563_s30 + $0x1740] sm:$0xff] }
 0x373   : > { %v3051_v49 = vld [vmem:[%s13563_s30 + $0x1760] sm:$0xff] }
 0x374   : > { %v10958_v63 = vcombine.low %v3047_v48, %v3051_v49  ;;  %v3091_v40 = vld [vmem:[%s13563_s30 + $0x18a0] sm:$0xff] }
 0x375   : > { %8781 = vmatpush1.bf16.msra.mxu0 %v10902_v56  ;;  %9109 = vmatpush1.bf16.msra.mxu1 %v10904_v57  ;;  %v10959_v56 = vcombine.high %v3047_v48, %v3051_v49  ;;  %v10961_v57 = vcombine.high %v3048_v50, %v3052_v51  ;;  %v10999_v48 = vcombine.high %v3087_v39, %v3091_v40  ;;  %v3095_v50 = vld [vmem:[%s13563_s30 + $0x18c0] sm:$0xff] }
 0x376   : > { %8782 = vmatprep.subr.bf16.mxu0 %v10911_v58  ;;  %9110 = vmatprep.subr.bf16.mxu1 %v10913_v59  ;;  %v3055_v58 = vld [vmem:[%s13563_s30 + $0x1780] sm:$0xff] }
 0x377   : > { %v3059_v59 = vld [vmem:[%s13563_s30 + $0x17a0] sm:$0xff] }
 0x378   : > { %v10966_v11 = vcombine.low %v3055_v58, %v3059_v59  ;;  %v3099_v51 = vld [vmem:[%s13563_s30 + $0x18e0] sm:$0xff] }
 0x379   : > { %8783 = vmatpush1.bf16.msra.mxu0 %v10910_v10  ;;  %9111 = vmatpush1.bf16.msra.mxu1 %v10912_v4  ;;  %v10967_v10 = vcombine.high %v3055_v58, %v3059_v59  ;;  %v10969_v4 = vcombine.high %v3056_v60, %v3060_v62  ;;  %v11007_v58 = vcombine.high %v3095_v50, %v3099_v51  ;;  %v3131_v29 = vld [vmem:[%s13563_s30 + $0x19e0] sm:$0xff] }
 0x37a   : > { %8784 = vmatprep.subr.bf16.mxu0 %v10919_v5  ;;  %9112 = vmatprep.subr.bf16.mxu1 %v10921_v6  ;;  %v3063_v5 = vld [vmem:[%s13563_s30 + $0x17c0] sm:$0xff] }
 0x37b   : > { %v3067_v6 = vld [vmem:[%s13563_s30 + $0x17e0] sm:$0xff] }
 0x37c   : > { %v10974_v19 = vcombine.low %v3063_v5, %v3067_v6 }
 0x37d   : > { %8785 = vmatpush1.bf16.msra.mxu0 %v10918_v12  ;;  %9113 = vmatpush1.bf16.msra.mxu1 %v10920_v13  ;;  %v10968_v12 = vcombine.low %v3056_v60, %v3060_v62  ;;  %v10975_v13 = vcombine.high %v3063_v5, %v3067_v6  ;;  %v3103_v60 = vld [vmem:[%s13563_s30 + $0x1900] sm:$0xff] }
 0x37e   : > { %8786 = vmatprep.subr.bf16.mxu0 %v10927_v14  ;;  %9114 = vmatprep.subr.bf16.mxu1 %v10929_v15  ;;  %v10977_v14 = vcombine.high %v3064_v8, %v3068_v9  ;;  %v3071_v15 = vld [vmem:[%s13563_s30 + $0x1800] sm:$0xff] }
 0x37f   : > { %v3107_v62 = vld [vmem:[%s13563_s30 + $0x1920] sm:$0xff] }
 0x380   : > { %v11015_v5 = vcombine.high %v3103_v60, %v3107_v62 }
 0x381   : > { %8787 = vmatpush1.bf16.msra.mxu0 %v10926_v21  ;;  %9115 = vmatpush1.bf16.msra.mxu1 %v10928_v22  ;;  %v10976_v21 = vcombine.low %v3064_v8, %v3068_v9  ;;  %v10983_v22 = vcombine.high %v3071_v15, %v3075_v16  ;;  %v3115_v8 = vld [vmem:[%s13563_s30 + $0x1960] sm:$0xff]  ;;  %v3112_v9 = vld [vmem:[%s13563_s30 + $0x1948] sm:$0xff] }
 0x382   : > { %8788 = vmatprep.subr.bf16.mxu0 %v10935_v24  ;;  %9116 = vmatprep.subr.bf16.mxu1 %v10937_v27  ;;  %v10985_v24 = vcombine.high %v3072_v2, %v3076_v18  ;;  %v3079_v27 = vld [vmem:[%s13563_s30 + $0x1840] sm:$0xff] }
 0x385   : > { %8789 = vmatpush1.bf16.msra.mxu0 %v10934_v34  ;;  %9117 = vmatpush1.bf16.msra.mxu1 %v10936_v35  ;;  %v3084_v34 = vld [vmem:[%s13563_s30 + $0x1868] sm:$0xff]  ;;  %v10982_v35 = vcombine.low %v3071_v15, %v3075_v16  ;;  %v3119_v16 = vld [vmem:[%s13563_s30 + $0x1980] sm:$0xff] }
 0x386   : > { %8790 = vmatprep.subr.bf16.mxu0 %v10943_v33  ;;  %9118 = vmatprep.subr.bf16.mxu1 %v10945_v37  ;;  %v10984_v33 = vcombine.low %v3072_v2, %v3076_v18  ;;  %v10991_v37 = vcombine.high %v3079_v27, %v3083_v28  ;;  %v10993_v38 = vcombine.high %v3080_v31, %v3084_v34  ;;  %v3123_v2 = vld [vmem:[%s13563_s30 + $0x19a0] sm:$0xff]  ;;  %v3120_v18 = vld [vmem:[%s13563_s30 + $0x1988] sm:$0xff] }
 0x389   : > { %8791 = vmatpush1.bf16.msra.mxu0 %v10942_v44  ;;  %9119 = vmatpush1.bf16.msra.mxu1 %v10944_v45  ;;  %v3088_v44 = vld [vmem:[%s13563_s30 + $0x1888] sm:$0xff] }
 0x38a   : > { %8792 = vmatprep.subr.bf16.mxu0 %v10951_v46  ;;  %9120 = vmatprep.subr.bf16.mxu1 %v10953_v47  ;;  %v3092_v45 = vld [vmem:[%s13563_s30 + $0x18a8] sm:$0xff]  ;;  %v10990_v46 = vcombine.low %v3079_v27, %v3083_v28  ;;  %v10992_v47 = vcombine.low %v3080_v31, %v3084_v34  ;;  %v3127_v28 = vld [vmem:[%s13563_s30 + $0x19c0] sm:$0xff] }
 0x38b   : > { %v11001_v49 = vcombine.high %v3088_v44, %v3092_v45  ;;  %v3128_v31 = vld [vmem:[%s13563_s30 + $0x19c8] sm:$0xff] }
 0x38c   : > { %v3132_v34 = vld [vmem:[%s13563_s30 + $0x19e8] sm:$0xff] }
 0x38d   : > { %8793 = vmatpush1.bf16.msra.mxu0 %v10950_v53  ;;  %9121 = vmatpush1.bf16.msra.mxu1 %v10952_v54  ;;  %v3096_v53 = vld [vmem:[%s13563_s30 + $0x18c8] sm:$0xff] }
 0x38e   : > { %8794 = vmatprep.subr.bf16.mxu0 %v10959_v56  ;;  %9122 = vmatprep.subr.bf16.mxu1 %v10961_v57  ;;  %v3100_v54 = vld [vmem:[%s13563_s30 + $0x18e8] sm:$0xff]  ;;  %v10998_v56 = vcombine.low %v3087_v39, %v3091_v40  ;;  %v11000_v57 = vcombine.low %v3088_v44, %v3092_v45  ;;  %v3135_v39 = vld [vmem:[%s13563_s30 + $0x1a00] sm:$0xff] }
 0x38f   : > { %v11009_v59 = vcombine.high %v3096_v53, %v3100_v54  ;;  %v3139_v40 = vld [vmem:[%s13563_s30 + $0x1a20] sm:$0xff]  ;;  %v3136_v44 = vld [vmem:[%s13563_s30 + $0x1a08] sm:$0xff] }
 0x390   : > { %v3140_v45 = vld [vmem:[%s13563_s30 + $0x1a28] sm:$0xff] }
 0x391   : > { %8795 = vmatpush1.bf16.msra.mxu0 %v10958_v63  ;;  %9123 = vmatpush1.bf16.msra.mxu1 %v10960_v0  ;;  %v3104_v63 = vld [vmem:[%s13563_s30 + $0x1908] sm:$0xff] }
 0x392   : > { %8796 = vmatprep.subr.bf16.mxu0 %v10967_v10  ;;  %9124 = vmatprep.subr.bf16.mxu1 %v10969_v4  ;;  %v3108_v0 = vld [vmem:[%s13563_s30 + $0x1928] sm:$0xff]  ;;  %v11006_v10 = vcombine.low %v3095_v50, %v3099_v51  ;;  %v11008_v4 = vcombine.low %v3096_v53, %v3100_v54  ;;  %v3143_v50 = vld [vmem:[%s13563_s30 + $0x1a40] sm:$0xff] }
 0x393   : > { %v11017_v6 = vcombine.high %v3104_v63, %v3108_v0  ;;  %v3147_v51 = vld [vmem:[%s13563_s30 + $0x1a60] sm:$0xff]  ;;  %v3144_v53 = vld [vmem:[%s13563_s30 + $0x1a48] sm:$0xff] }
 0x394   : > { %v3148_v54 = vld [vmem:[%s13563_s30 + $0x1a68] sm:$0xff] }
 0x395   : > { %8797 = vmatpush1.bf16.msra.mxu0 %v10966_v11  ;;  %9125 = vmatpush1.bf16.msra.mxu1 %v10968_v12  ;;  %v3116_v11 = vld [vmem:[%s13563_s30 + $0x1968] sm:$0xff]  ;;  %v11014_v12 = vcombine.low %v3103_v60, %v3107_v62  ;;  %v3151_v60 = vld [vmem:[%s13563_s30 + $0x1a80] sm:$0xff] }
 0x396   : > { %8798 = vmatprep.subr.bf16.mxu0 %v10975_v13  ;;  %9126 = vmatprep.subr.bf16.mxu1 %v10977_v14  ;;  %v11016_v13 = vcombine.low %v3104_v63, %v3108_v0  ;;  %v11023_v14 = vcombine.high %v3111_v32, %v3115_v8  ;;  %v11025_v15 = vcombine.high %v3112_v9, %v3116_v11  ;;  %v3155_v62 = vld [vmem:[%s13563_s30 + $0x1aa0] sm:$0xff]  ;;  %v3152_v63 = vld [vmem:[%s13563_s30 + $0x1a88] sm:$0xff] }
 0x397   : > { %v3156_v0 = vld [vmem:[%s13563_s30 + $0x1aa8] sm:$0xff] }
 0x399   : > { %8799 = vmatpush1.bf16.msra.mxu0 %v10974_v19  ;;  %9127 = vmatpush1.bf16.msra.mxu1 %v10976_v21  ;;  %v3124_v19 = vld [vmem:[%s13563_s30 + $0x19a8] sm:$0xff]  ;;  %v11022_v21 = vcombine.low %v3111_v32, %v3115_v8  ;;  %v3159_v32 = vld [vmem:[%s13563_s30 + $0x1ac0] sm:$0xff] }
 0x39a   : > { %8809 = vmatprep.subr.bf16.mxu0 %v10983_v22  ;;  %9137 = vmatprep.subr.bf16.mxu1 %v10985_v24  ;;  %v11024_v22 = vcombine.low %v3112_v9, %v3116_v11  ;;  %v11031_v24 = vcombine.high %v3119_v16, %v3123_v2  ;;  %v11033_v27 = vcombine.high %v3120_v18, %v3124_v19  ;;  %v3163_v8 = vld [vmem:[%s13563_s30 + $0x1ae0] sm:$0xff]  ;;  %v3160_v9 = vld [vmem:[%s13563_s30 + $0x1ac8] sm:$0xff] }
 0x39b   : > { %v3164_v11 = vld [vmem:[%s13563_s30 + $0x1ae8] sm:$0xff] }
 0x39c   : > { %8801 = vmatmul.mubr.bf16.vlgmr.msra.gmra.mrb[0].mxu0 %v14059_v30  ;;  %9129 = vmatmul.mubr.bf16.vlgmr.msra.gmra.mrb[0].mxu1 %v14059_v30 }
 0x39d   : > { %8810 = vmatpush1.bf16.msra.mxu0 %v10982_v35  ;;  %9138 = vmatpush1.bf16.msra.mxu1 %v10984_v33  ;;  %v11030_v35 = vcombine.low %v3119_v16, %v3123_v2  ;;  %v11032_v33 = vcombine.low %v3120_v18, %v3124_v19  ;;  %v3167_v16 = vld [vmem:[%s13563_s30 + $0x1b00] sm:$0xff]  ;;  %v3168_v18 = vld [vmem:[%s13563_s30 + $0x1b08] sm:$0xff] }
 0x39e   : > { %8811 = vmatprep.subr.bf16.mxu0 %v10991_v37  ;;  %9139 = vmatprep.subr.bf16.mxu1 %v10993_v38  ;;  %v11039_v37 = vcombine.high %v3127_v28, %v3131_v29  ;;  %v11041_v38 = vcombine.high %v3128_v31, %v3132_v34  ;;  %v3171_v2 = vld [vmem:[%s13563_s30 + $0x1b20] sm:$0xff]  ;;  %v3172_v19 = vld [vmem:[%s13563_s30 + $0x1b28] sm:$0xff] }
 0x39f   : > { %8841 = vmatprep.mubr.bf16.mxu0 %v14066_v41  ;;  %9169 = vmatprep.mubr.bf16.mxu1 %v14066_v41 }
 0x3a1   : > { %8812 = vmatpush1.bf16.msra.mxu0 %v10990_v46  ;;  %9140 = vmatpush1.bf16.msra.mxu1 %v10992_v47  ;;  %v11038_v46 = vcombine.low %v3127_v28, %v3131_v29  ;;  %v11040_v47 = vcombine.low %v3128_v31, %v3132_v34  ;;  %v3175_v28 = vld [vmem:[%s13563_s30 + $0x1b40] sm:$0xff]  ;;  %v3176_v31 = vld [vmem:[%s13563_s30 + $0x1b48] sm:$0xff] }
 0x3a2   : > { %8813 = vmatprep.subr.bf16.mxu0 %v10999_v48  ;;  %9141 = vmatprep.subr.bf16.mxu1 %v11001_v49  ;;  %v11047_v48 = vcombine.high %v3135_v39, %v3139_v40  ;;  %v11049_v49 = vcombine.high %v3136_v44, %v3140_v45  ;;  %v3179_v29 = vld [vmem:[%s13563_s30 + $0x1b60] sm:$0xff]  ;;  %v3180_v34 = vld [vmem:[%s13563_s30 + $0x1b68] sm:$0xff] }
 0x3a5   : > { %8814 = vmatpush1.bf16.msra.mxu0 %v10998_v56  ;;  %9142 = vmatpush1.bf16.msra.mxu1 %v11000_v57  ;;  %v11046_v56 = vcombine.low %v3135_v39, %v3139_v40  ;;  %v11048_v57 = vcombine.low %v3136_v44, %v3140_v45  ;;  %v3183_v39 = vld [vmem:[%s13563_s30 + $0x1b80] sm:$0xff]  ;;  %v3184_v44 = vld [vmem:[%s13563_s30 + $0x1b88] sm:$0xff] }
 0x3a6   : > { %8815 = vmatprep.subr.bf16.mxu0 %v11007_v58  ;;  %9143 = vmatprep.subr.bf16.mxu1 %v11009_v59  ;;  %v11055_v58 = vcombine.high %v3143_v50, %v3147_v51  ;;  %v11057_v59 = vcombine.high %v3144_v53, %v3148_v54  ;;  %v3187_v40 = vld [vmem:[%s13563_s30 + $0x1ba0] sm:$0xff]  ;;  %v3188_v45 = vld [vmem:[%s13563_s30 + $0x1ba8] sm:$0xff] }
 0x3a9   : > { %8816 = vmatpush1.bf16.msra.mxu0 %v11006_v10  ;;  %9144 = vmatpush1.bf16.msra.mxu1 %v11008_v4  ;;  %v11054_v10 = vcombine.low %v3143_v50, %v3147_v51  ;;  %v11056_v4 = vcombine.low %v3144_v53, %v3148_v54  ;;  %v3191_v50 = vld [vmem:[%s13563_s30 + $0x1bc0] sm:$0xff]  ;;  %v3192_v53 = vld [vmem:[%s13563_s30 + $0x1bc8] sm:$0xff] }
 0x3aa   : > { %8817 = vmatprep.subr.bf16.mxu0 %v11015_v5  ;;  %9145 = vmatprep.subr.bf16.mxu1 %v11017_v6  ;;  %v11063_v5 = vcombine.high %v3151_v60, %v3155_v62  ;;  %v11065_v6 = vcombine.high %v3152_v63, %v3156_v0  ;;  %v3195_v51 = vld [vmem:[%s13563_s30 + $0x1be0] sm:$0xff]  ;;  %v3196_v54 = vld [vmem:[%s13563_s30 + $0x1be8] sm:$0xff] }
 0x3ad   : > { %8818 = vmatpush1.bf16.msra.mxu0 %v11014_v12  ;;  %9146 = vmatpush1.bf16.msra.mxu1 %v11016_v13  ;;  %v11062_v12 = vcombine.low %v3151_v60, %v3155_v62  ;;  %v11064_v13 = vcombine.low %v3152_v63, %v3156_v0  ;;  %v3199_v60 = vld [vmem:[%s13563_s30 + $0x1c00] sm:$0xff]  ;;  %v3200_v63 = vld [vmem:[%s13563_s30 + $0x1c08] sm:$0xff] }
 0x3ae   : > { %8819 = vmatprep.subr.bf16.mxu0 %v11023_v14  ;;  %9147 = vmatprep.subr.bf16.mxu1 %v11025_v15  ;;  %v11071_v14 = vcombine.high %v3159_v32, %v3163_v8  ;;  %v11073_v15 = vcombine.high %v3160_v9, %v3164_v11  ;;  %v3203_v62 = vld [vmem:[%s13563_s30 + $0x1c20] sm:$0xff]  ;;  %v3204_v0 = vld [vmem:[%s13563_s30 + $0x1c28] sm:$0xff] }
 0x3b1   : > { %8820 = vmatpush1.bf16.msra.mxu0 %v11022_v21  ;;  %9148 = vmatpush1.bf16.msra.mxu1 %v11024_v22  ;;  %v11070_v21 = vcombine.low %v3159_v32, %v3163_v8  ;;  %v11072_v22 = vcombine.low %v3160_v9, %v3164_v11  ;;  %v3207_v32 = vld [vmem:[%s13563_s30 + $0x1c40] sm:$0xff]  ;;  %v14134_v9 = vrot.slane %v14049_v17, %v13578_v23  ;;  %v3208_v11 = vld [vmem:[%s13563_s30 + $0x1c48] sm:$0xff] }
 0x3b2   : > { %8821 = vmatprep.subr.bf16.mxu0 %v11031_v24  ;;  %9149 = vmatprep.subr.bf16.mxu1 %v11033_v27  ;;  %v11079_v24 = vcombine.high %v3167_v16, %v3171_v2  ;;  %v11081_v27 = vcombine.high %v3168_v18, %v3172_v19  ;;  %v3211_v8 = vld [vmem:[%s13563_s30 + $0x1c60] sm:$0xff]  ;;  %v3216_v17 = vld [vmem:[%s13563_s30 + $0x1c88] sm:$0xff] }
 0x3b5   : > { %8822 = vmatpush1.bf16.msra.mxu0 %v11030_v35  ;;  %9150 = vmatpush1.bf16.msra.mxu1 %v11032_v33  ;;  %v11078_v35 = vcombine.low %v3167_v16, %v3171_v2  ;;  %v11080_v33 = vcombine.low %v3168_v18, %v3172_v19  ;;  %v3215_v2 = vld [vmem:[%s13563_s30 + $0x1c80] sm:$0xff]  ;;  %v14142_v19 = vcombine.high %v14066_v41, %v14066_v41 }
 0x3b6   : > { %8823 = vmatprep.subr.bf16.mxu0 %v11039_v37  ;;  %9151 = vmatprep.subr.bf16.mxu1 %v11041_v38  ;;  %v11087_v37 = vcombine.high %v3175_v28, %v3179_v29  ;;  %v11089_v38 = vcombine.high %v3176_v31, %v3180_v34  ;;  %v3219_v18 = vld [vmem:[%s13563_s30 + $0x1ca0] sm:$0xff] }
 0x3b9   : > { %8824 = vmatpush1.bf16.msra.mxu0 %v11038_v46  ;;  %9152 = vmatpush1.bf16.msra.mxu1 %v11040_v47  ;;  %v11086_v46 = vcombine.low %v3175_v28, %v3179_v29  ;;  %v11088_v47 = vcombine.low %v3176_v31, %v3180_v34  ;;  %v3223_v29 = vld [vmem:[%s13563_s30 + $0x1cc0] sm:$0xff]  ;;  %v3224_v34 = vld [vmem:[%s13563_s30 + $0x1cc8] sm:$0xff] }
 0x3ba   : > { %8825 = vmatprep.subr.bf16.mxu0 %v11047_v48  ;;  %9153 = vmatprep.subr.bf16.mxu1 %v11049_v49  ;;  %v11095_v48 = vcombine.high %v3183_v39, %v3187_v40  ;;  %v11097_v49 = vcombine.high %v3184_v44, %v3188_v45  ;;  %v3227_v31 = vld [vmem:[%s13563_s30 + $0x1ce0] sm:$0xff] }
 0x3bd   : > { %8826 = vmatpush1.bf16.msra.mxu0 %v11046_v56  ;;  %9154 = vmatpush1.bf16.msra.mxu1 %v11048_v57  ;;  %v11094_v56 = vcombine.low %v3183_v39, %v3187_v40  ;;  %v11096_v57 = vcombine.low %v3184_v44, %v3188_v45  ;;  %v3231_v40 = vld [vmem:[%s13563_s30 + $0x1d00] sm:$0xff]  ;;  %v3232_v45 = vld [vmem:[%s13563_s30 + $0x1d08] sm:$0xff] }
 0x3be   : > { %8827 = vmatprep.subr.bf16.mxu0 %v11055_v58  ;;  %9155 = vmatprep.subr.bf16.mxu1 %v11057_v59  ;;  %v11103_v58 = vcombine.high %v3191_v50, %v3195_v51  ;;  %v11105_v59 = vcombine.high %v3192_v53, %v3196_v54  ;;  %v3235_v44 = vld [vmem:[%s13563_s30 + $0x1d20] sm:$0xff] }
 0x3c1   : > { %8828 = vmatpush1.bf16.msra.mxu0 %v11054_v10  ;;  %9156 = vmatpush1.bf16.msra.mxu1 %v11056_v4  ;;  %v11102_v10 = vcombine.low %v3191_v50, %v3195_v51  ;;  %v11104_v4 = vcombine.low %v3192_v53, %v3196_v54  ;;  %v3239_v51 = vld [vmem:[%s13563_s30 + $0x1d40] sm:$0xff]  ;;  %v3240_v54 = vld [vmem:[%s13563_s30 + $0x1d48] sm:$0xff] }
 0x3c2   : > { %8829 = vmatprep.subr.bf16.mxu0 %v11063_v5  ;;  %9157 = vmatprep.subr.bf16.mxu1 %v11065_v6  ;;  %v11111_v5 = vcombine.high %v3199_v60, %v3203_v62  ;;  %v11113_v6 = vcombine.high %v3200_v63, %v3204_v0  ;;  %v3243_v53 = vld [vmem:[%s13563_s30 + $0x1d60] sm:$0xff] }
 0x3c5   : > { %8830 = vmatpush1.bf16.msra.mxu0 %v11062_v12  ;;  %9158 = vmatpush1.bf16.msra.mxu1 %v11064_v13  ;;  %v3212_v12 = vld [vmem:[%s13563_s30 + $0x1c68] sm:$0xff]  ;;  %v11110_v13 = vcombine.low %v3199_v60, %v3203_v62  ;;  %v3247_v62 = vld [vmem:[%s13563_s30 + $0x1d80] sm:$0xff] }
 0x3c6   : > { %8831 = vmatprep.subr.bf16.mxu0 %v11071_v14  ;;  %9159 = vmatprep.subr.bf16.mxu1 %v11073_v15  ;;  %v11112_v14 = vcombine.low %v3200_v63, %v3204_v0  ;;  %v11119_v15 = vcombine.high %v3207_v32, %v3211_v8  ;;  %v11121_v16 = vcombine.high %v3208_v11, %v3212_v12  ;;  %v3251_v63 = vld [vmem:[%s13563_s30 + $0x1da0] sm:$0xff]  ;;  %v3248_v0 = vld [vmem:[%s13563_s30 + $0x1d88] sm:$0xff] }
 0x3c9   : > { %8832 = vmatpush1.bf16.msra.mxu0 %v11070_v21  ;;  %9160 = vmatpush1.bf16.msra.mxu1 %v11072_v22  ;;  %v3220_v21 = vld [vmem:[%s13563_s30 + $0x1ca8] sm:$0xff]  ;;  %v11118_v22 = vcombine.low %v3207_v32, %v3211_v8  ;;  %v3255_v8 = vld [vmem:[%s13563_s30 + $0x1dc0] sm:$0xff] }
 0x3ca   : > { %8833 = vmatprep.subr.bf16.mxu0 %v11079_v24  ;;  %9161 = vmatprep.subr.bf16.mxu1 %v11081_v27  ;;  %v11120_v24 = vcombine.low %v3208_v11, %v3212_v12  ;;  %v11127_v27 = vcombine.high %v3215_v2, %v3219_v18  ;;  %v11129_v28 = vcombine.high %v3216_v17, %v3220_v21  ;;  %v3259_v11 = vld [vmem:[%s13563_s30 + $0x1de0] sm:$0xff]  ;;  %v3256_v12 = vld [vmem:[%s13563_s30 + $0x1dc8] sm:$0xff] }
 0x3cd   : > { %8834 = vmatpush1.bf16.msra.mxu0 %v11078_v35  ;;  %9162 = vmatpush1.bf16.msra.mxu1 %v11080_v33  ;;  %v3228_v35 = vld [vmem:[%s13563_s30 + $0x1ce8] sm:$0xff]  ;;  %v11126_v33 = vcombine.low %v3215_v2, %v3219_v18  ;;  %v3263_v18 = vld [vmem:[%s13563_s30 + $0x1e00] sm:$0xff] }
 0x3ce   : > { %8835 = vmatprep.subr.bf16.mxu0 %v11087_v37  ;;  %9163 = vmatprep.subr.bf16.mxu1 %v11089_v38  ;;  %v11128_v37 = vcombine.low %v3216_v17, %v3220_v21  ;;  %v11135_v38 = vcombine.high %v3223_v29, %v3227_v31  ;;  %v11137_v39 = vcombine.high %v3224_v34, %v3228_v35  ;;  %v3267_v17 = vld [vmem:[%s13563_s30 + $0x1e20] sm:$0xff]  ;;  %v3264_v21 = vld [vmem:[%s13563_s30 + $0x1e08] sm:$0xff] }
 0x3d1   : > { %8836 = vmatpush1.bf16.msra.mxu0 %v11086_v46  ;;  %9164 = vmatpush1.bf16.msra.mxu1 %v11088_v47  ;;  %v3236_v46 = vld [vmem:[%s13563_s30 + $0x1d28] sm:$0xff]  ;;  %v11134_v47 = vcombine.low %v3223_v29, %v3227_v31  ;;  %v3271_v31 = vld [vmem:[%s13563_s30 + $0x1e40] sm:$0xff] }
 0x3d2   : > { %8837 = vmatprep.subr.bf16.mxu0 %v11095_v48  ;;  %9165 = vmatprep.subr.bf16.mxu1 %v11097_v49  ;;  %v11136_v48 = vcombine.low %v3224_v34, %v3228_v35  ;;  %v11143_v49 = vcombine.high %v3231_v40, %v3235_v44  ;;  %v11145_v50 = vcombine.high %v3232_v45, %v3236_v46  ;;  %v3275_v34 = vld [vmem:[%s13563_s30 + $0x1e60] sm:$0xff]  ;;  %v3272_v35 = vld [vmem:[%s13563_s30 + $0x1e48] sm:$0xff] }
 0x3d5   : > { %8838 = vmatpush1.bf16.msra.mxu0 %v11094_v56  ;;  %9166 = vmatpush1.bf16.msra.mxu1 %v11096_v57  ;;  %v3244_v56 = vld [vmem:[%s13563_s30 + $0x1d68] sm:$0xff]  ;;  %v11142_v57 = vcombine.low %v3231_v40, %v3235_v44  ;;  %v3279_v44 = vld [vmem:[%s13563_s30 + $0x1e80] sm:$0xff] }
 0x3d6   : > { %8839 = vmatprep.subr.bf16.mxu0 %v11103_v58  ;;  %9167 = vmatprep.subr.bf16.mxu1 %v11105_v59  ;;  %v11144_v58 = vcombine.low %v3232_v45, %v3236_v46  ;;  %v11151_v59 = vcombine.high %v3239_v51, %v3243_v53  ;;  %v11153_v60 = vcombine.high %v3240_v54, %v3244_v56  ;;  %v3283_v45 = vld [vmem:[%s13563_s30 + $0x1ea0] sm:$0xff]  ;;  %v3280_v46 = vld [vmem:[%s13563_s30 + $0x1e88] sm:$0xff] }
 0x3d9   : > { %8840 = vmatpush1.bf16.msra.mxu0 %v11102_v10  ;;  %9168 = vmatpush1.bf16.msra.mxu1 %v11104_v4  ;;  %v3252_v10 = vld [vmem:[%s13563_s30 + $0x1da8] sm:$0xff]  ;;  %v11150_v4 = vcombine.low %v3239_v51, %v3243_v53  ;;  %v3287_v53 = vld [vmem:[%s13563_s30 + $0x1ec0] sm:$0xff] }
 0x3da   : > { %8850 = vmatprep.subr.bf16.mxu0 %v11111_v5  ;;  %9178 = vmatprep.subr.bf16.mxu1 %v11113_v6  ;;  %v11152_v5 = vcombine.low %v3240_v54, %v3244_v56  ;;  %v11159_v6 = vcombine.high %v3247_v62, %v3251_v63  ;;  %v11161_v32 = vcombine.high %v3248_v0, %v3252_v10  ;;  %v3291_v54 = vld [vmem:[%s13563_s30 + $0x1ee0] sm:$0xff]  ;;  %v3288_v56 = vld [vmem:[%s13563_s30 + $0x1ec8] sm:$0xff] }
 0x3dc   : > { %8842 = vmatmul.mubr.bf16.vlgmr.msra.gmra.mrb[0].mxu0 %v14134_v9  ;;  %9170 = vmatmul.mubr.bf16.vlgmr.msra.gmra.mrb[0].mxu1 %v14134_v9 }
 0x3dd   : > { %8851 = vmatpush1.bf16.msra.mxu0 %v11110_v13  ;;  %9179 = vmatpush1.bf16.msra.mxu1 %v11112_v14  ;;  %v3260_v13 = vld [vmem:[%s13563_s30 + $0x1de8] sm:$0xff]  ;;  %v11158_v14 = vcombine.low %v3247_v62, %v3251_v63  ;;  %v3295_v63 = vld [vmem:[%s13563_s30 + $0x1f00] sm:$0xff] }
 0x3de   : > { %8852 = vmatprep.subr.bf16.mxu0 %v11119_v15  ;;  %9180 = vmatprep.subr.bf16.mxu1 %v11121_v16  ;;  %v11160_v15 = vcombine.low %v3248_v0, %v3252_v10  ;;  %v11167_v16 = vcombine.high %v3255_v8, %v3259_v11  ;;  %v11169_v2 = vcombine.high %v3256_v12, %v3260_v13  ;;  %v3299_v0 = vld [vmem:[%s13563_s30 + $0x1f20] sm:$0xff]  ;;  %v3296_v10 = vld [vmem:[%s13563_s30 + $0x1f08] sm:$0xff] }
 0x3df   : > { %8882 = vmatprep.mubr.bf16.mxu0 %v14142_v19  ;;  %9210 = vmatprep.mubr.bf16.mxu1 %v14142_v19 }
 0x3e1   : > { %8853 = vmatpush1.bf16.msra.mxu0 %v11118_v22  ;;  %9181 = vmatpush1.bf16.msra.mxu1 %v11120_v24  ;;  %v3268_v22 = vld [vmem:[%s13563_s30 + $0x1e28] sm:$0xff]  ;;  %v11166_v24 = vcombine.low %v3255_v8, %v3259_v11  ;;  %v3303_v11 = vld [vmem:[%s13563_s30 + $0x1f40] sm:$0xff] }
 0x3e2   : > { %8854 = vmatprep.subr.bf16.mxu0 %v11127_v27  ;;  %9182 = vmatprep.subr.bf16.mxu1 %v11129_v28  ;;  %v11168_v27 = vcombine.low %v3256_v12, %v3260_v13  ;;  %v11175_v28 = vcombine.high %v3263_v18, %v3267_v17  ;;  %v11177_v29 = vcombine.high %v3264_v21, %v3268_v22  ;;  %v3307_v12 = vld [vmem:[%s13563_s30 + $0x1f60] sm:$0xff]  ;;  %v3304_v13 = vld [vmem:[%s13563_s30 + $0x1f48] sm:$0xff] }
 0x3e5   : > { %8855 = vmatpush1.bf16.msra.mxu0 %v11126_v33  ;;  %9183 = vmatpush1.bf16.msra.mxu1 %v11128_v37  ;;  %v3276_v33 = vld [vmem:[%s13563_s30 + $0x1e68] sm:$0xff]  ;;  %v11174_v37 = vcombine.low %v3263_v18, %v3267_v17  ;;  %v3311_v17 = vld [vmem:[%s13563_s30 + $0x1f80] sm:$0xff] }
 0x3e6   : > { %8856 = vmatprep.subr.bf16.mxu0 %v11135_v38  ;;  %9184 = vmatprep.subr.bf16.mxu1 %v11137_v39  ;;  %v11176_v38 = vcombine.low %v3264_v21, %v3268_v22  ;;  %v11183_v39 = vcombine.high %v3271_v31, %v3275_v34  ;;  %v11185_v40 = vcombine.high %v3272_v35, %v3276_v33  ;;  %v3315_v21 = vld [vmem:[%s13563_s30 + $0x1fa0] sm:$0xff]  ;;  %v3312_v22 = vld [vmem:[%s13563_s30 + $0x1f88] sm:$0xff] }
 0x3e9   : > { %8857 = vmatpush1.bf16.msra.mxu0 %v11134_v47  ;;  %9185 = vmatpush1.bf16.msra.mxu1 %v11136_v48  ;;  %v3284_v47 = vld [vmem:[%s13563_s30 + $0x1ea8] sm:$0xff]  ;;  %v11182_v48 = vcombine.low %v3271_v31, %v3275_v34  ;;  %v3319_v34 = vld [vmem:[%s13563_s30 + $0x1fc0] sm:$0xff] }
 0x3ea   : > { %8858 = vmatprep.subr.bf16.mxu0 %v11143_v49  ;;  %9186 = vmatprep.subr.bf16.mxu1 %v11145_v50  ;;  %v11184_v49 = vcombine.low %v3272_v35, %v3276_v33  ;;  %v11191_v50 = vcombine.high %v3279_v44, %v3283_v45  ;;  %v11193_v51 = vcombine.high %v3280_v46, %v3284_v47  ;;  %v3323_v35 = vld [vmem:[%s13563_s30 + $0x1fe0] sm:$0xff]  ;;  %v3320_v33 = vld [vmem:[%s13563_s30 + $0x1fc8] sm:$0xff] }
 0x3ed   : > { %8859 = vmatpush1.bf16.msra.mxu0 %v11142_v57  ;;  %9187 = vmatpush1.bf16.msra.mxu1 %v11144_v58  ;;  %v3292_v57 = vld [vmem:[%s13563_s30 + $0x1ee8] sm:$0xff]  ;;  %v11190_v58 = vcombine.low %v3279_v44, %v3283_v45  ;;  %v2305_v45 = vld [vmem:[%s13563_s30 + $0x10] sm:$0xff] }
 0x3ee   : > { %8860 = vmatprep.subr.bf16.mxu0 %v11151_v59  ;;  %9188 = vmatprep.subr.bf16.mxu1 %v11153_v60  ;;  %v11192_v59 = vcombine.low %v3280_v46, %v3284_v47  ;;  %v11199_v60 = vcombine.high %v3287_v53, %v3291_v54  ;;  %v11201_v62 = vcombine.high %v3288_v56, %v3292_v57  ;;  %v2309_v46 = vld [vmem:[%s13563_s30 + $0x30] sm:$0xff]  ;;  %v2306_v47 = vld [vmem:[%s13563_s30 + $0x18] sm:$0xff] }
 0x3f1   : > { %8861 = vmatpush1.bf16.msra.mxu0 %v11150_v4  ;;  %9189 = vmatpush1.bf16.msra.mxu1 %v11152_v5  ;;  %v3300_v4 = vld [vmem:[%s13563_s30 + $0x1f28] sm:$0xff]  ;;  %v11198_v5 = vcombine.low %v3287_v53, %v3291_v54  ;;  %v2313_v54 = vld [vmem:[%s13563_s30 + $0x50] sm:$0xff] }
 0x3f2   : > { %8862 = vmatprep.subr.bf16.mxu0 %v11159_v6  ;;  %9190 = vmatprep.subr.bf16.mxu1 %v11161_v32  ;;  %v11200_v6 = vcombine.low %v3288_v56, %v3292_v57  ;;  %v11207_v32 = vcombine.high %v3295_v63, %v3299_v0  ;;  %v11209_v8 = vcombine.high %v3296_v10, %v3300_v4  ;;  %v2317_v56 = vld [vmem:[%s13563_s30 + $0x70] sm:$0xff] }
 0x3f3   : > { %v14210_v57 = vcombine.high %v14134_v9, %v14134_v9 }
 0x3f5   : > { %8863 = vmatpush1.bf16.msra.mxu0 %v11158_v14  ;;  %9191 = vmatpush1.bf16.msra.mxu1 %v11160_v15  ;;  %v3308_v14 = vld [vmem:[%s13563_s30 + $0x1f68] sm:$0xff]  ;;  %v11206_v15 = vcombine.low %v3295_v63, %v3299_v0  ;;  %v10227_v63 = vcombine.high %v2313_v54, %v2317_v56 }
 0x3f6   : > { %8864 = vmatprep.subr.bf16.mxu0 %v11167_v16  ;;  %9192 = vmatprep.subr.bf16.mxu1 %v11169_v2  ;;  %v11208_v16 = vcombine.low %v3296_v10, %v3300_v4  ;;  %v11215_v2 = vcombine.high %v3303_v11, %v3307_v12  ;;  %v11217_v18 = vcombine.high %v3304_v13, %v3308_v14  ;;  %v2321_v10 = vld [vmem:[%s13563_s30 + $0x90] sm:$0xff] }
 0x3f7   : > { %v2325_v4 = vld [vmem:[%s13563_s30 + $0xb0] sm:$0xff] }
 0x3f9   : > { %8865 = vmatpush1.bf16.msra.mxu0 %v11166_v24  ;;  %9193 = vmatpush1.bf16.msra.mxu1 %v11168_v27  ;;  %v3316_v24 = vld [vmem:[%s13563_s30 + $0x1fa8] sm:$0xff]  ;;  %v11214_v27 = vcombine.low %v3303_v11, %v3307_v12  ;;  %v10235_v11 = vcombine.high %v2321_v10, %v2325_v4 }
 0x3fa   : > { %8866 = vmatprep.subr.bf16.mxu0 %v11175_v28  ;;  %9194 = vmatprep.subr.bf16.mxu1 %v11177_v29  ;;  %v11216_v28 = vcombine.low %v3304_v13, %v3308_v14  ;;  %v11223_v29 = vcombine.high %v3311_v17, %v3315_v21  ;;  %v11225_v31 = vcombine.high %v3312_v22, %v3316_v24  ;;  %v2329_v13 = vld [vmem:[%s13563_s30 + $0xd0] sm:$0xff] }
 0x3fb   : > { %v2333_v14 = vld [vmem:[%s13563_s30 + $0xf0] sm:$0xff] }
 0x3fd   : > { %8867 = vmatpush1.bf16.msra.mxu0 %v11174_v37  ;;  %9195 = vmatpush1.bf16.msra.mxu1 %v11176_v38  ;;  %v3324_v37 = vld [vmem:[%s13563_s30 + $0x1fe8] sm:$0xff]  ;;  %v11222_v38 = vcombine.low %v3311_v17, %v3315_v21  ;;  %v10243_v17 = vcombine.high %v2329_v13, %v2333_v14 }
 0x3fe   : > { %8868 = vmatprep.subr.bf16.mxu0 %v11183_v39  ;;  %9196 = vmatprep.subr.bf16.mxu1 %v11185_v40  ;;  %v11224_v39 = vcombine.low %v3312_v22, %v3316_v24  ;;  %v11231_v40 = vcombine.high %v3319_v34, %v3323_v35  ;;  %v11233_v44 = vcombine.high %v3320_v33, %v3324_v37  ;;  %v2337_v22 = vld [vmem:[%s13563_s30 + $0x110] sm:$0xff] }
 0x3ff   : > { %v2341_v24 = vld [vmem:[%s13563_s30 + $0x130] sm:$0xff] }
 0x401   : > { %8869 = vmatpush1.bf16.msra.mxu0 %v11182_v48  ;;  %9197 = vmatpush1.bf16.msra.mxu1 %v11184_v49  ;;  %v2310_v48 = vld [vmem:[%s13563_s30 + $0x38] sm:$0xff]  ;;  %v11230_v49 = vcombine.low %v3319_v34, %v3323_v35  ;;  %v2345_v35 = vld [vmem:[%s13563_s30 + $0x150] sm:$0xff] }
 0x402   : > { %8870 = vmatprep.subr.bf16.mxu0 %v11191_v50  ;;  %9198 = vmatprep.subr.bf16.mxu1 %v11193_v51  ;;  %v11232_v50 = vcombine.low %v3320_v33, %v3324_v37  ;;  %v10219_v51 = vcombine.high %v2305_v45, %v2309_v46  ;;  %v10221_v53 = vcombine.high %v2306_v47, %v2310_v48  ;;  %v2349_v33 = vld [vmem:[%s13563_s30 + $0x170] sm:$0xff]  ;;  %v2346_v37 = vld [vmem:[%s13563_s30 + $0x158] sm:$0xff] }
 0x405   : > { %8871 = vmatpush1.bf16.msra.mxu0 %v11190_v58  ;;  %9199 = vmatpush1.bf16.msra.mxu1 %v11192_v59  ;;  %v2314_v58 = vld [vmem:[%s13563_s30 + $0x58] sm:$0xff] }
 0x406   : > { %8872 = vmatprep.subr.bf16.mxu0 %v11199_v60  ;;  %9200 = vmatprep.subr.bf16.mxu1 %v11201_v62  ;;  %v2318_v59 = vld [vmem:[%s13563_s30 + $0x78] sm:$0xff]  ;;  %v10218_v60 = vcombine.low %v2305_v45, %v2309_v46  ;;  %v10220_v62 = vcombine.low %v2306_v47, %v2310_v48  ;;  %v2353_v46 = vld [vmem:[%s13563_s30 + $0x190] sm:$0xff] }
 0x407   : > { %v10229_v0 = vcombine.high %v2314_v58, %v2318_v59  ;;  %v2357_v47 = vld [vmem:[%s13563_s30 + $0x1b0] sm:$0xff]  ;;  %v2354_v48 = vld [vmem:[%s13563_s30 + $0x198] sm:$0xff] }
 0x409   : > { %8873 = vmatpush1.bf16.msra.mxu0 %v11198_v5  ;;  %9201 = vmatpush1.bf16.msra.mxu1 %v11200_v6  ;;  %v2322_v5 = vld [vmem:[%s13563_s30 + $0x98] sm:$0xff] }
 0x40a   : > { %8874 = vmatprep.subr.bf16.mxu0 %v11207_v32  ;;  %9202 = vmatprep.subr.bf16.mxu1 %v11209_v8  ;;  %v2326_v6 = vld [vmem:[%s13563_s30 + $0xb8] sm:$0xff]  ;;  %v10226_v32 = vcombine.low %v2313_v54, %v2317_v56  ;;  %v10228_v8 = vcombine.low %v2314_v58, %v2318_v59  ;;  %v2361_v56 = vld [vmem:[%s13563_s30 + $0x1d0] sm:$0xff] }
 0x40b   : > { %v10237_v12 = vcombine.high %v2322_v5, %v2326_v6  ;;  %v2365_v58 = vld [vmem:[%s13563_s30 + $0x1f0] sm:$0xff]  ;;  %v2362_v59 = vld [vmem:[%s13563_s30 + $0x1d8] sm:$0xff] }
 0x40d   : > { %8875 = vmatpush1.bf16.msra.mxu0 %v11206_v15  ;;  %9203 = vmatpush1.bf16.msra.mxu1 %v11208_v16  ;;  %v2330_v15 = vld [vmem:[%s13563_s30 + $0xd8] sm:$0xff] }
 0x40e   : > { %8876 = vmatprep.subr.bf16.mxu0 %v11215_v2  ;;  %9204 = vmatprep.subr.bf16.mxu1 %v11217_v18  ;;  %v2334_v16 = vld [vmem:[%s13563_s30 + $0xf8] sm:$0xff]  ;;  %v10234_v2 = vcombine.low %v2321_v10, %v2325_v4  ;;  %v10236_v18 = vcombine.low %v2322_v5, %v2326_v6  ;;  %v2369_v4 = vld [vmem:[%s13563_s30 + $0x210] sm:$0xff] }
 0x40f   : > { %v10245_v21 = vcombine.high %v2330_v15, %v2334_v16  ;;  %v2373_v5 = vld [vmem:[%s13563_s30 + $0x230] sm:$0xff]  ;;  %v2370_v6 = vld [vmem:[%s13563_s30 + $0x218] sm:$0xff] }
 0x411   : > { %8877 = vmatpush1.bf16.msra.mxu0 %v11214_v27  ;;  %9205 = vmatpush1.bf16.msra.mxu1 %v11216_v28  ;;  %v2338_v27 = vld [vmem:[%s13563_s30 + $0x118] sm:$0xff] }
 0x412   : > { %8878 = vmatprep.subr.bf16.mxu0 %v11223_v29  ;;  %9206 = vmatprep.subr.bf16.mxu1 %v11225_v31  ;;  %v2342_v28 = vld [vmem:[%s13563_s30 + $0x138] sm:$0xff]  ;;  %v10242_v29 = vcombine.low %v2329_v13, %v2333_v14  ;;  %v10251_v31 = vcombine.high %v2337_v22, %v2341_v24  ;;  %v2377_v14 = vld [vmem:[%s13563_s30 + $0x250] sm:$0xff] }
 0x413   : > { %v10253_v34 = vcombine.high %v2338_v27, %v2342_v28 }
 0x415   : > { %8879 = vmatpush1.bf16.msra.mxu0 %v11222_v38  ;;  %9207 = vmatpush1.bf16.msra.mxu1 %v11224_v39  ;;  %v2350_v38 = vld [vmem:[%s13563_s30 + $0x178] sm:$0xff]  ;;  %v10250_v39 = vcombine.low %v2337_v22, %v2341_v24  ;;  %v2385_v24 = vld [vmem:[%s13563_s30 + $0x290] sm:$0xff] }
 0x416   : > { %8880 = vmatprep.subr.bf16.mxu0 %v11231_v40  ;;  %9208 = vmatprep.subr.bf16.mxu1 %v11233_v44  ;;  %v10252_v40 = vcombine.low %v2338_v27, %v2342_v28  ;;  %v10259_v44 = vcombine.high %v2345_v35, %v2349_v33  ;;  %v10261_v45 = vcombine.high %v2346_v37, %v2350_v38  ;;  %v2389_v27 = vld [vmem:[%s13563_s30 + $0x2b0] sm:$0xff]  ;;  %v2386_v28 = vld [vmem:[%s13563_s30 + $0x298] sm:$0xff] }
 0x419   : > { %8881 = vmatpush1.bf16.msra.mxu0 %v11230_v49  ;;  %9209 = vmatpush1.bf16.msra.mxu1 %v11232_v50  ;;  %v2358_v49 = vld [vmem:[%s13563_s30 + $0x1b8] sm:$0xff]  ;;  %v10258_v50 = vcombine.low %v2345_v35, %v2349_v33  ;;  %v2393_v33 = vld [vmem:[%s13563_s30 + $0x2d0] sm:$0xff] }
 0x41a   : > { %9219 = vmatprep.subr.bf16.mxu0 %v10219_v51  ;;  %9547 = vmatprep.subr.bf16.mxu1 %v10221_v53  ;;  %v10260_v51 = vcombine.low %v2346_v37, %v2350_v38  ;;  %v10267_v53 = vcombine.high %v2353_v46, %v2357_v47  ;;  %v10269_v54 = vcombine.high %v2354_v48, %v2358_v49  ;;  %v2397_v37 = vld [vmem:[%s13563_s30 + $0x2f0] sm:$0xff]  ;;  %v2394_v38 = vld [vmem:[%s13563_s30 + $0x2d8] sm:$0xff] }
 0x41c   : > { %8883 = vmatmul.mubr.bf16.vlgmr.msra.gmra.mrb[0].mxu0 %v14210_v57  ;;  %9211 = vmatmul.mubr.bf16.vlgmr.msra.gmra.mrb[0].mxu1 %v14210_v57 }
 0x41d   : > { %9220 = vmatpush1.bf16.msra.mxu0 %v10218_v60  ;;  %9548 = vmatpush1.bf16.msra.mxu1 %v10220_v62  ;;  %v2366_v60 = vld [vmem:[%s13563_s30 + $0x1f8] sm:$0xff]  ;;  %v10266_v62 = vcombine.low %v2353_v46, %v2357_v47  ;;  %v2401_v47 = vld [vmem:[%s13563_s30 + $0x310] sm:$0xff] }
 0x41e   : > { %9221 = vmatprep.subr.bf16.mxu0 %v10227_v63  ;;  %9549 = vmatprep.subr.bf16.mxu1 %v10229_v0  ;;  %v10268_v63 = vcombine.low %v2354_v48, %v2358_v49  ;;  %v10275_v0 = vcombine.high %v2361_v56, %v2365_v58  ;;  %v10277_v10 = vcombine.high %v2362_v59, %v2366_v60  ;;  %v2405_v48 = vld [vmem:[%s13563_s30 + $0x330] sm:$0xff]  ;;  %v2402_v49 = vld [vmem:[%s13563_s30 + $0x318] sm:$0xff] }
 0x41f   : > { %9251 = vmatprep.mubr.bf16.mxu0 %v13600_v43  ;;  %9579 = vmatprep.mubr.bf16.mxu1 %v13600_v43  ;;  %v10244_v43 = vcombine.low %v2330_v15, %v2334_v16  ;;  %v2381_v15 = vld [vmem:[%s13563_s30 + $0x270] sm:$0xff]  ;;  %v2378_v16 = vld [vmem:[%s13563_s30 + $0x258] sm:$0xff] }
 0x421   : > { %9222 = vmatpush1.bf16.msra.mxu0 %v10226_v32  ;;  %9550 = vmatpush1.bf16.msra.mxu1 %v10228_v8  ;;  %v2374_v32 = vld [vmem:[%s13563_s30 + $0x238] sm:$0xff]  ;;  %v10274_v8 = vcombine.low %v2361_v56, %v2365_v58  ;;  %v2409_v58 = vld [vmem:[%s13563_s30 + $0x350] sm:$0xff] }
 0x422   : > { %9223 = vmatprep.subr.bf16.mxu0 %v10235_v11  ;;  %9551 = vmatprep.subr.bf16.mxu1 %v10237_v12  ;;  %v10276_v11 = vcombine.low %v2362_v59, %v2366_v60  ;;  %v10283_v12 = vcombine.high %v2369_v4, %v2373_v5  ;;  %v10285_v13 = vcombine.high %v2370_v6, %v2374_v32  ;;  %v2413_v59 = vld [vmem:[%s13563_s30 + $0x370] sm:$0xff]  ;;  %v2410_v60 = vld [vmem:[%s13563_s30 + $0x358] sm:$0xff] }
 0x425   : > { %9224 = vmatpush1.bf16.msra.mxu0 %v10234_v2  ;;  %9552 = vmatpush1.bf16.msra.mxu1 %v10236_v18  ;;  %v2382_v2 = vld [vmem:[%s13563_s30 + $0x278] sm:$0xff]  ;;  %v10282_v18 = vcombine.low %v2369_v4, %v2373_v5  ;;  %v2417_v5 = vld [vmem:[%s13563_s30 + $0x390] sm:$0xff] }
 0x426   : > { %9225 = vmatprep.subr.bf16.mxu0 %v10243_v17  ;;  %9553 = vmatprep.subr.bf16.mxu1 %v10245_v21  ;;  %v10284_v17 = vcombine.low %v2370_v6, %v2374_v32  ;;  %v10291_v21 = vcombine.high %v2377_v14, %v2381_v15  ;;  %v10293_v22 = vcombine.high %v2378_v16, %v2382_v2  ;;  %v2421_v6 = vld [vmem:[%s13563_s30 + $0x3b0] sm:$0xff]  ;;  %v2418_v32 = vld [vmem:[%s13563_s30 + $0x398] sm:$0xff] }
 0x429   : > { %9226 = vmatpush1.bf16.msra.mxu0 %v10242_v29  ;;  %9554 = vmatpush1.bf16.msra.mxu1 %v10244_v43  ;;  %v2390_v29 = vld [vmem:[%s13563_s30 + $0x2b8] sm:$0xff]  ;;  %v10290_v43 = vcombine.low %v2377_v14, %v2381_v15  ;;  %v2425_v15 = vld [vmem:[%s13563_s30 + $0x3d0] sm:$0xff] }
 0x42a   : > { %9227 = vmatprep.subr.bf16.mxu0 %v10251_v31  ;;  %9555 = vmatprep.subr.bf16.mxu1 %v10253_v34  ;;  %v10292_v31 = vcombine.low %v2378_v16, %v2382_v2  ;;  %v10299_v34 = vcombine.high %v2385_v24, %v2389_v27  ;;  %v10301_v35 = vcombine.high %v2386_v28, %v2390_v29  ;;  %v2429_v16 = vld [vmem:[%s13563_s30 + $0x3f0] sm:$0xff]  ;;  %v2426_v2 = vld [vmem:[%s13563_s30 + $0x3d8] sm:$0xff] }
 0x42d   : > { %9228 = vmatpush1.bf16.msra.mxu0 %v10250_v39  ;;  %9556 = vmatpush1.bf16.msra.mxu1 %v10252_v40  ;;  %v2398_v39 = vld [vmem:[%s13563_s30 + $0x2f8] sm:$0xff]  ;;  %v10298_v40 = vcombine.low %v2385_v24, %v2389_v27  ;;  %v2433_v27 = vld [vmem:[%s13563_s30 + $0x410] sm:$0xff] }
 0x42e   : > { %9229 = vmatprep.subr.bf16.mxu0 %v10259_v44  ;;  %9557 = vmatprep.subr.bf16.mxu1 %v10261_v45  ;;  %v10300_v44 = vcombine.low %v2386_v28, %v2390_v29  ;;  %v10307_v45 = vcombine.high %v2393_v33, %v2397_v37  ;;  %v10309_v46 = vcombine.high %v2394_v38, %v2398_v39  ;;  %v2437_v28 = vld [vmem:[%s13563_s30 + $0x430] sm:$0xff]  ;;  %v2434_v29 = vld [vmem:[%s13563_s30 + $0x418] sm:$0xff] }
 0x431   : > { %9230 = vmatpush1.bf16.msra.mxu0 %v10258_v50  ;;  %9558 = vmatpush1.bf16.msra.mxu1 %v10260_v51  ;;  %v2406_v50 = vld [vmem:[%s13563_s30 + $0x338] sm:$0xff]  ;;  %v10306_v51 = vcombine.low %v2393_v33, %v2397_v37  ;;  %v2441_v37 = vld [vmem:[%s13563_s30 + $0x450] sm:$0xff] }
 0x432   : > { %9231 = vmatprep.subr.bf16.mxu0 %v10267_v53  ;;  %9559 = vmatprep.subr.bf16.mxu1 %v10269_v54  ;;  %v10308_v53 = vcombine.low %v2394_v38, %v2398_v39  ;;  %v10315_v54 = vcombine.high %v2401_v47, %v2405_v48  ;;  %v10317_v56 = vcombine.high %v2402_v49, %v2406_v50  ;;  %v2445_v38 = vld [vmem:[%s13563_s30 + $0x470] sm:$0xff]  ;;  %v2442_v39 = vld [vmem:[%s13563_s30 + $0x458] sm:$0xff] }
 0x435   : > { %9232 = vmatpush1.bf16.msra.mxu0 %v10266_v62  ;;  %9560 = vmatpush1.bf16.msra.mxu1 %v10268_v63  ;;  %v2414_v62 = vld [vmem:[%s13563_s30 + $0x378] sm:$0xff]  ;;  %v10314_v63 = vcombine.low %v2401_v47, %v2405_v48  ;;  %v2449_v48 = vld [vmem:[%s13563_s30 + $0x490] sm:$0xff] }
 0x436   : > { %9233 = vmatprep.subr.bf16.mxu0 %v10275_v0  ;;  %9561 = vmatprep.subr.bf16.mxu1 %v10277_v10  ;;  %v10316_v0 = vcombine.low %v2402_v49, %v2406_v50  ;;  %v10323_v10 = vcombine.high %v2409_v58, %v2413_v59  ;;  %v10325_v4 = vcombine.high %v2410_v60, %v2414_v62  ;;  %v2453_v49 = vld [vmem:[%s13563_s30 + $0x4b0] sm:$0xff]  ;;  %v2450_v50 = vld [vmem:[%s13563_s30 + $0x498] sm:$0xff] }
 0x439   : > { %9234 = vmatpush1.bf16.msra.mxu0 %v10274_v8  ;;  %9562 = vmatpush1.bf16.msra.mxu1 %v10276_v11  ;;  %v2422_v8 = vld [vmem:[%s13563_s30 + $0x3b8] sm:$0xff]  ;;  %v10322_v11 = vcombine.low %v2409_v58, %v2413_v59  ;;  %v2457_v59 = vld [vmem:[%s13563_s30 + $0x4d0] sm:$0xff] }
 0x43a   : > { %9235 = vmatprep.subr.bf16.mxu0 %v10283_v12  ;;  %9563 = vmatprep.subr.bf16.mxu1 %v10285_v13  ;;  %v10324_v12 = vcombine.low %v2410_v60, %v2414_v62  ;;  %v10331_v13 = vcombine.high %v2417_v5, %v2421_v6  ;;  %v10333_v14 = vcombine.high %v2418_v32, %v2422_v8  ;;  %v2461_v60 = vld [vmem:[%s13563_s30 + $0x4f0] sm:$0xff]  ;;  %v2458_v62 = vld [vmem:[%s13563_s30 + $0x4d8] sm:$0xff] }
 0x43d   : > { %9236 = vmatpush1.bf16.msra.mxu0 %v10282_v18  ;;  %9564 = vmatpush1.bf16.msra.mxu1 %v10284_v17  ;;  %v2430_v18 = vld [vmem:[%s13563_s30 + $0x3f8] sm:$0xff]  ;;  %v10330_v17 = vcombine.low %v2417_v5, %v2421_v6  ;;  %v2465_v5 = vld [vmem:[%s13563_s30 + $0x510] sm:$0xff] }
 0x43e   : > { %9237 = vmatprep.subr.bf16.mxu0 %v10291_v21  ;;  %9565 = vmatprep.subr.bf16.mxu1 %v10293_v22  ;;  %v10332_v21 = vcombine.low %v2418_v32, %v2422_v8  ;;  %v10339_v22 = vcombine.high %v2425_v15, %v2429_v16  ;;  %v10341_v24 = vcombine.high %v2426_v2, %v2430_v18  ;;  %v2469_v6 = vld [vmem:[%s13563_s30 + $0x530] sm:$0xff]  ;;  %v2466_v32 = vld [vmem:[%s13563_s30 + $0x518] sm:$0xff] }
 0x43f   : > { %v2470_v8 = vld [vmem:[%s13563_s30 + $0x538] sm:$0xff] }
 0x441   : > { %9238 = vmatpush1.bf16.msra.mxu0 %v10290_v43  ;;  %9566 = vmatpush1.bf16.msra.mxu1 %v10292_v31  ;;  %v2438_v43 = vld [vmem:[%s13563_s30 + $0x438] sm:$0xff]  ;;  %v10338_v31 = vcombine.low %v2425_v15, %v2429_v16  ;;  %v2477_v15 = vld [vmem:[%s13563_s30 + $0x570] sm:$0xff] }
 0x442   : > { %9239 = vmatprep.subr.bf16.mxu0 %v10299_v34  ;;  %9567 = vmatprep.subr.bf16.mxu1 %v10301_v35  ;;  %v10340_v34 = vcombine.low %v2426_v2, %v2430_v18  ;;  %v10347_v35 = vcombine.high %v2433_v27, %v2437_v28  ;;  %v10349_v33 = vcombine.high %v2434_v29, %v2438_v43  ;;  %v2474_v16 = vld [vmem:[%s13563_s30 + $0x558] sm:$0xff] }
 0x443   : > { %v2478_v2 = vld [vmem:[%s13563_s30 + $0x578] sm:$0xff]  ;;  %v10378_v18 = vcombine.low %v2465_v5, %v2469_v6 }
 0x445   : > { %9240 = vmatpush1.bf16.msra.mxu0 %v10298_v40  ;;  %9568 = vmatpush1.bf16.msra.mxu1 %v10300_v44  ;;  %v2446_v40 = vld [vmem:[%s13563_s30 + $0x478] sm:$0xff]  ;;  %v10346_v44 = vcombine.low %v2433_v27, %v2437_v28  ;;  %v2485_v27 = vld [vmem:[%s13563_s30 + $0x5b0] sm:$0xff] }
 0x446   : > { %9241 = vmatprep.subr.bf16.mxu0 %v10307_v45  ;;  %9569 = vmatprep.subr.bf16.mxu1 %v10309_v46  ;;  %v10348_v45 = vcombine.low %v2434_v29, %v2438_v43  ;;  %v10355_v46 = vcombine.high %v2441_v37, %v2445_v38  ;;  %v10357_v47 = vcombine.high %v2442_v39, %v2446_v40  ;;  %v2482_v28 = vld [vmem:[%s13563_s30 + $0x598] sm:$0xff] }
 0x447   : > { %v2486_v29 = vld [vmem:[%s13563_s30 + $0x5b8] sm:$0xff] }
 0x449   : > { %9242 = vmatpush1.bf16.msra.mxu0 %v10306_v51  ;;  %9570 = vmatpush1.bf16.msra.mxu1 %v10308_v53  ;;  %v2454_v51 = vld [vmem:[%s13563_s30 + $0x4b8] sm:$0xff]  ;;  %v10354_v53 = vcombine.low %v2441_v37, %v2445_v38  ;;  %v2493_v37 = vld [vmem:[%s13563_s30 + $0x5f0] sm:$0xff] }
 0x44a   : > { %9243 = vmatprep.subr.bf16.mxu0 %v10315_v54  ;;  %9571 = vmatprep.subr.bf16.mxu1 %v10317_v56  ;;  %v10356_v54 = vcombine.low %v2442_v39, %v2446_v40  ;;  %v10363_v56 = vcombine.high %v2449_v48, %v2453_v49  ;;  %v10365_v58 = vcombine.high %v2450_v50, %v2454_v51  ;;  %v2490_v38 = vld [vmem:[%s13563_s30 + $0x5d8] sm:$0xff] }
 0x44b   : > { %v2494_v39 = vld [vmem:[%s13563_s30 + $0x5f8] sm:$0xff] }
 0x44d   : > { %9244 = vmatpush1.bf16.msra.mxu0 %v10314_v63  ;;  %9572 = vmatpush1.bf16.msra.mxu1 %v10316_v0  ;;  %v2462_v63 = vld [vmem:[%s13563_s30 + $0x4f8] sm:$0xff]  ;;  %v10364_v0 = vcombine.low %v2450_v50, %v2454_v51 }
 0x44e   : > { %9245 = vmatprep.subr.bf16.mxu0 %v10323_v10  ;;  %9573 = vmatprep.subr.bf16.mxu1 %v10325_v4  ;;  %v10371_v10 = vcombine.high %v2457_v59, %v2461_v60  ;;  %v10373_v4 = vcombine.high %v2458_v62, %v2462_v63  ;;  %v2502_v50 = vld [vmem:[%s13563_s30 + $0x638] sm:$0xff] }
 0x451   : > { %9246 = vmatpush1.bf16.msra.mxu0 %v10322_v11  ;;  %9574 = vmatpush1.bf16.msra.mxu1 %v10324_v12  ;;  %v10370_v11 = vcombine.low %v2457_v59, %v2461_v60  ;;  %v10379_v12 = vcombine.high %v2465_v5, %v2469_v6  ;;  %v2509_v59 = vld [vmem:[%s13563_s30 + $0x670] sm:$0xff]  ;;  %v2506_v60 = vld [vmem:[%s13563_s30 + $0x658] sm:$0xff] }
 0x452   : > { %9247 = vmatprep.subr.bf16.mxu0 %v10331_v13  ;;  %9575 = vmatprep.subr.bf16.mxu1 %v10333_v14  ;;  %v10381_v13 = vcombine.high %v2466_v32, %v2470_v8  ;;  %v2473_v14 = vld [vmem:[%s13563_s30 + $0x550] sm:$0xff]  ;;  %v2514_v6 = vld [vmem:[%s13563_s30 + $0x698] sm:$0xff] }
 0x453   : > { %v10386_v43 = vcombine.low %v2473_v14, %v2477_v15  ;;  %v2517_v5 = vld [vmem:[%s13563_s30 + $0x6b0] sm:$0xff] }
 0x455   : > { %9248 = vmatpush1.bf16.msra.mxu0 %v10330_v17  ;;  %9576 = vmatpush1.bf16.msra.mxu1 %v10332_v21  ;;  %v10380_v17 = vcombine.low %v2466_v32, %v2470_v8  ;;  %v10387_v21 = vcombine.high %v2473_v14, %v2477_v15  ;;  %v2518_v32 = vld [vmem:[%s13563_s30 + $0x6b8] sm:$0xff]  ;;  %v2525_v14 = vld [vmem:[%s13563_s30 + $0x6f0] sm:$0xff] }
 0x456   : > { %9249 = vmatprep.subr.bf16.mxu0 %v10339_v22  ;;  %9577 = vmatprep.subr.bf16.mxu1 %v10341_v24  ;;  %v10389_v22 = vcombine.high %v2474_v16, %v2478_v2  ;;  %v2481_v24 = vld [vmem:[%s13563_s30 + $0x590] sm:$0xff]  ;;  %v2522_v15 = vld [vmem:[%s13563_s30 + $0x6d8] sm:$0xff] }
 0x457   : > { %v10394_v40 = vcombine.low %v2481_v24, %v2485_v27 }
 0x459   : > { %9250 = vmatpush1.bf16.msra.mxu0 %v10338_v31  ;;  %9578 = vmatpush1.bf16.msra.mxu1 %v10340_v34  ;;  %v10388_v31 = vcombine.low %v2474_v16, %v2478_v2  ;;  %v10395_v34 = vcombine.high %v2481_v24, %v2485_v27  ;;  %v2526_v16 = vld [vmem:[%s13563_s30 + $0x6f8] sm:$0xff]  ;;  %v2533_v24 = vld [vmem:[%s13563_s30 + $0x730] sm:$0xff] }
 0x45a   : > { %9260 = vmatprep.subr.bf16.mxu0 %v10347_v35  ;;  %9588 = vmatprep.subr.bf16.mxu1 %v10349_v33  ;;  %v10397_v35 = vcombine.high %v2482_v28, %v2486_v29  ;;  %v2489_v33 = vld [vmem:[%s13563_s30 + $0x5d0] sm:$0xff]  ;;  %v2530_v27 = vld [vmem:[%s13563_s30 + $0x718] sm:$0xff] }
 0x45b   : > { %v10402_v51 = vcombine.low %v2489_v33, %v2493_v37 }
 0x45c   : > { %9252 = vmatmul.mubr.bf16.vlgmr.msra.gmra.mrb[4].mxu0 %v13656_v26  ;;  %9580 = vmatmul.mubr.bf16.vlgmr.msra.gmra.mrb[4].mxu1 %v13656_v26  ;;  %v10362_v26 = vcombine.low %v2449_v48, %v2453_v49  ;;  %v2501_v48 = vld [vmem:[%s13563_s30 + $0x630] sm:$0xff]  ;;  %v2498_v49 = vld [vmem:[%s13563_s30 + $0x618] sm:$0xff] }
 0x45d   : > { %9261 = vmatpush1.bf16.msra.mxu0 %v10346_v44  ;;  %9589 = vmatpush1.bf16.msra.mxu1 %v10348_v45  ;;  %v10396_v44 = vcombine.low %v2482_v28, %v2486_v29  ;;  %v10403_v45 = vcombine.high %v2489_v33, %v2493_v37  ;;  %v2534_v28 = vld [vmem:[%s13563_s30 + $0x738] sm:$0xff]  ;;  %v2541_v33 = vld [vmem:[%s13563_s30 + $0x770] sm:$0xff] }
 0x45e   : > { %9262 = vmatprep.subr.bf16.mxu0 %v10355_v46  ;;  %9590 = vmatprep.subr.bf16.mxu1 %v10357_v47  ;;  %v10405_v46 = vcombine.high %v2490_v38, %v2494_v39  ;;  %v2497_v47 = vld [vmem:[%s13563_s30 + $0x610] sm:$0xff]  ;;  %v2538_v37 = vld [vmem:[%s13563_s30 + $0x758] sm:$0xff] }
 0x45f   : > { %9292 = vmatprep.mubr.bf16.mxu0 %v13664_v36  ;;  %9620 = vmatprep.mubr.bf16.mxu1 %v13664_v36  ;;  %v10372_v36 = vcombine.low %v2458_v62, %v2462_v63  ;;  %v2510_v62 = vld [vmem:[%s13563_s30 + $0x678] sm:$0xff]  ;;  %v10410_v63 = vcombine.low %v2497_v47, %v2501_v48 }
 0x461   : > { %9263 = vmatpush1.bf16.msra.mxu0 %v10354_v53  ;;  %9591 = vmatpush1.bf16.msra.mxu1 %v10356_v54  ;;  %v10404_v53 = vcombine.low %v2490_v38, %v2494_v39  ;;  %v10411_v54 = vcombine.high %v2497_v47, %v2501_v48  ;;  %v2542_v38 = vld [vmem:[%s13563_s30 + $0x778] sm:$0xff]  ;;  %v2549_v47 = vld [vmem:[%s13563_s30 + $0x7b0] sm:$0xff] }
 0x462   : > { %9264 = vmatprep.subr.bf16.mxu0 %v10363_v56  ;;  %9592 = vmatprep.subr.bf16.mxu1 %v10365_v58  ;;  %v10413_v56 = vcombine.high %v2498_v49, %v2502_v50  ;;  %v2505_v58 = vld [vmem:[%s13563_s30 + $0x650] sm:$0xff]  ;;  %v2546_v48 = vld [vmem:[%s13563_s30 + $0x798] sm:$0xff] }
 0x463   : > { %v10418_v8 = vcombine.low %v2505_v58, %v2509_v59 }
 0x465   : > { %9265 = vmatpush1.bf16.msra.mxu0 %v10362_v26  ;;  %9593 = vmatpush1.bf16.msra.mxu1 %v10364_v0  ;;  %v10412_v26 = vcombine.low %v2498_v49, %v2502_v50  ;;  %v10419_v0 = vcombine.high %v2505_v58, %v2509_v59  ;;  %v2550_v49 = vld [vmem:[%s13563_s30 + $0x7b8] sm:$0xff]  ;;  %v2557_v58 = vld [vmem:[%s13563_s30 + $0x7f0] sm:$0xff] }
 0x466   : > { %9266 = vmatprep.subr.bf16.mxu0 %v10371_v10  ;;  %9594 = vmatprep.subr.bf16.mxu1 %v10373_v4  ;;  %v10421_v10 = vcombine.high %v2506_v60, %v2510_v62  ;;  %v2513_v4 = vld [vmem:[%s13563_s30 + $0x690] sm:$0xff]  ;;  %v2554_v59 = vld [vmem:[%s13563_s30 + $0x7d8] sm:$0xff] }
 0x467   : > { %v10426_v2 = vcombine.low %v2513_v4, %v2517_v5 }
 0x469   : > { %9267 = vmatpush1.bf16.msra.mxu0 %v10370_v11  ;;  %9595 = vmatpush1.bf16.msra.mxu1 %v10372_v36  ;;  %v10420_v11 = vcombine.low %v2506_v60, %v2510_v62  ;;  %v10427_v36 = vcombine.high %v2513_v4, %v2517_v5  ;;  %v2558_v60 = vld [vmem:[%s13563_s30 + $0x7f8] sm:$0xff]  ;;  %v2565_v4 = vld [vmem:[%s13563_s30 + $0x830] sm:$0xff] }
 0x46a   : > { %9268 = vmatprep.subr.bf16.mxu0 %v10379_v12  ;;  %9596 = vmatprep.subr.bf16.mxu1 %v10381_v13  ;;  %v10429_v12 = vcombine.high %v2514_v6, %v2518_v32  ;;  %v2521_v13 = vld [vmem:[%s13563_s30 + $0x6d0] sm:$0xff]  ;;  %v2562_v5 = vld [vmem:[%s13563_s30 + $0x818] sm:$0xff] }
 0x46b   : > { %v10434_v29 = vcombine.low %v2521_v13, %v2525_v14 }
 0x46d   : > { %9269 = vmatpush1.bf16.msra.mxu0 %v10378_v18  ;;  %9597 = vmatpush1.bf16.msra.mxu1 %v10380_v17  ;;  %v10428_v18 = vcombine.low %v2514_v6, %v2518_v32  ;;  %v10435_v17 = vcombine.high %v2521_v13, %v2525_v14  ;;  %v2566_v6 = vld [vmem:[%s13563_s30 + $0x838] sm:$0xff]  ;;  %v2573_v13 = vld [vmem:[%s13563_s30 + $0x870] sm:$0xff] }
 0x46e   : > { %9270 = vmatprep.subr.bf16.mxu0 %v10387_v21  ;;  %9598 = vmatprep.subr.bf16.mxu1 %v10389_v22  ;;  %v10437_v21 = vcombine.high %v2522_v15, %v2526_v16  ;;  %v2529_v22 = vld [vmem:[%s13563_s30 + $0x710] sm:$0xff]  ;;  %v2570_v14 = vld [vmem:[%s13563_s30 + $0x858] sm:$0xff] }
 0x46f   : > { %v10442_v39 = vcombine.low %v2529_v22, %v2533_v24 }
 0x471   : > { %9271 = vmatpush1.bf16.msra.mxu0 %v10386_v43  ;;  %9599 = vmatpush1.bf16.msra.mxu1 %v10388_v31  ;;  %v10436_v43 = vcombine.low %v2522_v15, %v2526_v16  ;;  %v10443_v31 = vcombine.high %v2529_v22, %v2533_v24  ;;  %v2574_v15 = vld [vmem:[%s13563_s30 + $0x878] sm:$0xff]  ;;  %v2581_v22 = vld [vmem:[%s13563_s30 + $0x8b0] sm:$0xff] }
 0x472   : > { %9272 = vmatprep.subr.bf16.mxu0 %v10395_v34  ;;  %9600 = vmatprep.subr.bf16.mxu1 %v10397_v35  ;;  %v10445_v34 = vcombine.high %v2530_v27, %v2534_v28  ;;  %v2537_v35 = vld [vmem:[%s13563_s30 + $0x750] sm:$0xff]  ;;  %v2578_v24 = vld [vmem:[%s13563_s30 + $0x898] sm:$0xff] }
 0x473   : > { %v10450_v50 = vcombine.low %v2537_v35, %v2541_v33 }
 0x475   : > { %9273 = vmatpush1.bf16.msra.mxu0 %v10394_v40  ;;  %9601 = vmatpush1.bf16.msra.mxu1 %v10396_v44  ;;  %v10444_v40 = vcombine.low %v2530_v27, %v2534_v28  ;;  %v10451_v44 = vcombine.high %v2537_v35, %v2541_v33  ;;  %v2582_v27 = vld [vmem:[%s13563_s30 + $0x8b8] sm:$0xff]  ;;  %v2589_v35 = vld [vmem:[%s13563_s30 + $0x8f0] sm:$0xff] }
 0x476   : > { %9274 = vmatprep.subr.bf16.mxu0 %v10403_v45  ;;  %9602 = vmatprep.subr.bf16.mxu1 %v10405_v46  ;;  %v10453_v45 = vcombine.high %v2538_v37, %v2542_v38  ;;  %v2545_v46 = vld [vmem:[%s13563_s30 + $0x790] sm:$0xff]  ;;  %v2586_v33 = vld [vmem:[%s13563_s30 + $0x8d8] sm:$0xff] }
 0x477   : > { %v10458_v62 = vcombine.low %v2545_v46, %v2549_v47 }
 0x479   : > { %9275 = vmatpush1.bf16.msra.mxu0 %v10402_v51  ;;  %9603 = vmatpush1.bf16.msra.mxu1 %v10404_v53  ;;  %v10452_v51 = vcombine.low %v2538_v37, %v2542_v38  ;;  %v10459_v53 = vcombine.high %v2545_v46, %v2549_v47  ;;  %v2590_v37 = vld [vmem:[%s13563_s30 + $0x8f8] sm:$0xff]  ;;  %v10492_v38 = vcombine.low %v2578_v24, %v2582_v27 }
 0x47a   : > { %9276 = vmatprep.subr.bf16.mxu0 %v10411_v54  ;;  %9604 = vmatprep.subr.bf16.mxu1 %v10413_v56  ;;  %v10461_v54 = vcombine.high %v2546_v48, %v2550_v49  ;;  %v2553_v56 = vld [vmem:[%s13563_s30 + $0x7d0] sm:$0xff]  ;;  %v2594_v46 = vld [vmem:[%s13563_s30 + $0x918] sm:$0xff] }
 0x47b   : > { %v10466_v32 = vcombine.low %v2553_v56, %v2557_v58  ;;  %v2598_v47 = vld [vmem:[%s13563_s30 + $0x938] sm:$0xff] }
 0x47d   : > { %9277 = vmatpush1.bf16.msra.mxu0 %v10410_v63  ;;  %9605 = vmatpush1.bf16.msra.mxu1 %v10412_v26  ;;  %v10460_v63 = vcombine.low %v2546_v48, %v2550_v49  ;;  %v10467_v26 = vcombine.high %v2553_v56, %v2557_v58  ;;  %v2606_v56 = vld [vmem:[%s13563_s30 + $0x978] sm:$0xff] }
 0x47e   : > { %9278 = vmatprep.subr.bf16.mxu0 %v10419_v0  ;;  %9606 = vmatprep.subr.bf16.mxu1 %v10421_v10  ;;  %v10469_v0 = vcombine.high %v2554_v59, %v2558_v60  ;;  %v2561_v10 = vld [vmem:[%s13563_s30 + $0x810] sm:$0xff] }
 0x47f   : > { %v10474_v16 = vcombine.low %v2561_v10, %v2565_v4 }
 0x481   : > { %9279 = vmatpush1.bf16.msra.mxu0 %v10418_v8  ;;  %9607 = vmatpush1.bf16.msra.mxu1 %v10420_v11  ;;  %v10468_v8 = vcombine.low %v2554_v59, %v2558_v60  ;;  %v10475_v11 = vcombine.high %v2561_v10, %v2565_v4  ;;  %v10508_v59 = vcombine.low %v2594_v46, %v2598_v47  ;;  %v2614_v10 = vld [vmem:[%s13563_s30 + $0x9b8] sm:$0xff] }
 0x482   : > { %9280 = vmatprep.subr.bf16.mxu0 %v10427_v36  ;;  %9608 = vmatprep.subr.bf16.mxu1 %v10429_v12  ;;  %v10477_v36 = vcombine.high %v2562_v5, %v2566_v6  ;;  %v2569_v12 = vld [vmem:[%s13563_s30 + $0x850] sm:$0xff] }
 0x483   : > { %v10482_v28 = vcombine.low %v2569_v12, %v2573_v13 }
 0x485   : > { %9281 = vmatpush1.bf16.msra.mxu0 %v10426_v2  ;;  %9609 = vmatpush1.bf16.msra.mxu1 %v10428_v18  ;;  %v10476_v2 = vcombine.low %v2562_v5, %v2566_v6  ;;  %v10483_v18 = vcombine.high %v2569_v12, %v2573_v13  ;;  %v2622_v12 = vld [vmem:[%s13563_s30 + $0x9f8] sm:$0xff] }
 0x486   : > { %9282 = vmatprep.subr.bf16.mxu0 %v10435_v17  ;;  %9610 = vmatprep.subr.bf16.mxu1 %v10437_v21  ;;  %v10485_v17 = vcombine.high %v2570_v14, %v2574_v15  ;;  %v2577_v21 = vld [vmem:[%s13563_s30 + $0x890] sm:$0xff] }
 0x489   : > { %9283 = vmatpush1.bf16.msra.mxu0 %v10434_v29  ;;  %9611 = vmatpush1.bf16.msra.mxu1 %v10436_v43  ;;  %v10484_v29 = vcombine.low %v2570_v14, %v2574_v15  ;;  %v10491_v43 = vcombine.high %v2577_v21, %v2581_v22 }
 0x48a   : > { %9284 = vmatprep.subr.bf16.mxu0 %v10443_v31  ;;  %9612 = vmatprep.subr.bf16.mxu1 %v10445_v34  ;;  %v10493_v31 = vcombine.high %v2578_v24, %v2582_v27  ;;  %v2585_v34 = vld [vmem:[%s13563_s30 + $0x8d0] sm:$0xff] }
 0x48b   : > { %v10498_v48 = vcombine.low %v2585_v34, %v2589_v35 }
 0x48d   : > { %9285 = vmatpush1.bf16.msra.mxu0 %v10442_v39  ;;  %9613 = vmatpush1.bf16.msra.mxu1 %v10444_v40  ;;  %v10499_v39 = vcombine.high %v2585_v34, %v2589_v35  ;;  %v10501_v40 = vcombine.high %v2586_v33, %v2590_v37  ;;  %v2638_v34 = vld [vmem:[%s13563_s30 + $0xa78] sm:$0xff] }
 0x48e   : > { %9286 = vmatprep.subr.bf16.mxu0 %v10451_v44  ;;  %9614 = vmatprep.subr.bf16.mxu1 %v10453_v45  ;;  %v2593_v44 = vld [vmem:[%s13563_s30 + $0x910] sm:$0xff] }
 0x48f   : > { %v2597_v45 = vld [vmem:[%s13563_s30 + $0x930] sm:$0xff] }
 0x490   : > { %v10507_v49 = vcombine.high %v2593_v44, %v2597_v45  ;;  %v10506_v58 = vcombine.low %v2593_v44, %v2597_v45  ;;  %v2646_v44 = vld [vmem:[%s13563_s30 + $0xab8] sm:$0xff] }
 0x491   : > { %9287 = vmatpush1.bf16.msra.mxu0 %v10450_v50  ;;  %9615 = vmatpush1.bf16.msra.mxu1 %v10452_v51  ;;  %v10509_v50 = vcombine.high %v2594_v46, %v2598_v47  ;;  %v2601_v51 = vld [vmem:[%s13563_s30 + $0x950] sm:$0xff] }
 0x492   : > { %9288 = vmatprep.subr.bf16.mxu0 %v10459_v53  ;;  %9616 = vmatprep.subr.bf16.mxu1 %v10461_v54  ;;  %v2605_v53 = vld [vmem:[%s13563_s30 + $0x970] sm:$0xff]  ;;  %v2602_v54 = vld [vmem:[%s13563_s30 + $0x958] sm:$0xff] }
 0x493   : > { %v10515_v60 = vcombine.high %v2601_v51, %v2605_v53  ;;  %v10514_v4 = vcombine.low %v2601_v51, %v2605_v53  ;;  %v10516_v5 = vcombine.low %v2602_v54, %v2606_v56  ;;  %v2654_v51 = vld [vmem:[%s13563_s30 + $0xaf8] sm:$0xff] }
 0x495   : > { %9289 = vmatpush1.bf16.msra.mxu0 %v10458_v62  ;;  %9617 = vmatpush1.bf16.msra.mxu1 %v10460_v63  ;;  %v10517_v62 = vcombine.high %v2602_v54, %v2606_v56  ;;  %v2609_v63 = vld [vmem:[%s13563_s30 + $0x990] sm:$0xff] }
 0x496   : > { %9290 = vmatprep.subr.bf16.mxu0 %v10467_v26  ;;  %9618 = vmatprep.subr.bf16.mxu1 %v10469_v0  ;;  %v2613_v26 = vld [vmem:[%s13563_s30 + $0x9b0] sm:$0xff]  ;;  %v2610_v0 = vld [vmem:[%s13563_s30 + $0x998] sm:$0xff] }
 0x497   : > { %v10523_v6 = vcombine.high %v2609_v63, %v2613_v26  ;;  %v10522_v13 = vcombine.low %v2609_v63, %v2613_v26  ;;  %v10524_v14 = vcombine.low %v2610_v0, %v2614_v10  ;;  %v2662_v63 = vld [vmem:[%s13563_s30 + $0xb38] sm:$0xff] }
 0x499   : > { %9291 = vmatpush1.bf16.msra.mxu0 %v10466_v32  ;;  %9619 = vmatpush1.bf16.msra.mxu1 %v10468_v8  ;;  %v10525_v32 = vcombine.high %v2610_v0, %v2614_v10  ;;  %v2617_v8 = vld [vmem:[%s13563_s30 + $0x9d0] sm:$0xff] }
 0x49a   : > { %9301 = vmatprep.subr.bf16.mxu0 %v10475_v11  ;;  %9629 = vmatprep.subr.bf16.mxu1 %v10477_v36  ;;  %v2621_v11 = vld [vmem:[%s13563_s30 + $0x9f0] sm:$0xff]  ;;  %v2618_v36 = vld [vmem:[%s13563_s30 + $0x9d8] sm:$0xff] }
 0x49b   : > { %v10531_v15 = vcombine.high %v2617_v8, %v2621_v11  ;;  %v10532_v24 = vcombine.low %v2618_v36, %v2622_v12 }
 0x49c   : > { %9293 = vmatmul.mubr.bf16.vlgmr.msra.gmra.mrb[4].mxu0 %v13739_v42  ;;  %9621 = vmatmul.mubr.bf16.vlgmr.msra.gmra.mrb[4].mxu1 %v13739_v42  ;;  %v10490_v42 = vcombine.low %v2577_v21, %v2581_v22  ;;  %v2630_v21 = vld [vmem:[%s13563_s30 + $0xa38] sm:$0xff]  ;;  %v10530_v22 = vcombine.low %v2617_v8, %v2621_v11 }
 0x49d   : > { %9302 = vmatpush1.bf16.msra.mxu0 %v10474_v16  ;;  %9630 = vmatpush1.bf16.msra.mxu1 %v10476_v2  ;;  %v10533_v16 = vcombine.high %v2618_v36, %v2622_v12  ;;  %v2625_v2 = vld [vmem:[%s13563_s30 + $0xa10] sm:$0xff]  ;;  %v2670_v8 = vld [vmem:[%s13563_s30 + $0xb78] sm:$0xff] }
 0x49e   : > { %9303 = vmatprep.subr.bf16.mxu0 %v10483_v18  ;;  %9631 = vmatprep.subr.bf16.mxu1 %v10485_v17  ;;  %v2629_v18 = vld [vmem:[%s13563_s30 + $0xa30] sm:$0xff]  ;;  %v2626_v17 = vld [vmem:[%s13563_s30 + $0xa18] sm:$0xff] }
 0x49f   : > { %9333 = vmatprep.mubr.bf16.mxu0 %v13746_v52  ;;  %9661 = vmatprep.mubr.bf16.mxu1 %v13746_v52  ;;  %v10500_v52 = vcombine.low %v2586_v33, %v2590_v37  ;;  %v10539_v27 = vcombine.high %v2625_v2, %v2629_v18  ;;  %v10538_v35 = vcombine.low %v2625_v2, %v2629_v18  ;;  %v2678_v2 = vld [vmem:[%s13563_s30 + $0xbb8] sm:$0xff] }
 0x4a0   : > { %v10540_v33 = vcombine.low %v2626_v17, %v2630_v21 }
 0x4a1   : > { %9304 = vmatpush1.bf16.msra.mxu0 %v10482_v28  ;;  %9632 = vmatpush1.bf16.msra.mxu1 %v10484_v29  ;;  %v10541_v28 = vcombine.high %v2626_v17, %v2630_v21  ;;  %v2633_v29 = vld [vmem:[%s13563_s30 + $0xa50] sm:$0xff] }
 0x4a2   : > { %9305 = vmatprep.subr.bf16.mxu0 %v10491_v43  ;;  %9633 = vmatprep.subr.bf16.mxu1 %v10493_v31  ;;  %v2637_v43 = vld [vmem:[%s13563_s30 + $0xa70] sm:$0xff]  ;;  %v2634_v31 = vld [vmem:[%s13563_s30 + $0xa58] sm:$0xff] }
 0x4a3   : > { %v10547_v37 = vcombine.high %v2633_v29, %v2637_v43  ;;  %v10546_v45 = vcombine.low %v2633_v29, %v2637_v43  ;;  %v10548_v46 = vcombine.low %v2634_v31, %v2638_v34  ;;  %v2686_v29 = vld [vmem:[%s13563_s30 + $0xbf8] sm:$0xff] }
 0x4a5   : > { %9306 = vmatpush1.bf16.msra.mxu0 %v10490_v42  ;;  %9634 = vmatpush1.bf16.msra.mxu1 %v10492_v38  ;;  %v10549_v42 = vcombine.high %v2634_v31, %v2638_v34  ;;  %v2641_v38 = vld [vmem:[%s13563_s30 + $0xa90] sm:$0xff] }
 0x4a6   : > { %9307 = vmatprep.subr.bf16.mxu0 %v10499_v39  ;;  %9635 = vmatprep.subr.bf16.mxu1 %v10501_v40  ;;  %v2645_v39 = vld [vmem:[%s13563_s30 + $0xab0] sm:$0xff]  ;;  %v2642_v40 = vld [vmem:[%s13563_s30 + $0xa98] sm:$0xff] }
 0x4a7   : > { %v10555_v47 = vcombine.high %v2641_v38, %v2645_v39  ;;  %v10554_v53 = vcombine.low %v2641_v38, %v2645_v39  ;;  %v10556_v54 = vcombine.low %v2642_v40, %v2646_v44  ;;  %v2694_v38 = vld [vmem:[%s13563_s30 + $0xc38] sm:$0xff] }
 0x4a9   : > { %9308 = vmatpush1.bf16.msra.mxu0 %v10498_v48  ;;  %9636 = vmatpush1.bf16.msra.mxu1 %v10500_v52  ;;  %v10557_v48 = vcombine.high %v2642_v40, %v2646_v44  ;;  %v2649_v52 = vld [vmem:[%s13563_s30 + $0xad0] sm:$0xff] }
 0x4aa   : > { %9309 = vmatprep.subr.bf16.mxu0 %v10507_v49  ;;  %9637 = vmatprep.subr.bf16.mxu1 %v10509_v50  ;;  %v2653_v49 = vld [vmem:[%s13563_s30 + $0xaf0] sm:$0xff]  ;;  %v2650_v50 = vld [vmem:[%s13563_s30 + $0xad8] sm:$0xff] }
 0x4ab   : > { %v10563_v56 = vcombine.high %v2649_v52, %v2653_v49  ;;  %v10562_v26 = vcombine.low %v2649_v52, %v2653_v49  ;;  %v10564_v0 = vcombine.low %v2650_v50, %v2654_v51  ;;  %v2702_v52 = vld [vmem:[%s13563_s30 + $0xc78] sm:$0xff] }
 0x4ad   : > { %9310 = vmatpush1.bf16.msra.mxu0 %v10506_v58  ;;  %9638 = vmatpush1.bf16.msra.mxu1 %v10508_v59  ;;  %v10565_v58 = vcombine.high %v2650_v50, %v2654_v51  ;;  %v2657_v59 = vld [vmem:[%s13563_s30 + $0xb10] sm:$0xff] }
 0x4ae   : > { %9311 = vmatprep.subr.bf16.mxu0 %v10515_v60  ;;  %9639 = vmatprep.subr.bf16.mxu1 %v10517_v62  ;;  %v2661_v60 = vld [vmem:[%s13563_s30 + $0xb30] sm:$0xff]  ;;  %v2658_v62 = vld [vmem:[%s13563_s30 + $0xb18] sm:$0xff] }
 0x4af   : > { %v10571_v10 = vcombine.high %v2657_v59, %v2661_v60  ;;  %v10570_v11 = vcombine.low %v2657_v59, %v2661_v60  ;;  %v10572_v36 = vcombine.low %v2658_v62, %v2662_v63  ;;  %v2710_v59 = vld [vmem:[%s13563_s30 + $0xcb8] sm:$0xff] }
 0x4b1   : > { %9312 = vmatpush1.bf16.msra.mxu0 %v10514_v4  ;;  %9640 = vmatpush1.bf16.msra.mxu1 %v10516_v5  ;;  %v10573_v4 = vcombine.high %v2658_v62, %v2662_v63  ;;  %v2665_v5 = vld [vmem:[%s13563_s30 + $0xb50] sm:$0xff] }
 0x4b2   : > { %9313 = vmatprep.subr.bf16.mxu0 %v10523_v6  ;;  %9641 = vmatprep.subr.bf16.mxu1 %v10525_v32  ;;  %v2669_v6 = vld [vmem:[%s13563_s30 + $0xb70] sm:$0xff]  ;;  %v2666_v32 = vld [vmem:[%s13563_s30 + $0xb58] sm:$0xff] }
 0x4b3   : > { %v10579_v12 = vcombine.high %v2665_v5, %v2669_v6  ;;  %v10578_v18 = vcombine.low %v2665_v5, %v2669_v6  ;;  %v10580_v17 = vcombine.low %v2666_v32, %v2670_v8  ;;  %v2718_v5 = vld [vmem:[%s13563_s30 + $0xcf8] sm:$0xff] }
 0x4b5   : > { %9314 = vmatpush1.bf16.msra.mxu0 %v10522_v13  ;;  %9642 = vmatpush1.bf16.msra.mxu1 %v10524_v14  ;;  %v10581_v13 = vcombine.high %v2666_v32, %v2670_v8  ;;  %v2673_v14 = vld [vmem:[%s13563_s30 + $0xb90] sm:$0xff] }
 0x4b6   : > { %9315 = vmatprep.subr.bf16.mxu0 %v10531_v15  ;;  %9643 = vmatprep.subr.bf16.mxu1 %v10533_v16  ;;  %v2677_v15 = vld [vmem:[%s13563_s30 + $0xbb0] sm:$0xff]  ;;  %v2674_v16 = vld [vmem:[%s13563_s30 + $0xb98] sm:$0xff] }
 0x4b7   : > { %v10587_v21 = vcombine.high %v2673_v14, %v2677_v15  ;;  %v10586_v43 = vcombine.low %v2673_v14, %v2677_v15  ;;  %v10588_v31 = vcombine.low %v2674_v16, %v2678_v2 }
 0x4b9   : > { %9316 = vmatpush1.bf16.msra.mxu0 %v10530_v22  ;;  %9644 = vmatpush1.bf16.msra.mxu1 %v10532_v24  ;;  %v10589_v22 = vcombine.high %v2674_v16, %v2678_v2  ;;  %v2681_v24 = vld [vmem:[%s13563_s30 + $0xbd0] sm:$0xff]  ;;  %v11442_v2 = vmov 1983009808  }
 0x4ba   : > { %9317 = vmatprep.subr.bf16.mxu0 %v10539_v27  ;;  %9645 = vmatprep.subr.bf16.mxu1 %v10541_v28  ;;  %v2685_v27 = vld [vmem:[%s13563_s30 + $0xbf0] sm:$0xff]  ;;  %v2682_v28 = vld [vmem:[%s13563_s30 + $0xbd8] sm:$0xff] }
 0x4bb   : > { %v10595_v34 = vcombine.high %v2681_v24, %v2685_v27  ;;  %v10594_v39 = vcombine.low %v2681_v24, %v2685_v27  ;;  %v10596_v40 = vcombine.low %v2682_v28, %v2686_v29  ;;  %v2734_v24 = vld [vmem:[%s13563_s30 + $0xd78] sm:$0xff] }
 0x4bd   : > { %9318 = vmatpush1.bf16.msra.mxu0 %v10538_v35  ;;  %9646 = vmatpush1.bf16.msra.mxu1 %v10540_v33  ;;  %v10597_v35 = vcombine.high %v2682_v28, %v2686_v29  ;;  %v2689_v33 = vld [vmem:[%s13563_s30 + $0xc10] sm:$0xff] }
 0x4be   : > { %9319 = vmatprep.subr.bf16.mxu0 %v10547_v37  ;;  %9647 = vmatprep.subr.bf16.mxu1 %v10549_v42  ;;  %v2693_v37 = vld [vmem:[%s13563_s30 + $0xc30] sm:$0xff]  ;;  %v2690_v42 = vld [vmem:[%s13563_s30 + $0xc18] sm:$0xff] }
 0x4bf   : > { %v10603_v44 = vcombine.high %v2689_v33, %v2693_v37  ;;  %v10602_v49 = vcombine.low %v2689_v33, %v2693_v37  ;;  %v10604_v50 = vcombine.low %v2690_v42, %v2694_v38  ;;  %v2738_v33 = vld [vmem:[%s13563_s30 + $0xd98] sm:$0xff] }
 0x4c0   : > { %v2742_v37 = vld [vmem:[%s13563_s30 + $0xdb8] sm:$0xff] }
 0x4c1   : > { %9320 = vmatpush1.bf16.msra.mxu0 %v10546_v45  ;;  %9648 = vmatpush1.bf16.msra.mxu1 %v10548_v46  ;;  %v10605_v45 = vcombine.high %v2690_v42, %v2694_v38  ;;  %v2697_v46 = vld [vmem:[%s13563_s30 + $0xc50] sm:$0xff] }
 0x4c2   : > { %9321 = vmatprep.subr.bf16.mxu0 %v10555_v47  ;;  %9649 = vmatprep.subr.bf16.mxu1 %v10557_v48  ;;  %v2701_v47 = vld [vmem:[%s13563_s30 + $0xc70] sm:$0xff]  ;;  %v2698_v48 = vld [vmem:[%s13563_s30 + $0xc58] sm:$0xff] }
 0x4c3   : > { %v10611_v51 = vcombine.high %v2697_v46, %v2701_v47  ;;  %v10610_v60 = vcombine.low %v2697_v46, %v2701_v47  ;;  %v10612_v62 = vcombine.low %v2698_v48, %v2702_v52  ;;  %v2745_v46 = vld [vmem:[%s13563_s30 + $0xdd0] sm:$0xff] }
 0x4c4   : > { %v2749_v47 = vld [vmem:[%s13563_s30 + $0xdf0] sm:$0xff] }
 0x4c5   : > { %9322 = vmatpush1.bf16.msra.mxu0 %v10554_v53  ;;  %9650 = vmatpush1.bf16.msra.mxu1 %v10556_v54  ;;  %v10613_v53 = vcombine.high %v2698_v48, %v2702_v52  ;;  %v2705_v54 = vld [vmem:[%s13563_s30 + $0xc90] sm:$0xff] }
 0x4c6   : > { %9323 = vmatprep.subr.bf16.mxu0 %v10563_v56  ;;  %9651 = vmatprep.subr.bf16.mxu1 %v10565_v58  ;;  %v2709_v56 = vld [vmem:[%s13563_s30 + $0xcb0] sm:$0xff]  ;;  %v2706_v58 = vld [vmem:[%s13563_s30 + $0xc98] sm:$0xff] }
 0x4c7   : > { %v10619_v63 = vcombine.high %v2705_v54, %v2709_v56  ;;  %v10620_v6 = vcombine.low %v2706_v58, %v2710_v59 }
 0x4c9   : > { %9324 = vmatpush1.bf16.msra.mxu0 %v10562_v26  ;;  %9652 = vmatpush1.bf16.msra.mxu1 %v10564_v0  ;;  %v10621_v26 = vcombine.high %v2706_v58, %v2710_v59  ;;  %v2713_v0 = vld [vmem:[%s13563_s30 + $0xcd0] sm:$0xff] }
 0x4ca   : > { %9325 = vmatprep.subr.bf16.mxu0 %v10571_v10  ;;  %9653 = vmatprep.subr.bf16.mxu1 %v10573_v4  ;;  %v2717_v10 = vld [vmem:[%s13563_s30 + $0xcf0] sm:$0xff]  ;;  %v2714_v4 = vld [vmem:[%s13563_s30 + $0xcd8] sm:$0xff] }
 0x4cb   : > { %v10627_v32 = vcombine.high %v2713_v0, %v2717_v10  ;;  %v10629_v8 = vcombine.high %v2714_v4, %v2718_v5  ;;  %v10626_v14 = vcombine.low %v2713_v0, %v2717_v10 }
 0x4cd   : > { %9326 = vmatpush1.bf16.msra.mxu0 %v10570_v11  ;;  %9654 = vmatpush1.bf16.msra.mxu1 %v10572_v36  ;;  %v2721_v11 = vld [vmem:[%s13563_s30 + $0xd10] sm:$0xff] }
 0x4ce   : > { %9327 = vmatprep.subr.bf16.mxu0 %v10579_v12  ;;  %9655 = vmatprep.subr.bf16.mxu1 %v10581_v13  ;;  %v2725_v36 = vld [vmem:[%s13563_s30 + $0xd30] sm:$0xff]  ;;  %v2722_v12 = vld [vmem:[%s13563_s30 + $0xd18] sm:$0xff] }
 0x4cf   : > { %v2726_v13 = vld [vmem:[%s13563_s30 + $0xd38] sm:$0xff]  ;;  %v10635_v15 = vcombine.high %v2721_v11, %v2725_v36  ;;  %v10634_v27 = vcombine.low %v2721_v11, %v2725_v36 }
 0x4d0   : > { %v10637_v16 = vcombine.high %v2722_v12, %v2726_v13  ;;  %v10636_v28 = vcombine.low %v2722_v12, %v2726_v13 }
 0x4d1   : > { %9328 = vmatpush1.bf16.msra.mxu0 %v10578_v18  ;;  %9656 = vmatpush1.bf16.msra.mxu1 %v10580_v17  ;;  %v9886_v18 = vunpack.c.l.s4 %v11442_v2  ;;  %v2729_v17 = vld [vmem:[%s13563_s30 + $0xd50] sm:$0xff] }
 0x4d2   : > { %9329 = vmatprep.subr.bf16.mxu0 %v10587_v21  ;;  %9657 = vmatprep.subr.bf16.mxu1 %v10589_v22  ;;  %v2733_v21 = vld [vmem:[%s13563_s30 + $0xd70] sm:$0xff]  ;;  %v2730_v22 = vld [vmem:[%s13563_s30 + $0xd58] sm:$0xff] }
 0x4d3   : > { %v10643_v29 = vcombine.high %v2729_v17, %v2733_v21  ;;  %v10642_v42 = vcombine.low %v2729_v17, %v2733_v21  ;;  %v10644_v38 = vcombine.low %v2730_v22, %v2734_v24 }
 0x4d5   : > { %9330 = vmatpush1.bf16.msra.mxu0 %v10586_v43  ;;  %9658 = vmatpush1.bf16.msra.mxu1 %v10588_v31  ;;  %v9887_v43 = vunpack.c.0.s8 %v9886_v18  ;;  %v10645_v31 = vcombine.high %v2730_v22, %v2734_v24  ;;  %v2769_v22 = vld [vmem:[%s13563_s30 + $0xe90] sm:$0xff] }
 0x4d6   : > { %9331 = vmatprep.subr.bf16.mxu0 %v10595_v34  ;;  %9659 = vmatprep.subr.bf16.mxu1 %v10597_v35  ;;  %v2737_v34 = vld [vmem:[%s13563_s30 + $0xd90] sm:$0xff] }
 0x4d7   : > { %v2741_v35 = vld [vmem:[%s13563_s30 + $0xdb0] sm:$0xff] }
 0x4d8   : > { %v2773_v24 = vld [vmem:[%s13563_s30 + $0xeb0] sm:$0xff] }
 0x4d9   : > { %9332 = vmatpush1.bf16.msra.mxu0 %v10594_v39  ;;  %9660 = vmatpush1.bf16.msra.mxu1 %v10596_v40  ;;  %v10651_v39 = vcombine.high %v2737_v34, %v2741_v35 }
 0x4da   : > { %9342 = vmatprep.subr.bf16.mxu0 %v10603_v44  ;;  %9670 = vmatprep.subr.bf16.mxu1 %v10605_v45  ;;  %v14443_v44 = vsub.s32 %v9887_v43, %v13561_v3  ;;  %v10653_v45 = vcombine.high %v2738_v33, %v2742_v37 }
 0x4dc   : > { %9334 = vmatmul.mubr.bf16.vlgmr.msra.gmra.mrb[4].mxu0 %v13814_v61  ;;  %9662 = vmatmul.mubr.bf16.vlgmr.msra.gmra.mrb[4].mxu1 %v13814_v61  ;;  %v10618_v61 = vcombine.low %v2705_v54, %v2709_v56  ;;  %v10650_v56 = vcombine.low %v2737_v34, %v2741_v35  ;;  %v2777_v35 = vld [vmem:[%s13563_s30 + $0xed0] sm:$0xff] }
 0x4dd   : > { %9343 = vmatpush1.bf16.msra.mxu0 %v10602_v49  ;;  %9671 = vmatpush1.bf16.msra.mxu1 %v10604_v50  ;;  %v2746_v49 = vld [vmem:[%s13563_s30 + $0xdd8] sm:$0xff] }
 0x4de   : > { %9344 = vmatprep.subr.bf16.mxu0 %v10611_v51  ;;  %9672 = vmatprep.subr.bf16.mxu1 %v10613_v53  ;;  %v2750_v50 = vld [vmem:[%s13563_s30 + $0xdf8] sm:$0xff] }
 0x4df   : > { %9374 = vmatprep.mubr.bf16.mxu0 %v13822_v7  ;;  %9702 = vmatprep.mubr.bf16.mxu1 %v13822_v7  ;;  %v10628_v7 = vcombine.low %v2714_v4, %v2718_v5  ;;  %v10661_v10 = vcombine.high %v2746_v49, %v2750_v50  ;;  %v2753_v4 = vld [vmem:[%s13563_s30 + $0xe10] sm:$0xff]  ;;  %v10660_v36 = vcombine.low %v2746_v49, %v2750_v50 }
 0x4e0   : > { %v2757_v5 = vld [vmem:[%s13563_s30 + $0xe30] sm:$0xff] }
 0x4e1   : > { %9345 = vmatpush1.bf16.msra.mxu0 %v10610_v60  ;;  %9673 = vmatpush1.bf16.msra.mxu1 %v10612_v62  ;;  %v10652_v62 = vcombine.low %v2738_v33, %v2742_v37  ;;  %v10667_v12 = vcombine.high %v2753_v4, %v2757_v5  ;;  %v10666_v2 = vcombine.low %v2753_v4, %v2757_v5  ;;  %v2781_v33 = vld [vmem:[%s13563_s30 + $0xef0] sm:$0xff]  ;;  %v2778_v37 = vld [vmem:[%s13563_s30 + $0xed8] sm:$0xff] }
 0x4e2   : > { %9346 = vmatprep.subr.bf16.mxu0 %v10619_v63  ;;  %9674 = vmatprep.subr.bf16.mxu1 %v10621_v26  ;;  %v10659_v63 = vcombine.high %v2745_v46, %v2749_v47  ;;  %v10690_v49 = vcombine.low %v2777_v35, %v2781_v33  ;;  %v2805_v4 = vld [vmem:[%s13563_s30 + $0xfb0] sm:$0xff]  ;;  %v2802_v5 = vld [vmem:[%s13563_s30 + $0xf98] sm:$0xff] }
 0x4e5   : > { %9347 = vmatpush1.bf16.msra.mxu0 %v10618_v61  ;;  %9675 = vmatpush1.bf16.msra.mxu1 %v10620_v6  ;;  %v2754_v6 = vld [vmem:[%s13563_s30 + $0xe18] sm:$0xff] }
 0x4e6   : > { %9348 = vmatprep.subr.bf16.mxu0 %v10627_v32  ;;  %9676 = vmatprep.subr.bf16.mxu1 %v10629_v8  ;;  %v2758_v32 = vld [vmem:[%s13563_s30 + $0xe38] sm:$0xff]  ;;  %v10658_v8 = vcombine.low %v2745_v46, %v2749_v47  ;;  %v2785_v46 = vld [vmem:[%s13563_s30 + $0xf10] sm:$0xff] }
 0x4e7   : > { %v10669_v13 = vcombine.high %v2754_v6, %v2758_v32  ;;  %v10668_v18 = vcombine.low %v2754_v6, %v2758_v32  ;;  %v2789_v47 = vld [vmem:[%s13563_s30 + $0xf30] sm:$0xff]  ;;  %v2806_v6 = vld [vmem:[%s13563_s30 + $0xfb8] sm:$0xff] }
 0x4e9   : > { %9349 = vmatpush1.bf16.msra.mxu0 %v10626_v14  ;;  %9677 = vmatpush1.bf16.msra.mxu1 %v10628_v7  ;;  %v2761_v14 = vld [vmem:[%s13563_s30 + $0xe50] sm:$0xff] }
 0x4ea   : > { %9350 = vmatprep.subr.bf16.mxu0 %v10635_v15  ;;  %9678 = vmatprep.subr.bf16.mxu1 %v10637_v16  ;;  %v2765_v7 = vld [vmem:[%s13563_s30 + $0xe70] sm:$0xff]  ;;  %v2762_v15 = vld [vmem:[%s13563_s30 + $0xe58] sm:$0xff] }
 0x4eb   : > { %v2766_v16 = vld [vmem:[%s13563_s30 + $0xe78] sm:$0xff]  ;;  %v10675_v17 = vcombine.high %v2761_v14, %v2765_v7 }
 0x4ec   : > { %v10677_v21 = vcombine.high %v2762_v15, %v2766_v16  ;;  %v10676_v43 = vcombine.low %v2762_v15, %v2766_v16  ;;  %v2814_v15 = vld [vmem:[%s13563_s30 + $0xff8] sm:$0xff] }
 0x4ed   : > { %9351 = vmatpush1.bf16.msra.mxu0 %v10634_v27  ;;  %9679 = vmatpush1.bf16.msra.mxu1 %v10636_v28  ;;  %v2770_v27 = vld [vmem:[%s13563_s30 + $0xe98] sm:$0xff] }
 0x4ee   : > { %9352 = vmatprep.subr.bf16.mxu0 %v10643_v29  ;;  %9680 = vmatprep.subr.bf16.mxu1 %v10645_v31  ;;  %v2774_v28 = vld [vmem:[%s13563_s30 + $0xeb8] sm:$0xff]  ;;  %v10674_v29 = vcombine.low %v2761_v14, %v2765_v7  ;;  %v10683_v31 = vcombine.high %v2769_v22, %v2773_v24  ;;  %v2813_v14 = vld [vmem:[%s13563_s30 + $0xff0] sm:$0xff] }
 0x4ef   : > { %v8884_v40 = vpop.f32.mrb[0].mxu0  ;;  %v9212_v48 = vpop.f32.mrb[0].mxu1  ;;  %v10685_v34 = vcombine.high %v2770_v27, %v2774_v28  ;;  %v2810_v7 = vld [vmem:[%s13563_s30 + $0xfd8] sm:$0xff] }
 0x4f0   : > { %v8886_v52 = vpop.f32.mrb[1].mxu0  ;;  %v9214_v53 = vpop.f32.mrb[1].mxu1 }
 0x4f1   : > { %v9883_v51 = vcombine.low %v8884_v40, %v8886_v52  ;;  %v8888_v54 = vpop.f32.mrb[2].mxu0  ;;  %9353 = vmatpush1.bf16.msra.mxu0 %v10642_v42  ;;  %v9884_v58 = vcombine.low %v9212_v48, %v9214_v53  ;;  %v9216_v59 = vpop.f32.mrb[2].mxu1  ;;  %9681 = vmatpush1.bf16.msra.mxu1 %v10644_v38  ;;  %v2782_v42 = vld [vmem:[%s13563_s30 + $0xef8] sm:$0xff]  ;;  %v10682_v38 = vcombine.low %v2769_v22, %v2773_v24  ;;  %v2821_v22 = vld [vmem:[%s13563_s30 + $0x1030] sm:$0xff] }
 0x4f2   : > { %v8889_v60 = vpop.f32.mrb[3].mxu0  ;;  %9354 = vmatprep.subr.bf16.mxu0 %v10651_v39  ;;  %v9217_v0 = vpop.f32.mrb[3].mxu1  ;;  %9682 = vmatprep.subr.bf16.mxu1 %v10653_v45  ;;  %v10684_v39 = vcombine.low %v2770_v27, %v2774_v28  ;;  %v10691_v40 = vcombine.high %v2777_v35, %v2781_v33  ;;  %v10693_v45 = vcombine.high %v2778_v37, %v2782_v42  ;;  %v2786_v48 = vld [vmem:[%s13563_s30 + $0xf18] sm:$0xff]  ;;  %v2793_v54 = vld [vmem:[%s13563_s30 + $0xf50] sm:$0xff] }
 0x4f3   : > { %v14450_v26 = vrot.slane %v9883_v51, %v14443_v44  ;;  %v14455_v61 = vrot.slane %v9884_v58, %v14443_v44  ;;  %v2790_v52 = vld [vmem:[%s13563_s30 + $0xf38] sm:$0xff]  ;;  %v10692_v50 = vcombine.low %v2778_v37, %v2782_v42  ;;  %v10699_v51 = vcombine.high %v2785_v46, %v2789_v47  ;;  %v2829_v35 = vld [vmem:[%s13563_s30 + $0x1070] sm:$0xff] }
 0x4f4   : > { %v10701_v53 = vcombine.high %v2786_v48, %v2790_v52  ;;  %v2794_v58 = vld [vmem:[%s13563_s30 + $0xf58] sm:$0xff]  ;;  %v10698_v60 = vcombine.low %v2785_v46, %v2789_v47  ;;  %v2837_v46 = vld [vmem:[%s13563_s30 + $0x10b0] sm:$0xff] }
 0x4f5   : > { %9355 = vmatpush1.bf16.msra.mxu0 %v10650_v56  ;;  %v9899_v11 = vcombine.low %v14450_v26, %v14455_v61  ;;  %9683 = vmatpush1.bf16.msra.mxu1 %v10652_v62  ;;  %v2797_v56 = vld [vmem:[%s13563_s30 + $0xf70] sm:$0xff]  ;;  %v2798_v59 = vld [vmem:[%s13563_s30 + $0xf78] sm:$0xff]  ;;  %v10700_v62 = vcombine.low %v2786_v48, %v2790_v52 }
 0x4f6   : > { %9356 = vmatprep.subr.bf16.mxu0 %v10659_v63  ;;  %9684 = vmatprep.subr.bf16.mxu1 %v10661_v10  ;;  %v10707_v63 = vcombine.high %v2793_v54, %v2797_v56  ;;  %v10709_v0 = vcombine.high %v2794_v58, %v2798_v59  ;;  %v2801_v10 = vld [vmem:[%s13563_s30 + $0xf90] sm:$0xff]  ;;  %v10706_v32 = vcombine.low %v2793_v54, %v2797_v56  ;;  %v2818_v24 = vld [vmem:[%s13563_s30 + $0x1018] sm:$0xff] }
 0x4f7   : > { %v10714_v16 = vcombine.low %v2801_v10, %v2805_v4  ;;  %v2822_v27 = vld [vmem:[%s13563_s30 + $0x1038] sm:$0xff]  ;;  %v2845_v54 = vld [vmem:[%s13563_s30 + $0x10f0] sm:$0xff] }
 0x4f8   : > { %v2826_v33 = vld [vmem:[%s13563_s30 + $0x1058] sm:$0xff] }
 0x4f9   : > { %9357 = vmatpush1.bf16.msra.mxu0 %v10658_v8  ;;  %9685 = vmatpush1.bf16.msra.mxu1 %v10660_v36  ;;  %v10708_v8 = vcombine.low %v2794_v58, %v2798_v59  ;;  %v10715_v36 = vcombine.high %v2801_v10, %v2805_v4  ;;  %v2830_v37 = vld [vmem:[%s13563_s30 + $0x1078] sm:$0xff] }
 0x4fa   : > { %9358 = vmatprep.subr.bf16.mxu0 %v10667_v12  ;;  %9686 = vmatprep.subr.bf16.mxu1 %v10669_v13  ;;  %v10717_v12 = vcombine.high %v2802_v5, %v2806_v6  ;;  %v2809_v13 = vld [vmem:[%s13563_s30 + $0xfd0] sm:$0xff]  ;;  %v2834_v47 = vld [vmem:[%s13563_s30 + $0x1098] sm:$0xff] }
 0x4fb   : > { %v10722_v28 = vcombine.low %v2809_v13, %v2813_v14  ;;  %v2838_v48 = vld [vmem:[%s13563_s30 + $0x10b8] sm:$0xff] }
 0x4fc   : > { %v2842_v56 = vld [vmem:[%s13563_s30 + $0x10d8] sm:$0xff]  ;;  %v10748_v59 = vcombine.low %v2834_v47, %v2838_v48 }
 0x4fd   : > { %9359 = vmatpush1.bf16.msra.mxu0 %v10666_v2  ;;  %9687 = vmatpush1.bf16.msra.mxu1 %v10668_v18  ;;  %v10716_v2 = vcombine.low %v2802_v5, %v2806_v6  ;;  %v10723_v18 = vcombine.high %v2809_v13, %v2813_v14  ;;  %v2846_v58 = vld [vmem:[%s13563_s30 + $0x10f8] sm:$0xff] }
 0x4fe   : > { %9360 = vmatprep.subr.bf16.mxu0 %v10675_v17  ;;  %9688 = vmatprep.subr.bf16.mxu1 %v10677_v21  ;;  %v10725_v17 = vcombine.high %v2810_v7, %v2814_v15  ;;  %v2817_v21 = vld [vmem:[%s13563_s30 + $0x1010] sm:$0xff]  ;;  %v2850_v10 = vld [vmem:[%s13563_s30 + $0x1118] sm:$0xff] }
 0x4ff   : > { %v10730_v42 = vcombine.low %v2817_v21, %v2821_v22  ;;  %v2854_v4 = vld [vmem:[%s13563_s30 + $0x1138] sm:$0xff] }
 0x500   : > { %v2862_v13 = vld [vmem:[%s13563_s30 + $0x1178] sm:$0xff] }
 0x501   : > { %9361 = vmatpush1.bf16.msra.mxu0 %v10674_v29  ;;  %9689 = vmatpush1.bf16.msra.mxu1 %v10676_v43  ;;  %v10724_v29 = vcombine.low %v2810_v7, %v2814_v15  ;;  %v10731_v43 = vcombine.high %v2817_v21, %v2821_v22  ;;  %v10764_v7 = vcombine.low %v2850_v10, %v2854_v4  ;;  %v2870_v21 = vld [vmem:[%s13563_s30 + $0x11b8] sm:$0xff] }
 0x502   : > { %9362 = vmatprep.subr.bf16.mxu0 %v10683_v31  ;;  %9690 = vmatprep.subr.bf16.mxu1 %v10685_v34  ;;  %v10733_v31 = vcombine.high %v2818_v24, %v2822_v27  ;;  %v2825_v34 = vld [vmem:[%s13563_s30 + $0x1050] sm:$0xff] }
 0x503   : > { %v10738_v52 = vcombine.low %v2825_v34, %v2829_v35 }
 0x505   : > { %9363 = vmatpush1.bf16.msra.mxu0 %v10682_v38  ;;  %9691 = vmatpush1.bf16.msra.mxu1 %v10684_v39  ;;  %v10732_v38 = vcombine.low %v2818_v24, %v2822_v27  ;;  %v10739_v39 = vcombine.high %v2825_v34, %v2829_v35  ;;  %v2878_v34 = vld [vmem:[%s13563_s30 + $0x11f8] sm:$0xff] }
 0x506   : > { %9364 = vmatprep.subr.bf16.mxu0 %v10691_v40  ;;  %9692 = vmatprep.subr.bf16.mxu1 %v10693_v45  ;;  %v10741_v40 = vcombine.high %v2826_v33, %v2830_v37  ;;  %v2833_v45 = vld [vmem:[%s13563_s30 + $0x1090] sm:$0xff] }
 0x509   : > { %9365 = vmatpush1.bf16.msra.mxu0 %v10690_v49  ;;  %9693 = vmatpush1.bf16.msra.mxu1 %v10692_v50  ;;  %v10740_v49 = vcombine.low %v2826_v33, %v2830_v37  ;;  %v10747_v50 = vcombine.high %v2833_v45, %v2837_v46 }
 0x50a   : > { %9366 = vmatprep.subr.bf16.mxu0 %v10699_v51  ;;  %9694 = vmatprep.subr.bf16.mxu1 %v10701_v53  ;;  %v10749_v51 = vcombine.high %v2834_v47, %v2838_v48  ;;  %v2841_v53 = vld [vmem:[%s13563_s30 + $0x10d0] sm:$0xff] }
 0x50b   : > { %v10754_v5 = vcombine.low %v2841_v53, %v2845_v54 }
 0x50d   : > { %9367 = vmatpush1.bf16.msra.mxu0 %v10698_v60  ;;  %9695 = vmatpush1.bf16.msra.mxu1 %v10700_v62  ;;  %v10755_v60 = vcombine.high %v2841_v53, %v2845_v54  ;;  %v10757_v62 = vcombine.high %v2842_v56, %v2846_v58  ;;  %v2894_v53 = vld [vmem:[%s13563_s30 + $0x1278] sm:$0xff] }
 0x50e   : > { %9368 = vmatprep.subr.bf16.mxu0 %v10707_v63  ;;  %9696 = vmatprep.subr.bf16.mxu1 %v10709_v0  ;;  %v2849_v63 = vld [vmem:[%s13563_s30 + $0x1110] sm:$0xff] }
 0x50f   : > { %v2853_v0 = vld [vmem:[%s13563_s30 + $0x1130] sm:$0xff] }
 0x510   : > { %v10763_v6 = vcombine.high %v2849_v63, %v2853_v0  ;;  %v10762_v14 = vcombine.low %v2849_v63, %v2853_v0  ;;  %v2902_v63 = vld [vmem:[%s13563_s30 + $0x12b8] sm:$0xff] }
 0x511   : > { %9369 = vmatpush1.bf16.msra.mxu0 %v10706_v32  ;;  %9697 = vmatpush1.bf16.msra.mxu1 %v10708_v8  ;;  %v10765_v32 = vcombine.high %v2850_v10, %v2854_v4  ;;  %v2857_v8 = vld [vmem:[%s13563_s30 + $0x1150] sm:$0xff] }
 0x512   : > { %9370 = vmatprep.subr.bf16.mxu0 %v10715_v36  ;;  %9698 = vmatprep.subr.bf16.mxu1 %v10717_v12  ;;  %v2861_v36 = vld [vmem:[%s13563_s30 + $0x1170] sm:$0xff]  ;;  %v2858_v12 = vld [vmem:[%s13563_s30 + $0x1158] sm:$0xff] }
 0x513   : > { %v10771_v15 = vcombine.high %v2857_v8, %v2861_v36  ;;  %v10770_v22 = vcombine.low %v2857_v8, %v2861_v36  ;;  %v10772_v24 = vcombine.low %v2858_v12, %v2862_v13  ;;  %v2910_v8 = vld [vmem:[%s13563_s30 + $0x12f8] sm:$0xff] }
 0x515   : > { %9371 = vmatpush1.bf16.msra.mxu0 %v10714_v16  ;;  %9699 = vmatpush1.bf16.msra.mxu1 %v10716_v2  ;;  %v10773_v16 = vcombine.high %v2858_v12, %v2862_v13  ;;  %v2865_v2 = vld [vmem:[%s13563_s30 + $0x1190] sm:$0xff] }
 0x516   : > { %9372 = vmatprep.subr.bf16.mxu0 %v10723_v18  ;;  %9700 = vmatprep.subr.bf16.mxu1 %v10725_v17  ;;  %v2869_v18 = vld [vmem:[%s13563_s30 + $0x11b0] sm:$0xff]  ;;  %v2866_v17 = vld [vmem:[%s13563_s30 + $0x1198] sm:$0xff] }
 0x517   : > { %v10779_v27 = vcombine.high %v2865_v2, %v2869_v18  ;;  %v10778_v35 = vcombine.low %v2865_v2, %v2869_v18  ;;  %v10780_v33 = vcombine.low %v2866_v17, %v2870_v21  ;;  %v2918_v2 = vld [vmem:[%s13563_s30 + $0x1338] sm:$0xff] }
 0x519   : > { %9373 = vmatpush1.bf16.msra.mxu0 %v10722_v28  ;;  %9701 = vmatpush1.bf16.msra.mxu1 %v10724_v29  ;;  %v10781_v28 = vcombine.high %v2866_v17, %v2870_v21  ;;  %v2873_v29 = vld [vmem:[%s13563_s30 + $0x11d0] sm:$0xff] }
 0x51a   : > { %9383 = vmatprep.subr.bf16.mxu0 %v10731_v43  ;;  %9711 = vmatprep.subr.bf16.mxu1 %v10733_v31  ;;  %v2877_v43 = vld [vmem:[%s13563_s30 + $0x11f0] sm:$0xff]  ;;  %v2874_v31 = vld [vmem:[%s13563_s30 + $0x11d8] sm:$0xff] }
 0x51b   : > { %v10787_v37 = vcombine.high %v2873_v29, %v2877_v43  ;;  %v10788_v47 = vcombine.low %v2874_v31, %v2878_v34 }
 0x51c   : > { %9375 = vmatmul.mubr.bf16.vlgmr.msra.gmra.mrb[4].mxu0 %v13901_v20  ;;  %9703 = vmatmul.mubr.bf16.vlgmr.msra.gmra.mrb[4].mxu1 %v13901_v20  ;;  %v10746_v20 = vcombine.low %v2833_v45, %v2837_v46  ;;  %v2886_v45 = vld [vmem:[%s13563_s30 + $0x1238] sm:$0xff]  ;;  %v10786_v46 = vcombine.low %v2873_v29, %v2877_v43 }
 0x51d   : > { %9384 = vmatpush1.bf16.msra.mxu0 %v10730_v42  ;;  %9712 = vmatpush1.bf16.msra.mxu1 %v10732_v38  ;;  %v10789_v42 = vcombine.high %v2874_v31, %v2878_v34  ;;  %v2881_v38 = vld [vmem:[%s13563_s30 + $0x1210] sm:$0xff]  ;;  %v2926_v29 = vld [vmem:[%s13563_s30 + $0x1378] sm:$0xff] }
 0x51e   : > { %9385 = vmatprep.subr.bf16.mxu0 %v10739_v39  ;;  %9713 = vmatprep.subr.bf16.mxu1 %v10741_v40  ;;  %v2885_v39 = vld [vmem:[%s13563_s30 + $0x1230] sm:$0xff]  ;;  %v2882_v40 = vld [vmem:[%s13563_s30 + $0x1218] sm:$0xff] }
 0x51f   : > { %9415 = vmatprep.mubr.bf16.mxu0 %v13908_v25  ;;  %9743 = vmatprep.mubr.bf16.mxu1 %v13908_v25  ;;  %v10756_v25 = vcombine.low %v2842_v56, %v2846_v58  ;;  %v10795_v48 = vcombine.high %v2881_v38, %v2885_v39  ;;  %v10794_v54 = vcombine.low %v2881_v38, %v2885_v39  ;;  %v2934_v38 = vld [vmem:[%s13563_s30 + $0x13b8] sm:$0xff] }
 0x520   : > { %v10796_v56 = vcombine.low %v2882_v40, %v2886_v45 }
 0x521   : > { %9386 = vmatpush1.bf16.msra.mxu0 %v10738_v52  ;;  %9714 = vmatpush1.bf16.msra.mxu1 %v10740_v49  ;;  %v10797_v52 = vcombine.high %v2882_v40, %v2886_v45  ;;  %v2889_v49 = vld [vmem:[%s13563_s30 + $0x1250] sm:$0xff] }
 0x522   : > { %9387 = vmatprep.subr.bf16.mxu0 %v10747_v50  ;;  %9715 = vmatprep.subr.bf16.mxu1 %v10749_v51  ;;  %v2893_v50 = vld [vmem:[%s13563_s30 + $0x1270] sm:$0xff]  ;;  %v2890_v51 = vld [vmem:[%s13563_s30 + $0x1258] sm:$0xff] }
 0x523   : > { %v10803_v58 = vcombine.high %v2889_v49, %v2893_v50  ;;  %v10802_v0 = vcombine.low %v2889_v49, %v2893_v50  ;;  %v10804_v10 = vcombine.low %v2890_v51, %v2894_v53  ;;  %v2942_v49 = vld [vmem:[%s13563_s30 + $0x13f8] sm:$0xff] }
 0x525   : > { %9388 = vmatpush1.bf16.msra.mxu0 %v10746_v20  ;;  %9716 = vmatpush1.bf16.msra.mxu1 %v10748_v59  ;;  %v10805_v20 = vcombine.high %v2890_v51, %v2894_v53  ;;  %v2897_v59 = vld [vmem:[%s13563_s30 + $0x1290] sm:$0xff] }
 0x526   : > { %9389 = vmatprep.subr.bf16.mxu0 %v10755_v60  ;;  %9717 = vmatprep.subr.bf16.mxu1 %v10757_v62  ;;  %v2901_v60 = vld [vmem:[%s13563_s30 + $0x12b0] sm:$0xff]  ;;  %v2898_v62 = vld [vmem:[%s13563_s30 + $0x1298] sm:$0xff] }
 0x527   : > { %v10811_v4 = vcombine.high %v2897_v59, %v2901_v60  ;;  %v10810_v36 = vcombine.low %v2897_v59, %v2901_v60  ;;  %v10812_v12 = vcombine.low %v2898_v62, %v2902_v63  ;;  %v2950_v59 = vld [vmem:[%s13563_s30 + $0x1438] sm:$0xff] }
 0x529   : > { %9390 = vmatpush1.bf16.msra.mxu0 %v10754_v5  ;;  %9718 = vmatpush1.bf16.msra.mxu1 %v10756_v25  ;;  %v10813_v5 = vcombine.high %v2898_v62, %v2902_v63  ;;  %v2905_v25 = vld [vmem:[%s13563_s30 + $0x12d0] sm:$0xff] }
 0x52a   : > { %9391 = vmatprep.subr.bf16.mxu0 %v10763_v6  ;;  %9719 = vmatprep.subr.bf16.mxu1 %v10765_v32  ;;  %v2909_v6 = vld [vmem:[%s13563_s30 + $0x12f0] sm:$0xff]  ;;  %v2906_v32 = vld [vmem:[%s13563_s30 + $0x12d8] sm:$0xff] }
 0x52b   : > { %v10819_v13 = vcombine.high %v2905_v25, %v2909_v6  ;;  %v10818_v18 = vcombine.low %v2905_v25, %v2909_v6  ;;  %v10820_v17 = vcombine.low %v2906_v32, %v2910_v8  ;;  %v2958_v25 = vld [vmem:[%s13563_s30 + $0x1478] sm:$0xff] }
 0x52d   : > { %9392 = vmatpush1.bf16.msra.mxu0 %v10762_v14  ;;  %9720 = vmatpush1.bf16.msra.mxu1 %v10764_v7  ;;  %v10821_v14 = vcombine.high %v2906_v32, %v2910_v8  ;;  %v2913_v7 = vld [vmem:[%s13563_s30 + $0x1310] sm:$0xff] }
 0x52e   : > { %9393 = vmatprep.subr.bf16.mxu0 %v10771_v15  ;;  %9721 = vmatprep.subr.bf16.mxu1 %v10773_v16  ;;  %v2917_v15 = vld [vmem:[%s13563_s30 + $0x1330] sm:$0xff]  ;;  %v2914_v16 = vld [vmem:[%s13563_s30 + $0x1318] sm:$0xff] }
 0x52f   : > { %v10827_v21 = vcombine.high %v2913_v7, %v2917_v15  ;;  %v10826_v43 = vcombine.low %v2913_v7, %v2917_v15  ;;  %v10828_v31 = vcombine.low %v2914_v16, %v2918_v2  ;;  %v2966_v7 = vld [vmem:[%s13563_s30 + $0x14b8] sm:$0xff] }
 0x531   : > { %9394 = vmatpush1.bf16.msra.mxu0 %v10770_v22  ;;  %9722 = vmatpush1.bf16.msra.mxu1 %v10772_v24  ;;  %v10829_v22 = vcombine.high %v2914_v16, %v2918_v2  ;;  %v2921_v24 = vld [vmem:[%s13563_s30 + $0x1350] sm:$0xff] }
 0x532   : > { %9395 = vmatprep.subr.bf16.mxu0 %v10779_v27  ;;  %9723 = vmatprep.subr.bf16.mxu1 %v10781_v28  ;;  %v2925_v27 = vld [vmem:[%s13563_s30 + $0x1370] sm:$0xff]  ;;  %v2922_v28 = vld [vmem:[%s13563_s30 + $0x1358] sm:$0xff] }
 0x533   : > { %v10835_v34 = vcombine.high %v2921_v24, %v2925_v27  ;;  %v10834_v39 = vcombine.low %v2921_v24, %v2925_v27  ;;  %v10836_v40 = vcombine.low %v2922_v28, %v2926_v29  ;;  %v2974_v24 = vld [vmem:[%s13563_s30 + $0x14f8] sm:$0xff] }
 0x535   : > { %9396 = vmatpush1.bf16.msra.mxu0 %v10778_v35  ;;  %9724 = vmatpush1.bf16.msra.mxu1 %v10780_v33  ;;  %v10837_v35 = vcombine.high %v2922_v28, %v2926_v29  ;;  %v2929_v33 = vld [vmem:[%s13563_s30 + $0x1390] sm:$0xff] }
 0x536   : > { %9397 = vmatprep.subr.bf16.mxu0 %v10787_v37  ;;  %9725 = vmatprep.subr.bf16.mxu1 %v10789_v42  ;;  %v2933_v37 = vld [vmem:[%s13563_s30 + $0x13b0] sm:$0xff]  ;;  %v2930_v42 = vld [vmem:[%s13563_s30 + $0x1398] sm:$0xff] }
 0x537   : > { %v10843_v45 = vcombine.high %v2929_v33, %v2933_v37  ;;  %v10842_v50 = vcombine.low %v2929_v33, %v2933_v37  ;;  %v10844_v51 = vcombine.low %v2930_v42, %v2934_v38 }
 0x539   : > { %9398 = vmatpush1.bf16.msra.mxu0 %v10786_v46  ;;  %9726 = vmatpush1.bf16.msra.mxu1 %v10788_v47  ;;  %v10845_v46 = vcombine.high %v2930_v42, %v2934_v38  ;;  %v2937_v47 = vld [vmem:[%s13563_s30 + $0x13d0] sm:$0xff] }
 0x53a   : > { %9399 = vmatprep.subr.bf16.mxu0 %v10795_v48  ;;  %9727 = vmatprep.subr.bf16.mxu1 %v10797_v52  ;;  %v2941_v48 = vld [vmem:[%s13563_s30 + $0x13f0] sm:$0xff]  ;;  %v2938_v52 = vld [vmem:[%s13563_s30 + $0x13d8] sm:$0xff] }
 0x53b   : > { %v10851_v53 = vcombine.high %v2937_v47, %v2941_v48  ;;  %v10850_v60 = vcombine.low %v2937_v47, %v2941_v48  ;;  %v10852_v62 = vcombine.low %v2938_v52, %v2942_v49  ;;  %v2985_v38 = vld [vmem:[%s13563_s30 + $0x1550] sm:$0xff] }
 0x53d   : > { %9400 = vmatpush1.bf16.msra.mxu0 %v10794_v54  ;;  %9728 = vmatpush1.bf16.msra.mxu1 %v10796_v56  ;;  %v10853_v54 = vcombine.high %v2938_v52, %v2942_v49  ;;  %v2945_v56 = vld [vmem:[%s13563_s30 + $0x1410] sm:$0xff] }
 0x53e   : > { %9401 = vmatprep.subr.bf16.mxu0 %v10803_v58  ;;  %9729 = vmatprep.subr.bf16.mxu1 %v10805_v20  ;;  %v2949_v58 = vld [vmem:[%s13563_s30 + $0x1430] sm:$0xff]  ;;  %v2946_v20 = vld [vmem:[%s13563_s30 + $0x1418] sm:$0xff] }
 0x53f   : > { %v10859_v63 = vcombine.high %v2945_v56, %v2949_v58  ;;  %v10858_v6 = vcombine.low %v2945_v56, %v2949_v58  ;;  %v10860_v32 = vcombine.low %v2946_v20, %v2950_v59  ;;  %v2993_v49 = vld [vmem:[%s13563_s30 + $0x1590] sm:$0xff] }
 0x541   : > { %9402 = vmatpush1.bf16.msra.mxu0 %v10802_v0  ;;  %9730 = vmatpush1.bf16.msra.mxu1 %v10804_v10  ;;  %v10861_v0 = vcombine.high %v2946_v20, %v2950_v59  ;;  %v2953_v10 = vld [vmem:[%s13563_s30 + $0x1450] sm:$0xff] }
 0x542   : > { %9403 = vmatprep.subr.bf16.mxu0 %v10811_v4  ;;  %9731 = vmatprep.subr.bf16.mxu1 %v10813_v5  ;;  %v2957_v4 = vld [vmem:[%s13563_s30 + $0x1470] sm:$0xff]  ;;  %v2954_v5 = vld [vmem:[%s13563_s30 + $0x1458] sm:$0xff] }
 0x543   : > { %v10867_v8 = vcombine.high %v2953_v10, %v2957_v4  ;;  %v10866_v15 = vcombine.low %v2953_v10, %v2957_v4  ;;  %v10868_v16 = vcombine.low %v2954_v5, %v2958_v25  ;;  %v3001_v59 = vld [vmem:[%s13563_s30 + $0x15d0] sm:$0xff] }
 0x545   : > { %9404 = vmatpush1.bf16.msra.mxu0 %v10810_v36  ;;  %9732 = vmatpush1.bf16.msra.mxu1 %v10812_v12  ;;  %v10869_v36 = vcombine.high %v2954_v5, %v2958_v25  ;;  %v2961_v12 = vld [vmem:[%s13563_s30 + $0x1490] sm:$0xff] }
 0x546   : > { %9405 = vmatprep.subr.bf16.mxu0 %v10819_v13  ;;  %9733 = vmatprep.subr.bf16.mxu1 %v10821_v14  ;;  %v2965_v13 = vld [vmem:[%s13563_s30 + $0x14b0] sm:$0xff]  ;;  %v2962_v14 = vld [vmem:[%s13563_s30 + $0x1498] sm:$0xff] }
 0x547   : > { %v10875_v2 = vcombine.high %v2961_v12, %v2965_v13  ;;  %v10876_v27 = vcombine.low %v2962_v14, %v2966_v7  ;;  %v3009_v25 = vld [vmem:[%s13563_s30 + $0x1610] sm:$0xff] }
 0x549   : > { %9406 = vmatpush1.bf16.msra.mxu0 %v10818_v18  ;;  %9734 = vmatpush1.bf16.msra.mxu1 %v10820_v17  ;;  %v10877_v18 = vcombine.high %v2962_v14, %v2966_v7  ;;  %v2969_v17 = vld [vmem:[%s13563_s30 + $0x14d0] sm:$0xff] }
 0x54a   : > { %9407 = vmatprep.subr.bf16.mxu0 %v10827_v21  ;;  %9735 = vmatprep.subr.bf16.mxu1 %v10829_v22  ;;  %v2973_v21 = vld [vmem:[%s13563_s30 + $0x14f0] sm:$0xff]  ;;  %v2970_v22 = vld [vmem:[%s13563_s30 + $0x14d8] sm:$0xff] }
 0x54b   : > { %v10883_v28 = vcombine.high %v2969_v17, %v2973_v21  ;;  %v10885_v29 = vcombine.high %v2970_v22, %v2974_v24  ;;  %v10882_v33 = vcombine.low %v2969_v17, %v2973_v21  ;;  %v3017_v7 = vld [vmem:[%s13563_s30 + $0x1650] sm:$0xff] }
 0x54d   : > { %9408 = vmatpush1.bf16.msra.mxu0 %v10826_v43  ;;  %9736 = vmatpush1.bf16.msra.mxu1 %v10828_v31  ;;  %v2977_v43 = vld [vmem:[%s13563_s30 + $0x1510] sm:$0xff] }
 0x54e   : > { %9409 = vmatprep.subr.bf16.mxu0 %v10835_v34  ;;  %9737 = vmatprep.subr.bf16.mxu1 %v10837_v35  ;;  %v2981_v31 = vld [vmem:[%s13563_s30 + $0x1530] sm:$0xff]  ;;  %v2978_v34 = vld [vmem:[%s13563_s30 + $0x1518] sm:$0xff] }
 0x54f   : > { %v2982_v35 = vld [vmem:[%s13563_s30 + $0x1538] sm:$0xff]  ;;  %v10891_v37 = vcombine.high %v2977_v43, %v2981_v31 }
 0x550   : > { %v10893_v42 = vcombine.high %v2978_v34, %v2982_v35  ;;  %v10892_v47 = vcombine.low %v2978_v34, %v2982_v35  ;;  %v3033_v35 = vld [vmem:[%s13563_s30 + $0x16d0] sm:$0xff] }
 0x551   : > { %9410 = vmatpush1.bf16.msra.mxu0 %v10834_v39  ;;  %9738 = vmatpush1.bf16.msra.mxu1 %v10836_v40  ;;  %v2989_v39 = vld [vmem:[%s13563_s30 + $0x1570] sm:$0xff]  ;;  %v2986_v40 = vld [vmem:[%s13563_s30 + $0x1558] sm:$0xff] }
 0x552   : > { %9411 = vmatprep.subr.bf16.mxu0 %v10843_v45  ;;  %9739 = vmatprep.subr.bf16.mxu1 %v10845_v46  ;;  %v2990_v45 = vld [vmem:[%s13563_s30 + $0x1578] sm:$0xff]  ;;  %v10890_v46 = vcombine.low %v2977_v43, %v2981_v31  ;;  %v10899_v48 = vcombine.high %v2985_v38, %v2989_v39 }
 0x553   : > { %v10901_v52 = vcombine.high %v2986_v40, %v2990_v45  ;;  %v10900_v56 = vcombine.low %v2986_v40, %v2990_v45  ;;  %v3041_v45 = vld [vmem:[%s13563_s30 + $0x1710] sm:$0xff] }
 0x555   : > { %9412 = vmatpush1.bf16.msra.mxu0 %v10842_v50  ;;  %9740 = vmatpush1.bf16.msra.mxu1 %v10844_v51  ;;  %v2997_v50 = vld [vmem:[%s13563_s30 + $0x15b0] sm:$0xff]  ;;  %v2994_v51 = vld [vmem:[%s13563_s30 + $0x1598] sm:$0xff] }
 0x556   : > { %9413 = vmatprep.subr.bf16.mxu0 %v10851_v53  ;;  %9741 = vmatprep.subr.bf16.mxu1 %v10853_v54  ;;  %v2998_v53 = vld [vmem:[%s13563_s30 + $0x15b8] sm:$0xff]  ;;  %v10898_v54 = vcombine.low %v2985_v38, %v2989_v39  ;;  %v10907_v58 = vcombine.high %v2993_v49, %v2997_v50 }
 0x557   : > { %v10909_v20 = vcombine.high %v2994_v51, %v2998_v53  ;;  %v10908_v10 = vcombine.low %v2994_v51, %v2998_v53  ;;  %v3049_v53 = vld [vmem:[%s13563_s30 + $0x1750] sm:$0xff] }
 0x559   : > { %9414 = vmatpush1.bf16.msra.mxu0 %v10850_v60  ;;  %9742 = vmatpush1.bf16.msra.mxu1 %v10852_v62  ;;  %v3005_v60 = vld [vmem:[%s13563_s30 + $0x15f0] sm:$0xff]  ;;  %v3002_v62 = vld [vmem:[%s13563_s30 + $0x15d8] sm:$0xff] }
 0x55a   : > { %9424 = vmatprep.subr.bf16.mxu0 %v10859_v63  ;;  %9752 = vmatprep.subr.bf16.mxu1 %v10861_v0  ;;  %v3006_v63 = vld [vmem:[%s13563_s30 + $0x15f8] sm:$0xff]  ;;  %v10906_v0 = vcombine.low %v2993_v49, %v2997_v50  ;;  %v10915_v4 = vcombine.high %v3001_v59, %v3005_v60 }
 0x55b   : > { %v10917_v5 = vcombine.high %v3002_v62, %v3006_v63 }
 0x55c   : > { %9416 = vmatmul.mubr.bf16.vlgmr.msra.gmra.mrb[4].mxu0 %v13976_v55  ;;  %9744 = vmatmul.mubr.bf16.vlgmr.msra.gmra.mrb[4].mxu1 %v13976_v55  ;;  %v10874_v55 = vcombine.low %v2961_v12, %v2965_v13  ;;  %v10916_v12 = vcombine.low %v3002_v62, %v3006_v63  ;;  %v3057_v63 = vld [vmem:[%s13563_s30 + $0x1790] sm:$0xff] }
 0x55d   : > { %9425 = vmatpush1.bf16.msra.mxu0 %v10858_v6  ;;  %9753 = vmatpush1.bf16.msra.mxu1 %v10860_v32  ;;  %v3013_v6 = vld [vmem:[%s13563_s30 + $0x1630] sm:$0xff]  ;;  %v3010_v32 = vld [vmem:[%s13563_s30 + $0x1618] sm:$0xff] }
 0x55e   : > { %9426 = vmatprep.subr.bf16.mxu0 %v10867_v8  ;;  %9754 = vmatprep.subr.bf16.mxu1 %v10869_v36  ;;  %v3014_v8 = vld [vmem:[%s13563_s30 + $0x1638] sm:$0xff]  ;;  %v10914_v36 = vcombine.low %v3001_v59, %v3005_v60  ;;  %v10923_v13 = vcombine.high %v3009_v25, %v3013_v6 }
 0x55f   : > { %9456 = vmatprep.mubr.bf16.mxu0 %v13984_v1  ;;  %9784 = vmatprep.mubr.bf16.mxu1 %v13984_v1  ;;  %v10884_v1 = vcombine.low %v2970_v22, %v2974_v24  ;;  %v10925_v14 = vcombine.high %v3010_v32, %v3014_v8  ;;  %v10924_v17 = vcombine.low %v3010_v32, %v3014_v8  ;;  %v3025_v24 = vld [vmem:[%s13563_s30 + $0x1690] sm:$0xff] }
 0x560   : > { %v3065_v8 = vld [vmem:[%s13563_s30 + $0x17d0] sm:$0xff] }
 0x561   : > { %9427 = vmatpush1.bf16.msra.mxu0 %v10866_v15  ;;  %9755 = vmatpush1.bf16.msra.mxu1 %v10868_v16  ;;  %v3021_v15 = vld [vmem:[%s13563_s30 + $0x1670] sm:$0xff]  ;;  %v3018_v16 = vld [vmem:[%s13563_s30 + $0x1658] sm:$0xff] }
 0x562   : > { %9428 = vmatprep.subr.bf16.mxu0 %v10875_v2  ;;  %9756 = vmatprep.subr.bf16.mxu1 %v10877_v18  ;;  %v3022_v2 = vld [vmem:[%s13563_s30 + $0x1678] sm:$0xff]  ;;  %v10922_v18 = vcombine.low %v3009_v25, %v3013_v6  ;;  %v10931_v21 = vcombine.high %v3017_v7, %v3021_v15 }
 0x563   : > { %v10933_v22 = vcombine.high %v3018_v16, %v3022_v2  ;;  %v10932_v43 = vcombine.low %v3018_v16, %v3022_v2  ;;  %v3073_v2 = vld [vmem:[%s13563_s30 + $0x1810] sm:$0xff] }
 0x565   : > { %9429 = vmatpush1.bf16.msra.mxu0 %v10874_v55  ;;  %9757 = vmatpush1.bf16.msra.mxu1 %v10876_v27  ;;  %v3029_v55 = vld [vmem:[%s13563_s30 + $0x16b0] sm:$0xff]  ;;  %v3026_v27 = vld [vmem:[%s13563_s30 + $0x1698] sm:$0xff] }
 0x566   : > { %9430 = vmatprep.subr.bf16.mxu0 %v10883_v28  ;;  %9758 = vmatprep.subr.bf16.mxu1 %v10885_v29  ;;  %v3030_v28 = vld [vmem:[%s13563_s30 + $0x16b8] sm:$0xff]  ;;  %v10930_v29 = vcombine.low %v3017_v7, %v3021_v15  ;;  %v10939_v31 = vcombine.high %v3025_v24, %v3029_v55 }
 0x567   : > { %v10941_v34 = vcombine.high %v3026_v27, %v3030_v28  ;;  %v10940_v38 = vcombine.low %v3026_v27, %v3030_v28  ;;  %v3081_v28 = vld [vmem:[%s13563_s30 + $0x1850] sm:$0xff] }
 0x569   : > { %9431 = vmatpush1.bf16.msra.mxu0 %v10882_v33  ;;  %9759 = vmatpush1.bf16.msra.mxu1 %v10884_v1  ;;  %v3037_v33 = vld [vmem:[%s13563_s30 + $0x16f0] sm:$0xff]  ;;  %v3034_v1 = vld [vmem:[%s13563_s30 + $0x16d8] sm:$0xff] }
 0x56a   : > { %9432 = vmatprep.subr.bf16.mxu0 %v10891_v37  ;;  %9760 = vmatprep.subr.bf16.mxu1 %v10893_v42  ;;  %v3038_v37 = vld [vmem:[%s13563_s30 + $0x16f8] sm:$0xff]  ;;  %v10938_v42 = vcombine.low %v3025_v24, %v3029_v55  ;;  %v10947_v39 = vcombine.high %v3033_v35, %v3037_v33 }
 0x56b   : > { %v10949_v40 = vcombine.high %v3034_v1, %v3038_v37  ;;  %v10948_v49 = vcombine.low %v3034_v1, %v3038_v37  ;;  %v3089_v37 = vld [vmem:[%s13563_s30 + $0x1890] sm:$0xff] }
 0x56d   : > { %9433 = vmatpush1.bf16.msra.mxu0 %v10890_v46  ;;  %9761 = vmatpush1.bf16.msra.mxu1 %v10892_v47  ;;  %v3045_v46 = vld [vmem:[%s13563_s30 + $0x1730] sm:$0xff]  ;;  %v3042_v47 = vld [vmem:[%s13563_s30 + $0x1718] sm:$0xff] }
 0x56e   : > { %9434 = vmatprep.subr.bf16.mxu0 %v10899_v48  ;;  %9762 = vmatprep.subr.bf16.mxu1 %v10901_v52  ;;  %v3046_v48 = vld [vmem:[%s13563_s30 + $0x1738] sm:$0xff]  ;;  %v10946_v52 = vcombine.low %v3033_v35, %v3037_v33  ;;  %v10955_v50 = vcombine.high %v3041_v45, %v3045_v46 }
 0x56f   : > { %v10957_v51 = vcombine.high %v3042_v47, %v3046_v48  ;;  %v10956_v59 = vcombine.low %v3042_v47, %v3046_v48  ;;  %v3097_v48 = vld [vmem:[%s13563_s30 + $0x18d0] sm:$0xff] }
 0x571   : > { %9435 = vmatpush1.bf16.msra.mxu0 %v10898_v54  ;;  %9763 = vmatpush1.bf16.msra.mxu1 %v10900_v56  ;;  %v3053_v54 = vld [vmem:[%s13563_s30 + $0x1770] sm:$0xff]  ;;  %v3050_v56 = vld [vmem:[%s13563_s30 + $0x1758] sm:$0xff] }
 0x572   : > { %9436 = vmatprep.subr.bf16.mxu0 %v10907_v58  ;;  %9764 = vmatprep.subr.bf16.mxu1 %v10909_v20  ;;  %v3054_v58 = vld [vmem:[%s13563_s30 + $0x1778] sm:$0xff]  ;;  %v10954_v20 = vcombine.low %v3041_v45, %v3045_v46  ;;  %v10963_v60 = vcombine.high %v3049_v53, %v3053_v54 }
 0x573   : > { %v10965_v62 = vcombine.high %v3050_v56, %v3054_v58  ;;  %v10964_v25 = vcombine.low %v3050_v56, %v3054_v58  ;;  %v3105_v56 = vld [vmem:[%s13563_s30 + $0x1910] sm:$0xff] }
 0x574   : > { %v3109_v58 = vld [vmem:[%s13563_s30 + $0x1930] sm:$0xff] }
 0x575   : > { %9437 = vmatpush1.bf16.msra.mxu0 %v10906_v0  ;;  %9765 = vmatpush1.bf16.msra.mxu1 %v10908_v10  ;;  %v3061_v0 = vld [vmem:[%s13563_s30 + $0x17b0] sm:$0xff]  ;;  %v3058_v10 = vld [vmem:[%s13563_s30 + $0x1798] sm:$0xff] }
 0x576   : > { %9438 = vmatprep.subr.bf16.mxu0 %v10915_v4  ;;  %9766 = vmatprep.subr.bf16.mxu1 %v10917_v5  ;;  %v3062_v4 = vld [vmem:[%s13563_s30 + $0x17b8] sm:$0xff]  ;;  %v10962_v5 = vcombine.low %v3049_v53, %v3053_v54  ;;  %v10971_v6 = vcombine.high %v3057_v63, %v3061_v0 }
 0x577   : > { %v10973_v32 = vcombine.high %v3058_v10, %v3062_v4  ;;  %v10972_v7 = vcombine.low %v3058_v10, %v3062_v4  ;;  %v3117_v10 = vld [vmem:[%s13563_s30 + $0x1970] sm:$0xff]  ;;  %v3114_v4 = vld [vmem:[%s13563_s30 + $0x1958] sm:$0xff] }
 0x579   : > { %9439 = vmatpush1.bf16.msra.mxu0 %v10914_v36  ;;  %9767 = vmatpush1.bf16.msra.mxu1 %v10916_v12  ;;  %v3069_v36 = vld [vmem:[%s13563_s30 + $0x17f0] sm:$0xff]  ;;  %v3066_v12 = vld [vmem:[%s13563_s30 + $0x17d8] sm:$0xff] }
 0x57a   : > { %9440 = vmatprep.subr.bf16.mxu0 %v10923_v13  ;;  %9768 = vmatprep.subr.bf16.mxu1 %v10925_v14  ;;  %v3070_v13 = vld [vmem:[%s13563_s30 + $0x17f8] sm:$0xff]  ;;  %v10970_v14 = vcombine.low %v3057_v63, %v3061_v0  ;;  %v10979_v15 = vcombine.high %v3065_v8, %v3069_v36  ;;  %v3113_v0 = vld [vmem:[%s13563_s30 + $0x1950] sm:$0xff] }
 0x57b   : > { %v10981_v16 = vcombine.high %v3066_v12, %v3070_v13  ;;  %v10980_v24 = vcombine.low %v3066_v12, %v3070_v13  ;;  %v3125_v12 = vld [vmem:[%s13563_s30 + $0x19b0] sm:$0xff]  ;;  %v3122_v13 = vld [vmem:[%s13563_s30 + $0x1998] sm:$0xff] }
 0x57d   : > { %9441 = vmatpush1.bf16.msra.mxu0 %v10922_v18  ;;  %9769 = vmatpush1.bf16.msra.mxu1 %v10924_v17  ;;  %v3077_v18 = vld [vmem:[%s13563_s30 + $0x1830] sm:$0xff]  ;;  %v3074_v17 = vld [vmem:[%s13563_s30 + $0x1818] sm:$0xff] }
 0x57e   : > { %9442 = vmatprep.subr.bf16.mxu0 %v10931_v21  ;;  %9770 = vmatprep.subr.bf16.mxu1 %v10933_v22  ;;  %v3078_v21 = vld [vmem:[%s13563_s30 + $0x1838] sm:$0xff]  ;;  %v10978_v22 = vcombine.low %v3065_v8, %v3069_v36  ;;  %v10987_v55 = vcombine.high %v3073_v2, %v3077_v18  ;;  %v3121_v36 = vld [vmem:[%s13563_s30 + $0x1990] sm:$0xff] }
 0x57f   : > { %v10989_v27 = vcombine.high %v3074_v17, %v3078_v21  ;;  %v10988_v35 = vcombine.low %v3074_v17, %v3078_v21  ;;  %v3133_v17 = vld [vmem:[%s13563_s30 + $0x19f0] sm:$0xff]  ;;  %v3130_v21 = vld [vmem:[%s13563_s30 + $0x19d8] sm:$0xff] }
 0x581   : > { %9443 = vmatpush1.bf16.msra.mxu0 %v10930_v29  ;;  %9771 = vmatpush1.bf16.msra.mxu1 %v10932_v43  ;;  %v3085_v29 = vld [vmem:[%s13563_s30 + $0x1870] sm:$0xff]  ;;  %v3082_v43 = vld [vmem:[%s13563_s30 + $0x1858] sm:$0xff] }
 0x582   : > { %9444 = vmatprep.subr.bf16.mxu0 %v10939_v31  ;;  %9772 = vmatprep.subr.bf16.mxu1 %v10941_v34  ;;  %v3086_v31 = vld [vmem:[%s13563_s30 + $0x1878] sm:$0xff]  ;;  %v10986_v34 = vcombine.low %v3073_v2, %v3077_v18  ;;  %v10995_v33 = vcombine.high %v3081_v28, %v3085_v29  ;;  %v3129_v18 = vld [vmem:[%s13563_s30 + $0x19d0] sm:$0xff] }
 0x583   : > { %v10997_v1 = vcombine.high %v3082_v43, %v3086_v31  ;;  %v10996_v45 = vcombine.low %v3082_v43, %v3086_v31  ;;  %v3141_v43 = vld [vmem:[%s13563_s30 + $0x1a30] sm:$0xff]  ;;  %v3138_v31 = vld [vmem:[%s13563_s30 + $0x1a18] sm:$0xff] }
 0x585   : > { %9445 = vmatpush1.bf16.msra.mxu0 %v10938_v42  ;;  %9773 = vmatpush1.bf16.msra.mxu1 %v10940_v38  ;;  %v3093_v42 = vld [vmem:[%s13563_s30 + $0x18b0] sm:$0xff]  ;;  %v3090_v38 = vld [vmem:[%s13563_s30 + $0x1898] sm:$0xff] }
 0x586   : > { %9446 = vmatprep.subr.bf16.mxu0 %v10947_v39  ;;  %9774 = vmatprep.subr.bf16.mxu1 %v10949_v40  ;;  %v3094_v39 = vld [vmem:[%s13563_s30 + $0x18b8] sm:$0xff]  ;;  %v10994_v40 = vcombine.low %v3081_v28, %v3085_v29  ;;  %v11003_v46 = vcombine.high %v3089_v37, %v3093_v42  ;;  %v3137_v29 = vld [vmem:[%s13563_s30 + $0x1a10] sm:$0xff] }
 0x587   : > { %v11005_v47 = vcombine.high %v3090_v38, %v3094_v39 }
 0x589   : > { %9447 = vmatpush1.bf16.msra.mxu0 %v10946_v52  ;;  %9775 = vmatpush1.bf16.msra.mxu1 %v10948_v49  ;;  %v3101_v52 = vld [vmem:[%s13563_s30 + $0x18f0] sm:$0xff]  ;;  %v3098_v49 = vld [vmem:[%s13563_s30 + $0x18d8] sm:$0xff] }
 0x58a   : > { %9448 = vmatprep.subr.bf16.mxu0 %v10955_v50  ;;  %9776 = vmatprep.subr.bf16.mxu1 %v10957_v51  ;;  %v3102_v50 = vld [vmem:[%s13563_s30 + $0x18f8] sm:$0xff]  ;;  %v11004_v51 = vcombine.low %v3090_v38, %v3094_v39  ;;  %v11011_v53 = vcombine.high %v3097_v48, %v3101_v52  ;;  %v3149_v38 = vld [vmem:[%s13563_s30 + $0x1a70] sm:$0xff] }
 0x58b   : > { %v11013_v54 = vcombine.high %v3098_v49, %v3102_v50  ;;  %v3146_v39 = vld [vmem:[%s13563_s30 + $0x1a58] sm:$0xff] }
 0x58d   : > { %9449 = vmatpush1.bf16.msra.mxu0 %v10954_v20  ;;  %9777 = vmatpush1.bf16.msra.mxu1 %v10956_v59  ;;  %v3106_v20 = vld [vmem:[%s13563_s30 + $0x1918] sm:$0xff] }
 0x58e   : > { %9450 = vmatprep.subr.bf16.mxu0 %v10963_v60  ;;  %9778 = vmatprep.subr.bf16.mxu1 %v10965_v62  ;;  %v3110_v59 = vld [vmem:[%s13563_s30 + $0x1938] sm:$0xff]  ;;  %v11010_v60 = vcombine.low %v3097_v48, %v3101_v52  ;;  %v11019_v62 = vcombine.high %v3105_v56, %v3109_v58  ;;  %v3153_v52 = vld [vmem:[%s13563_s30 + $0x1a90] sm:$0xff] }
 0x58f   : > { %v11021_v63 = vcombine.high %v3106_v20, %v3110_v59 }
 0x591   : > { %9451 = vmatpush1.bf16.msra.mxu0 %v10962_v5  ;;  %9779 = vmatpush1.bf16.msra.mxu1 %v10964_v25  ;;  %v3118_v5 = vld [vmem:[%s13563_s30 + $0x1978] sm:$0xff]  ;;  %v11018_v25 = vcombine.low %v3105_v56, %v3109_v58  ;;  %v3161_v58 = vld [vmem:[%s13563_s30 + $0x1ad0] sm:$0xff] }
 0x592   : > { %9452 = vmatprep.subr.bf16.mxu0 %v10971_v6  ;;  %9780 = vmatprep.subr.bf16.mxu1 %v10973_v32  ;;  %v11020_v6 = vcombine.low %v3106_v20, %v3110_v59  ;;  %v11027_v32 = vcombine.high %v3113_v0, %v3117_v10  ;;  %v11029_v8 = vcombine.high %v3114_v4, %v3118_v5  ;;  %v3165_v20 = vld [vmem:[%s13563_s30 + $0x1af0] sm:$0xff]  ;;  %v3162_v59 = vld [vmem:[%s13563_s30 + $0x1ad8] sm:$0xff] }
 0x595   : > { %9453 = vmatpush1.bf16.msra.mxu0 %v10970_v14  ;;  %9781 = vmatpush1.bf16.msra.mxu1 %v10972_v7  ;;  %v3126_v14 = vld [vmem:[%s13563_s30 + $0x19b8] sm:$0xff]  ;;  %v11026_v7 = vcombine.low %v3113_v0, %v3117_v10  ;;  %v3169_v10 = vld [vmem:[%s13563_s30 + $0x1b10] sm:$0xff] }
 0x596   : > { %9454 = vmatprep.subr.bf16.mxu0 %v10979_v15  ;;  %9782 = vmatprep.subr.bf16.mxu1 %v10981_v16  ;;  %v11028_v15 = vcombine.low %v3114_v4, %v3118_v5  ;;  %v11035_v16 = vcombine.high %v3121_v36, %v3125_v12  ;;  %v11037_v2 = vcombine.high %v3122_v13, %v3126_v14  ;;  %v3173_v4 = vld [vmem:[%s13563_s30 + $0x1b30] sm:$0xff]  ;;  %v3170_v5 = vld [vmem:[%s13563_s30 + $0x1b18] sm:$0xff] }
 0x599   : > { %9455 = vmatpush1.bf16.msra.mxu0 %v10978_v22  ;;  %9783 = vmatpush1.bf16.msra.mxu1 %v10980_v24  ;;  %v3134_v22 = vld [vmem:[%s13563_s30 + $0x19f8] sm:$0xff]  ;;  %v11034_v24 = vcombine.low %v3121_v36, %v3125_v12  ;;  %v3177_v12 = vld [vmem:[%s13563_s30 + $0x1b50] sm:$0xff] }
 0x59a   : > { %9465 = vmatprep.subr.bf16.mxu0 %v10987_v55  ;;  %9793 = vmatprep.subr.bf16.mxu1 %v10989_v27  ;;  %v11036_v55 = vcombine.low %v3122_v13, %v3126_v14  ;;  %v11043_v27 = vcombine.high %v3129_v18, %v3133_v17  ;;  %v11045_v28 = vcombine.high %v3130_v21, %v3134_v22  ;;  %v3181_v13 = vld [vmem:[%s13563_s30 + $0x1b70] sm:$0xff]  ;;  %v3178_v14 = vld [vmem:[%s13563_s30 + $0x1b58] sm:$0xff] }
 0x59c   : > { %9457 = vmatmul.mubr.bf16.vlgmr.msra.gmra.mrb[4].mxu0 %v14059_v30  ;;  %9785 = vmatmul.mubr.bf16.vlgmr.msra.gmra.mrb[4].mxu1 %v14059_v30  ;;  %v11002_v30 = vcombine.low %v3089_v37, %v3093_v42  ;;  %v3145_v42 = vld [vmem:[%s13563_s30 + $0x1a50] sm:$0xff] }
 0x59d   : > { %9466 = vmatpush1.bf16.msra.mxu0 %v10986_v34  ;;  %9794 = vmatpush1.bf16.msra.mxu1 %v10988_v35  ;;  %v3142_v34 = vld [vmem:[%s13563_s30 + $0x1a38] sm:$0xff]  ;;  %v11042_v35 = vcombine.low %v3129_v18, %v3133_v17  ;;  %v3185_v17 = vld [vmem:[%s13563_s30 + $0x1b90] sm:$0xff] }
 0x59e   : > { %9467 = vmatprep.subr.bf16.mxu0 %v10995_v33  ;;  %9795 = vmatprep.subr.bf16.mxu1 %v10997_v1  ;;  %v11044_v33 = vcombine.low %v3130_v21, %v3134_v22  ;;  %v11051_v1 = vcombine.high %v3137_v29, %v3141_v43  ;;  %v11053_v37 = vcombine.high %v3138_v31, %v3142_v34  ;;  %v3189_v21 = vld [vmem:[%s13563_s30 + $0x1bb0] sm:$0xff]  ;;  %v3186_v22 = vld [vmem:[%s13563_s30 + $0x1b98] sm:$0xff] }
 0x59f   : > { %9497 = vmatprep.mubr.bf16.mxu0 %v14066_v41  ;;  %9825 = vmatprep.mubr.bf16.mxu1 %v14066_v41  ;;  %v11012_v41 = vcombine.low %v3098_v49, %v3102_v50  ;;  %v3157_v49 = vld [vmem:[%s13563_s30 + $0x1ab0] sm:$0xff]  ;;  %v3154_v50 = vld [vmem:[%s13563_s30 + $0x1a98] sm:$0xff] }
 0x5a1   : > { %9468 = vmatpush1.bf16.msra.mxu0 %v10994_v40  ;;  %9796 = vmatpush1.bf16.msra.mxu1 %v10996_v45  ;;  %v3150_v40 = vld [vmem:[%s13563_s30 + $0x1a78] sm:$0xff]  ;;  %v11050_v45 = vcombine.low %v3137_v29, %v3141_v43  ;;  %v3193_v43 = vld [vmem:[%s13563_s30 + $0x1bd0] sm:$0xff] }
 0x5a2   : > { %9469 = vmatprep.subr.bf16.mxu0 %v11003_v46  ;;  %9797 = vmatprep.subr.bf16.mxu1 %v11005_v47  ;;  %v11052_v46 = vcombine.low %v3138_v31, %v3142_v34  ;;  %v11059_v47 = vcombine.high %v3145_v42, %v3149_v38  ;;  %v11061_v48 = vcombine.high %v3146_v39, %v3150_v40  ;;  %v3197_v31 = vld [vmem:[%s13563_s30 + $0x1bf0] sm:$0xff]  ;;  %v3194_v34 = vld [vmem:[%s13563_s30 + $0x1bd8] sm:$0xff] }
 0x5a5   : > { %9470 = vmatpush1.bf16.msra.mxu0 %v11002_v30  ;;  %9798 = vmatpush1.bf16.msra.mxu1 %v11004_v51  ;;  %v3158_v30 = vld [vmem:[%s13563_s30 + $0x1ab8] sm:$0xff]  ;;  %v11058_v51 = vcombine.low %v3145_v42, %v3149_v38  ;;  %v3201_v38 = vld [vmem:[%s13563_s30 + $0x1c10] sm:$0xff] }
 0x5a6   : > { %9471 = vmatprep.subr.bf16.mxu0 %v11011_v53  ;;  %9799 = vmatprep.subr.bf16.mxu1 %v11013_v54  ;;  %v11060_v53 = vcombine.low %v3146_v39, %v3150_v40  ;;  %v11067_v54 = vcombine.high %v3153_v52, %v3157_v49  ;;  %v11069_v56 = vcombine.high %v3154_v50, %v3158_v30  ;;  %v3205_v39 = vld [vmem:[%s13563_s30 + $0x1c30] sm:$0xff]  ;;  %v3202_v40 = vld [vmem:[%s13563_s30 + $0x1c18] sm:$0xff] }
 0x5a9   : > { %9472 = vmatpush1.bf16.msra.mxu0 %v11010_v60  ;;  %9800 = vmatpush1.bf16.msra.mxu1 %v11012_v41  ;;  %v3166_v60 = vld [vmem:[%s13563_s30 + $0x1af8] sm:$0xff]  ;;  %v11066_v41 = vcombine.low %v3153_v52, %v3157_v49  ;;  %v3209_v49 = vld [vmem:[%s13563_s30 + $0x1c50] sm:$0xff] }
 0x5aa   : > { %9473 = vmatprep.subr.bf16.mxu0 %v11019_v62  ;;  %9801 = vmatprep.subr.bf16.mxu1 %v11021_v63  ;;  %v11068_v62 = vcombine.low %v3154_v50, %v3158_v30  ;;  %v11075_v63 = vcombine.high %v3161_v58, %v3165_v20  ;;  %v11077_v0 = vcombine.high %v3162_v59, %v3166_v60  ;;  %v3213_v50 = vld [vmem:[%s13563_s30 + $0x1c70] sm:$0xff]  ;;  %v3210_v30 = vld [vmem:[%s13563_s30 + $0x1c58] sm:$0xff] }
 0x5ad   : > { %9474 = vmatpush1.bf16.msra.mxu0 %v11018_v25  ;;  %9802 = vmatpush1.bf16.msra.mxu1 %v11020_v6  ;;  %v3174_v25 = vld [vmem:[%s13563_s30 + $0x1b38] sm:$0xff]  ;;  %v11074_v6 = vcombine.low %v3161_v58, %v3165_v20  ;;  %v3217_v20 = vld [vmem:[%s13563_s30 + $0x1c90] sm:$0xff] }
 0x5ae   : > { %9475 = vmatprep.subr.bf16.mxu0 %v11027_v32  ;;  %9803 = vmatprep.subr.bf16.mxu1 %v11029_v8  ;;  %v11076_v32 = vcombine.low %v3162_v59, %v3166_v60  ;;  %v11083_v8 = vcombine.high %v3169_v10, %v3173_v4  ;;  %v11085_v36 = vcombine.high %v3170_v5, %v3174_v25  ;;  %v3221_v59 = vld [vmem:[%s13563_s30 + $0x1cb0] sm:$0xff]  ;;  %v3218_v60 = vld [vmem:[%s13563_s30 + $0x1c98] sm:$0xff] }
 0x5b1   : > { %9476 = vmatpush1.bf16.msra.mxu0 %v11026_v7  ;;  %9804 = vmatpush1.bf16.msra.mxu1 %v11028_v15  ;;  %v3182_v7 = vld [vmem:[%s13563_s30 + $0x1b78] sm:$0xff]  ;;  %v11082_v15 = vcombine.low %v3169_v10, %v3173_v4  ;;  %v3225_v4 = vld [vmem:[%s13563_s30 + $0x1cd0] sm:$0xff] }
 0x5b2   : > { %9477 = vmatprep.subr.bf16.mxu0 %v11035_v16  ;;  %9805 = vmatprep.subr.bf16.mxu1 %v11037_v2  ;;  %v11084_v16 = vcombine.low %v3170_v5, %v3174_v25  ;;  %v11091_v2 = vcombine.high %v3177_v12, %v3181_v13  ;;  %v11093_v18 = vcombine.high %v3178_v14, %v3182_v7  ;;  %v3229_v5 = vld [vmem:[%s13563_s30 + $0x1cf0] sm:$0xff]  ;;  %v3226_v25 = vld [vmem:[%s13563_s30 + $0x1cd8] sm:$0xff] }
 0x5b5   : > { %9478 = vmatpush1.bf16.msra.mxu0 %v11034_v24  ;;  %9806 = vmatpush1.bf16.msra.mxu1 %v11036_v55  ;;  %v3190_v24 = vld [vmem:[%s13563_s30 + $0x1bb8] sm:$0xff]  ;;  %v11090_v55 = vcombine.low %v3177_v12, %v3181_v13  ;;  %v3233_v12 = vld [vmem:[%s13563_s30 + $0x1d10] sm:$0xff] }
 0x5b6   : > { %9479 = vmatprep.subr.bf16.mxu0 %v11043_v27  ;;  %9807 = vmatprep.subr.bf16.mxu1 %v11045_v28  ;;  %v11092_v27 = vcombine.low %v3178_v14, %v3182_v7  ;;  %v11099_v28 = vcombine.high %v3185_v17, %v3189_v21  ;;  %v11101_v29 = vcombine.high %v3186_v22, %v3190_v24  ;;  %v3237_v13 = vld [vmem:[%s13563_s30 + $0x1d30] sm:$0xff]  ;;  %v3234_v14 = vld [vmem:[%s13563_s30 + $0x1d18] sm:$0xff] }
 0x5b7   : > { %v3238_v7 = vld [vmem:[%s13563_s30 + $0x1d38] sm:$0xff] }
 0x5b9   : > { %9480 = vmatpush1.bf16.msra.mxu0 %v11042_v35  ;;  %9808 = vmatpush1.bf16.msra.mxu1 %v11044_v33  ;;  %v3198_v35 = vld [vmem:[%s13563_s30 + $0x1bf8] sm:$0xff]  ;;  %v11098_v33 = vcombine.low %v3185_v17, %v3189_v21  ;;  %v3245_v17 = vld [vmem:[%s13563_s30 + $0x1d70] sm:$0xff] }
 0x5ba   : > { %9481 = vmatprep.subr.bf16.mxu0 %v11051_v1  ;;  %9809 = vmatprep.subr.bf16.mxu1 %v11053_v37  ;;  %v11100_v1 = vcombine.low %v3186_v22, %v3190_v24  ;;  %v11107_v37 = vcombine.high %v3193_v43, %v3197_v31  ;;  %v11109_v42 = vcombine.high %v3194_v34, %v3198_v35  ;;  %v3242_v21 = vld [vmem:[%s13563_s30 + $0x1d58] sm:$0xff] }
 0x5bb   : > { %v3246_v22 = vld [vmem:[%s13563_s30 + $0x1d78] sm:$0xff]  ;;  %v11146_v24 = vcombine.low %v3233_v12, %v3237_v13 }
 0x5bd   : > { %9482 = vmatpush1.bf16.msra.mxu0 %v11050_v45  ;;  %9810 = vmatpush1.bf16.msra.mxu1 %v11052_v46  ;;  %v3206_v45 = vld [vmem:[%s13563_s30 + $0x1c38] sm:$0xff]  ;;  %v11106_v46 = vcombine.low %v3193_v43, %v3197_v31  ;;  %v3253_v43 = vld [vmem:[%s13563_s30 + $0x1db0] sm:$0xff] }
 0x5be   : > { %9483 = vmatprep.subr.bf16.mxu0 %v11059_v47  ;;  %9811 = vmatprep.subr.bf16.mxu1 %v11061_v48  ;;  %v11108_v47 = vcombine.low %v3194_v34, %v3198_v35  ;;  %v11115_v48 = vcombine.high %v3201_v38, %v3205_v39  ;;  %v11117_v52 = vcombine.high %v3202_v40, %v3206_v45  ;;  %v3250_v31 = vld [vmem:[%s13563_s30 + $0x1d98] sm:$0xff] }
 0x5bf   : > { %v3254_v34 = vld [vmem:[%s13563_s30 + $0x1db8] sm:$0xff] }
 0x5c1   : > { %9484 = vmatpush1.bf16.msra.mxu0 %v11058_v51  ;;  %9812 = vmatpush1.bf16.msra.mxu1 %v11060_v53  ;;  %v3214_v51 = vld [vmem:[%s13563_s30 + $0x1c78] sm:$0xff]  ;;  %v11114_v53 = vcombine.low %v3201_v38, %v3205_v39  ;;  %v3261_v38 = vld [vmem:[%s13563_s30 + $0x1df0] sm:$0xff] }
 0x5c2   : > { %9485 = vmatprep.subr.bf16.mxu0 %v11067_v54  ;;  %9813 = vmatprep.subr.bf16.mxu1 %v11069_v56  ;;  %v11116_v54 = vcombine.low %v3202_v40, %v3206_v45  ;;  %v11123_v56 = vcombine.high %v3209_v49, %v3213_v50  ;;  %v11125_v58 = vcombine.high %v3210_v30, %v3214_v51  ;;  %v3258_v39 = vld [vmem:[%s13563_s30 + $0x1dd8] sm:$0xff] }
 0x5c3   : > { %v3262_v40 = vld [vmem:[%s13563_s30 + $0x1df8] sm:$0xff] }
 0x5c5   : > { %9486 = vmatpush1.bf16.msra.mxu0 %v11066_v41  ;;  %9814 = vmatpush1.bf16.msra.mxu1 %v11068_v62  ;;  %v3222_v41 = vld [vmem:[%s13563_s30 + $0x1cb8] sm:$0xff]  ;;  %v11122_v62 = vcombine.low %v3209_v49, %v3213_v50  ;;  %v3269_v49 = vld [vmem:[%s13563_s30 + $0x1e30] sm:$0xff] }
 0x5c6   : > { %9487 = vmatprep.subr.bf16.mxu0 %v11075_v63  ;;  %9815 = vmatprep.subr.bf16.mxu1 %v11077_v0  ;;  %v11124_v63 = vcombine.low %v3210_v30, %v3214_v51  ;;  %v11131_v0 = vcombine.high %v3217_v20, %v3221_v59  ;;  %v11133_v10 = vcombine.high %v3218_v60, %v3222_v41  ;;  %v3266_v50 = vld [vmem:[%s13563_s30 + $0x1e18] sm:$0xff] }
 0x5c7   : > { %v3270_v30 = vld [vmem:[%s13563_s30 + $0x1e38] sm:$0xff] }
 0x5c9   : > { %9488 = vmatpush1.bf16.msra.mxu0 %v11074_v6  ;;  %9816 = vmatpush1.bf16.msra.mxu1 %v11076_v32  ;;  %v3230_v6 = vld [vmem:[%s13563_s30 + $0x1cf8] sm:$0xff]  ;;  %v11132_v32 = vcombine.low %v3218_v60, %v3222_v41 }
 0x5ca   : > { %9489 = vmatprep.subr.bf16.mxu0 %v11083_v8  ;;  %9817 = vmatprep.subr.bf16.mxu1 %v11085_v36  ;;  %v11139_v8 = vcombine.high %v3225_v4, %v3229_v5  ;;  %v11141_v36 = vcombine.high %v3226_v25, %v3230_v6  ;;  %v3278_v60 = vld [vmem:[%s13563_s30 + $0x1e78] sm:$0xff] }
 0x5cd   : > { %9490 = vmatpush1.bf16.msra.mxu0 %v11082_v15  ;;  %9818 = vmatpush1.bf16.msra.mxu1 %v11084_v16  ;;  %v11138_v15 = vcombine.low %v3225_v4, %v3229_v5  ;;  %v11147_v16 = vcombine.high %v3233_v12, %v3237_v13  ;;  %v3285_v4 = vld [vmem:[%s13563_s30 + $0x1eb0] sm:$0xff]  ;;  %v3282_v5 = vld [vmem:[%s13563_s30 + $0x1e98] sm:$0xff] }
 0x5ce   : > { %9491 = vmatprep.subr.bf16.mxu0 %v11091_v2  ;;  %9819 = vmatprep.subr.bf16.mxu1 %v11093_v18  ;;  %v11149_v2 = vcombine.high %v3234_v14, %v3238_v7  ;;  %v3241_v18 = vld [vmem:[%s13563_s30 + $0x1d50] sm:$0xff]  ;;  %v3290_v13 = vld [vmem:[%s13563_s30 + $0x1ed8] sm:$0xff] }
 0x5cf   : > { %v11154_v35 = vcombine.low %v3241_v18, %v3245_v17  ;;  %v3293_v12 = vld [vmem:[%s13563_s30 + $0x1ef0] sm:$0xff] }
 0x5d1   : > { %9492 = vmatpush1.bf16.msra.mxu0 %v11090_v55  ;;  %9820 = vmatpush1.bf16.msra.mxu1 %v11092_v27  ;;  %v11148_v55 = vcombine.low %v3234_v14, %v3238_v7  ;;  %v11155_v27 = vcombine.high %v3241_v18, %v3245_v17  ;;  %v3294_v14 = vld [vmem:[%s13563_s30 + $0x1ef8] sm:$0xff]  ;;  %v3301_v18 = vld [vmem:[%s13563_s30 + $0x1f30] sm:$0xff] }
 0x5d2   : > { %9493 = vmatprep.subr.bf16.mxu0 %v11099_v28  ;;  %9821 = vmatprep.subr.bf16.mxu1 %v11101_v29  ;;  %v11157_v28 = vcombine.high %v3242_v21, %v3246_v22  ;;  %v3249_v29 = vld [vmem:[%s13563_s30 + $0x1d90] sm:$0xff]  ;;  %v3298_v17 = vld [vmem:[%s13563_s30 + $0x1f18] sm:$0xff] }
 0x5d3   : > { %v11162_v45 = vcombine.low %v3249_v29, %v3253_v43 }
 0x5d5   : > { %9494 = vmatpush1.bf16.msra.mxu0 %v11098_v33  ;;  %9822 = vmatpush1.bf16.msra.mxu1 %v11100_v1  ;;  %v11156_v33 = vcombine.low %v3242_v21, %v3246_v22  ;;  %v11163_v1 = vcombine.high %v3249_v29, %v3253_v43  ;;  %v3302_v21 = vld [vmem:[%s13563_s30 + $0x1f38] sm:$0xff]  ;;  %v3309_v29 = vld [vmem:[%s13563_s30 + $0x1f70] sm:$0xff] }
 0x5d6   : > { %9495 = vmatprep.subr.bf16.mxu0 %v11107_v37  ;;  %9823 = vmatprep.subr.bf16.mxu1 %v11109_v42  ;;  %v11165_v37 = vcombine.high %v3250_v31, %v3254_v34  ;;  %v3257_v42 = vld [vmem:[%s13563_s30 + $0x1dd0] sm:$0xff]  ;;  %v3306_v43 = vld [vmem:[%s13563_s30 + $0x1f58] sm:$0xff] }
 0x5d7   : > { %v11170_v51 = vcombine.low %v3257_v42, %v3261_v38 }
 0x5d9   : > { %9496 = vmatpush1.bf16.msra.mxu0 %v11106_v46  ;;  %9824 = vmatpush1.bf16.msra.mxu1 %v11108_v47  ;;  %v11164_v46 = vcombine.low %v3250_v31, %v3254_v34  ;;  %v11171_v47 = vcombine.high %v3257_v42, %v3261_v38  ;;  %v3310_v31 = vld [vmem:[%s13563_s30 + $0x1f78] sm:$0xff]  ;;  %v3317_v42 = vld [vmem:[%s13563_s30 + $0x1fb0] sm:$0xff] }
 0x5da   : > { %9506 = vmatprep.subr.bf16.mxu0 %v11115_v48  ;;  %9834 = vmatprep.subr.bf16.mxu1 %v11117_v52  ;;  %v11173_v48 = vcombine.high %v3258_v39, %v3262_v40  ;;  %v3265_v52 = vld [vmem:[%s13563_s30 + $0x1e10] sm:$0xff]  ;;  %v3314_v38 = vld [vmem:[%s13563_s30 + $0x1f98] sm:$0xff] }
 0x5db   : > { %v11178_v41 = vcombine.low %v3265_v52, %v3269_v49 }
 0x5dc   : > { %9498 = vmatmul.mubr.bf16.vlgmr.msra.gmra.mrb[4].mxu0 %v14134_v9  ;;  %9826 = vmatmul.mubr.bf16.vlgmr.msra.gmra.mrb[4].mxu1 %v14134_v9  ;;  %v11130_v9 = vcombine.low %v3217_v20, %v3221_v59  ;;  %v3277_v20 = vld [vmem:[%s13563_s30 + $0x1e70] sm:$0xff]  ;;  %v3274_v59 = vld [vmem:[%s13563_s30 + $0x1e58] sm:$0xff] }
 0x5dd   : > { %9507 = vmatpush1.bf16.msra.mxu0 %v11114_v53  ;;  %9835 = vmatpush1.bf16.msra.mxu1 %v11116_v54  ;;  %v11172_v53 = vcombine.low %v3258_v39, %v3262_v40  ;;  %v11179_v54 = vcombine.high %v3265_v52, %v3269_v49  ;;  %v3318_v39 = vld [vmem:[%s13563_s30 + $0x1fb8] sm:$0xff]  ;;  %v3325_v52 = vld [vmem:[%s13563_s30 + $0x1ff0] sm:$0xff] }
 0x5de   : > { %9508 = vmatprep.subr.bf16.mxu0 %v11123_v56  ;;  %9836 = vmatprep.subr.bf16.mxu1 %v11125_v58  ;;  %v11181_v56 = vcombine.high %v3266_v50, %v3270_v30  ;;  %v3273_v58 = vld [vmem:[%s13563_s30 + $0x1e50] sm:$0xff]  ;;  %v3322_v49 = vld [vmem:[%s13563_s30 + $0x1fd8] sm:$0xff] }
 0x5df   : > { %9538 = vmatprep.mubr.bf16.mxu0 %v14142_v19  ;;  %9866 = vmatprep.mubr.bf16.mxu1 %v14142_v19  ;;  %v11140_v19 = vcombine.low %v3226_v25, %v3230_v6  ;;  %v3286_v25 = vld [vmem:[%s13563_s30 + $0x1eb8] sm:$0xff]  ;;  %v11186_v6 = vcombine.low %v3273_v58, %v3277_v20 }
 0x5e1   : > { %9509 = vmatpush1.bf16.msra.mxu0 %v11122_v62  ;;  %9837 = vmatpush1.bf16.msra.mxu1 %v11124_v63  ;;  %v11180_v62 = vcombine.low %v3266_v50, %v3270_v30  ;;  %v11187_v63 = vcombine.high %v3273_v58, %v3277_v20  ;;  %v3326_v50 = vld [vmem:[%s13563_s30 + $0x1ff8] sm:$0xff]  ;;  %v9932_v20 = vsub.s32 0, %v13561_v3 }
 0x5e2   : > { %9510 = vmatprep.subr.bf16.mxu0 %v11131_v0  ;;  %9838 = vmatprep.subr.bf16.mxu1 %v11133_v10  ;;  %v11189_v0 = vcombine.high %v3274_v59, %v3278_v60  ;;  %v3281_v10 = vld [vmem:[%s13563_s30 + $0x1e90] sm:$0xff]  ;;  %v11236_v58 = vcombine.low %v3322_v49, %v3326_v50 }
 0x5e3   : > { %v11194_v7 = vcombine.low %v3281_v10, %v3285_v4 }
 0x5e5   : > { %9511 = vmatpush1.bf16.msra.mxu0 %v11130_v9  ;;  %9839 = vmatpush1.bf16.msra.mxu1 %v11132_v32  ;;  %v11188_v9 = vcombine.low %v3274_v59, %v3278_v60  ;;  %v11195_v32 = vcombine.high %v3281_v10, %v3285_v4  ;;  %v9936_v59 = vsub.s32 1, %v13561_v3  ;;  %v9940_v60 = vsub.s32 2, %v13561_v3 }
 0x5e6   : > { %9512 = vmatprep.subr.bf16.mxu0 %v11139_v8  ;;  %9840 = vmatprep.subr.bf16.mxu1 %v11141_v36  ;;  %v11197_v8 = vcombine.high %v3282_v5, %v3286_v25  ;;  %v3289_v36 = vld [vmem:[%s13563_s30 + $0x1ed0] sm:$0xff] }
 0x5e7   : > { %v11202_v22 = vcombine.low %v3289_v36, %v3293_v12 }
 0x5e9   : > { %9513 = vmatpush1.bf16.msra.mxu0 %v11138_v15  ;;  %9841 = vmatpush1.bf16.msra.mxu1 %v11140_v19  ;;  %v11196_v15 = vcombine.low %v3282_v5, %v3286_v25  ;;  %v11203_v19 = vcombine.high %v3289_v36, %v3293_v12  ;;  %v9956_v36 = vsub.s32 6, %v13561_v3  ;;  %v9960_v12 = vsub.s32 7, %v13561_v3 }
 0x5ea   : > { %9514 = vmatprep.subr.bf16.mxu0 %v11147_v16  ;;  %9842 = vmatprep.subr.bf16.mxu1 %v11149_v2  ;;  %v11205_v16 = vcombine.high %v3290_v13, %v3294_v14  ;;  %v3297_v2 = vld [vmem:[%s13563_s30 + $0x1f10] sm:$0xff] }
 0x5eb   : > { %v11210_v34 = vcombine.low %v3297_v2, %v3301_v18 }
 0x5ed   : > { %9515 = vmatpush1.bf16.msra.mxu0 %v11146_v24  ;;  %9843 = vmatpush1.bf16.msra.mxu1 %v11148_v55  ;;  %v11204_v24 = vcombine.low %v3290_v13, %v3294_v14  ;;  %v11211_v55 = vcombine.high %v3297_v2, %v3301_v18 }
 0x5ee   : > { %9516 = vmatprep.subr.bf16.mxu0 %v11155_v27  ;;  %9844 = vmatprep.subr.bf16.mxu1 %v11157_v28  ;;  %v11213_v27 = vcombine.high %v3298_v17, %v3302_v21  ;;  %v3305_v28 = vld [vmem:[%s13563_s30 + $0x1f50] sm:$0xff] }
 0x5ef   : > { %v11218_v40 = vcombine.low %v3305_v28, %v3309_v29 }
 0x5f1   : > { %9517 = vmatpush1.bf16.msra.mxu0 %v11154_v35  ;;  %9845 = vmatpush1.bf16.msra.mxu1 %v11156_v33  ;;  %v11212_v35 = vcombine.low %v3298_v17, %v3302_v21  ;;  %v11219_v33 = vcombine.high %v3305_v28, %v3309_v29 }
 0x5f2   : > { %9518 = vmatprep.subr.bf16.mxu0 %v11163_v1  ;;  %9846 = vmatprep.subr.bf16.mxu1 %v11165_v37  ;;  %v11221_v1 = vcombine.high %v3306_v43, %v3310_v31  ;;  %v3313_v37 = vld [vmem:[%s13563_s30 + $0x1f90] sm:$0xff] }
 0x5f3   : > { %v11226_v30 = vcombine.low %v3313_v37, %v3317_v42 }
 0x5f5   : > { %9519 = vmatpush1.bf16.msra.mxu0 %v11162_v45  ;;  %9847 = vmatpush1.bf16.msra.mxu1 %v11164_v46  ;;  %v11220_v45 = vcombine.low %v3306_v43, %v3310_v31  ;;  %v11227_v46 = vcombine.high %v3313_v37, %v3317_v42 }
 0x5f6   : > { %9520 = vmatprep.subr.bf16.mxu0 %v11171_v47  ;;  %9848 = vmatprep.subr.bf16.mxu1 %v11173_v48  ;;  %v11229_v47 = vcombine.high %v3314_v38, %v3318_v39  ;;  %v3321_v48 = vld [vmem:[%s13563_s30 + $0x1fd0] sm:$0xff] }
 0x5f9   : > { %9521 = vmatpush1.bf16.msra.mxu0 %v11170_v51  ;;  %9849 = vmatpush1.bf16.msra.mxu1 %v11172_v53  ;;  %v11228_v51 = vcombine.low %v3314_v38, %v3318_v39  ;;  %v11235_v53 = vcombine.high %v3321_v48, %v3325_v52 }
 0x5fa   : > { %9522 = vmatprep.subr.bf16.mxu0 %v11179_v54  ;;  %9850 = vmatprep.subr.bf16.mxu1 %v11181_v56  ;;  %v11237_v54 = vcombine.high %v3322_v49, %v3326_v50  ;;  %v11234_v56 = vcombine.low %v3321_v48, %v3325_v52 }
 0x5fd   : > { %9523 = vmatpush1.bf16.msra.mxu0 %v11178_v41  ;;  %9851 = vmatpush1.bf16.msra.mxu1 %v11180_v62  ;;  %v9944_v41 = vsub.s32 3, %v13561_v3  ;;  %v9928_v62 = vld [vmem:[%s2286_s11] sm:$0xff] }
 0x5fe   : > { %9524 = vmatprep.subr.bf16.mxu0 %v11187_v63  ;;  %9852 = vmatprep.subr.bf16.mxu1 %v11189_v0  ;;  %v9933_v63 = vrot.slane %v9928_v62, %v9932_v20  ;;  %v9941_v0 = vrot.slane %v9928_v62, %v9940_v60 }
 0x5ff   : > { %v9945_v10 = vrot.slane %v9928_v62, %v9944_v41 }
 0x601   : > { %9525 = vmatpush1.bf16.msra.mxu0 %v11186_v6  ;;  %9853 = vmatpush1.bf16.msra.mxu1 %v11188_v9  ;;  %v9963_v5 = vcombine.low %v9941_v0, %v9945_v10 }
 0x602   : > { %9526 = vmatprep.subr.bf16.mxu0 %v11195_v32  ;;  %9854 = vmatprep.subr.bf16.mxu1 %v11197_v8  ;;  %v9948_v32 = vsub.s32 4, %v13561_v3  ;;  %v9952_v8 = vsub.s32 5, %v13561_v3 }
 0x603   : > { %v9977_v6 = vrot.slane %v9963_v5, %v14443_v44 }
 0x604   : > { %v9949_v14 = vrot.slane %v9928_v62, %v9948_v32 }
 0x605   : > { %9527 = vmatpush1.bf16.msra.mxu0 %v11194_v7  ;;  %9855 = vmatpush1.bf16.msra.mxu1 %v11196_v15  ;;  %v9953_v7 = vrot.slane %v9928_v62, %v9952_v8  ;;  %v9957_v15 = vrot.slane %v9928_v62, %v9956_v36 }
 0x606   : > { %9528 = vmatprep.subr.bf16.mxu0 %v11203_v19  ;;  %9856 = vmatprep.subr.bf16.mxu1 %v11205_v16  ;;  %v9961_v19 = vrot.slane %v9928_v62, %v9960_v12 }
 0x607   : > { %v9979_v2 = vcombine.low %v9949_v14, %v9953_v7 }
 0x608   : > { %v9980_v18 = vcombine.low %v9957_v15, %v9961_v19 }
 0x609   : > { %9529 = vmatpush1.bf16.msra.mxu0 %v11202_v22  ;;  %9857 = vmatpush1.bf16.msra.mxu1 %v11204_v24 }
 0x60a   : > { %9530 = vmatprep.subr.bf16.mxu0 %v11211_v55  ;;  %9858 = vmatprep.subr.bf16.mxu1 %v11213_v27  ;;  %v9987_v55 = vrot.slane %v9979_v2, %v14443_v44  ;;  %v9994_v27 = vrot.slane %v9980_v18, %v14443_v44 }
 0x60d   : > { %9531 = vmatpush1.bf16.msra.mxu0 %v11210_v34  ;;  %9859 = vmatpush1.bf16.msra.mxu1 %v11212_v35 }
 0x60e   : > { %9532 = vmatprep.subr.bf16.mxu0 %v11219_v33  ;;  %9860 = vmatprep.subr.bf16.mxu1 %v11221_v1  ;;  %v9995_v33 = vcombine.low %v9987_v55, %v9994_v27 }
 0x611   : > { %9533 = vmatpush1.bf16.msra.mxu0 %v11218_v40  ;;  %9861 = vmatpush1.bf16.msra.mxu1 %v11220_v45 }
 0x612   : > { %9534 = vmatprep.subr.bf16.mxu0 %v11227_v46  ;;  %9862 = vmatprep.subr.bf16.mxu1 %v11229_v47 }
 0x615   : > { %9535 = vmatpush1.bf16.msra.mxu0 %v11226_v30  ;;  %9863 = vmatpush1.bf16.msra.mxu1 %v11228_v51 }
 0x616   : > { %9536 = vmatprep.subr.bf16.mxu0 %v11235_v53  ;;  %9864 = vmatprep.subr.bf16.mxu1 %v11237_v54 }
 0x619   : > { %9537 = vmatpush1.bf16.msra.mxu0 %v11234_v56  ;;  %9865 = vmatpush1.bf16.msra.mxu1 %v11236_v58 }
 0x61c   : > { %9539 = vmatmul.mubr.bf16.vlgmr.msra.gmra.mrb[4].mxu0 %v14210_v57  ;;  %9867 = vmatmul.mubr.bf16.vlgmr.msra.gmra.mrb[4].mxu1 %v14210_v57  ;;  %v9937_v57 = vrot.slane %v9928_v62, %v9936_v59 }
 0x61e   : > { %v9962_v4 = vcombine.low %v9933_v63, %v9937_v57 }
 0x620   : > { %v9970_v25 = vrot.slane %v9962_v4, %v14443_v44 }
 0x622   : > { %v9978_v9 = vcombine.low %v9970_v25, %v9977_v6 }
 0x624   : > { %v9998_v13 = vadd.f32 %v9978_v9, %v9899_v11 }
 0x626   : > { %v10000_v16 = vmax.f32 %v9998_v13, 0.0 }
 0x628   : > { %v10004_v21 = vcombine.high %v10000_v16, %v10000_v16  ;;  %v10011_v1 = vrot.slane %v10000_v16, %v14443_v44 }
 0x62a   : > { %v10018_v34 = vrot.slane %v10004_v21, %v14443_v44  ;;  %v10019_v39 = vcombine.high %v10011_v1, %v10011_v1 }
 0x62c   : > { %v10020_v42 = vcombine.high %v10018_v34, %v10018_v34  ;;  %v11238_v48 = vpack.c.bf16 %v10019_v39, %v10011_v1 }
 0x62e   : > { %v11239_v45 = vpack.c.bf16 %v10020_v42, %v10018_v34  ;;  %v10072_v53 = vrot.slane %v11238_v48, %v13578_v23 }
 0x630   : > { %v10079_v50 = vrot.slane %v11239_v45, %v13578_v23 }
 0x632   : > { %v10094_v56 = vcombine.low %v10072_v53, %v10079_v50 }
 0x634   : > { %v10102_v60 = vrot.slane %v10094_v56, %v13578_v23 }
 0x6ef   : > { %v9540_v17 = vpop.f32.mrb[4].mxu0  ;;  %v9868_v22 = vpop.f32.mrb[4].mxu1 }
 0x6f0   : > { %v9542_v24 = vpop.f32.mrb[5].mxu0  ;;  %v9870_v28 = vpop.f32.mrb[5].mxu1 }
 0x6f1   : > { %v9900_v3 = vcombine.low %v9540_v17, %v9542_v24  ;;  %v9544_v29 = vpop.f32.mrb[6].mxu0  ;;  %v9901_v26 = vcombine.low %v9868_v22, %v9870_v28  ;;  %v9872_v61 = vpop.f32.mrb[6].mxu1 }
 0x6f2   : > { %v9545_v11 = vpop.f32.mrb[7].mxu0  ;;  %v9873_v31 = vpop.f32.mrb[7].mxu1 }
 0x6f3   : > { %v9908_v43 = vrot.slane %v9900_v3, %v14443_v44  ;;  %v9915_v35 = vrot.slane %v9901_v26, %v14443_v44 }
 0x6f5   : > { %v9916_v37 = vcombine.low %v9908_v43, %v9915_v35 }
 0x6f7   : > { %v9999_v38 = vadd.f32 %v9995_v33, %v9916_v37 }
 0x6f9   : > { %v10001_v40 = vmax.f32 %v9999_v38, 0.0 }
 0x6fb   : > { %v10021_v46 = vcombine.high %v10001_v40, %v10001_v40  ;;  %v10028_v47 = vrot.slane %v10001_v40, %v14443_v44 }
 0x6fd   : > { %v10035_v52 = vrot.slane %v10021_v46, %v14443_v44  ;;  %v10036_v49 = vcombine.high %v10028_v47, %v10028_v47 }
 0x6ff   : > { %v10037_v30 = vcombine.high %v10035_v52, %v10035_v52  ;;  %v11240_v51 = vpack.c.bf16 %v10036_v49, %v10028_v47 }
 0x701   : > { %v11241_v54 = vpack.c.bf16 %v10037_v30, %v10035_v52  ;;  %v10086_v58 = vrot.slane %v11240_v51, %v13578_v23 }
 0x703   : > { %v10093_v20 = vrot.slane %v11241_v54, %v13578_v23 }
 0x705   : > { %v10095_v59 = vcombine.low %v10086_v58, %v10093_v20 }
 0x707   : > { %v10109_v41 = vrot.slane %v10095_v59, %v13578_v23 }
 0x709   : > { %v10110_v44 = vcombine.low %v10102_v60, %v10109_v41 }
 0x70b   : > { %10112 = vst [vmem:[%s2291_s18] sm:$0xff] %v10110_v44 }
 0x70c PF: > { %s13_s16 = sadd.s32 1, %s11439_s16   ;;  %s14820_s12 = smov %s11427_s13 }
 0x70d   : > { %p10_p10 = scmp.ge.s32.totalorder %s13_s16, 4   ;;  %s14821_s13 = smov %s11498_s20 }
 0x70e   : > { %s14822_s14 = smov %s11435_s15  ;;  %s14823_s15 = smov %s14825_s17 }
 0x70f   :  { %12 = sbr.rel (!%p10_p10) target bundleno = 3 (0x3), region = 104 }

</bundles_post_ra>
